<compile_context>
chip_gen: v7x
topology: tpu7x:2x2x1
jax: 0.10.0
libtpu: 0.0.40
codegen_flags: <defaults>
</compile_context>

<pallas_src>
import jax
import jax.numpy as jnp
import numpy as np
from jax.experimental import pallas as pl
from jax.experimental.pallas import tpu as pltpu


def _make_encode_kernel(H, W, Cin, Cout):
    H1, W1 = H // 2, W // 2      # spatial size after pool1
    H2, W2 = H1 // 2, W1 // 2    # spatial size after pool2

    def conv3x3(xp_ref, w_ref, b_ref, Hc, Wc, Ci):
        """3x3 'same' conv (+bias) on a zero-padded VMEM tile via 9 MXU matmuls.

        xp_ref: (Hc+2, Wc+2, Ci)  zero-padded input (NHWC, channels on lanes)
        w_ref : (9, Ci, Co)       taps flattened as dh*3 + dw
        b_ref : (1, Co)
        returns (Hc*Wc, Co) float32
        """
        Co = w_ref.shape[-1]
        acc = jnp.zeros((Hc * Wc, Co), jnp.float32)
        for dh in range(3):
            for dw in range(3):
                xs = xp_ref[pl.ds(dh, Hc), pl.ds(dw, Wc), :]      # (Hc, Wc, Ci)
                xs = xs.reshape(Hc * Wc, Ci)                      # tile-aligned fold
                acc = acc + jnp.dot(
                    xs, w_ref[dh * 3 + dw],
                    preferred_element_type=jnp.float32,
                    precision=jax.lax.Precision.HIGHEST)
        return acc + b_ref[...]                                   # bias (hoisted, once)

    def pool_w_relu(hp_ref, Wo):
        """2x1 max-pool along W via stride-2 sublane reads, then ReLU."""
        even = hp_ref[:, pl.ds(0, Wo, 2), :]
        odd = hp_ref[:, pl.ds(1, Wo, 2), :]
        return jnp.maximum(jnp.maximum(even, odd), 0.0)

    def kernel(x_ref, w1_ref, b1_ref, w2_ref, b2_ref, o_ref,
               xp1_ref, hp1_ref, xp2_ref, hp2_ref):
        # ------------- stage 1: pad -> conv1 -> pool1 -> relu -------------
        xp1_ref[...] = jnp.zeros_like(xp1_ref)                    # halo = 0
        xp1_ref[pl.ds(1, H), pl.ds(1, W), :] = x_ref[0]           # interior

        acc1 = conv3x3(xp1_ref, w1_ref, b1_ref, H, W, Cin)        # (H*W, Cout)
        a1 = acc1.reshape(H1, 2, W, Cout)                         # split H (free)
        hp1_ref[...] = jnp.maximum(a1[:, 0], a1[:, 1])            # H-pool, one store
        y1 = pool_w_relu(hp1_ref, W1)                             # (H1, W1, Cout)

        # ------------- stage 2: pad -> conv2 -> pool2 -> relu -------------
        xp2_ref[...] = jnp.zeros_like(xp2_ref)
        xp2_ref[pl.ds(1, H1), pl.ds(1, W1), :] = y1               # intermediate stays in VMEM

        acc2 = conv3x3(xp2_ref, w2_ref, b2_ref, H1, W1, Cout)     # (H1*W1, Cout)
        a2 = acc2.reshape(H2, 2, W1, Cout)
        hp2_ref[...] = jnp.maximum(a2[:, 0], a2[:, 1])
        y2 = pool_w_relu(hp2_ref, W2)                             # (H2, W2, Cout)

        o_ref[0, :, :, :] = y2                                    # ONE output store

    return kernel


@jax.jit
def encode_block_forward(x_nchw, w1_oihw, b1, w2_oihw, b2):
    """Equivalent of encodeBlock.forward (PyTorch NCHW input, OIHW weights)."""
    N, Cin, H, W = x_nchw.shape
    Cout = w1_oihw.shape[0]
    if H % 4 != 0 or W % 4 != 0:
        raise ValueError("encode_block_forward requires H and W divisible by 4")
    H1, W1, H2, W2 = H // 2, W // 2, H // 4, W // 4

    # Layout glue in plain JAX: NCHW -> NHWC, OIHW -> (9, Ci, Co) tap-major slabs.
    x = jnp.transpose(x_nchw, (0, 2, 3, 1)).astype(jnp.float32)
    w1 = jnp.transpose(w1_oihw, (2, 3, 1, 0)).reshape(9, Cin, Cout).astype(jnp.float32)
    w2 = jnp.transpose(w2_oihw, (2, 3, 1, 0)).reshape(9, Cout, Cout).astype(jnp.float32)
    b1r = b1.reshape(1, Cout).astype(jnp.float32)
    b2r = b2.reshape(1, Cout).astype(jnp.float32)

    kernel = _make_encode_kernel(H, W, Cin, Cout)

    out_nhwc = pl.pallas_call(
        kernel,
        out_shape=jax.ShapeDtypeStruct((N, H2, W2, Cout), jnp.float32),
        grid_spec=pltpu.PrefetchScalarGridSpec(
            num_scalar_prefetch=0,
            grid=(N,),
            in_specs=[
                pl.BlockSpec((1, H, W, Cin), lambda n: (n, 0, 0, 0)),
                pl.BlockSpec((9, Cin, Cout), lambda n: (0, 0, 0)),
                pl.BlockSpec((1, Cout), lambda n: (0, 0)),
                pl.BlockSpec((9, Cout, Cout), lambda n: (0, 0, 0)),
                pl.BlockSpec((1, Cout), lambda n: (0, 0)),
            ],
            out_specs=pl.BlockSpec((1, H2, W2, Cout), lambda n: (n, 0, 0, 0)),
            scratch_shapes=[
                pltpu.VMEM((H + 2, W + 2, Cin), jnp.float32),      # padded stage-1 input
                pltpu.VMEM((H1, W, Cout), jnp.float32),            # stage-1 H-pooled
                pltpu.VMEM((H1 + 2, W1 + 2, Cout), jnp.float32),   # padded stage-2 input
                pltpu.VMEM((H2, W1, Cout), jnp.float32),           # stage-2 H-pooled
            ],
        ),
        compiler_params=pltpu.CompilerParams(
            dimension_semantics=("parallel",)),
    )(x, w1, b1r, w2, b2r)

    return jnp.transpose(out_nhwc, (0, 3, 1, 2))                   # NHWC -> NCHW


def _reference_block(x_nchw, w1_oihw, b1, w2_oihw, b2):
    """Pure-JAX (XLA) reference with PyTorch semantics, for verification."""
    def conv(x, w, b):
        y = jax.lax.conv_general_dilated(
            x, w, window_strides=(1, 1), padding=((1, 1), (1, 1)),
            dimension_numbers=("NCHW", "OIHW", "NCHW"),
            precision=jax.lax.Precision.HIGHEST)
        return y + b[None, :, None, None]

    def pool(x):
        return jax.lax.reduce_window(
            x, -jnp.inf, jax.lax.max, (1, 1, 2, 2), (1, 1, 2, 2), "VALID")

    y = jnp.maximum(pool(conv(x_nchw, w1_oihw, b1)), 0.0)
    y = jnp.maximum(pool(conv(y, w2_oihw, b2)), 0.0)
    return y


if __name__ == "__main__":
    # Small shapes consistent with the module: batch=2, in_channels=4,
    # out_channels=8, spatial=16x16.
    N, CIN, COUT, H = 2, 4, 8, 16

    key = jax.random.PRNGKey(0)
    k1, k2, k3, k4, k5 = jax.random.split(key, 5)

    x = jax.random.normal(k1, (N, CIN, H, H), jnp.float32)
    # PyTorch Conv2d parameter layouts: OIHW weights, (O,) biases.
    w1_oihw = 0.1 * jax.random.normal(k2, (COUT, CIN, 3, 3), jnp.float32)
    b1 = 0.1 * jax.random.normal(k3, (COUT,), jnp.float32)
    w2_oihw = 0.1 * jax.random.normal(k4, (COUT, COUT, 3, 3), jnp.float32)
    b2 = 0.1 * jax.random.normal(k5, (COUT,), jnp.float32)

    out = jax.block_until_ready(encode_block_forward(x, w1_oihw, b1, w2_oihw, b2))
    assert out.shape == (N, COUT, H // 4, H // 4), out.shape

    ref = jax.block_until_ready(_reference_block(x, w1_oihw, b1, w2_oihw, b2))
    # Tolerance leaves headroom for MXU bf16-pass rounding of the f32 matmuls;
    # any structural bug (wrong tap / pooling / bias) is orders of magnitude larger.
    np.testing.assert_allclose(np.asarray(out), np.asarray(ref),
                               rtol=2e-2, atol=2e-2)
    print("KERNEL_OK")
</pallas_src>

<mosaic_0001>
module attributes {stable_mosaic.version = 11 : i64} {
  func.func @kernel(%arg0: i32, %arg1: memref<1x16x16x4xf32, #tpu.memory_space<vmem>>, %arg2: memref<9x4x8xf32, #tpu.memory_space<vmem>>, %arg3: memref<1x8xf32, #tpu.memory_space<vmem>>, %arg4: memref<9x8x8xf32, #tpu.memory_space<vmem>>, %arg5: memref<1x8xf32, #tpu.memory_space<vmem>>, %arg6: memref<1x4x4x8xf32, #tpu.memory_space<vmem>>, %arg7: memref<18x18x4xf32, #tpu.memory_space<vmem>>, %arg8: memref<8x16x8xf32, #tpu.memory_space<vmem>>, %arg9: memref<10x10x8xf32, #tpu.memory_space<vmem>>, %arg10: memref<4x8x8xf32, #tpu.memory_space<vmem>>) attributes {dimension_semantics = [#tpu.dimension_semantics<parallel>], iteration_bounds = array<i64: 2>, scalar_prefetch = 0 : i64, scratch_operands = 4 : i64, tpu.core_type = #tpu.core_type<tc>, window_params = [{transform_indices = @transform_0, window_bounds = array<i64: 1, 16, 16, 4>}, {pipeline_mode = #tpu.pipeline_mode<synchronous>, transform_indices = @transform_1, window_bounds = array<i64: 9, 4, 8>}, {pipeline_mode = #tpu.pipeline_mode<synchronous>, transform_indices = @transform_2, window_bounds = array<i64: 1, 8>}, {pipeline_mode = #tpu.pipeline_mode<synchronous>, transform_indices = @transform_3, window_bounds = array<i64: 9, 8, 8>}, {pipeline_mode = #tpu.pipeline_mode<synchronous>, transform_indices = @transform_4, window_bounds = array<i64: 1, 8>}, {transform_indices = @transform_5, window_bounds = array<i64: 1, 4, 4, 8>}]} {
    %cst = arith.constant 0.000000e+00 : f32
    %0 = vector.broadcast %cst : f32 to vector<18x18x4xf32>
    %c0 = arith.constant 0 : index
    %c0_0 = arith.constant 0 : index
    %c0_1 = arith.constant 0 : index
    %1 = vector.load %arg7[%c0, %c0_0, %c0_1] : memref<18x18x4xf32, #tpu.memory_space<vmem>>, vector<18x18x4xf32>
    tpu.vector_store %arg7[%c0, %c0_0, %c0_1], %0 {strides = array<i32>} : memref<18x18x4xf32, #tpu.memory_space<vmem>>, vector<18x18x4xf32>,
    %c0_2 = arith.constant 0 : index
    %c0_3 = arith.constant 0 : index
    %c0_4 = arith.constant 0 : index
    %c0_5 = arith.constant 0 : index
    %2 = vector.load %arg1[%c0_2, %c0_3, %c0_4, %c0_5] : memref<1x16x16x4xf32, #tpu.memory_space<vmem>>, vector<1x16x16x4xf32>
    %3 = vector.shape_cast %2 : vector<1x16x16x4xf32> to vector<16x16x4xf32>
    %c1 = arith.constant 1 : index
    %c1_6 = arith.constant 1 : index
    %c0_7 = arith.constant 0 : index
    %4 = vector.load %arg7[%c1, %c1_6, %c0_7] : memref<18x18x4xf32, #tpu.memory_space<vmem>>, vector<16x16x4xf32>
    tpu.vector_store %arg7[%c1, %c1_6, %c0_7], %3 {strides = array<i32>} : memref<18x18x4xf32, #tpu.memory_space<vmem>>, vector<16x16x4xf32>,
    %cst_8 = arith.constant 0.000000e+00 : f32
    %5 = vector.broadcast %cst_8 : f32 to vector<256x8xf32>
    %c0_9 = arith.constant 0 : index
    %c0_10 = arith.constant 0 : index
    %c0_11 = arith.constant 0 : index
    %6 = vector.load %arg7[%c0_9, %c0_10, %c0_11] : memref<18x18x4xf32, #tpu.memory_space<vmem>>, vector<16x16x4xf32>
    %7 = vector.shape_cast %6 : vector<16x16x4xf32> to vector<256x4xf32>
    %c0_12 = arith.constant 0 : index
    %c0_13 = arith.constant 0 : index
    %c0_14 = arith.constant 0 : index
    %8 = vector.load %arg2[%c0_12, %c0_13, %c0_14] : memref<9x4x8xf32, #tpu.memory_space<vmem>>, vector<1x4x8xf32>
    %9 = vector.shape_cast %8 : vector<1x4x8xf32> to vector<4x8xf32>
    %cst_15 = arith.constant dense<0.000000e+00> : vector<256x8xf32>
    %10 = tpu.matmul %7, %9, %cst_15 {dimension_numbers = #tpu.dot_dimension_numbers<[1], [0], [0], [1], [0, 0, 1, 1], [], []>, precision = #tpu.contract_precision<fp32>} : vector<256x4xf32>, vector<4x8xf32>, vector<256x8xf32> -> vector<256x8xf32>
    %11 = arith.addf %5, %10 : vector<256x8xf32>
    %c0_16 = arith.constant 0 : index
    %c1_17 = arith.constant 1 : index
    %c0_18 = arith.constant 0 : index
    %12 = vector.load %arg7[%c0_16, %c1_17, %c0_18] : memref<18x18x4xf32, #tpu.memory_space<vmem>>, vector<16x16x4xf32>
    %13 = vector.shape_cast %12 : vector<16x16x4xf32> to vector<256x4xf32>
    %c1_19 = arith.constant 1 : index
    %c0_20 = arith.constant 0 : index
    %c0_21 = arith.constant 0 : index
    %14 = vector.load %arg2[%c1_19, %c0_20, %c0_21] : memref<9x4x8xf32, #tpu.memory_space<vmem>>, vector<1x4x8xf32>
    %15 = vector.shape_cast %14 : vector<1x4x8xf32> to vector<4x8xf32>
    %cst_22 = arith.constant dense<0.000000e+00> : vector<256x8xf32>
    %16 = tpu.matmul %13, %15, %cst_22 {dimension_numbers = #tpu.dot_dimension_numbers<[1], [0], [0], [1], [0, 0, 1, 1], [], []>, precision = #tpu.contract_precision<fp32>} : vector<256x4xf32>, vector<4x8xf32>, vector<256x8xf32> -> vector<256x8xf32>
    %17 = arith.addf %11, %16 : vector<256x8xf32>
    %c0_23 = arith.constant 0 : index
    %c2 = arith.constant 2 : index
    %c0_24 = arith.constant 0 : index
    %18 = vector.load %arg7[%c0_23, %c2, %c0_24] : memref<18x18x4xf32, #tpu.memory_space<vmem>>, vector<16x16x4xf32>
    %19 = vector.shape_cast %18 : vector<16x16x4xf32> to vector<256x4xf32>
    %c2_25 = arith.constant 2 : index
    %c0_26 = arith.constant 0 : index
    %c0_27 = arith.constant 0 : index
    %20 = vector.load %arg2[%c2_25, %c0_26, %c0_27] : memref<9x4x8xf32, #tpu.memory_space<vmem>>, vector<1x4x8xf32>
    %21 = vector.shape_cast %20 : vector<1x4x8xf32> to vector<4x8xf32>
    %cst_28 = arith.constant dense<0.000000e+00> : vector<256x8xf32>
    %22 = tpu.matmul %19, %21, %cst_28 {dimension_numbers = #tpu.dot_dimension_numbers<[1], [0], [0], [1], [0, 0, 1, 1], [], []>, precision = #tpu.contract_precision<fp32>} : vector<256x4xf32>, vector<4x8xf32>, vector<256x8xf32> -> vector<256x8xf32>
    %23 = arith.addf %17, %22 : vector<256x8xf32>
    %c1_29 = arith.constant 1 : index
    %c0_30 = arith.constant 0 : index
    %c0_31 = arith.constant 0 : index
    %24 = vector.load %arg7[%c1_29, %c0_30, %c0_31] : memref<18x18x4xf32, #tpu.memory_space<vmem>>, vector<16x16x4xf32>
    %25 = vector.shape_cast %24 : vector<16x16x4xf32> to vector<256x4xf32>
    %c3 = arith.constant 3 : index
    %c0_32 = arith.constant 0 : index
    %c0_33 = arith.constant 0 : index
    %26 = vector.load %arg2[%c3, %c0_32, %c0_33] : memref<9x4x8xf32, #tpu.memory_space<vmem>>, vector<1x4x8xf32>
    %27 = vector.shape_cast %26 : vector<1x4x8xf32> to vector<4x8xf32>
    %cst_34 = arith.constant dense<0.000000e+00> : vector<256x8xf32>
    %28 = tpu.matmul %25, %27, %cst_34 {dimension_numbers = #tpu.dot_dimension_numbers<[1], [0], [0], [1], [0, 0, 1, 1], [], []>, precision = #tpu.contract_precision<fp32>} : vector<256x4xf32>, vector<4x8xf32>, vector<256x8xf32> -> vector<256x8xf32>
    %29 = arith.addf %23, %28 : vector<256x8xf32>
    %c1_35 = arith.constant 1 : index
    %c1_36 = arith.constant 1 : index
    %c0_37 = arith.constant 0 : index
    %30 = vector.load %arg7[%c1_35, %c1_36, %c0_37] : memref<18x18x4xf32, #tpu.memory_space<vmem>>, vector<16x16x4xf32>
    %31 = vector.shape_cast %30 : vector<16x16x4xf32> to vector<256x4xf32>
    %c4 = arith.constant 4 : index
    %c0_38 = arith.constant 0 : index
    %c0_39 = arith.constant 0 : index
    %32 = vector.load %arg2[%c4, %c0_38, %c0_39] : memref<9x4x8xf32, #tpu.memory_space<vmem>>, vector<1x4x8xf32>
    %33 = vector.shape_cast %32 : vector<1x4x8xf32> to vector<4x8xf32>
    %cst_40 = arith.constant dense<0.000000e+00> : vector<256x8xf32>
    %34 = tpu.matmul %31, %33, %cst_40 {dimension_numbers = #tpu.dot_dimension_numbers<[1], [0], [0], [1], [0, 0, 1, 1], [], []>, precision = #tpu.contract_precision<fp32>} : vector<256x4xf32>, vector<4x8xf32>, vector<256x8xf32> -> vector<256x8xf32>
    %35 = arith.addf %29, %34 : vector<256x8xf32>
    %c1_41 = arith.constant 1 : index
    %c2_42 = arith.constant 2 : index
    %c0_43 = arith.constant 0 : index
    %36 = vector.load %arg7[%c1_41, %c2_42, %c0_43] : memref<18x18x4xf32, #tpu.memory_space<vmem>>, vector<16x16x4xf32>
    %37 = vector.shape_cast %36 : vector<16x16x4xf32> to vector<256x4xf32>
    %c5 = arith.constant 5 : index
    %c0_44 = arith.constant 0 : index
    %c0_45 = arith.constant 0 : index
    %38 = vector.load %arg2[%c5, %c0_44, %c0_45] : memref<9x4x8xf32, #tpu.memory_space<vmem>>, vector<1x4x8xf32>
    %39 = vector.shape_cast %38 : vector<1x4x8xf32> to vector<4x8xf32>
    %cst_46 = arith.constant dense<0.000000e+00> : vector<256x8xf32>
    %40 = tpu.matmul %37, %39, %cst_46 {dimension_numbers = #tpu.dot_dimension_numbers<[1], [0], [0], [1], [0, 0, 1, 1], [], []>, precision = #tpu.contract_precision<fp32>} : vector<256x4xf32>, vector<4x8xf32>, vector<256x8xf32> -> vector<256x8xf32>
    %41 = arith.addf %35, %40 : vector<256x8xf32>
    %c2_47 = arith.constant 2 : index
    %c0_48 = arith.constant 0 : index
    %c0_49 = arith.constant 0 : index
    %42 = vector.load %arg7[%c2_47, %c0_48, %c0_49] : memref<18x18x4xf32, #tpu.memory_space<vmem>>, vector<16x16x4xf32>
    %43 = vector.shape_cast %42 : vector<16x16x4xf32> to vector<256x4xf32>
    %c6 = arith.constant 6 : index
    %c0_50 = arith.constant 0 : index
    %c0_51 = arith.constant 0 : index
    %44 = vector.load %arg2[%c6, %c0_50, %c0_51] : memref<9x4x8xf32, #tpu.memory_space<vmem>>, vector<1x4x8xf32>
    %45 = vector.shape_cast %44 : vector<1x4x8xf32> to vector<4x8xf32>
    %cst_52 = arith.constant dense<0.000000e+00> : vector<256x8xf32>
    %46 = tpu.matmul %43, %45, %cst_52 {dimension_numbers = #tpu.dot_dimension_numbers<[1], [0], [0], [1], [0, 0, 1, 1], [], []>, precision = #tpu.contract_precision<fp32>} : vector<256x4xf32>, vector<4x8xf32>, vector<256x8xf32> -> vector<256x8xf32>
    %47 = arith.addf %41, %46 : vector<256x8xf32>
    %c2_53 = arith.constant 2 : index
    %c1_54 = arith.constant 1 : index
    %c0_55 = arith.constant 0 : index
    %48 = vector.load %arg7[%c2_53, %c1_54, %c0_55] : memref<18x18x4xf32, #tpu.memory_space<vmem>>, vector<16x16x4xf32>
    %49 = vector.shape_cast %48 : vector<16x16x4xf32> to vector<256x4xf32>
    %c7 = arith.constant 7 : index
    %c0_56 = arith.constant 0 : index
    %c0_57 = arith.constant 0 : index
    %50 = vector.load %arg2[%c7, %c0_56, %c0_57] : memref<9x4x8xf32, #tpu.memory_space<vmem>>, vector<1x4x8xf32>
    %51 = vector.shape_cast %50 : vector<1x4x8xf32> to vector<4x8xf32>
    %cst_58 = arith.constant dense<0.000000e+00> : vector<256x8xf32>
    %52 = tpu.matmul %49, %51, %cst_58 {dimension_numbers = #tpu.dot_dimension_numbers<[1], [0], [0], [1], [0, 0, 1, 1], [], []>, precision = #tpu.contract_precision<fp32>} : vector<256x4xf32>, vector<4x8xf32>, vector<256x8xf32> -> vector<256x8xf32>
    %53 = arith.addf %47, %52 : vector<256x8xf32>
    %c2_59 = arith.constant 2 : index
    %c2_60 = arith.constant 2 : index
    %c0_61 = arith.constant 0 : index
    %54 = vector.load %arg7[%c2_59, %c2_60, %c0_61] : memref<18x18x4xf32, #tpu.memory_space<vmem>>, vector<16x16x4xf32>
    %55 = vector.shape_cast %54 : vector<16x16x4xf32> to vector<256x4xf32>
    %c8 = arith.constant 8 : index
    %c0_62 = arith.constant 0 : index
    %c0_63 = arith.constant 0 : index
    %56 = vector.load %arg2[%c8, %c0_62, %c0_63] : memref<9x4x8xf32, #tpu.memory_space<vmem>>, vector<1x4x8xf32>
    %57 = vector.shape_cast %56 : vector<1x4x8xf32> to vector<4x8xf32>
    %cst_64 = arith.constant dense<0.000000e+00> : vector<256x8xf32>
    %58 = tpu.matmul %55, %57, %cst_64 {dimension_numbers = #tpu.dot_dimension_numbers<[1], [0], [0], [1], [0, 0, 1, 1], [], []>, precision = #tpu.contract_precision<fp32>} : vector<256x4xf32>, vector<4x8xf32>, vector<256x8xf32> -> vector<256x8xf32>
    %59 = arith.addf %53, %58 : vector<256x8xf32>
    %c0_65 = arith.constant 0 : index
    %c0_66 = arith.constant 0 : index
    %60 = vector.load %arg3[%c0_65, %c0_66] : memref<1x8xf32, #tpu.memory_space<vmem>>, vector<1x8xf32>
    %61 = vector.broadcast %60 : vector<1x8xf32> to vector<256x8xf32>
    %62 = arith.addf %59, %61 : vector<256x8xf32>
    %63 = vector.shape_cast %62 : vector<256x8xf32> to vector<8x2x16x8xf32>
    %64 = vector.extract_strided_slice %63 {offsets = [0, 0, 0, 0], sizes = [8, 1, 16, 8], strides = [1, 1, 1, 1]} : vector<8x2x16x8xf32> to vector<8x1x16x8xf32>
    %65 = vector.shape_cast %64 : vector<8x1x16x8xf32> to vector<8x16x8xf32>
    %66 = vector.extract_strided_slice %63 {offsets = [0, 1, 0, 0], sizes = [8, 1, 16, 8], strides = [1, 1, 1, 1]} : vector<8x2x16x8xf32> to vector<8x1x16x8xf32>
    %67 = vector.shape_cast %66 : vector<8x1x16x8xf32> to vector<8x16x8xf32>
    %68 = arith.maximumf %65, %67 : vector<8x16x8xf32>
    %c0_67 = arith.constant 0 : index
    %c0_68 = arith.constant 0 : index
    %c0_69 = arith.constant 0 : index
    %69 = vector.load %arg8[%c0_67, %c0_68, %c0_69] : memref<8x16x8xf32, #tpu.memory_space<vmem>>, vector<8x16x8xf32>
    tpu.vector_store %arg8[%c0_67, %c0_68, %c0_69], %68 {strides = array<i32>} : memref<8x16x8xf32, #tpu.memory_space<vmem>>, vector<8x16x8xf32>,
    %c0_70 = arith.constant 0 : index
    %c0_71 = arith.constant 0 : index
    %c0_72 = arith.constant 0 : index
    %70 = tpu.strided_load %arg8[%c0_70, %c0_71, %c0_72] {strides = array<i32: 1, 2, 1>} : memref<8x16x8xf32, #tpu.memory_space<vmem>>, vector<8x8x8xf32>
    %c0_73 = arith.constant 0 : index
    %c1_74 = arith.constant 1 : index
    %c0_75 = arith.constant 0 : index
    %71 = tpu.strided_load %arg8[%c0_73, %c1_74, %c0_75] {strides = array<i32: 1, 2, 1>} : memref<8x16x8xf32, #tpu.memory_space<vmem>>, vector<8x8x8xf32>
    %72 = arith.maximumf %70, %71 : vector<8x8x8xf32>
    %cst_76 = arith.constant 0.000000e+00 : f32
    %73 = vector.broadcast %cst_76 : f32 to vector<8x8x8xf32>
    %74 = arith.maximumf %72, %73 : vector<8x8x8xf32>
    %cst_77 = arith.constant 0.000000e+00 : f32
    %75 = vector.broadcast %cst_77 : f32 to vector<10x10x8xf32>
    %c0_78 = arith.constant 0 : index
    %c0_79 = arith.constant 0 : index
    %c0_80 = arith.constant 0 : index
    %76 = vector.load %arg9[%c0_78, %c0_79, %c0_80] : memref<10x10x8xf32, #tpu.memory_space<vmem>>, vector<10x10x8xf32>
    tpu.vector_store %arg9[%c0_78, %c0_79, %c0_80], %75 {strides = array<i32>} : memref<10x10x8xf32, #tpu.memory_space<vmem>>, vector<10x10x8xf32>,
    %c1_81 = arith.constant 1 : index
    %c1_82 = arith.constant 1 : index
    %c0_83 = arith.constant 0 : index
    %77 = vector.load %arg9[%c1_81, %c1_82, %c0_83] : memref<10x10x8xf32, #tpu.memory_space<vmem>>, vector<8x8x8xf32>
    tpu.vector_store %arg9[%c1_81, %c1_82, %c0_83], %74 {strides = array<i32>} : memref<10x10x8xf32, #tpu.memory_space<vmem>>, vector<8x8x8xf32>,
    %cst_84 = arith.constant 0.000000e+00 : f32
    %78 = vector.broadcast %cst_84 : f32 to vector<64x8xf32>
    %c0_85 = arith.constant 0 : index
    %c0_86 = arith.constant 0 : index
    %c0_87 = arith.constant 0 : index
    %79 = vector.load %arg9[%c0_85, %c0_86, %c0_87] : memref<10x10x8xf32, #tpu.memory_space<vmem>>, vector<8x8x8xf32>
    %80 = vector.shape_cast %79 : vector<8x8x8xf32> to vector<64x8xf32>
    %c0_88 = arith.constant 0 : index
    %c0_89 = arith.constant 0 : index
    %c0_90 = arith.constant 0 : index
    %81 = vector.load %arg4[%c0_88, %c0_89, %c0_90] : memref<9x8x8xf32, #tpu.memory_space<vmem>>, vector<1x8x8xf32>
    %82 = vector.shape_cast %81 : vector<1x8x8xf32> to vector<8x8xf32>
    %cst_91 = arith.constant dense<0.000000e+00> : vector<64x8xf32>
    %83 = tpu.matmul %80, %82, %cst_91 {dimension_numbers = #tpu.dot_dimension_numbers<[1], [0], [0], [1], [0, 0, 1, 1], [], []>, precision = #tpu.contract_precision<fp32>} : vector<64x8xf32>, vector<8x8xf32>, vector<64x8xf32> -> vector<64x8xf32>
    %84 = arith.addf %78, %83 : vector<64x8xf32>
    %c0_92 = arith.constant 0 : index
    %c1_93 = arith.constant 1 : index
    %c0_94 = arith.constant 0 : index
    %85 = vector.load %arg9[%c0_92, %c1_93, %c0_94] : memref<10x10x8xf32, #tpu.memory_space<vmem>>, vector<8x8x8xf32>
    %86 = vector.shape_cast %85 : vector<8x8x8xf32> to vector<64x8xf32>
    %c1_95 = arith.constant 1 : index
    %c0_96 = arith.constant 0 : index
    %c0_97 = arith.constant 0 : index
    %87 = vector.load %arg4[%c1_95, %c0_96, %c0_97] : memref<9x8x8xf32, #tpu.memory_space<vmem>>, vector<1x8x8xf32>
    %88 = vector.shape_cast %87 : vector<1x8x8xf32> to vector<8x8xf32>
    %cst_98 = arith.constant dense<0.000000e+00> : vector<64x8xf32>
    %89 = tpu.matmul %86, %88, %cst_98 {dimension_numbers = #tpu.dot_dimension_numbers<[1], [0], [0], [1], [0, 0, 1, 1], [], []>, precision = #tpu.contract_precision<fp32>} : vector<64x8xf32>, vector<8x8xf32>, vector<64x8xf32> -> vector<64x8xf32>
    %90 = arith.addf %84, %89 : vector<64x8xf32>
    %c0_99 = arith.constant 0 : index
    %c2_100 = arith.constant 2 : index
    %c0_101 = arith.constant 0 : index
    %91 = vector.load %arg9[%c0_99, %c2_100, %c0_101] : memref<10x10x8xf32, #tpu.memory_space<vmem>>, vector<8x8x8xf32>
    %92 = vector.shape_cast %91 : vector<8x8x8xf32> to vector<64x8xf32>
    %c2_102 = arith.constant 2 : index
    %c0_103 = arith.constant 0 : index
    %c0_104 = arith.constant 0 : index
    %93 = vector.load %arg4[%c2_102, %c0_103, %c0_104] : memref<9x8x8xf32, #tpu.memory_space<vmem>>, vector<1x8x8xf32>
    %94 = vector.shape_cast %93 : vector<1x8x8xf32> to vector<8x8xf32>
    %cst_105 = arith.constant dense<0.000000e+00> : vector<64x8xf32>
    %95 = tpu.matmul %92, %94, %cst_105 {dimension_numbers = #tpu.dot_dimension_numbers<[1], [0], [0], [1], [0, 0, 1, 1], [], []>, precision = #tpu.contract_precision<fp32>} : vector<64x8xf32>, vector<8x8xf32>, vector<64x8xf32> -> vector<64x8xf32>
    %96 = arith.addf %90, %95 : vector<64x8xf32>
    %c1_106 = arith.constant 1 : index
    %c0_107 = arith.constant 0 : index
    %c0_108 = arith.constant 0 : index
    %97 = vector.load %arg9[%c1_106, %c0_107, %c0_108] : memref<10x10x8xf32, #tpu.memory_space<vmem>>, vector<8x8x8xf32>
    %98 = vector.shape_cast %97 : vector<8x8x8xf32> to vector<64x8xf32>
    %c3_109 = arith.constant 3 : index
    %c0_110 = arith.constant 0 : index
    %c0_111 = arith.constant 0 : index
    %99 = vector.load %arg4[%c3_109, %c0_110, %c0_111] : memref<9x8x8xf32, #tpu.memory_space<vmem>>, vector<1x8x8xf32>
    %100 = vector.shape_cast %99 : vector<1x8x8xf32> to vector<8x8xf32>
    %cst_112 = arith.constant dense<0.000000e+00> : vector<64x8xf32>
    %101 = tpu.matmul %98, %100, %cst_112 {dimension_numbers = #tpu.dot_dimension_numbers<[1], [0], [0], [1], [0, 0, 1, 1], [], []>, precision = #tpu.contract_precision<fp32>} : vector<64x8xf32>, vector<8x8xf32>, vector<64x8xf32> -> vector<64x8xf32>
    %102 = arith.addf %96, %101 : vector<64x8xf32>
    %c1_113 = arith.constant 1 : index
    %c1_114 = arith.constant 1 : index
    %c0_115 = arith.constant 0 : index
    %103 = vector.load %arg9[%c1_113, %c1_114, %c0_115] : memref<10x10x8xf32, #tpu.memory_space<vmem>>, vector<8x8x8xf32>
    %104 = vector.shape_cast %103 : vector<8x8x8xf32> to vector<64x8xf32>
    %c4_116 = arith.constant 4 : index
    %c0_117 = arith.constant 0 : index
    %c0_118 = arith.constant 0 : index
    %105 = vector.load %arg4[%c4_116, %c0_117, %c0_118] : memref<9x8x8xf32, #tpu.memory_space<vmem>>, vector<1x8x8xf32>
    %106 = vector.shape_cast %105 : vector<1x8x8xf32> to vector<8x8xf32>
    %cst_119 = arith.constant dense<0.000000e+00> : vector<64x8xf32>
    %107 = tpu.matmul %104, %106, %cst_119 {dimension_numbers = #tpu.dot_dimension_numbers<[1], [0], [0], [1], [0, 0, 1, 1], [], []>, precision = #tpu.contract_precision<fp32>} : vector<64x8xf32>, vector<8x8xf32>, vector<64x8xf32> -> vector<64x8xf32>
    %108 = arith.addf %102, %107 : vector<64x8xf32>
    %c1_120 = arith.constant 1 : index
    %c2_121 = arith.constant 2 : index
    %c0_122 = arith.constant 0 : index
    %109 = vector.load %arg9[%c1_120, %c2_121, %c0_122] : memref<10x10x8xf32, #tpu.memory_space<vmem>>, vector<8x8x8xf32>
    %110 = vector.shape_cast %109 : vector<8x8x8xf32> to vector<64x8xf32>
    %c5_123 = arith.constant 5 : index
    %c0_124 = arith.constant 0 : index
    %c0_125 = arith.constant 0 : index
    %111 = vector.load %arg4[%c5_123, %c0_124, %c0_125] : memref<9x8x8xf32, #tpu.memory_space<vmem>>, vector<1x8x8xf32>
    %112 = vector.shape_cast %111 : vector<1x8x8xf32> to vector<8x8xf32>
    %cst_126 = arith.constant dense<0.000000e+00> : vector<64x8xf32>
    %113 = tpu.matmul %110, %112, %cst_126 {dimension_numbers = #tpu.dot_dimension_numbers<[1], [0], [0], [1], [0, 0, 1, 1], [], []>, precision = #tpu.contract_precision<fp32>} : vector<64x8xf32>, vector<8x8xf32>, vector<64x8xf32> -> vector<64x8xf32>
    %114 = arith.addf %108, %113 : vector<64x8xf32>
    %c2_127 = arith.constant 2 : index
    %c0_128 = arith.constant 0 : index
    %c0_129 = arith.constant 0 : index
    %115 = vector.load %arg9[%c2_127, %c0_128, %c0_129] : memref<10x10x8xf32, #tpu.memory_space<vmem>>, vector<8x8x8xf32>
    %116 = vector.shape_cast %115 : vector<8x8x8xf32> to vector<64x8xf32>
    %c6_130 = arith.constant 6 : index
    %c0_131 = arith.constant 0 : index
    %c0_132 = arith.constant 0 : index
    %117 = vector.load %arg4[%c6_130, %c0_131, %c0_132] : memref<9x8x8xf32, #tpu.memory_space<vmem>>, vector<1x8x8xf32>
    %118 = vector.shape_cast %117 : vector<1x8x8xf32> to vector<8x8xf32>
    %cst_133 = arith.constant dense<0.000000e+00> : vector<64x8xf32>
    %119 = tpu.matmul %116, %118, %cst_133 {dimension_numbers = #tpu.dot_dimension_numbers<[1], [0], [0], [1], [0, 0, 1, 1], [], []>, precision = #tpu.contract_precision<fp32>} : vector<64x8xf32>, vector<8x8xf32>, vector<64x8xf32> -> vector<64x8xf32>
    %120 = arith.addf %114, %119 : vector<64x8xf32>
    %c2_134 = arith.constant 2 : index
    %c1_135 = arith.constant 1 : index
    %c0_136 = arith.constant 0 : index
    %121 = vector.load %arg9[%c2_134, %c1_135, %c0_136] : memref<10x10x8xf32, #tpu.memory_space<vmem>>, vector<8x8x8xf32>
    %122 = vector.shape_cast %121 : vector<8x8x8xf32> to vector<64x8xf32>
    %c7_137 = arith.constant 7 : index
    %c0_138 = arith.constant 0 : index
    %c0_139 = arith.constant 0 : index
    %123 = vector.load %arg4[%c7_137, %c0_138, %c0_139] : memref<9x8x8xf32, #tpu.memory_space<vmem>>, vector<1x8x8xf32>
    %124 = vector.shape_cast %123 : vector<1x8x8xf32> to vector<8x8xf32>
    %cst_140 = arith.constant dense<0.000000e+00> : vector<64x8xf32>
    %125 = tpu.matmul %122, %124, %cst_140 {dimension_numbers = #tpu.dot_dimension_numbers<[1], [0], [0], [1], [0, 0, 1, 1], [], []>, precision = #tpu.contract_precision<fp32>} : vector<64x8xf32>, vector<8x8xf32>, vector<64x8xf32> -> vector<64x8xf32>
    %126 = arith.addf %120, %125 : vector<64x8xf32>
    %c2_141 = arith.constant 2 : index
    %c2_142 = arith.constant 2 : index
    %c0_143 = arith.constant 0 : index
    %127 = vector.load %arg9[%c2_141, %c2_142, %c0_143] : memref<10x10x8xf32, #tpu.memory_space<vmem>>, vector<8x8x8xf32>
    %128 = vector.shape_cast %127 : vector<8x8x8xf32> to vector<64x8xf32>
    %c8_144 = arith.constant 8 : index
    %c0_145 = arith.constant 0 : index
    %c0_146 = arith.constant 0 : index
    %129 = vector.load %arg4[%c8_144, %c0_145, %c0_146] : memref<9x8x8xf32, #tpu.memory_space<vmem>>, vector<1x8x8xf32>
    %130 = vector.shape_cast %129 : vector<1x8x8xf32> to vector<8x8xf32>
    %cst_147 = arith.constant dense<0.000000e+00> : vector<64x8xf32>
    %131 = tpu.matmul %128, %130, %cst_147 {dimension_numbers = #tpu.dot_dimension_numbers<[1], [0], [0], [1], [0, 0, 1, 1], [], []>, precision = #tpu.contract_precision<fp32>} : vector<64x8xf32>, vector<8x8xf32>, vector<64x8xf32> -> vector<64x8xf32>
    %132 = arith.addf %126, %131 : vector<64x8xf32>
    %c0_148 = arith.constant 0 : index
    %c0_149 = arith.constant 0 : index
    %133 = vector.load %arg5[%c0_148, %c0_149] : memref<1x8xf32, #tpu.memory_space<vmem>>, vector<1x8xf32>
    %134 = vector.broadcast %133 : vector<1x8xf32> to vector<64x8xf32>
    %135 = arith.addf %132, %134 : vector<64x8xf32>
    %136 = vector.shape_cast %135 : vector<64x8xf32> to vector<4x2x8x8xf32>
    %137 = vector.extract_strided_slice %136 {offsets = [0, 0, 0, 0], sizes = [4, 1, 8, 8], strides = [1, 1, 1, 1]} : vector<4x2x8x8xf32> to vector<4x1x8x8xf32>
    %138 = vector.shape_cast %137 : vector<4x1x8x8xf32> to vector<4x8x8xf32>
    %139 = vector.extract_strided_slice %136 {offsets = [0, 1, 0, 0], sizes = [4, 1, 8, 8], strides = [1, 1, 1, 1]} : vector<4x2x8x8xf32> to vector<4x1x8x8xf32>
    %140 = vector.shape_cast %139 : vector<4x1x8x8xf32> to vector<4x8x8xf32>
    %141 = arith.maximumf %138, %140 : vector<4x8x8xf32>
    %c0_150 = arith.constant 0 : index
    %c0_151 = arith.constant 0 : index
    %c0_152 = arith.constant 0 : index
    %142 = vector.load %arg10[%c0_150, %c0_151, %c0_152] : memref<4x8x8xf32, #tpu.memory_space<vmem>>, vector<4x8x8xf32>
    tpu.vector_store %arg10[%c0_150, %c0_151, %c0_152], %141 {strides = array<i32>} : memref<4x8x8xf32, #tpu.memory_space<vmem>>, vector<4x8x8xf32>,
    %c0_153 = arith.constant 0 : index
    %c0_154 = arith.constant 0 : index
    %c0_155 = arith.constant 0 : index
    %143 = tpu.strided_load %arg10[%c0_153, %c0_154, %c0_155] {strides = array<i32: 1, 2, 1>} : memref<4x8x8xf32, #tpu.memory_space<vmem>>, vector<4x4x8xf32>
    %c0_156 = arith.constant 0 : index
    %c1_157 = arith.constant 1 : index
    %c0_158 = arith.constant 0 : index
    %144 = tpu.strided_load %arg10[%c0_156, %c1_157, %c0_158] {strides = array<i32: 1, 2, 1>} : memref<4x8x8xf32, #tpu.memory_space<vmem>>, vector<4x4x8xf32>
    %145 = arith.maximumf %143, %144 : vector<4x4x8xf32>
    %cst_159 = arith.constant 0.000000e+00 : f32
    %146 = vector.broadcast %cst_159 : f32 to vector<4x4x8xf32>
    %147 = arith.maximumf %145, %146 : vector<4x4x8xf32>
    %c0_160 = arith.constant 0 : index
    %c0_161 = arith.constant 0 : index
    %c0_162 = arith.constant 0 : index
    %c0_163 = arith.constant 0 : index
    %148 = vector.load %arg6[%c0_160, %c0_161, %c0_162, %c0_163] : memref<1x4x4x8xf32, #tpu.memory_space<vmem>>, vector<1x4x4x8xf32>
    %149 = vector.shape_cast %148 : vector<1x4x4x8xf32> to vector<4x4x8xf32>
    %150 = vector.shape_cast %147 : vector<4x4x8xf32> to vector<1x4x4x8xf32>
    tpu.vector_store %arg6[%c0_160, %c0_161, %c0_162, %c0_163], %150 {strides = array<i32>} : memref<1x4x4x8xf32, #tpu.memory_space<vmem>>, vector<1x4x4x8xf32>,
    return
  }
  func.func @transform_0(%arg0: i32) -> (i32, i32, i32, i32) {
    %c0_i32 = arith.constant 0 : i32
    %c0_i32_0 = arith.constant 0 : i32
    %c0_i32_1 = arith.constant 0 : i32
    %c0_i32_2 = arith.constant 0 : i32
    return %arg0, %c0_i32, %c0_i32_0, %c0_i32_1 : i32, i32, i32, i32
  }
  func.func @transform_1(%arg0: i32) -> (i32, i32, i32) {
    %c0_i32 = arith.constant 0 : i32
    %c0_i32_0 = arith.constant 0 : i32
    %c0_i32_1 = arith.constant 0 : i32
    %c0_i32_2 = arith.constant 0 : i32
    return %c0_i32, %c0_i32_0, %c0_i32_1 : i32, i32, i32
  }
  func.func @transform_2(%arg0: i32) -> (i32, i32) {
    %c0_i32 = arith.constant 0 : i32
    %c0_i32_0 = arith.constant 0 : i32
    %c0_i32_1 = arith.constant 0 : i32
    return %c0_i32, %c0_i32_0 : i32, i32
  }
  func.func @transform_3(%arg0: i32) -> (i32, i32, i32) {
    %c0_i32 = arith.constant 0 : i32
    %c0_i32_0 = arith.constant 0 : i32
    %c0_i32_1 = arith.constant 0 : i32
    %c0_i32_2 = arith.constant 0 : i32
    return %c0_i32, %c0_i32_0, %c0_i32_1 : i32, i32, i32
  }
  func.func @transform_4(%arg0: i32) -> (i32, i32) {
    %c0_i32 = arith.constant 0 : i32
    %c0_i32_0 = arith.constant 0 : i32
    %c0_i32_1 = arith.constant 0 : i32
    return %c0_i32, %c0_i32_0 : i32, i32
  }
  func.func @transform_5(%arg0: i32) -> (i32, i32, i32, i32) {
    %c0_i32 = arith.constant 0 : i32
    %c0_i32_0 = arith.constant 0 : i32
    %c0_i32_1 = arith.constant 0 : i32
    %c0_i32_2 = arith.constant 0 : i32
    return %arg0, %c0_i32, %c0_i32_0, %c0_i32_1 : i32, i32, i32, i32
  }
}

</mosaic_0001>

<bundles_post_ra>
// kernel: encode_block_forward.1
= control target key start
LH: loop header
LB: loop body
LE: loop exit
PB: predicated region body
PF: predicated region fallthrough
CT: control target
= control target key end

     0   :  { %10 = vsyncpa [#allocation7], 0  ;;  %s39343_s0 = inlined_call_operand.vmem [shape: f32[2,16,16,4], index: 0, kind: input, shape index: {}]   ;;  %s39344_s1 = inlined_call_operand.vmem [shape: f32[9,4,8], index: 1, kind: input, shape index: {}]   ;;  %s39345_s2 = inlined_call_operand.vmem [shape: f32[1,8], index: 2, kind: input, shape index: {}]   ;;  %s39346_s3 = inlined_call_operand.vmem [shape: f32[9,8,8], index: 3, kind: input, shape index: {}]   ;;  %s39347_s4 = inlined_call_operand.vmem [shape: f32[1,8], index: 4, kind: input, shape index: {}]   ;;  %s39348_s5 = inlined_call_operand.hbm [shape: f32[2,4,4,8], index: 5, kind: output, shape index: {}]  }
   0x1   :  { %12 = vsyncpa [#allocation7 + $0x1], 0  ;;  %s33156_s18 = smov 0   ;;  %s33158_s19 = smov 0  }
   0x2   :  { %s33160_s20 = smov 0   ;;  %s33162_s21 = smov 0  }
   0x3 LB: > { %s33177_s22 = sadd.s32 4294967295, %s33120_s21   ;;  %s25138_s23 = sadd.s32 4294967294, %s33120_s21   ;;  %s33120_s21 = sphi %s33162_s21, %s41872_s21   ;;  %s33116_s20 = sphi %s33160_s20, %s41871_s20   ;;  %s33112_s19 = sphi %s33158_s19, %s41870_s19   ;;  %s33108_s18 = sphi %s33156_s18, %s41869_s18  }
   0x4   : > { %s33181_s24 = sadd.s32 1, %s33120_s21   ;;  %s135_s25 = sadd.s32 1, %s33116_s20 }
   0x5   : > { %s132_s26 = ssub.s32 %s33120_s21, %s33181_s24  ;;  %p145_p0 = scmp.ne.s32.totalorder %s33116_s20, %s33112_s19 }
   0x6   : > { %p133_p1 = scmp.eq.s32.totalorder %s132_s26, 0  ;;  %p146_p2 = scmp.eq.s32.totalorder %s33177_s22, 1 }
   0x7   : > { %p151_p3 = scmp.ne.s32.totalorder %s33112_s19, %s33108_s18  ;;  %p152_p4 = scmp.eq.s32.totalorder %s25138_s23, 1 }
   0x8   : > { %s33192_s27 = scalar_select %p133_p1, %s33116_s20, %s135_s25  }
   0x9   : > { %p33194_p5 = por %p146_p2, %p145_p0  ;;  %p33198_p6 = por %p152_p4, %p151_p3 }
   0xa   : > { %p25141_p7 = scmp.ge.s32.totalorder %s33120_s21, 1  ;;  %p190_p8 = scmp.lt.s32.totalorder %s33120_s21, 3 }
   0xc   : > { %p191_p9 = pnand %p25141_p7, %p190_p8 }
   0xe   : > { %194 = sbr.rel (%p191_p9) target bundleno = 3562 (0xdea), region = 40 }
  0x15   : > { %vm507_vm0 = vcmask 1043456   ;;  %v25147_v0 = vld [vmem:[%s39344_s1 + $0xc] sm:$0xf]  ;;  %p218_p10 = scmp.lt.s32.totalorder %s33177_s22, 1  ;;  %vm223_vm1 = vcmask 31744   ;;  %v39349_v2 = vmov 0.0  }
  0x16   : > { %v6243_v1 = vsel %vm507_vm0, %v25147_v0, 0  ;;  %228 = vst.msk [vmem:[#allocation2 + $0x18] sm:$0xff] %vm223_vm1, %v39349_v2  ;;  %229 = vst.msk [vmem:[#allocation2 + $0x20] sm:$0xff] %vm223_vm1, %v39349_v2  ;;  %v25145_v3 = vld [vmem:[%s39344_s1 + $0x4] sm:$0xf]  ;;  %vm226_vm2 = vcmask 25600  }
  0x17   : > { %224 = vst.msk [vmem:[#allocation2] sm:$0xff] %vm223_vm1, %v39349_v2  ;;  %225 = vst.msk [vmem:[#allocation2 + $0x8] sm:$0xff] %vm223_vm1, %v39349_v2  ;;  %v33284_v4 = vand.u32 4294901760, %v6243_v1  ;;  %s219_s9 = scalar_select %p218_p10, %s33177_s22, 1  ;;  %v509_v5 = vsel %vm507_vm0, %v25145_v3, 0  ;;  %vm17832_vm3 = vcmask 64512  }
  0x18   : > { %231 = vst.msk [vmem:[#allocation2 + $0x30] sm:$0xff] %vm223_vm1, %v39349_v2  ;;  %232 = vst.msk [vmem:[#allocation2 + $0x38] sm:$0xff] %vm223_vm1, %v39349_v2  ;;  %v33326_v6 = vand.u32 4294901760, %v509_v5  ;;  %vm17897_vm4 = vcmask 58368   ;;  %s215_s23 = sand.u32 1, %s33112_s19   ;;  %vm25057_vm5 = vcmask 60416  }
  0x19   : > { %234 = vst.msk [vmem:[#allocation2 + $0x48] sm:$0xff] %vm223_vm1, %v39349_v2  ;;  %235 = vst.msk [vmem:[#allocation2 + $0x50] sm:$0xff] %vm223_vm1, %v39349_v2  ;;  %v33329_v7 = vsub.f32 %v6243_v1, %v33284_v4  ;;  %s25168_s10 = sshll.u32 %s219_s9, 8  ;;  %s25142_s25 = sshll.u32 %s215_s23, 4 }
  0x1a   : > { %237 = vst.msk [vmem:[#allocation2 + $0x60] sm:$0xff] %vm223_vm1, %v39349_v2  ;;  %238 = vst.msk [vmem:[#allocation2 + $0x68] sm:$0xff] %vm223_vm1, %v39349_v2  ;;  %s33334_s13 = scalar_lea.vmem %s39343_s0, %s25168_s10  ;;  %27438 = vmatprep.subr.mxu1 %v33326_v6  ;;  %v33338_v8 = vsub.f32 %v509_v5, %v33326_v6  ;;  %s217_s26 = scalar_lea.vmem [#allocation6], %s25142_s25 }
  0x1b   : > { %240 = vst.msk [vmem:[#allocation2 + $0x78] sm:$0xff] %vm223_vm1, %v39349_v2  ;;  %241 = vst.msk [vmem:[#allocation2 + $0x80] sm:$0xff] %vm223_vm1, %v39349_v2  ;;  %28438 = vmatprep.subr.mxu0 %v33329_v7  ;;  %v279_v9 = vld [vmem:[%s33334_s13] sm:$0xff]  ;;  %v280_v10 = vld [vmem:[%s33334_s13 + $0x8] sm:$0xff]  ;;  %27439 = vmatpush3.msra.mxu1 %v33326_v6  ;;  %v33410_v46 = vand.u32 4294901760, %v33329_v7  ;;  %s25169_s30 = sshll.u32 %s33177_s22, 8 }
  0x1c   : > { %243 = vst.msk [vmem:[#allocation2 + $0x90] sm:$0xff] %vm223_vm1, %v39349_v2  ;;  %244 = vst.msk [vmem:[#allocation2 + $0x98] sm:$0xff] %vm223_vm1, %v39349_v2  ;;  %v281_v11 = vld [vmem:[%s33334_s13 + $0x10] sm:$0xff]  ;;  %28439 = vmatpush3.msra.mxu0 %v33329_v7  ;;  %v282_v12 = vld [vmem:[%s33334_s13 + $0x18] sm:$0xff]  ;;  %v33353_v15 = vand.u32 4294901760, %v33338_v8  ;;  %s25076_s6 = sshll.u32 %s217_s26, 4  ;;  %s39295_s9 = scalar_lea.hbm %s39348_s5, %s25169_s30  ;;  %s39297_s6 = int_to_ptr.vmem [resolvable:$true] %s25076_s6 }
  0x1d   : > { %246 = vst.msk [vmem:[#allocation2 + $0xa8] sm:$0xff] %vm223_vm1, %v39349_v2  ;;  %247 = vst.msk [vmem:[#allocation2 + $0xb0] sm:$0xff] %vm223_vm1, %v39349_v2  ;;  %v283_v13 = vld [vmem:[%s33334_s13 + $0x20] sm:$0xff]  ;;  %v284_v14 = vld [vmem:[%s33334_s13 + $0x28] sm:$0xff]  ;;  %28488 = vmatprep.subr.mxu0 %v33284_v4  ;;  %s39302_s22 = scalar_lea.sflag [#allocation7], %s215_s23  ;;  %s33058_s10 = scalar_lea.vmem %s39297_s6, 256 }
  0x1e   : > { %249 = vst.msk [vmem:[#allocation2 + $0xc0] sm:$0xff] %vm223_vm1, %v39349_v2  ;;  %250 = vst.msk [vmem:[#allocation2 + $0xc8] sm:$0xff] %vm223_vm1, %v39349_v2  ;;  %v377_v16 = vld [vmem:[#allocation2 + $0x1] sm:$0xff]  ;;  %v285_v17 = vld [vmem:[%s33334_s13 + $0x30] sm:$0xff]  ;;  %v901_v23 = vsub.f32 %v33338_v8, %v33353_v15  ;;  %p33059_p11 = scmp.ne.s32.totalorder %s39297_s6, %s33058_s10  ;;  %s33123_s11 = smov [#allocation6]  }
  0x1f   : > { %252 = vst.msk [vmem:[#allocation2 + $0xd8] sm:$0xff] %vm223_vm1, %v39349_v2  ;;  %253 = vst.msk [vmem:[#allocation2 + $0xe0] sm:$0xff] %vm223_vm1, %v39349_v2  ;;  %v286_v18 = vld [vmem:[%s33334_s13 + $0x38] sm:$0xff]  ;;  %v412_v19 = vsel %vm223_vm1, %v377_v16, 0  ;;  %v287_v21 = vld [vmem:[%s33334_s13 + $0x40] sm:$0xff]  ;;  %s33062_s12 = sshll.u32 %s33123_s11, 4  ;;  %s33063_s12 = int_to_ptr.vmem [resolvable:$false] %s33062_s12 }
  0x20   : > { %255 = vst.msk [vmem:[#allocation2 + $0xf0] sm:$0xff] %vm223_vm1, %v39349_v2  ;;  %256 = vst.msk [vmem:[#allocation2 + $0xf8] sm:$0xff] %vm223_vm1, %v39349_v2  ;;  %v288_v22 = vld [vmem:[%s33334_s13 + $0x48] sm:$0xff]  ;;  %v33368_v24 = vand.u32 4294901760, %v412_v19  ;;  %v289_v26 = vld [vmem:[%s33334_s13 + $0x50] sm:$0xff]  ;;  %v33384_v33 = vand.u32 4294901760, %v901_v23  ;;  %p33060_p12 = pnand %p33059_p11, %p33194_p5  ;;  %p33065_p0 = scmp.lt.s32.totalorder %s39297_s6, %s33063_s12 }
  0x21   : > { %258 = vst.msk [vmem:[#allocation2 + $0x108] sm:$0xff] %vm223_vm1, %v39349_v2  ;;  %259 = vst.msk [vmem:[#allocation2 + $0x110] sm:$0xff] %vm223_vm1, %v39349_v2  ;;  %v290_v27 = vld [vmem:[%s33334_s13 + $0x58] sm:$0xff]  ;;  %v291_v28 = vld [vmem:[%s33334_s13 + $0x60] sm:$0xff] }
  0x22   : > { %261 = vst.msk [vmem:[#allocation2 + $0x120] sm:$0xff] %vm223_vm1, %v39349_v2  ;;  %262 = vst.msk [vmem:[#allocation2 + $0x128] sm:$0xff] %vm223_vm1, %v39349_v2  ;;  %v292_v30 = vld [vmem:[%s33334_s13 + $0x68] sm:$0xff]  ;;  %v293_v31 = vld [vmem:[%s33334_s13 + $0x70] sm:$0xff]  ;;  %v33387_v34 = vsub.f32 %v412_v19, %v33368_v24  ;;  %27488 = vmatprep.subr.mxu1 %v33384_v33  ;;  %p33061_p13 = pneg %p33060_p12 }
  0x23   : > { %264 = vst.msk [vmem:[#allocation2 + $0x138] sm:$0xff] %vm223_vm1, %v39349_v2  ;;  %265 = vst.msk [vmem:[#allocation2 + $0x140] sm:$0xff] %vm223_vm1, %v39349_v2  ;;  %v294_v32 = vld [vmem:[%s33334_s13 + $0x78] sm:$0xff]  ;;  %v295_v35 = vld [vmem:[%s33334_s13 + $0x80] sm:$0xff] }
  0x24   : > { %267 = vst.msk [vmem:[#allocation2 + $0x150] sm:$0xff] %vm223_vm1, %v39349_v2  ;;  %268 = vst.msk [vmem:[#allocation2 + $0x158] sm:$0xff] %vm223_vm1, %v39349_v2  ;;  %v296_v36 = vld [vmem:[%s33334_s13 + $0x88] sm:$0xff]  ;;  %v297_v37 = vld [vmem:[%s33334_s13 + $0x90] sm:$0xff]  ;;  %v39356_v44 = vand.u32 4294901760, %v33387_v34 }
  0x25   : > { %270 = vst.msk [vmem:[#allocation2 + $0x168] sm:$0xff] %vm223_vm1, %v39349_v2  ;;  %271 = vst.msk [vmem:[#allocation2 + $0x170] sm:$0xff] %vm223_vm1, %v39349_v2  ;;  %v298_v39 = vld [vmem:[%s33334_s13 + $0x98] sm:$0xff]  ;;  %v299_v40 = vld [vmem:[%s33334_s13 + $0xa0] sm:$0xff] }
  0x26   : > { %273 = vst.msk [vmem:[#allocation2 + $0x180] sm:$0xff] %vm223_vm1, %v39349_v2  ;;  %274 = vst.msk [vmem:[#allocation2 + $0x188] sm:$0xff] %vm223_vm1, %v39349_v2  ;;  %v300_v41 = vld [vmem:[%s33334_s13 + $0xa8] sm:$0xff]  ;;  %v580_v55 = vsub.f32 %v33387_v34, %v39356_v44 }
  0x27   : > { %276 = vst.msk [vmem:[#allocation2 + $0x198] sm:$0xff] %vm223_vm1, %v39349_v2  ;;  %277 = vst.msk [vmem:[#allocation2 + $0x1a0] sm:$0xff] %vm223_vm1, %v39349_v2 }
  0x28   : > { %40399 = vst [vmem:[#allocation9_spill] sm:$0xff] %v33284_v4  ;;  %230 = vst.msk [vmem:[#allocation2 + $0x28] sm:$0x3] %vm226_vm2, %v39349_v2  ;;  %v581_v5 = vand.u32 4294901760, %v580_v55 }
  0x29   : > { %227 = vst.msk [vmem:[#allocation2 + $0x10] sm:$0x3] %vm226_vm2, %v39349_v2  ;;  %233 = vst.msk [vmem:[#allocation2 + $0x40] sm:$0x3] %vm226_vm2, %v39349_v2 }
  0x2a   : > { %236 = vst.msk [vmem:[#allocation2 + $0x58] sm:$0x3] %vm226_vm2, %v39349_v2  ;;  %239 = vst.msk [vmem:[#allocation2 + $0x70] sm:$0x3] %vm226_vm2, %v39349_v2  ;;  %27440 = vmatprep.mubr.f32.mxu1 %v581_v5 }
  0x2b   : > { %242 = vst.msk [vmem:[#allocation2 + $0x88] sm:$0x3] %vm226_vm2, %v39349_v2  ;;  %245 = vst.msk [vmem:[#allocation2 + $0xa0] sm:$0x3] %vm226_vm2, %v39349_v2 }
  0x2c   : > { %248 = vst.msk [vmem:[#allocation2 + $0xb8] sm:$0x3] %vm226_vm2, %v39349_v2  ;;  %251 = vst.msk [vmem:[#allocation2 + $0xd0] sm:$0x3] %vm226_vm2, %v39349_v2 }
  0x2d   : > { %254 = vst.msk [vmem:[#allocation2 + $0xe8] sm:$0x3] %vm226_vm2, %v39349_v2  ;;  %257 = vst.msk [vmem:[#allocation2 + $0x100] sm:$0x3] %vm226_vm2, %v39349_v2 }
  0x2e   : > { %260 = vst.msk [vmem:[#allocation2 + $0x118] sm:$0x3] %vm226_vm2, %v39349_v2  ;;  %263 = vst.msk [vmem:[#allocation2 + $0x130] sm:$0x3] %vm226_vm2, %v39349_v2 }
  0x2f   : > { %266 = vst.msk [vmem:[#allocation2 + $0x148] sm:$0x3] %vm226_vm2, %v39349_v2  ;;  %269 = vst.msk [vmem:[#allocation2 + $0x160] sm:$0x3] %vm226_vm2, %v39349_v2 }
  0x30   : > { %272 = vst.msk [vmem:[#allocation2 + $0x178] sm:$0x3] %vm226_vm2, %v39349_v2  ;;  %275 = vst.msk [vmem:[#allocation2 + $0x190] sm:$0x3] %vm226_vm2, %v39349_v2  ;;  %v378_v20 = vld [vmem:[#allocation2 + $0x9] sm:$0xff] }
  0x31   : > { %278 = vst.msk [vmem:[#allocation2 + $0x1a8] sm:$0x3] %vm226_vm2, %v39349_v2  ;;  %40400 = vst [vmem:[#allocation10_spill] sm:$0xff] %v33329_v7  ;;  %v415_v25 = vsel %vm223_vm1, %v378_v20, 0 }
  0x32   : > { %312 = vst.msk [vmem:[#allocation2 + $0x19] sm:$0xff] %vm223_vm1, %v279_v9  ;;  %313 = vst.msk [vmem:[#allocation2 + $0x21] sm:$0xff] %vm223_vm1, %v280_v10  ;;  %v33376_v29 = vand.u32 4294901760, %v415_v25 }
  0x33   : > { %314 = vst.msk [vmem:[#allocation2 + $0x31] sm:$0xff] %vm223_vm1, %v281_v11  ;;  %40401 = vst [vmem:[#allocation11_spill] sm:$0xff] %v33353_v15 }
  0x34   : > { %315 = vst.msk [vmem:[#allocation2 + $0x39] sm:$0xff] %vm223_vm1, %v282_v12  ;;  %316 = vst.msk [vmem:[#allocation2 + $0x49] sm:$0xff] %vm223_vm1, %v283_v13  ;;  %v33396_v38 = vsub.f32 %v415_v25, %v33376_v29 }
  0x35   : > { %317 = vst.msk [vmem:[#allocation2 + $0x51] sm:$0xff] %vm223_vm1, %v284_v14  ;;  %318 = vst.msk [vmem:[#allocation2 + $0x61] sm:$0xff] %vm223_vm1, %v285_v17 }
  0x36   : > { %319 = vst.msk [vmem:[#allocation2 + $0x69] sm:$0xff] %vm223_vm1, %v286_v18  ;;  %40402 = vst [vmem:[#allocation12_spill] sm:$0xff] %v33368_v24  ;;  %v39355_v49 = vand.u32 4294901760, %v33396_v38 }
  0x37   : > { %320 = vst.msk [vmem:[#allocation2 + $0x79] sm:$0xff] %vm223_vm1, %v287_v21  ;;  %321 = vst.msk [vmem:[#allocation2 + $0x81] sm:$0xff] %vm223_vm1, %v288_v22 }
  0x38   : > { %40403 = vst [vmem:[#allocation13_spill] sm:$0xff] %v33376_v29  ;;  %322 = vst.msk [vmem:[#allocation2 + $0x91] sm:$0xff] %vm223_vm1, %v289_v26  ;;  %v590_v58 = vsub.f32 %v33396_v38, %v39355_v49 }
  0x39   : > { %323 = vst.msk [vmem:[#allocation2 + $0x99] sm:$0xff] %vm223_vm1, %v290_v27  ;;  %324 = vst.msk [vmem:[#allocation2 + $0xa9] sm:$0xff] %vm223_vm1, %v291_v28  ;;  %v6112_v42 = vld [vmem:[#allocation2 + $0x18] sm:$0xff]  ;;  %v6113_v43 = vld [vmem:[#allocation2 + $0x20] sm:$0xff] }
  0x3a   : > { %40404 = vst [vmem:[#allocation14_spill] sm:$0xff] %v33387_v34  ;;  %325 = vst.msk [vmem:[#allocation2 + $0xb1] sm:$0xff] %vm223_vm1, %v292_v30  ;;  %v6114_v45 = vld [vmem:[#allocation2 + $0x30] sm:$0xff]  ;;  %v6147_v47 = vsel %vm223_vm1, %v6112_v42, 0  ;;  %v6150_v48 = vsel %vm223_vm1, %v6113_v43, 0  ;;  %v379_v52 = vld [vmem:[#allocation2 + $0x19] sm:$0xff] }
  0x3b   : > { %326 = vst.msk [vmem:[#allocation2 + $0xc1] sm:$0xff] %vm223_vm1, %v293_v31  ;;  %327 = vst.msk [vmem:[#allocation2 + $0xc9] sm:$0xff] %vm223_vm1, %v294_v32  ;;  %v6153_v50 = vsel %vm223_vm1, %v6114_v45, 0  ;;  %v6115_v51 = vld [vmem:[#allocation2 + $0x38] sm:$0xff]  ;;  %v33416_v53 = vand.u32 4294901760, %v6147_v47  ;;  %v33418_v54 = vand.u32 4294901760, %v6150_v48 }
  0x3c   : > { %40405 = vst [vmem:[#allocation15_spill] sm:$0xff] %v33396_v38  ;;  %328 = vst.msk [vmem:[#allocation2 + $0xd9] sm:$0xff] %vm223_vm1, %v295_v35  ;;  %v33423_v56 = vand.u32 4294901760, %v6153_v50  ;;  %v380_v57 = vld [vmem:[#allocation2 + $0x21] sm:$0xff]  ;;  %v6156_v59 = vsel %vm223_vm1, %v6115_v51, 0  ;;  %v418_v60 = vsel %vm223_vm1, %v379_v52, 0 }
  0x3d   : > { %329 = vst.msk [vmem:[#allocation2 + $0xe1] sm:$0xff] %vm223_vm1, %v296_v36  ;;  %330 = vst.msk [vmem:[#allocation2 + $0xf1] sm:$0xff] %vm223_vm1, %v297_v37  ;;  %v421_v61 = vsel %vm223_vm1, %v380_v57, 0  ;;  %v6116_v62 = vld [vmem:[#allocation2 + $0x48] sm:$0xff]  ;;  %v6117_v63 = vld [vmem:[#allocation2 + $0x50] sm:$0xff]  ;;  %v33432_v1 = vsub.f32 %v6147_v47, %v33416_v53  ;;  %v33435_v3 = vsub.f32 %v6150_v48, %v33418_v54  ;;  %v591_v10 = vand.u32 4294901760, %v590_v58 }
  0x3e   : > { %331 = vst.msk [vmem:[#allocation2 + $0xf9] sm:$0xff] %vm223_vm1, %v298_v39  ;;  %332 = vst.msk [vmem:[#allocation2 + $0x109] sm:$0xff] %vm223_vm1, %v299_v40  ;;  %v381_v0 = vld [vmem:[#allocation2 + $0x31] sm:$0xff]  ;;  %v33438_v9 = vsub.f32 %v6153_v50, %v33423_v56  ;;  %v33440_v11 = vand.u32 4294901760, %v6156_v59  ;;  %v33442_v12 = vand.u32 4294901760, %v418_v60  ;;  %v33444_v13 = vand.u32 4294901760, %v421_v61 }
  0x3f   : > { %333 = vst.msk [vmem:[#allocation2 + $0x111] sm:$0xff] %vm223_vm1, %v300_v41  ;;  %40406 = vst [vmem:[#allocation16_spill] sm:$0xff] %v33410_v46  ;;  %v382_v14 = vld [vmem:[#allocation2 + $0x39] sm:$0xff]  ;;  %28440 = vmatprep.mubr.f32.mxu0 %v33432_v1  ;;  %v39359_v16 = vand.u32 4294901760, %v33435_v3  ;;  %v6159_v17 = vsel %vm223_vm1, %v6116_v62, 0  ;;  %v6162_v18 = vsel %vm223_vm1, %v6117_v63, 0  ;;  %27441 = vmatmul.mubr.f32.vlgmr.msra.gmra.mrb[0].mxu1 %v591_v10 }
  0x40   : > { %40407 = vst [vmem:[#allocation17_spill] sm:$0xff] %v33416_v53  ;;  %40408 = vst [vmem:[#allocation18_spill] sm:$0xff] %v33418_v54  ;;  %v424_v19 = vsel %vm223_vm1, %v381_v0, 0  ;;  %28441 = vmatmul.mubr.f32.vlgmr.msra.gmra.mrb[0].mxu0 %v33435_v3  ;;  %v33453_v20 = vsub.f32 %v6156_v59, %v33440_v11  ;;  %v33456_v21 = vsub.f32 %v418_v60, %v33442_v12  ;;  %v33461_v23 = vand.u32 4294901760, %v6159_v17  ;;  %v6118_v25 = vld [vmem:[#allocation2 + $0x60] sm:$0xff]  ;;  %v6119_v37 = vld [vmem:[#allocation2 + $0x68] sm:$0xff] }
  0x41   : > { %40409 = vst [vmem:[#allocation19_spill] sm:$0xff] %v33423_v56  ;;  %40410 = vst [vmem:[#allocation20_spill] sm:$0xff] %v33432_v1  ;;  %v33459_v22 = vsub.f32 %v421_v61, %v33444_v13  ;;  %v33466_v26 = vsub.f32 %v33435_v3, %v39359_v16  ;;  %28489 = vmatpush3.msra.mxu0 %v33284_v4  ;;  %28443 = vmatprep.mubr.f32.mxu0 %v33438_v9  ;;  %v33470_v27 = vand.u32 4294901760, %v6162_v18  ;;  %v383_v39 = vld [vmem:[#allocation2 + $0x49] sm:$0xff]  ;;  %v384_v40 = vld [vmem:[#allocation2 + $0x51] sm:$0xff] }
  0x42   : > { %40411 = vst [vmem:[#allocation21_spill] sm:$0xff] %v33438_v9  ;;  %40412 = vst [vmem:[#allocation22_spill] sm:$0xff] %v33440_v11  ;;  %v33472_v28 = vand.u32 4294901760, %v424_v19  ;;  %v427_v30 = vsel %vm223_vm1, %v382_v14, 0  ;;  %v39354_v31 = vand.u32 4294901760, %v33456_v21  ;;  %v33478_v35 = vsub.f32 %v6159_v17, %v33461_v23  ;;  %28538 = vmatprep.subr.mxu0 %v33410_v46  ;;  %27489 = vmatpush3.msra.mxu1 %v33384_v33  ;;  %v6120_v50 = vld [vmem:[#allocation2 + $0x78] sm:$0xff] }
  0x43   : > { %40413 = vst [vmem:[#allocation23_spill] sm:$0xff] %v33442_v12  ;;  %40414 = vst [vmem:[#allocation24_spill] sm:$0xff] %v33444_v13  ;;  %v39353_v32 = vand.u32 4294901760, %v33459_v22  ;;  %v33480_v36 = vand.u32 4294901760, %v427_v30  ;;  %v33485_v41 = vsub.f32 %v6162_v18, %v33470_v27  ;;  %v6165_v43 = vsel %vm223_vm1, %v6118_v25, 0  ;;  %27538 = vmatprep.subr.mxu1 %v33338_v8  ;;  %v6121_v58 = vld [vmem:[#allocation2 + $0x80] sm:$0xff] }
  0x44   : > { %40415 = vst [vmem:[#allocation25_spill] sm:$0xff] %v33453_v20  ;;  %40416 = vst [vmem:[#allocation26_spill] sm:$0xff] %v33456_v21  ;;  %v33488_v42 = vsub.f32 %v424_v19, %v33472_v28  ;;  %28444 = vmatmul.mubr.f32.gmra.mrb[2].mxu0 %v33453_v20  ;;  %v600_v45 = vsub.f32 %v33456_v21, %v39354_v31  ;;  %v33502_v48 = vand.u32 4294901760, %v6165_v43  ;;  %v6168_v52 = vsel %vm223_vm1, %v6119_v37, 0  ;;  %v385_v59 = vld [vmem:[#allocation2 + $0x61] sm:$0xff]  ;;  %v386_v17 = vld [vmem:[#allocation2 + $0x69] sm:$0xff] }
  0x45   : > { %40417 = vst [vmem:[#allocation27_spill] sm:$0xff] %v33459_v22  ;;  %40418 = vst [vmem:[#allocation28_spill] sm:$0xff] %v33461_v23  ;;  %v610_v33 = vsub.f32 %v33459_v22, %v39353_v32  ;;  %v33500_v47 = vsub.f32 %v427_v30, %v33480_v36  ;;  %28446 = vmatprep.mubr.f32.mxu0 %v33478_v35  ;;  %v430_v55 = vsel %vm223_vm1, %v383_v39, 0  ;;  %v433_v57 = vsel %vm223_vm1, %v384_v40, 0  ;;  %v6122_v37 = vld [vmem:[#allocation2 + $0x90] sm:$0xff]  ;;  %v302_v40 = vld [vmem:[%s33334_s13 + $0xb8] sm:$0xff] }
  0x46   : > { %40419 = vst [vmem:[#allocation29_spill] sm:$0xff] %v33466_v26  ;;  %40420 = vst [vmem:[#allocation30_spill] sm:$0xff] %v33470_v27  ;;  %v39352_v51 = vand.u32 4294901760, %v33488_v42  ;;  %v601_v60 = vand.u32 4294901760, %v600_v45  ;;  %v33511_v63 = vsub.f32 %v6165_v43, %v33502_v48  ;;  %v33516_v5 = vand.u32 4294901760, %v6168_v52  ;;  %v301_v39 = vld [vmem:[%s33334_s13 + $0xb0] sm:$0xff] }
  0x47   : > { %40421 = vst [vmem:[#allocation31_spill] sm:$0xff] %v33472_v28  ;;  %40422 = vst [vmem:[#allocation32_spill] sm:$0xff] %v33478_v35  ;;  %v611_v61 = vand.u32 4294901760, %v610_v33  ;;  %v39351_v62 = vand.u32 4294901760, %v33500_v47  ;;  %v33518_v10 = vand.u32 4294901760, %v430_v55  ;;  %v33520_v14 = vand.u32 4294901760, %v433_v57 }
  0x48   : > { %40423 = vst [vmem:[#allocation33_spill] sm:$0xff] %v33480_v36  ;;  %40424 = vst [vmem:[#allocation34_spill] sm:$0xff] %v33485_v41  ;;  %v620_v0 = vsub.f32 %v33488_v42, %v39352_v51  ;;  %27443 = vmatprep.mubr.f32.mxu1 %v601_v60  ;;  %28447 = vmatmul.mubr.f32.gmra.mrb[4].mxu0 %v33485_v41  ;;  %v6171_v19 = vsel %vm223_vm1, %v6120_v50, 0  ;;  %v6174_v25 = vsel %vm223_vm1, %v6121_v58, 0  ;;  %v436_v30 = vsel %vm223_vm1, %v385_v59, 0  ;;  %v6123_v58 = vld [vmem:[#allocation2 + $0x98] sm:$0xff] }
  0x49   : > { %40425 = vst [vmem:[#allocation35_spill] sm:$0xff] %v33488_v42  ;;  %40426 = vst [vmem:[#allocation36_spill] sm:$0xff] %v33500_v47  ;;  %v630_v18 = vsub.f32 %v33500_v47, %v39351_v62  ;;  %27444 = vmatmul.mubr.f32.gmra.mrb[2].mxu1 %v611_v61  ;;  %28449 = vmatprep.mubr.f32.mxu0 %v33511_v63  ;;  %v33533_v45 = vsub.f32 %v6168_v52, %v33516_v5  ;;  %v387_v59 = vld [vmem:[#allocation2 + $0x79] sm:$0xff]  ;;  %v33546_v52 = vand.u32 4294901760, %v6174_v25  ;;  %v388_v44 = vld [vmem:[#allocation2 + $0x81] sm:$0xff] }
  0x4a   : > { %40427 = vst [vmem:[#allocation37_spill] sm:$0xff] %v33502_v48  ;;  %40428 = vst [vmem:[#allocation38_spill] sm:$0xff] %v33511_v63  ;;  %v621_v43 = vand.u32 4294901760, %v620_v0  ;;  %v33536_v33 = vsub.f32 %v430_v55, %v33518_v10  ;;  %v33539_v50 = vsub.f32 %v433_v57, %v33520_v14  ;;  %v303_v60 = vld [vmem:[%s33334_s13 + $0xc0] sm:$0xff]  ;;  %v33544_v0 = vand.u32 4294901760, %v6171_v19  ;;  %v304_v55 = vld [vmem:[%s33334_s13 + $0xc8] sm:$0xff] }
  0x4b   : > { %40429 = vst [vmem:[#allocation39_spill] sm:$0xff] %v33516_v5  ;;  %40430 = vst [vmem:[#allocation40_spill] sm:$0xff] %v33518_v10  ;;  %v631_v61 = vand.u32 4294901760, %v630_v18  ;;  %v33548_v2 = vand.u32 4294901760, %v436_v30  ;;  %v305_v57 = vld [vmem:[%s33334_s13 + $0xd0] sm:$0xff]  ;;  %v439_v18 = vsel %vm223_vm1, %v386_v17, 0  ;;  %v33566_v32 = vsub.f32 %v6174_v25, %v33546_v52 }
  0x4c   : > { %40431 = vst [vmem:[#allocation41_spill] sm:$0xff] %v33520_v14  ;;  %40432 = vst [vmem:[#allocation42_spill] sm:$0xff] %v33533_v45  ;;  %27446 = vmatprep.mubr.f32.mxu1 %v621_v43  ;;  %v6177_v62 = vsel %vm223_vm1, %v6122_v37, 0  ;;  %v306_v51 = vld [vmem:[%s33334_s13 + $0xd8] sm:$0xff]  ;;  %28450 = vmatmul.mubr.f32.gmra.mrb[6].mxu0 %v33533_v45  ;;  %v33563_v43 = vsub.f32 %v6171_v19, %v33544_v0  ;;  %v33571_v17 = vand.u32 4294901760, %v439_v18  ;;  %v308_v37 = vld [vmem:[%s33334_s13 + $0xe8] sm:$0xff] }
  0x4d   : > { %40433 = vst [vmem:[#allocation43_spill] sm:$0xff] %v33536_v33  ;;  %40434 = vst [vmem:[#allocation44_spill] sm:$0xff] %v33539_v50  ;;  %v33569_v31 = vsub.f32 %v436_v30, %v33548_v2  ;;  %27447 = vmatmul.mubr.f32.gmra.mrb[4].mxu1 %v631_v61  ;;  %v33584_v30 = vand.u32 4294901760, %v6177_v62  ;;  %v6180_v49 = vsel %vm223_vm1, %v6123_v58, 0  ;;  %v6125_v58 = vld [vmem:[#allocation2 + $0xb0] sm:$0xff]  ;;  %v6126_v47 = vld [vmem:[#allocation2 + $0xc0] sm:$0xff] }
  0x4e   : > { %334 = vst.msk [vmem:[#allocation2 + $0x121] sm:$0xff] %vm223_vm1, %v301_v39  ;;  %335 = vst.msk [vmem:[#allocation2 + $0x129] sm:$0xff] %vm223_vm1, %v302_v40  ;;  %v39358_v39 = vand.u32 4294901760, %v33536_v33  ;;  %v39357_v40 = vand.u32 4294901760, %v33539_v50  ;;  %28452 = vmatprep.mubr.f32.mxu0 %v33563_v43  ;;  %v33593_v61 = vsub.f32 %v439_v18, %v33571_v17  ;;  %v6128_v38 = vld [vmem:[#allocation2 + $0xd8] sm:$0xff]  ;;  %v393_v34 = vld [vmem:[#allocation2 + $0xc1] sm:$0xff] }
  0x4f   : > { %40435 = vst [vmem:[#allocation45_spill] sm:$0xff] %v33544_v0  ;;  %40436 = vst [vmem:[#allocation46_spill] sm:$0xff] %v33546_v52  ;;  %v395_v0 = vld [vmem:[#allocation2 + $0xd9] sm:$0xff] }
  0x50   : > { %40437 = vst [vmem:[#allocation47_spill] sm:$0xff] %v33548_v2  ;;  %336 = vst.msk [vmem:[#allocation2 + $0x139] sm:$0xff] %vm223_vm1, %v303_v60  ;;  %v307_v60 = vld [vmem:[%s33334_s13 + $0xe0] sm:$0xff]  ;;  %v640_v19 = vsub.f32 %v33536_v33, %v39358_v39  ;;  %v650_v25 = vsub.f32 %v33539_v50, %v39357_v40  ;;  %v442_v40 = vsel %vm223_vm1, %v387_v59, 0  ;;  %v6124_v39 = vld [vmem:[#allocation2 + $0xa8] sm:$0xff]  ;;  %28453 = vmatmul.mubr.f32.gmra.mrb[8].mxu0 %v33566_v32  ;;  %v445_v59 = vsel %vm223_vm1, %v388_v44, 0 }
  0x51   : > { %337 = vst.msk [vmem:[#allocation2 + $0x141] sm:$0xff] %vm223_vm1, %v304_v55  ;;  %338 = vst.msk [vmem:[#allocation2 + $0x151] sm:$0xff] %vm223_vm1, %v305_v57  ;;  %v309_v55 = vld [vmem:[%s33334_s13 + $0xf0] sm:$0xff]  ;;  %v310_v57 = vld [vmem:[%s33334_s13 + $0xf8] sm:$0xff]  ;;  %v33616_v50 = vand.u32 4294901760, %v445_v59  ;;  %v6183_v33 = vsel %vm223_vm1, %v6124_v39, 0 }
  0x52   : > { %40438 = vst [vmem:[#allocation48_spill] sm:$0xff] %v33563_v43  ;;  %40439 = vst [vmem:[#allocation49_spill] sm:$0xff] %v33566_v32  ;;  %v641_v16 = vand.u32 4294901760, %v640_v19  ;;  %v651_v26 = vand.u32 4294901760, %v650_v25  ;;  %v389_v19 = vld [vmem:[#allocation2 + $0x91] sm:$0xff]  ;;  %v390_v25 = vld [vmem:[#allocation2 + $0x99] sm:$0xff] }
  0x53   : > { %40440 = vst [vmem:[#allocation50_spill] sm:$0xff] %v33569_v31  ;;  %40441 = vst [vmem:[#allocation51_spill] sm:$0xff] %v33571_v17  ;;  %v33629_v42 = vsub.f32 %v445_v59, %v33616_v50  ;;  %v448_v39 = vsel %vm223_vm1, %v389_v19, 0  ;;  %v398_v56 = vld [vmem:[#allocation2 + $0xf9] sm:$0xff]  ;;  %s33064_s13 = scalar_lea.vmem %s33063_s12, 512 }
  0x54   : > { %339 = vst.msk [vmem:[#allocation2 + $0x159] sm:$0xff] %vm223_vm1, %v306_v51  ;;  %340 = vst.msk [vmem:[#allocation2 + $0x169] sm:$0xff] %vm223_vm1, %v307_v60  ;;  %v39366_v51 = vand.u32 4294901760, %v33569_v31  ;;  %v33595_v60 = vand.u32 4294901760, %v6180_v49  ;;  %27449 = vmatprep.mubr.f32.mxu1 %v641_v16  ;;  %p33066_p1 = scmp.lt.s32.totalorder %s33064_s13, %s33058_s10 }
  0x55   : > { %40442 = vst [vmem:[#allocation52_spill] sm:$0xff] %v33584_v30  ;;  %341 = vst.msk [vmem:[#allocation2 + $0x171] sm:$0xff] %vm223_vm1, %v308_v37  ;;  %v33599_v37 = vsub.f32 %v6177_v62, %v33584_v30  ;;  %27450 = vmatmul.mubr.f32.gmra.mrb[6].mxu1 %v651_v26  ;;  %v6127_v26 = vld [vmem:[#allocation2 + $0xc8] sm:$0xff] }
  0x56   : > { %342 = vst.msk [vmem:[#allocation2 + $0x181] sm:$0xff] %vm223_vm1, %v309_v55  ;;  %343 = vst.msk [vmem:[#allocation2 + $0x189] sm:$0xff] %vm223_vm1, %v310_v57  ;;  %v33601_v55 = vand.u32 4294901760, %v442_v40  ;;  %v660_v18 = vsub.f32 %v33569_v31, %v39366_v51  ;;  %v33609_v7 = vsub.f32 %v6180_v49, %v33595_v60  ;;  %v6186_v51 = vsel %vm223_vm1, %v6125_v58, 0  ;;  %v394_v30 = vld [vmem:[#allocation2 + $0xc9] sm:$0xff]  ;;  %p33067_p2 = por %p33066_p1, %p33065_p0 }
  0x57   : > { %40443 = vst [vmem:[#allocation53_spill] sm:$0xff] %v33593_v61  ;;  %40444 = vst [vmem:[#allocation54_spill] sm:$0xff] %v33595_v60  ;;  %28455 = vmatprep.mubr.f32.mxu0 %v33599_v37  ;;  %v40450_v49 = vand.u32 4294901760, %v33593_v61  ;;  %v33623_v31 = vand.u32 4294901760, %v6183_v33  ;;  %v33625_v16 = vand.u32 4294901760, %v6186_v51  ;;  %v451_v58 = vsel %vm223_vm1, %v390_v25, 0 }
  0x58   : > { %40445 = vst [vmem:[#allocation55_spill] sm:$0xff] %v33599_v37  ;;  %40446 = vst [vmem:[#allocation56_spill] sm:$0xff] %v33601_v55  ;;  %v33614_v62 = vsub.f32 %v442_v40, %v33601_v55  ;;  %v661_v57 = vand.u32 4294901760, %v660_v18  ;;  %v391_v18 = vld [vmem:[#allocation2 + $0xa9] sm:$0xff]  ;;  %28456 = vmatmul.mubr.f32.gmra.mrb[10].mxu0 %v33609_v7  ;;  %v33640_v40 = vand.u32 4294901760, %v448_v39  ;;  %v39389_v25 = vand.u32 4294901760, %v33629_v42  ;;  %p33068_p3 = pnand %p33067_p2, %p33061_p13 }
  0x59   : > { %40447 = vst [vmem:[#allocation57_spill] sm:$0xff] %v33609_v7  ;;  %40449 = vst [vmem:[#allocation59_spill] sm:$0xff] %v33616_v50  ;;  %v670_v44 = vsub.f32 %v33593_v61, %v40450_v49  ;;  %v33635_v49 = vsub.f32 %v6183_v33, %v33623_v31  ;;  %v33638_v61 = vsub.f32 %v6186_v51, %v33625_v16  ;;  %v33646_v15 = vand.u32 4294901760, %v451_v58  ;;  %v6135_v54 = vld [vmem:[#allocation2 + $0x128] sm:$0xff] }
  0x5a   : > { %40448 = vst [vmem:[#allocation58_spill] sm:$0xff] %v33614_v62  ;;  %40451 = vst [vmem:[#allocation60_spill] sm:$0xff] %v33623_v31  ;;  %27452 = vmatprep.mubr.f32.mxu1 %v661_v57  ;;  %v40457_v59 = vand.u32 4294901760, %v33614_v62  ;;  %v6189_v57 = vsel %vm223_vm1, %v6126_v47, 0  ;;  %v33651_v33 = vsub.f32 %v448_v39, %v33640_v40  ;;  %v454_v21 = vsel %vm223_vm1, %v391_v18, 0  ;;  %v6129_v31 = vld [vmem:[#allocation2 + $0xe0] sm:$0xff] }
  0x5b   : > { %40452 = vst [vmem:[#allocation61_spill] sm:$0xff] %v33625_v16  ;;  %40453 = vst [vmem:[#allocation62_spill] sm:$0xff] %v33629_v42  ;;  %v671_v22 = vand.u32 4294901760, %v670_v44  ;;  %v392_v44 = vld [vmem:[#allocation2 + $0xb1] sm:$0xff]  ;;  %28458 = vmatprep.mubr.f32.mxu0 %v33635_v49  ;;  %v33653_v51 = vand.u32 4294901760, %v6189_v57  ;;  %v6192_v16 = vsel %vm223_vm1, %v6127_v26, 0  ;;  %v33661_v47 = vsub.f32 %v451_v58, %v33646_v15 }
  0x5c   : > { %40454 = vst [vmem:[#allocation63_spill] sm:$0xff] %v33635_v49  ;;  %40455 = vst [vmem:[#allocation64_spill] sm:$0xff] %v33638_v61  ;;  %v680_v19 = vsub.f32 %v33614_v62, %v40457_v59  ;;  %v690_v62 = vsub.f32 %v33629_v42, %v39389_v25  ;;  %28459 = vmatmul.mubr.f32.gmra.mrb[12].mxu0 %v33638_v61  ;;  %v39402_v39 = vand.u32 4294901760, %v33651_v33  ;;  %v33670_v18 = vand.u32 4294901760, %v454_v21 }
  0x5d   : > { %40456 = vst [vmem:[#allocation65_spill] sm:$0xff] %v33640_v40  ;;  %40458 = vst [vmem:[#allocation66_spill] sm:$0xff] %v33646_v15  ;;  %27453 = vmatmul.mubr.f32.gmra.mrb[8].mxu1 %v671_v22  ;;  %v33663_v22 = vand.u32 4294901760, %v6192_v16  ;;  %v33668_v26 = vsub.f32 %v6189_v57, %v33653_v51  ;;  %v39409_v58 = vand.u32 4294901760, %v33661_v47 }
  0x5e   : > { %40459 = vst [vmem:[#allocation67_spill] sm:$0xff] %v33651_v33  ;;  %40460 = vst [vmem:[#allocation68_spill] sm:$0xff] %v33653_v51  ;;  %v681_v59 = vand.u32 4294901760, %v680_v19  ;;  %v457_v19 = vsel %vm223_vm1, %v392_v44, 0  ;;  %v691_v25 = vand.u32 4294901760, %v690_v62  ;;  %v700_v57 = vsub.f32 %v33651_v33, %v39402_v39  ;;  %v6130_v33 = vld [vmem:[#allocation2 + $0xf0] sm:$0xff] }
  0x5f   : > { %40461 = vst [vmem:[#allocation69_spill] sm:$0xff] %v33661_v47  ;;  %40462 = vst [vmem:[#allocation70_spill] sm:$0xff] %v33663_v22  ;;  %v33675_v42 = vsub.f32 %v6192_v16, %v33663_v22  ;;  %v33677_v60 = vand.u32 4294901760, %v457_v19  ;;  %28461 = vmatprep.mubr.f32.mxu0 %v33668_v26  ;;  %v33684_v51 = vsub.f32 %v454_v21, %v33670_v18  ;;  %v6195_v62 = vsel %vm223_vm1, %v6128_v38, 0 }
  0x60   : > { %40463 = vst [vmem:[#allocation71_spill] sm:$0xff] %v33668_v26  ;;  %40464 = vst [vmem:[#allocation72_spill] sm:$0xff] %v33670_v18  ;;  %27455 = vmatprep.mubr.f32.mxu1 %v681_v59  ;;  %v6198_v44 = vsel %vm223_vm1, %v6129_v31, 0  ;;  %v710_v16 = vsub.f32 %v33661_v47, %v39409_v58  ;;  %v33694_v22 = vand.u32 4294901760, %v6195_v62  ;;  %v701_v52 = vand.u32 4294901760, %v700_v57 }
  0x61   : > { %40465 = vst [vmem:[#allocation73_spill] sm:$0xff] %v33675_v42  ;;  %40466 = vst [vmem:[#allocation74_spill] sm:$0xff] %v33677_v60  ;;  %27456 = vmatmul.mubr.f32.gmra.mrb[10].mxu1 %v691_v25  ;;  %v33692_v59 = vsub.f32 %v457_v19, %v33677_v60  ;;  %v33696_v39 = vand.u32 4294901760, %v6198_v44  ;;  %28462 = vmatmul.mubr.f32.gmra.mrb[14].mxu0 %v33675_v42  ;;  %v39416_v38 = vand.u32 4294901760, %v33684_v51  ;;  %v460_v21 = vsel %vm223_vm1, %v393_v34, 0  ;;  %v6131_v25 = vld [vmem:[#allocation2 + $0xf8] sm:$0xff] }
  0x62   : > { %40467 = vst [vmem:[#allocation75_spill] sm:$0xff] %v33684_v51  ;;  %40469 = vst [vmem:[#allocation77_spill] sm:$0xff] %v33694_v22  ;;  %v463_v31 = vsel %vm223_vm1, %v394_v30, 0  ;;  %v711_v58 = vand.u32 4294901760, %v710_v16  ;;  %v33704_v47 = vsub.f32 %v6195_v62, %v33694_v22  ;;  %27458 = vmatprep.mubr.f32.mxu1 %v701_v52  ;;  %v33712_v48 = vand.u32 4294901760, %v460_v21  ;;  %v396_v16 = vld [vmem:[#allocation2 + $0xe1] sm:$0xff] }
  0x63   : > { %40468 = vst [vmem:[#allocation76_spill] sm:$0xff] %v33692_v59  ;;  %40470 = vst [vmem:[#allocation78_spill] sm:$0xff] %v33696_v39  ;;  %v39421_v19 = vand.u32 4294901760, %v33692_v59  ;;  %v33707_v5 = vsub.f32 %v6198_v44, %v33696_v39  ;;  %v720_v57 = vsub.f32 %v33684_v51, %v39416_v38  ;;  %v33714_v34 = vand.u32 4294901760, %v463_v31  ;;  %v397_v22 = vld [vmem:[#allocation2 + $0xf1] sm:$0xff] }
  0x64   : > { %40471 = vst [vmem:[#allocation79_spill] sm:$0xff] %v33704_v47  ;;  %40473 = vst [vmem:[#allocation81_spill] sm:$0xff] %v33712_v48  ;;  %v6201_v30 = vsel %vm223_vm1, %v6130_v33, 0  ;;  %28464 = vmatprep.mubr.f32.mxu0 %v33704_v47  ;;  %v6204_v52 = vsel %vm223_vm1, %v6131_v25, 0  ;;  %v466_v38 = vsel %vm223_vm1, %v395_v0, 0  ;;  %v33727_v39 = vsub.f32 %v460_v21, %v33712_v48  ;;  %v400_v48 = vld [vmem:[#allocation2 + $0x111] sm:$0xff] }
  0x65   : > { %40472 = vst [vmem:[#allocation80_spill] sm:$0xff] %v33707_v5  ;;  %40474 = vst [vmem:[#allocation82_spill] sm:$0xff] %v33714_v34  ;;  %27459 = vmatmul.mubr.f32.gmra.mrb[12].mxu1 %v711_v58  ;;  %v730_v62 = vsub.f32 %v33692_v59, %v39421_v19  ;;  %v33721_v44 = vand.u32 4294901760, %v6201_v30  ;;  %v721_v51 = vand.u32 4294901760, %v720_v57  ;;  %28465 = vmatmul.mubr.f32.gmra.mrb[16].mxu0 %v33707_v5  ;;  %v33732_v58 = vand.u32 4294901760, %v6204_v52  ;;  %v6132_v19 = vld [vmem:[#allocation2 + $0x108] sm:$0xff] }
  0x66   : > { %40476 = vst [vmem:[#allocation84_spill] sm:$0xff] %v33727_v39  ;;  %v33730_v33 = vsub.f32 %v463_v31, %v33714_v34  ;;  %v6133_v59 = vld [vmem:[#allocation2 + $0x110] sm:$0xff]  ;;  %v33737_v25 = vand.u32 4294901760, %v466_v38  ;;  %v469_v0 = vsel %vm223_vm1, %v396_v16, 0  ;;  %v39438_v21 = vand.u32 4294901760, %v33727_v39 }
  0x67   : > { %40475 = vst [vmem:[#allocation83_spill] sm:$0xff] %v33721_v44  ;;  %40478 = vst [vmem:[#allocation86_spill] sm:$0xff] %v33732_v58  ;;  %v731_v27 = vand.u32 4294901760, %v730_v62  ;;  %v33735_v23 = vsub.f32 %v6201_v30, %v33721_v44  ;;  %27461 = vmatprep.mubr.f32.mxu1 %v721_v51  ;;  %v33743_v31 = vsub.f32 %v6204_v52, %v33732_v58  ;;  %v33745_v11 = vand.u32 4294901760, %v469_v0 }
  0x68   : > { %40477 = vst [vmem:[#allocation85_spill] sm:$0xff] %v33730_v33  ;;  %40480 = vst [vmem:[#allocation88_spill] sm:$0xff] %v33737_v25  ;;  %v39445_v57 = vand.u32 4294901760, %v33730_v33  ;;  %v33749_v30 = vsub.f32 %v466_v38, %v33737_v25  ;;  %v6207_v62 = vsel %vm223_vm1, %v6132_v19, 0  ;;  %v6210_v51 = vsel %vm223_vm1, %v6133_v59, 0  ;;  %v399_v19 = vld [vmem:[#allocation2 + $0x109] sm:$0xff] }
  0x69   : > { %40479 = vst [vmem:[#allocation87_spill] sm:$0xff] %v33735_v23  ;;  %40481 = vst [vmem:[#allocation89_spill] sm:$0xff] %v33743_v31  ;;  %27462 = vmatmul.mubr.f32.gmra.mrb[14].mxu1 %v731_v27  ;;  %28467 = vmatprep.mubr.f32.mxu0 %v33735_v23  ;;  %v472_v16 = vsel %vm223_vm1, %v397_v22, 0  ;;  %v740_v52 = vsub.f32 %v33727_v39, %v39438_v21  ;;  %v33762_v27 = vsub.f32 %v469_v0, %v33745_v11  ;;  %v6134_v39 = vld [vmem:[#allocation2 + $0x120] sm:$0xff] }
  0x6a   : > { %40482 = vst [vmem:[#allocation90_spill] sm:$0xff] %v33745_v11  ;;  %40483 = vst [vmem:[#allocation91_spill] sm:$0xff] %v33749_v30  ;;  %v750_v58 = vsub.f32 %v33730_v33, %v39445_v57  ;;  %28468 = vmatmul.mubr.f32.gmra.mrb[18].mxu0 %v33743_v31  ;;  %v33764_v38 = vand.u32 4294901760, %v6207_v62  ;;  %v39456_v59 = vand.u32 4294901760, %v33749_v30  ;;  %v33767_v44 = vand.u32 4294901760, %v6210_v51 }
  0x6b   : > { %40484 = vst [vmem:[#allocation92_spill] sm:$0xff] %v33762_v27  ;;  %v33769_v22 = vand.u32 4294901760, %v472_v16  ;;  %v475_v21 = vsel %vm223_vm1, %v398_v56, 0  ;;  %v741_v53 = vand.u32 4294901760, %v740_v52  ;;  %v39459_v33 = vand.u32 4294901760, %v33762_v27 }
  0x6c   : > { %40485 = vst [vmem:[#allocation93_spill] sm:$0xff] %v33764_v38  ;;  %40486 = vst [vmem:[#allocation94_spill] sm:$0xff] %v33767_v44  ;;  %v751_v57 = vand.u32 4294901760, %v750_v58  ;;  %v33774_v0 = vsub.f32 %v6207_v62, %v33764_v38  ;;  %v760_v11 = vsub.f32 %v33749_v30, %v39456_v59  ;;  %v33780_v25 = vsub.f32 %v6210_v51, %v33767_v44  ;;  %v402_v38 = vld [vmem:[#allocation2 + $0x129] sm:$0xff] }
  0x6d   : > { %40487 = vst [vmem:[#allocation95_spill] sm:$0xff] %v33769_v22  ;;  %v33783_v34 = vsub.f32 %v472_v16, %v33769_v22  ;;  %v33785_v56 = vand.u32 4294901760, %v475_v21  ;;  %27464 = vmatprep.mubr.f32.mxu1 %v741_v53  ;;  %v770_v58 = vsub.f32 %v33762_v27, %v39459_v33  ;;  %v6213_v62 = vsel %vm223_vm1, %v6134_v39, 0  ;;  %v401_v33 = vld [vmem:[#allocation2 + $0x121] sm:$0xff] }
  0x6e   : > { %40488 = vst [vmem:[#allocation96_spill] sm:$0xff] %v33774_v0  ;;  %40489 = vst [vmem:[#allocation97_spill] sm:$0xff] %v33780_v25  ;;  %28470 = vmatprep.mubr.f32.mxu0 %v33774_v0  ;;  %v6216_v52 = vsel %vm223_vm1, %v6135_v54, 0  ;;  %v478_v51 = vsel %vm223_vm1, %v399_v19, 0  ;;  %27465 = vmatmul.mubr.f32.gmra.mrb[16].mxu1 %v751_v57  ;;  %v761_v59 = vand.u32 4294901760, %v760_v11  ;;  %v33799_v30 = vand.u32 4294901760, %v6213_v62 }
  0x6f   : > { %40490 = vst [vmem:[#allocation98_spill] sm:$0xff] %v33783_v34  ;;  %40491 = vst [vmem:[#allocation99_spill] sm:$0xff] %v33785_v56  ;;  %28471 = vmatmul.mubr.f32.gmra.mrb[20].mxu0 %v33780_v25  ;;  %v39468_v16 = vand.u32 4294901760, %v33783_v34  ;;  %v33797_v53 = vsub.f32 %v475_v21, %v33785_v56  ;;  %v771_v27 = vand.u32 4294901760, %v770_v58  ;;  %v33801_v44 = vand.u32 4294901760, %v6216_v52 }
  0x70   : > { %40493 = vst [vmem:[#allocation101_spill] sm:$0xff] %v33799_v30  ;;  %v33803_v39 = vand.u32 4294901760, %v478_v51  ;;  %v481_v54 = vsel %vm223_vm1, %v400_v48, 0  ;;  %27467 = vmatprep.mubr.f32.mxu1 %v761_v59  ;;  %v33811_v21 = vsub.f32 %v6213_v62, %v33799_v30  ;;  %v484_v59 = vsel %vm223_vm1, %v401_v33, 0 }
  0x71   : > { %40492 = vst [vmem:[#allocation100_spill] sm:$0xff] %v33797_v53  ;;  %40494 = vst [vmem:[#allocation102_spill] sm:$0xff] %v33801_v44  ;;  %v780_v11 = vsub.f32 %v33783_v34, %v39468_v16  ;;  %v39473_v57 = vand.u32 4294901760, %v33797_v53  ;;  %v33813_v19 = vand.u32 4294901760, %v481_v54  ;;  %v33816_v58 = vsub.f32 %v6216_v52, %v33801_v44  ;;  %v403_v44 = vld [vmem:[#allocation2 + $0x139] sm:$0xff] }
  0x72   : > { %40495 = vst [vmem:[#allocation103_spill] sm:$0xff] %v33803_v39  ;;  %40496 = vst [vmem:[#allocation104_spill] sm:$0xff] %v33811_v21  ;;  %v33819_v56 = vsub.f32 %v478_v51, %v33803_v39  ;;  %27468 = vmatmul.mubr.f32.gmra.mrb[18].mxu1 %v771_v27  ;;  %28473 = vmatprep.mubr.f32.mxu0 %v33811_v21  ;;  %v33830_v52 = vand.u32 4294901760, %v484_v59  ;;  %v404_v51 = vld [vmem:[#allocation2 + $0x141] sm:$0xff]  ;;  %v487_v33 = vsel %vm223_vm1, %v402_v38, 0  ;;  %v40506_v38 = vand.u32 4294901760, %v33435_v3 }
  0x73   : > { %40497 = vst [vmem:[#allocation105_spill] sm:$0xff] %v33813_v19  ;;  %40498 = vst [vmem:[#allocation106_spill] sm:$0xff] %v33816_v58  ;;  %v781_v16 = vand.u32 4294901760, %v780_v11  ;;  %v790_v62 = vsub.f32 %v33797_v53, %v39473_v57  ;;  %v33828_v34 = vsub.f32 %v481_v54, %v33813_v19  ;;  %28474 = vmatmul.mubr.f32.gmra.mrb[22].mxu0 %v33816_v58  ;;  %v40501_v53 = vand.u32 4294901760, %v33432_v1  ;;  %v405_v19 = vld [vmem:[#allocation2 + $0x151] sm:$0xff] }
  0x74   : > { %40499 = vst [vmem:[#allocation107_spill] sm:$0xff] %v33819_v56  ;;  %40500 = vst [vmem:[#allocation108_spill] sm:$0xff] %v33830_v52  ;;  %v39486_v48 = vand.u32 4294901760, %v33819_v56  ;;  %v33840_v54 = vsub.f32 %v484_v59, %v33830_v52  ;;  %v33842_v30 = vand.u32 4294901760, %v487_v33  ;;  %v406_v52 = vld [vmem:[#allocation2 + $0x159] sm:$0xff] }
  0x75   : > { %27470 = vmatprep.mubr.f32.mxu1 %v781_v16  ;;  %v791_v11 = vand.u32 4294901760, %v790_v62  ;;  %v39489_v57 = vand.u32 4294901760, %v33828_v34  ;;  %28490 = vmatprep.mubr.f32.mxu0 %v40501_v53  ;;  %v490_v16 = vsel %vm223_vm1, %v403_v44, 0  ;;  %v493_v62 = vsel %vm223_vm1, %v404_v51, 0 }
  0x76   : > { %40502 = vst [vmem:[#allocation109_spill] sm:$0xff] %v33840_v54  ;;  %40503 = vst [vmem:[#allocation110_spill] sm:$0xff] %v33842_v30  ;;  %v800_v39 = vsub.f32 %v33819_v56, %v39486_v48  ;;  %v39491_v59 = vand.u32 4294901760, %v33840_v54  ;;  %v33855_v27 = vsub.f32 %v487_v33, %v33842_v30  ;;  %v33857_v1 = vand.u32 4294901760, %v490_v16 }
  0x77   : > { %27471 = vmatmul.mubr.f32.gmra.mrb[20].mxu1 %v791_v11  ;;  %v810_v53 = vsub.f32 %v33828_v34, %v39489_v57  ;;  %28491 = vmatmul.mubr.f32.vlgmr.msra.gmra.mrb[0].mxu0 %v40506_v38  ;;  %v33861_v44 = vand.u32 4294901760, %v493_v62  ;;  %v496_v11 = vsel %vm223_vm1, %v405_v19, 0  ;;  %v407_v38 = vld [vmem:[#allocation2 + $0x169] sm:$0xff] }
  0x78   : > { %40504 = vst [vmem:[#allocation111_spill] sm:$0xff] %v33855_v27  ;;  %40505 = vst [vmem:[#allocation112_spill] sm:$0xff] %v33857_v1  ;;  %v801_v48 = vand.u32 4294901760, %v800_v39  ;;  %28539 = vmatpush3.msra.mxu0 %v33410_v46  ;;  %v820_v33 = vsub.f32 %v33840_v54, %v39491_v59  ;;  %v39496_v57 = vand.u32 4294901760, %v33855_v27  ;;  %v40508_v39 = vand.u32 4294901760, %v33438_v9 }
  0x79   : > { %40507 = vst [vmem:[#allocation113_spill] sm:$0xff] %v33861_v44  ;;  %v811_v56 = vand.u32 4294901760, %v810_v53  ;;  %v33873_v3 = vsub.f32 %v490_v16, %v33857_v1  ;;  %v33876_v51 = vsub.f32 %v493_v62, %v33861_v44  ;;  %v33879_v53 = vand.u32 4294901760, %v496_v11  ;;  %28588 = vmatprep.subr.mxu0 %v33284_v4  ;;  %v408_v62 = vld [vmem:[#allocation2 + $0x171] sm:$0xff] }
  0x7a   : > { %28493 = vmatprep.mubr.f32.mxu0 %v40508_v39  ;;  %27473 = vmatprep.mubr.f32.mxu1 %v801_v48  ;;  %v499_v46 = vsel %vm223_vm1, %v406_v52, 0  ;;  %v821_v59 = vand.u32 4294901760, %v820_v33  ;;  %v830_v16 = vsub.f32 %v33855_v27, %v39496_v57  ;;  %v40512_v9 = vand.u32 4294901760, %v33453_v20 }
  0x7b   : > { %40509 = vst [vmem:[#allocation114_spill] sm:$0xff] %v33876_v51  ;;  %40510 = vst [vmem:[#allocation115_spill] sm:$0xff] %v33879_v53  ;;  %27474 = vmatmul.mubr.f32.gmra.mrb[22].mxu1 %v811_v56  ;;  %v39499_v39 = vand.u32 4294901760, %v33873_v3  ;;  %v33887_v48 = vand.u32 4294901760, %v499_v46  ;;  %v33893_v52 = vsub.f32 %v496_v11, %v33879_v53  ;;  %v502_v33 = vsel %vm223_vm1, %v407_v38, 0 }
  0x7c   : > { %28494 = vmatmul.mubr.f32.gmra.mrb[2].mxu0 %v40512_v9  ;;  %27476 = vmatprep.mubr.f32.mxu1 %v821_v59  ;;  %v831_v54 = vand.u32 4294901760, %v830_v16  ;;  %v40513_v27 = vand.u32 4294901760, %v33478_v35  ;;  %v33905_v19 = vand.u32 4294901760, %v502_v33  ;;  %v40515_v11 = vand.u32 4294901760, %v33876_v51 }
  0x7d   : > { %40511 = vst [vmem:[#allocation116_spill] sm:$0xff] %v33887_v48  ;;  %v840_v57 = vsub.f32 %v33873_v3, %v39499_v39  ;;  %v33903_v9 = vsub.f32 %v499_v46, %v33887_v48  ;;  %v39506_v38 = vand.u32 4294901760, %v33893_v52  ;;  %v505_v59 = vsel %vm223_vm1, %v408_v62, 0 }
  0x7e   : > { %28496 = vmatprep.mubr.f32.mxu0 %v40513_v27  ;;  %40514 = vst [vmem:[#allocation117_spill] sm:$0xff] %v33905_v19  ;;  %v850_v56 = vsub.f32 %v33876_v51, %v40515_v11  ;;  %v33914_v35 = vsub.f32 %v502_v33, %v33905_v19  ;;  %v33916_v27 = vand.u32 4294901760, %v505_v59  ;;  %v40517_v20 = vand.u32 4294901760, %v33485_v41  ;;  %v40560_v41 = vld [vmem:[#allocation60_spill] sm:$0xff] }
  0x7f   : > { %27477 = vmatmul.mubr.f32.gmra.mrb[24].mxu1 %v831_v54  ;;  %v841_v16 = vand.u32 4294901760, %v840_v57  ;;  %v39507_v39 = vand.u32 4294901760, %v33903_v9  ;;  %v860_v11 = vsub.f32 %v33893_v52, %v39506_v38  ;;  %v40518_v54 = vand.u32 4294901760, %v33511_v63 }
  0x80   : > { %40516 = vst [vmem:[#allocation118_spill] sm:$0xff] %v33916_v27  ;;  %v851_v46 = vand.u32 4294901760, %v850_v56  ;;  %28497 = vmatmul.mubr.f32.gmra.mrb[4].mxu0 %v40517_v20  ;;  %v39522_v62 = vand.u32 4294901760, %v33914_v35  ;;  %v33931_v56 = vsub.f32 %v505_v59, %v33916_v27  ;;  %v39518_v20 = vand.u32 4294901760, %v33563_v43  ;;  %v40558_v43 = vld [vmem:[#allocation14_spill] sm:$0xff] }
  0x81   : > { %27479 = vmatprep.mubr.f32.mxu1 %v841_v16  ;;  %v870_v57 = vsub.f32 %v33903_v9, %v39507_v39  ;;  %28499 = vmatprep.mubr.f32.mxu0 %v40518_v54  ;;  %v861_v33 = vand.u32 4294901760, %v860_v11  ;;  %v40519_v39 = vand.u32 4294901760, %v33533_v45  ;;  %v39517_v54 = vand.u32 4294901760, %v33566_v32  ;;  %v40557_v32 = vld [vmem:[#allocation52_spill] sm:$0xff]  ;;  %v40559_v45 = vld [vmem:[#allocation54_spill] sm:$0xff] }
  0x82   : > { %v880_v16 = vsub.f32 %v33914_v35, %v39522_v62  ;;  %v39521_v51 = vand.u32 4294901760, %v33931_v56 }
  0x83   : > { %27480 = vmatmul.mubr.f32.gmra.mrb[26].mxu1 %v851_v46  ;;  %v871_v38 = vand.u32 4294901760, %v870_v57  ;;  %v39516_v46 = vand.u32 4294901760, %v33599_v37  ;;  %v39512_v57 = vand.u32 4294901760, %v33635_v49  ;;  %v40554_v49 = vld [vmem:[#allocation39_spill] sm:$0xff]  ;;  %v40556_v37 = vld [vmem:[#allocation46_spill] sm:$0xff] }
  0x84   : > { %27482 = vmatprep.mubr.f32.mxu1 %v861_v33  ;;  %28500 = vmatmul.mubr.f32.gmra.mrb[6].mxu0 %v40519_v39  ;;  %v881_v63 = vand.u32 4294901760, %v880_v16  ;;  %v890_v59 = vsub.f32 %v33931_v56, %v39521_v51  ;;  %v39515_v39 = vand.u32 4294901760, %v33609_v7  ;;  %v39513_v33 = vand.u32 4294901760, %v33675_v42  ;;  %v40546_v42 = vld [vmem:[#allocation18_spill] sm:$0xff]  ;;  %v40555_v7 = vld [vmem:[#allocation45_spill] sm:$0xff] }
  0x85   : > { %28502 = vmatprep.mubr.f32.mxu0 %v39518_v20  ;;  %v39514_v16 = vand.u32 4294901760, %v33704_v47  ;;  %v6140_v20 = vld [vmem:[#allocation2 + $0x168] sm:$0xff] }
  0x86   : > { %v891_v11 = vand.u32 4294901760, %v890_v59  ;;  %v6136_v59 = vld [vmem:[#allocation2 + $0x138] sm:$0xff] }
  0x87   : > { %27483 = vmatmul.mubr.f32.gmra.mrb[28].mxu1 %v871_v38  ;;  %v39511_v38 = vand.u32 4294901760, %v33638_v61  ;;  %v40553_v61 = vld [vmem:[#allocation37_spill] sm:$0xff] }
  0x88   : > { %27485 = vmatprep.mubr.f32.mxu1 %v881_v63  ;;  %28503 = vmatmul.mubr.f32.gmra.mrb[8].mxu0 %v39517_v54  ;;  %v39510_v63 = vand.u32 4294901760, %v33668_v26  ;;  %v6139_v54 = vld [vmem:[#allocation2 + $0x158] sm:$0xff] }
  0x89   : > { %28505 = vmatprep.mubr.f32.mxu0 %v39516_v46  ;;  %v6228_v62 = vsel %vm223_vm1, %v6139_v54, 0  ;;  %v40526_v54 = vand.u32 4294901760, %v33811_v21  ;;  %v40552_v26 = vld [vmem:[#allocation30_spill] sm:$0xff] }
  0x8b   : > { %27486 = vmatmul.mubr.f32.gmra.mrb[30].mxu1 %v891_v11  ;;  %v39519_v11 = vand.u32 4294901760, %v33707_v5 }
  0x8c   : > { %27490 = vmatprep.mubr.f32.mxu1 %v33368_v24  ;;  %28506 = vmatmul.mubr.f32.gmra.mrb[10].mxu0 %v39515_v39  ;;  %v40592_v24 = vld [vmem:[#allocation92_spill] sm:$0xff] }
  0x8d   : > { %28508 = vmatprep.mubr.f32.mxu0 %v39512_v57  ;;  %v6138_v57 = vld [vmem:[#allocation2 + $0x150] sm:$0xff] }
  0x8e   : > { %v6225_v46 = vsel %vm223_vm1, %v6138_v57, 0 }
  0x8f   : > { %27491 = vmatmul.mubr.f32.vlgmr.msra.gmra.mrb[0].mxu1 %v33376_v29  ;;  %v34004_v51 = vand.u32 4294901760, %v6225_v46  ;;  %v40591_v29 = vld [vmem:[#allocation91_spill] sm:$0xff] }
  0x90   : > { %27493 = vmatprep.mubr.f32.mxu1 %v33442_v12  ;;  %28509 = vmatmul.mubr.f32.gmra.mrb[12].mxu0 %v39511_v38  ;;  %v6219_v38 = vsel %vm223_vm1, %v6136_v59, 0  ;;  %v40590_v12 = vld [vmem:[#allocation85_spill] sm:$0xff] }
  0x91   : > { %28511 = vmatprep.mubr.f32.mxu0 %v39510_v63  ;;  %27539 = vmatpush3.msra.mxu1 %v33338_v8  ;;  %v39520_v63 = vand.u32 4294901760, %v33735_v23  ;;  %v6137_v8 = vld [vmem:[#allocation2 + $0x140] sm:$0xff]  ;;  %v33987_v39 = vand.u32 4294901760, %v6219_v38  ;;  %40523 = vst [vmem:[#allocation122_spill] sm:$0xff] %v34004_v51  ;;  %v6231_v23 = vsel %vm223_vm1, %v6140_v20, 0 }
  0x92   : > { %27588 = vmatprep.subr.mxu1 %v33326_v6  ;;  %v6222_v59 = vsel %vm223_vm1, %v6137_v8, 0  ;;  %v34016_v8 = vand.u32 4294901760, %v6228_v62  ;;  %v34024_v5 = vand.u32 4294901760, %v6231_v23 }
  0x93   : > { %27494 = vmatmul.mubr.f32.gmra.mrb[2].mxu1 %v33444_v13  ;;  %40520 = vst [vmem:[#allocation119_spill] sm:$0xff] %v33987_v39  ;;  %v34002_v57 = vsub.f32 %v6219_v38, %v33987_v39 }
  0x94   : > { %27496 = vmatprep.mubr.f32.mxu1 %v33472_v28  ;;  %28512 = vmatmul.mubr.f32.gmra.mrb[14].mxu0 %v39513_v33  ;;  %v39527_v33 = vand.u32 4294901760, %v33743_v31  ;;  %v6141_v31 = vld [vmem:[#allocation2 + $0x170] sm:$0xff]  ;;  %40525 = vst [vmem:[#allocation124_spill] sm:$0xff] %v34016_v8  ;;  %40528 = vst [vmem:[#allocation126_spill] sm:$0xff] %v34024_v5  ;;  %v34034_v20 = vsub.f32 %v6228_v62, %v34016_v8  ;;  %v40588_v28 = vld [vmem:[#allocation84_spill] sm:$0xff] }
  0x95   : > { %28514 = vmatprep.mubr.f32.mxu0 %v39514_v16  ;;  %v39528_v16 = vand.u32 4294901760, %v33774_v0  ;;  %40522 = vst [vmem:[#allocation121_spill] sm:$0xff] %v34002_v57  ;;  %v34022_v0 = vsub.f32 %v6225_v46, %v34004_v51  ;;  %v40532_v21 = vand.u32 4294901760, %v34002_v57  ;;  %v40538_v57 = vld [vmem:[#allocation81_spill] sm:$0xff] }
  0x96   : > { %40530 = vst [vmem:[#allocation127_spill] sm:$0xff] %v34034_v20  ;;  %v39550_v62 = vand.u32 4294901760, %v34034_v20 }
  0x97   : > { %27497 = vmatmul.mubr.f32.gmra.mrb[4].mxu1 %v33480_v36  ;;  %40527 = vst [vmem:[#allocation125_spill] sm:$0xff] %v34022_v0  ;;  %v40587_v36 = vld [vmem:[#allocation76_spill] sm:$0xff] }
  0x98   : > { %27499 = vmatprep.mubr.f32.mxu1 %v33518_v10  ;;  %28515 = vmatmul.mubr.f32.gmra.mrb[16].mxu0 %v39519_v11  ;;  %v39535_v11 = vand.u32 4294901760, %v33780_v25  ;;  %v6234_v25 = vsel %vm223_vm1, %v6141_v31, 0  ;;  %v39545_v31 = vand.u32 4294901760, %v34022_v0  ;;  %v40540_v0 = vld [vmem:[#allocation82_spill] sm:$0xff] }
  0x99   : > { %28517 = vmatprep.mubr.f32.mxu0 %v39520_v63  ;;  %v33996_v63 = vand.u32 4294901760, %v6222_v59  ;;  %v34036_v46 = vand.u32 4294901760, %v6234_v25 }
  0x9b   : > { %27500 = vmatmul.mubr.f32.gmra.mrb[6].mxu1 %v33520_v14  ;;  %40521 = vst [vmem:[#allocation120_spill] sm:$0xff] %v33996_v63  ;;  %v34014_v38 = vsub.f32 %v6222_v59, %v33996_v63  ;;  %v40529_v59 = vand.u32 4294901760, %v33816_v58  ;;  %40531 = vst [vmem:[#allocation128_spill] sm:$0xff] %v34036_v46  ;;  %v40586_v14 = vld [vmem:[#allocation75_spill] sm:$0xff] }
  0x9c   : > { %27502 = vmatprep.mubr.f32.mxu1 %v33548_v2  ;;  %28518 = vmatmul.mubr.f32.gmra.mrb[18].mxu0 %v39527_v33  ;;  %v6142_v33 = vld [vmem:[#allocation2 + $0x180] sm:$0xff]  ;;  %v40585_v2 = vld [vmem:[#allocation69_spill] sm:$0xff] }
  0x9d   : > { %28520 = vmatprep.mubr.f32.mxu0 %v39528_v16  ;;  %40524 = vst [vmem:[#allocation123_spill] sm:$0xff] %v34014_v38  ;;  %v6143_v16 = vld [vmem:[#allocation2 + $0x188] sm:$0xff] }
  0x9e   : > { %v6240_v58 = vsel %vm223_vm1, %v6143_v16, 0 }
  0x9f   : > { %27503 = vmatmul.mubr.f32.gmra.mrb[8].mxu1 %v33571_v17  ;;  %v40584_v17 = vld [vmem:[#allocation102_spill] sm:$0xff] }
  0xa0   : > { %27505 = vmatprep.mubr.f32.mxu1 %v33601_v55  ;;  %28521 = vmatmul.mubr.f32.gmra.mrb[20].mxu0 %v39535_v11  ;;  %v6237_v11 = vsel %vm223_vm1, %v6142_v33, 0  ;;  %v34042_v33 = vsub.f32 %v6231_v23, %v34024_v5  ;;  %v40583_v55 = vld [vmem:[#allocation67_spill] sm:$0xff] }
  0xa1   : > { %28523 = vmatprep.mubr.f32.mxu0 %v40526_v54  ;;  %v39544_v54 = vand.u32 4294901760, %v34014_v38  ;;  %v34044_v47 = vand.u32 4294901760, %v6237_v11  ;;  %v40545_v38 = vld [vmem:[#allocation103_spill] sm:$0xff] }
  0xa2   : > { %40533 = vst [vmem:[#allocation129_spill] sm:$0xff] %v34042_v33  ;;  %v39551_v23 = vand.u32 4294901760, %v34042_v33  ;;  %v40544_v33 = vld [vmem:[#allocation99_spill] sm:$0xff] }
  0xa3   : > { %27506 = vmatmul.mubr.f32.gmra.mrb[10].mxu1 %v33616_v50  ;;  %40534 = vst [vmem:[#allocation130_spill] sm:$0xff] %v34044_v47  ;;  %v34061_v16 = vsub.f32 %v6237_v11, %v34044_v47  ;;  %v40541_v11 = vld [vmem:[#allocation88_spill] sm:$0xff]  ;;  %v40582_v50 = vld [vmem:[#allocation62_spill] sm:$0xff] }
  0xa4   : > { %27508 = vmatprep.mubr.f32.mxu1 %v33640_v40  ;;  %28524 = vmatmul.mubr.f32.gmra.mrb[22].mxu0 %v40529_v59  ;;  %v34055_v59 = vand.u32 4294901760, %v6240_v58  ;;  %v40581_v40 = vld [vmem:[#allocation101_spill] sm:$0xff] }
  0xa5   : > { %28526 = vmatprep.mubr.f32.mxu0 %v40532_v21  ;;  %v34053_v21 = vsub.f32 %v6234_v25, %v34036_v46  ;;  %40537 = vst [vmem:[#allocation133_spill] sm:$0xff] %v34061_v16 }
  0xa6   : > { %40536 = vst [vmem:[#allocation132_spill] sm:$0xff] %v34055_v59 }
  0xa7   : > { %27509 = vmatmul.mubr.f32.gmra.mrb[12].mxu1 %v33646_v15  ;;  %40535 = vst [vmem:[#allocation131_spill] sm:$0xff] %v34053_v21  ;;  %v39554_v25 = vand.u32 4294901760, %v34053_v21  ;;  %v40543_v21 = vld [vmem:[#allocation17_spill] sm:$0xff]  ;;  %v40580_v15 = vld [vmem:[#allocation94_spill] sm:$0xff] }
  0xa8   : > { %27511 = vmatprep.mubr.f32.mxu1 %v33670_v18  ;;  %28527 = vmatmul.mubr.f32.gmra.mrb[24].mxu0 %v39544_v54  ;;  %v34069_v54 = vsub.f32 %v6240_v58, %v34055_v59  ;;  %v40542_v58 = vld [vmem:[#allocation90_spill] sm:$0xff] }
  0xa9   : > { %28529 = vmatprep.mubr.f32.mxu0 %v39545_v31  ;;  %v39561_v31 = vand.u32 4294901760, %v34061_v16  ;;  %v40551_v16 = vld [vmem:[#allocation28_spill] sm:$0xff]  ;;  %v40579_v18 = vld [vmem:[#allocation58_spill] sm:$0xff] }
  0xaa   : > { %40539 = vst [vmem:[#allocation134_spill] sm:$0xff] %v34069_v54  ;;  %v39564_v20 = vand.u32 4294901760, %v34069_v54  ;;  %v40549_v54 = vld [vmem:[#allocation108_spill] sm:$0xff] }
  0xab   : > { %27512 = vmatmul.mubr.f32.gmra.mrb[14].mxu1 %v33677_v60  ;;  %v40578_v60 = vld [vmem:[#allocation53_spill] sm:$0xff] }
  0xac   : > { %27514 = vmatprep.mubr.f32.mxu1 %v40538_v57  ;;  %28530 = vmatmul.mubr.f32.gmra.mrb[26].mxu0 %v39550_v62  ;;  %v25148_v62 = vld [vmem:[%s39344_s1 + $0x10] sm:$0xf] }
  0xad   : > { %28532 = vmatprep.mubr.f32.mxu0 %v39551_v23  ;;  %v8187_v23 = vsel %vm507_vm0, %v25148_v62, 0  ;;  %v40548_v62 = vld [vmem:[#allocation105_spill] sm:$0xff] }
  0xae   : > { %v40577_v57 = vld [vmem:[#allocation93_spill] sm:$0xff] }
  0xaf   : > { %27515 = vmatmul.mubr.f32.gmra.mrb[16].mxu1 %v40540_v0  ;;  %v40576_v0 = vld [vmem:[#allocation86_spill] sm:$0xff] }
  0xb0   : > { %27517 = vmatprep.mubr.f32.mxu1 %v40541_v11  ;;  %28533 = vmatmul.mubr.f32.gmra.mrb[28].mxu0 %v39554_v25  ;;  %v34090_v25 = vand.u32 4294901760, %v8187_v23  ;;  %v40575_v11 = vld [vmem:[#allocation50_spill] sm:$0xff] }
  0xb1   : > { %28535 = vmatprep.mubr.f32.mxu0 %v39561_v31  ;;  %v40547_v31 = vld [vmem:[#allocation19_spill] sm:$0xff] }
  0xb2   : > { %v34149_v10 = vsub.f32 %v8187_v23, %v34090_v25 }
  0xb3   : > { %27518 = vmatmul.mubr.f32.gmra.mrb[18].mxu1 %v40542_v58  ;;  %v40574_v58 = vld [vmem:[#allocation44_spill] sm:$0xff] }
  0xb4   : > { %27520 = vmatprep.mubr.f32.mxu1 %v33769_v22  ;;  %28536 = vmatmul.mubr.f32.gmra.mrb[30].mxu0 %v39564_v20  ;;  %v40550_v20 = vld [vmem:[#allocation22_spill] sm:$0xff]  ;;  %v40573_v22 = vld [vmem:[#allocation83_spill] sm:$0xff]  ;;  %v34156_v13 = vand.u32 4294901760, %v34149_v10 }
  0xb5   : > { %28540 = vmatprep.mubr.f32.mxu0 %v40543_v21 }
  0xb6   : > { %40589 = vst [vmem:[#allocation14_spill] sm:$0xff] %v34156_v13  ;;  %v8579_v23 = vsub.f32 %v34149_v10, %v34156_v13  ;;  %v40596_v13 = vld [vmem:[#allocation109_spill] sm:$0xff] }
  0xb7   : > { %27521 = vmatmul.mubr.f32.gmra.mrb[20].mxu1 %v40544_v33  ;;  %v40572_v33 = vld [vmem:[#allocation78_spill] sm:$0xff] }
  0xb8   : > { %27523 = vmatprep.mubr.f32.mxu1 %v40545_v38  ;;  %28541 = vmatmul.mubr.f32.vlgmr.msra.gmra.mrb[0].mxu0 %v40546_v42  ;;  %v40571_v38 = vld [vmem:[#allocation43_spill] sm:$0xff] }
  0xb9   : > { %28589 = vmatpush3.msra.mxu0 %v33284_v4  ;;  %28543 = vmatprep.mubr.f32.mxu0 %v40547_v31  ;;  %v40561_v4 = vld [vmem:[#allocation15_spill] sm:$0xff] }
  0xba   : > { %28638 = vmatprep.subr.mxu0 %v34090_v25 }
  0xbb   : > { %27524 = vmatmul.mubr.f32.gmra.mrb[22].mxu1 %v40548_v62  ;;  %v40570_v62 = vld [vmem:[#allocation36_spill] sm:$0xff] }
  0xbc   : > { %27526 = vmatprep.mubr.f32.mxu1 %v40549_v54  ;;  %28544 = vmatmul.mubr.f32.gmra.mrb[2].mxu0 %v40550_v20  ;;  %v40569_v54 = vld [vmem:[#allocation77_spill] sm:$0xff] }
  0xbd   : > { %28546 = vmatprep.mubr.f32.mxu0 %v40551_v16 }
  0xbf   : > { %27527 = vmatmul.mubr.f32.gmra.mrb[24].mxu1 %v33842_v30  ;;  %v40568_v30 = vld [vmem:[#allocation70_spill] sm:$0xff] }
  0xc0   : > { %27529 = vmatprep.mubr.f32.mxu1 %v33857_v1  ;;  %28547 = vmatmul.mubr.f32.gmra.mrb[4].mxu0 %v40552_v26  ;;  %v40566_v1 = vld [vmem:[#allocation27_spill] sm:$0xff] }
  0xc1   : > { %28549 = vmatprep.mubr.f32.mxu0 %v40553_v61 }
  0xc3   : > { %27530 = vmatmul.mubr.f32.gmra.mrb[26].mxu1 %v33861_v44  ;;  %v40563_v44 = vld [vmem:[#allocation61_spill] sm:$0xff] }
  0xc4   : > { %27532 = vmatprep.mubr.f32.mxu1 %v33879_v53  ;;  %28550 = vmatmul.mubr.f32.gmra.mrb[6].mxu0 %v40554_v49  ;;  %v40562_v53 = vld [vmem:[#allocation26_spill] sm:$0xff] }
  0xc5   : > { %28552 = vmatprep.mubr.f32.mxu0 %v40555_v7 }
  0xc7   : > { %27533 = vmatmul.mubr.f32.gmra.mrb[28].mxu1 %v33887_v48  ;;  %v40564_v48 = vld [vmem:[#allocation68_spill] sm:$0xff] }
  0xc8   : > { %27535 = vmatprep.mubr.f32.mxu1 %v33905_v19  ;;  %28553 = vmatmul.mubr.f32.gmra.mrb[8].mxu0 %v40556_v37  ;;  %v40565_v19 = vld [vmem:[#allocation11_spill] sm:$0xff] }
  0xc9   : > { %28555 = vmatprep.mubr.f32.mxu0 %v40557_v32 }
  0xcb   : > { %27536 = vmatmul.mubr.f32.gmra.mrb[30].mxu1 %v33916_v27  ;;  %v40567_v27 = vld [vmem:[#allocation35_spill] sm:$0xff] }
  0xcc   : > { %27540 = vmatprep.mubr.f32.mxu1 %v40558_v43  ;;  %28556 = vmatmul.mubr.f32.gmra.mrb[10].mxu0 %v40559_v45 }
  0xcd   : > { %28558 = vmatprep.mubr.f32.mxu0 %v40560_v41 }
  0xcf   : > { %27541 = vmatmul.mubr.f32.vlgmr.msra.gmra.mrb[0].mxu1 %v40561_v4 }
  0xd0   : > { %27543 = vmatprep.mubr.f32.mxu1 %v40562_v53  ;;  %28559 = vmatmul.mubr.f32.gmra.mrb[12].mxu0 %v40563_v44 }
  0xd1   : > { %28561 = vmatprep.mubr.f32.mxu0 %v40564_v48  ;;  %27589 = vmatpush3.msra.mxu1 %v33326_v6 }
  0xd2   : > { %27638 = vmatprep.subr.mxu1 %v40565_v19 }
  0xd3   : > { %27544 = vmatmul.mubr.f32.gmra.mrb[2].mxu1 %v40566_v1 }
  0xd4   : > { %27546 = vmatprep.mubr.f32.mxu1 %v40567_v27  ;;  %28562 = vmatmul.mubr.f32.gmra.mrb[14].mxu0 %v40568_v30 }
  0xd5   : > { %28564 = vmatprep.mubr.f32.mxu0 %v40569_v54 }
  0xd7   : > { %27547 = vmatmul.mubr.f32.gmra.mrb[4].mxu1 %v40570_v62 }
  0xd8   : > { %27549 = vmatprep.mubr.f32.mxu1 %v40571_v38  ;;  %28565 = vmatmul.mubr.f32.gmra.mrb[16].mxu0 %v40572_v33 }
  0xd9   : > { %28567 = vmatprep.mubr.f32.mxu0 %v40573_v22 }
  0xdb   : > { %27550 = vmatmul.mubr.f32.gmra.mrb[6].mxu1 %v40574_v58 }
  0xdc   : > { %27552 = vmatprep.mubr.f32.mxu1 %v40575_v11  ;;  %28568 = vmatmul.mubr.f32.gmra.mrb[18].mxu0 %v40576_v0 }
  0xdd   : > { %28570 = vmatprep.mubr.f32.mxu0 %v40577_v57 }
  0xdf   : > { %27553 = vmatmul.mubr.f32.gmra.mrb[8].mxu1 %v40578_v60 }
  0xe0   : > { %27555 = vmatprep.mubr.f32.mxu1 %v40579_v18  ;;  %28571 = vmatmul.mubr.f32.gmra.mrb[20].mxu0 %v40580_v15 }
  0xe1   : > { %28573 = vmatprep.mubr.f32.mxu0 %v40581_v40 }
  0xe3   : > { %27556 = vmatmul.mubr.f32.gmra.mrb[10].mxu1 %v40582_v50 }
  0xe4   : > { %27558 = vmatprep.mubr.f32.mxu1 %v40583_v55  ;;  %28574 = vmatmul.mubr.f32.gmra.mrb[22].mxu0 %v40584_v17 }
  0xe5   : > { %28576 = vmatprep.mubr.f32.mxu0 %v33987_v39 }
  0xe7   : > { %27559 = vmatmul.mubr.f32.gmra.mrb[12].mxu1 %v40585_v2 }
  0xe8   : > { %27561 = vmatprep.mubr.f32.mxu1 %v40586_v14  ;;  %28577 = vmatmul.mubr.f32.gmra.mrb[24].mxu0 %v33996_v63 }
  0xe9   : > { %28579 = vmatprep.mubr.f32.mxu0 %v34004_v51 }
  0xeb   : > { %27562 = vmatmul.mubr.f32.gmra.mrb[14].mxu1 %v40587_v36 }
  0xec   : > { %27564 = vmatprep.mubr.f32.mxu1 %v40588_v28  ;;  %28580 = vmatmul.mubr.f32.gmra.mrb[26].mxu0 %v34016_v8  ;;  %v40593_v28 = vld [vmem:[#allocation98_spill] sm:$0xff] }
  0xed   : > { %28582 = vmatprep.mubr.f32.mxu0 %v34024_v5  ;;  %v34168_v5 = vand.u32 4294901760, %v8579_v23  ;;  %v40597_v23 = vld [vmem:[#allocation111_spill] sm:$0xff] }
  0xef   : > { %27565 = vmatmul.mubr.f32.gmra.mrb[16].mxu1 %v40590_v12  ;;  %v40594_v12 = vld [vmem:[#allocation100_spill] sm:$0xff] }
  0xf0   : > { %27567 = vmatprep.mubr.f32.mxu1 %v40591_v29  ;;  %28583 = vmatmul.mubr.f32.gmra.mrb[28].mxu0 %v34036_v46  ;;  %v40595_v29 = vld [vmem:[#allocation107_spill] sm:$0xff] }
  0xf1   : > { %28585 = vmatprep.mubr.f32.mxu0 %v34044_v47 }
  0xf3   : > { %27568 = vmatmul.mubr.f32.gmra.mrb[18].mxu1 %v40592_v24 }
  0xf4   : > { %27570 = vmatprep.mubr.f32.mxu1 %v40593_v28  ;;  %28586 = vmatmul.mubr.f32.gmra.mrb[30].mxu0 %v34055_v59 }
  0xf5   : > { %28590 = vmatprep.mubr.f32.mxu0 %v40543_v21 }
  0xf7   : > { %27571 = vmatmul.mubr.f32.gmra.mrb[20].mxu1 %v40594_v12 }
  0xf8   : > { %27573 = vmatprep.mubr.f32.mxu1 %v40595_v29  ;;  %28591 = vmatmul.mubr.f32.vlgmr.msra.gmra.mrb[0].mxu0 %v40546_v42  ;;  %v40598_v42 = vld [vmem:[#allocation114_spill] sm:$0xff] }
  0xf9   : > { %28639 = vmatpush3.msra.mxu0 %v34090_v25  ;;  %28593 = vmatprep.mubr.f32.mxu0 %v40547_v31  ;;  %v40692_v31 = vld [vmem:[#allocation12_spill] sm:$0xff] }
  0xfa   : > { %28688 = vmatprep.subr.mxu0 %v34168_v5 }
  0xfb   : > { %27574 = vmatmul.mubr.f32.gmra.mrb[22].mxu1 %v33828_v34 }
  0xfc   : > { %27576 = vmatprep.mubr.f32.mxu1 %v40596_v13  ;;  %28594 = vmatmul.mubr.f32.gmra.mrb[2].mxu0 %v40550_v20 }
  0xfd   : > { %28596 = vmatprep.mubr.f32.mxu0 %v40551_v16 }
  0xff   : > { %27577 = vmatmul.mubr.f32.gmra.mrb[24].mxu1 %v40597_v23 }
 0x100   : > { %27579 = vmatprep.mubr.f32.mxu1 %v33873_v3  ;;  %28597 = vmatmul.mubr.f32.gmra.mrb[4].mxu0 %v40552_v26  ;;  %v8077_v26 = vld [vmem:[#allocation2 + $0x111] sm:$0xff] }
 0x101   : > { %28599 = vmatprep.mubr.f32.mxu0 %v40553_v61  ;;  %v40599_v61 = vand.u32 4294901760, %v40558_v43  ;;  %v40602_v43 = vand.u32 4294901760, %v40566_v1  ;;  %v40606_v1 = vand.u32 4294901760, %v40574_v58 }
 0x103   : > { %27580 = vmatmul.mubr.f32.gmra.mrb[26].mxu1 %v40598_v42 }
 0x104   : > { %27582 = vmatprep.mubr.f32.mxu1 %v33893_v52  ;;  %28600 = vmatmul.mubr.f32.gmra.mrb[6].mxu0 %v40554_v49  ;;  %v40600_v49 = vand.u32 4294901760, %v40561_v4  ;;  %v40604_v4 = vand.u32 4294901760, %v40570_v62  ;;  %v40608_v62 = vand.u32 4294901760, %v40578_v60 }
 0x105   : > { %28602 = vmatprep.mubr.f32.mxu0 %v40555_v7  ;;  %v40601_v7 = vand.u32 4294901760, %v40562_v53 }
 0x107   : > { %27583 = vmatmul.mubr.f32.gmra.mrb[28].mxu1 %v33903_v9 }
 0x108   : > { %27585 = vmatprep.mubr.f32.mxu1 %v33914_v35  ;;  %28603 = vmatmul.mubr.f32.gmra.mrb[8].mxu0 %v40556_v37 }
 0x109   : > { %28605 = vmatprep.mubr.f32.mxu0 %v40557_v32 }
 0x10b   : > { %27586 = vmatmul.mubr.f32.gmra.mrb[30].mxu1 %v33931_v56 }
 0x10c   : > { %27590 = vmatprep.mubr.f32.mxu1 %v40599_v61  ;;  %28606 = vmatmul.mubr.f32.gmra.mrb[10].mxu0 %v40559_v45  ;;  %v40603_v61 = vand.u32 4294901760, %v40567_v27  ;;  %v8057_v27 = vld [vmem:[#allocation2 + $0x21] sm:$0xff] }
 0x10d   : > { %28608 = vmatprep.mubr.f32.mxu0 %v40560_v41 }
 0x10f   : > { %27591 = vmatmul.mubr.f32.vlgmr.msra.gmra.mrb[0].mxu1 %v40600_v49  ;;  %v8056_v49 = vld [vmem:[#allocation2 + $0x19] sm:$0xff] }
 0x110   : > { %27593 = vmatprep.mubr.f32.mxu1 %v40601_v7  ;;  %28609 = vmatmul.mubr.f32.gmra.mrb[12].mxu0 %v40563_v44  ;;  %v40605_v7 = vand.u32 4294901760, %v40571_v38  ;;  %v8091_v53 = vsel %vm223_vm1, %v8056_v49, 0  ;;  %v8058_v38 = vld [vmem:[#allocation2 + $0x31] sm:$0xff]  ;;  %v40611_v49 = vand.u32 4294901760, %v40582_v50  ;;  %v40665_v44 = vand.u32 4294901760, %v40597_v23 }
 0x111   : > { %28611 = vmatprep.mubr.f32.mxu0 %v40564_v48  ;;  %27639 = vmatpush3.msra.mxu1 %v40565_v19  ;;  %v40607_v19 = vand.u32 4294901760, %v40575_v11  ;;  %v34229_v58 = vand.u32 4294901760, %v8091_v53  ;;  %v8094_v11 = vsel %vm223_vm1, %v8057_v27, 0  ;;  %v8061_v50 = vld [vmem:[#allocation2 + $0x51] sm:$0xff] }
 0x112   : > { %27688 = vmatprep.subr.mxu1 %v33326_v6  ;;  %v34236_v60 = vand.u32 4294901760, %v8094_v11 }
 0x113   : > { %27594 = vmatmul.mubr.f32.gmra.mrb[2].mxu1 %v40602_v43  ;;  %v40609_v43 = vand.u32 4294901760, %v40579_v18  ;;  %40610 = vst [vmem:[#allocation15_spill] sm:$0xff] %v34229_v58  ;;  %v40613_v18 = vand.u32 4294901760, %v40583_v55 }
 0x114   : > { %27596 = vmatprep.mubr.f32.mxu1 %v40603_v61  ;;  %28612 = vmatmul.mubr.f32.gmra.mrb[14].mxu0 %v40568_v30  ;;  %v8097_v61 = vsel %vm223_vm1, %v8058_v38, 0  ;;  %40612 = vst [vmem:[#allocation26_spill] sm:$0xff] %v34236_v60  ;;  %v34252_v55 = vsub.f32 %v8094_v11, %v34236_v60  ;;  %v40649_v30 = vand.u32 4294901760, %v40594_v12 }
 0x115   : > { %28614 = vmatprep.mubr.f32.mxu0 %v40569_v54 }
 0x116   : > { %40617 = vst [vmem:[#allocation35_spill] sm:$0xff] %v34252_v55 }
 0x117   : > { %27597 = vmatmul.mubr.f32.gmra.mrb[4].mxu1 %v40604_v4  ;;  %v8059_v4 = vld [vmem:[#allocation2 + $0x39] sm:$0xff] }
 0x118   : > { %27599 = vmatprep.mubr.f32.mxu1 %v40605_v7  ;;  %28615 = vmatmul.mubr.f32.gmra.mrb[16].mxu0 %v40572_v33  ;;  %v8060_v7 = vld [vmem:[#allocation2 + $0x49] sm:$0xff]  ;;  %v8100_v27 = vsel %vm223_vm1, %v8059_v4, 0 }
 0x119   : > { %28617 = vmatprep.mubr.f32.mxu0 %v40573_v22  ;;  %v8103_v38 = vsel %vm223_vm1, %v8060_v7, 0  ;;  %v8068_v33 = vld [vmem:[#allocation2 + $0xa9] sm:$0xff] }
 0x11a   : > { %v34263_v7 = vand.u32 4294901760, %v8103_v38 }
 0x11b   : > { %27600 = vmatmul.mubr.f32.gmra.mrb[6].mxu1 %v40606_v1  ;;  %v34242_v1 = vsub.f32 %v8091_v53, %v34229_v58  ;;  %v40619_v53 = vand.u32 4294901760, %v40586_v14  ;;  %v40629_v14 = vld [vmem:[#allocation126_spill] sm:$0xff] }
 0x11c   : > { %27602 = vmatprep.mubr.f32.mxu1 %v40607_v19  ;;  %28618 = vmatmul.mubr.f32.gmra.mrb[18].mxu0 %v40576_v0  ;;  %v34244_v19 = vand.u32 4294901760, %v8097_v61  ;;  %40621 = vst [vmem:[#allocation44_spill] sm:$0xff] %v34263_v7 }
 0x11d   : > { %28620 = vmatprep.mubr.f32.mxu0 %v40577_v57  ;;  %40614 = vst [vmem:[#allocation11_spill] sm:$0xff] %v34242_v1 }
 0x11e   : > { %40615 = vst [vmem:[#allocation27_spill] sm:$0xff] %v34244_v19 }
 0x11f   : > { %27603 = vmatmul.mubr.f32.gmra.mrb[8].mxu1 %v40608_v62  ;;  %v40616_v62 = vand.u32 4294901760, %v40585_v2  ;;  %v8106_v2 = vsel %vm223_vm1, %v8061_v50, 0  ;;  %v40627_v50 = vand.u32 4294901760, %v34242_v1 }
 0x120   : > { %27605 = vmatprep.mubr.f32.mxu1 %v40609_v43  ;;  %28621 = vmatmul.mubr.f32.gmra.mrb[20].mxu0 %v40580_v15  ;;  %v34254_v43 = vand.u32 4294901760, %v8100_v27  ;;  %v34274_v4 = vand.u32 4294901760, %v8106_v2 }
 0x121   : > { %28623 = vmatprep.mubr.f32.mxu0 %v40581_v40  ;;  %v8066_v40 = vld [vmem:[#allocation2 + $0x91] sm:$0xff] }
 0x122   : > { %40618 = vst [vmem:[#allocation36_spill] sm:$0xff] %v34254_v43  ;;  %40624 = vst [vmem:[#allocation53_spill] sm:$0xff] %v34274_v4  ;;  %v34298_v57 = vsub.f32 %v8106_v2, %v34274_v4 }
 0x123   : > { %27606 = vmatmul.mubr.f32.gmra.mrb[10].mxu1 %v40611_v49  ;;  %v8062_v49 = vld [vmem:[#allocation2 + $0x61] sm:$0xff] }
 0x124   : > { %27608 = vmatprep.mubr.f32.mxu1 %v40613_v18  ;;  %28624 = vmatmul.mubr.f32.gmra.mrb[22].mxu0 %v40584_v17  ;;  %v34261_v18 = vsub.f32 %v8097_v61, %v34244_v19  ;;  %v8109_v11 = vsel %vm223_vm1, %v8062_v49, 0  ;;  %v8064_v61 = vld [vmem:[#allocation2 + $0x79] sm:$0xff]  ;;  %v8258_v49 = vsub.f32 %v34242_v1, %v40627_v50  ;;  %v40633_v50 = vand.u32 4294901760, %v34252_v55  ;;  %40634 = vst [vmem:[#allocation67_spill] sm:$0xff] %v34298_v57 }
 0x125   : > { %28626 = vmatprep.mubr.f32.mxu0 %v33987_v39  ;;  %v40622_v39 = vand.u32 4294901760, %v40587_v36 }
 0x126   : > { %40620 = vst [vmem:[#allocation43_spill] sm:$0xff] %v34261_v18  ;;  %v8268_v36 = vsub.f32 %v34252_v55, %v40633_v50 }
 0x127   : > { %27609 = vmatmul.mubr.f32.gmra.mrb[12].mxu1 %v40616_v62  ;;  %v8063_v62 = vld [vmem:[#allocation2 + $0x69] sm:$0xff] }
 0x128   : > { %27611 = vmatprep.mubr.f32.mxu1 %v40619_v53  ;;  %28627 = vmatmul.mubr.f32.gmra.mrb[24].mxu0 %v33996_v63  ;;  %v34272_v53 = vsub.f32 %v8100_v27, %v34254_v43  ;;  %v40625_v63 = vld [vmem:[#allocation84_spill] sm:$0xff]  ;;  %v34287_v27 = vand.u32 4294901760, %v8109_v11 }
 0x129   : > { %28629 = vmatprep.mubr.f32.mxu0 %v34004_v51  ;;  %v40626_v17 = vand.u32 4294901760, %v40625_v63  ;;  %v8112_v51 = vsel %vm223_vm1, %v8063_v62, 0  ;;  %v8115_v63 = vsel %vm223_vm1, %v8064_v61, 0  ;;  %v8259_v62 = vand.u32 4294901760, %v8258_v49  ;;  %v8067_v49 = vld [vmem:[#allocation2 + $0x99] sm:$0xff] }
 0x12a   : > { %40623 = vst [vmem:[#allocation50_spill] sm:$0xff] %v34272_v53  ;;  %40630 = vst [vmem:[#allocation62_spill] sm:$0xff] %v34287_v27  ;;  %v40637_v61 = vand.u32 4294901760, %v34261_v18  ;;  %v34307_v22 = vand.u32 4294901760, %v8112_v51  ;;  %v34311_v50 = vsub.f32 %v8109_v11, %v34287_v27  ;;  %v34313_v2 = vand.u32 4294901760, %v8115_v63 }
 0x12b   : > { %27612 = vmatmul.mubr.f32.gmra.mrb[14].mxu1 %v40622_v39  ;;  %v34284_v39 = vsub.f32 %v8103_v38, %v34263_v7  ;;  %v40641_v38 = vand.u32 4294901760, %v40592_v24  ;;  %v40643_v11 = vand.u32 4294901760, %v40593_v28  ;;  %v40652_v28 = vand.u32 4294901760, %v40595_v29 }
 0x12c   : > { %27614 = vmatprep.mubr.f32.mxu1 %v40626_v17  ;;  %28630 = vmatmul.mubr.f32.gmra.mrb[26].mxu0 %v34016_v8  ;;  %v8065_v17 = vld [vmem:[#allocation2 + $0x81] sm:$0xff]  ;;  %v40631_v8 = vld [vmem:[#allocation85_spill] sm:$0xff]  ;;  %40638 = vst [vmem:[#allocation69_spill] sm:$0xff] %v34307_v22  ;;  %40639 = vst [vmem:[#allocation75_spill] sm:$0xff] %v34311_v50 }
 0x12d   : > { %40628 = vst [vmem:[#allocation58_spill] sm:$0xff] %v34284_v39  ;;  %28632 = vmatprep.mubr.f32.mxu0 %v40629_v14  ;;  %v40632_v15 = vand.u32 4294901760, %v40631_v8  ;;  %v40635_v14 = vld [vmem:[#allocation91_spill] sm:$0xff]  ;;  %v8278_v8 = vsub.f32 %v34261_v18, %v40637_v61  ;;  %40640 = vst [vmem:[#allocation76_spill] sm:$0xff] %v34313_v2  ;;  %v8269_v61 = vand.u32 4294901760, %v8268_v36  ;;  %v8124_v36 = vsel %vm223_vm1, %v8067_v49, 0 }
 0x12e   : > { %v40636_v0 = vand.u32 4294901760, %v40635_v14  ;;  %v8121_v14 = vsel %vm223_vm1, %v8066_v40, 0  ;;  %v40650_v49 = vand.u32 4294901760, %v34298_v57 }
 0x12f   : > { %27615 = vmatmul.mubr.f32.gmra.mrb[16].mxu1 %v40632_v15  ;;  %v40642_v15 = vand.u32 4294901760, %v34272_v53  ;;  %v34331_v24 = vand.u32 4294901760, %v8121_v14 }
 0x130   : > { %27617 = vmatprep.mubr.f32.mxu1 %v40636_v0  ;;  %28633 = vmatmul.mubr.f32.gmra.mrb[28].mxu0 %v34036_v46  ;;  %v8118_v0 = vsel %vm223_vm1, %v8065_v17, 0  ;;  %v34327_v17 = vsub.f32 %v8112_v51, %v34307_v22  ;;  %v8070_v51 = vld [vmem:[#allocation2 + $0xc1] sm:$0xff] }
 0x131   : > { %28635 = vmatprep.mubr.f32.mxu0 %v34044_v47  ;;  %v8288_v46 = vsub.f32 %v34272_v53, %v40642_v15  ;;  %v34329_v40 = vand.u32 4294901760, %v8118_v0  ;;  %40646 = vst [vmem:[#allocation100_spill] sm:$0xff] %v34331_v24  ;;  %v8279_v15 = vand.u32 4294901760, %v8278_v8  ;;  %v40647_v47 = vand.u32 4294901760, %v34284_v39 }
 0x132   : > { %40644 = vst [vmem:[#allocation92_spill] sm:$0xff] %v34327_v17  ;;  %v34347_v8 = vand.u32 4294901760, %v8124_v36  ;;  %v34357_v12 = vsub.f32 %v8121_v14, %v34331_v24  ;;  %v40658_v14 = vand.u32 4294901760, %v33828_v34 }
 0x133   : > { %27618 = vmatmul.mubr.f32.gmra.mrb[18].mxu1 %v40641_v38  ;;  %40645 = vst [vmem:[#allocation98_spill] sm:$0xff] %v34329_v40  ;;  %v8069_v38 = vld [vmem:[#allocation2 + $0xb1] sm:$0xff]  ;;  %v8298_v54 = vsub.f32 %v34284_v39, %v40647_v47  ;;  %v8289_v48 = vand.u32 4294901760, %v8288_v46 }
 0x134   : > { %27620 = vmatprep.mubr.f32.mxu1 %v40643_v11  ;;  %28636 = vmatmul.mubr.f32.gmra.mrb[30].mxu0 %v34055_v59  ;;  %v34339_v11 = vsub.f32 %v8115_v63, %v34313_v2  ;;  %v8127_v59 = vsel %vm223_vm1, %v8068_v33, 0  ;;  %40651 = vst [vmem:[#allocation109_spill] sm:$0xff] %v34347_v8  ;;  %v8130_v47 = vsel %vm223_vm1, %v8069_v38, 0  ;;  %v39662_v63 = vand.u32 4294901760, %v34327_v17  ;;  %40654 = vst [vmem:[#allocation114_spill] sm:$0xff] %v34357_v12 }
 0x135   : > { %28640 = vmatprep.mubr.f32.mxu0 %v8259_v62  ;;  %v8308_v62 = vsub.f32 %v34298_v57, %v40650_v49  ;;  %v34354_v33 = vsub.f32 %v8118_v0, %v34329_v40  ;;  %v8299_v46 = vand.u32 4294901760, %v8298_v54  ;;  %v40655_v38 = vand.u32 4294901760, %v34311_v50  ;;  %v8071_v49 = vld [vmem:[#allocation2 + $0xc9] sm:$0xff] }
 0x136   : > { %40648 = vst [vmem:[#allocation107_spill] sm:$0xff] %v34339_v11  ;;  %v34367_v0 = vand.u32 4294901760, %v8130_v47  ;;  %v40670_v23 = vand.u32 4294901760, %v34357_v12  ;;  %v40712_v57 = vld [vmem:[#allocation33_spill] sm:$0xff] }
 0x137   : > { %27621 = vmatmul.mubr.f32.gmra.mrb[20].mxu1 %v40649_v30  ;;  %40653 = vst [vmem:[#allocation111_spill] sm:$0xff] %v34354_v33  ;;  %v8133_v30 = vsel %vm223_vm1, %v8070_v51, 0  ;;  %v8318_v29 = vsub.f32 %v34311_v50, %v40655_v38  ;;  %v8309_v51 = vand.u32 4294901760, %v8308_v62  ;;  %v40661_v38 = vand.u32 4294901760, %v40596_v13  ;;  %v8085_v50 = vld [vmem:[#allocation2 + $0x171] sm:$0xff] }
 0x138   : > { %27623 = vmatprep.mubr.f32.mxu1 %v40652_v28  ;;  %28641 = vmatmul.mubr.f32.vlgmr.msra.gmra.mrb[0].mxu0 %v8269_v61  ;;  %v34365_v28 = vand.u32 4294901760, %v8127_v59  ;;  %40657 = vst [vmem:[#allocation85_spill] sm:$0xff] %v34367_v0  ;;  %v34375_v54 = vand.u32 4294901760, %v8133_v30  ;;  %v8328_v61 = vsub.f32 %v34327_v17, %v39662_v63  ;;  %v8136_v62 = vsel %vm223_vm1, %v8071_v49, 0  ;;  %v8073_v63 = vld [vmem:[#allocation2 + $0xe1] sm:$0xff] }
 0x139   : > { %28689 = vmatpush3.msra.mxu0 %v34168_v5  ;;  %28643 = vmatprep.mubr.f32.mxu0 %v8279_v15  ;;  %v34373_v5 = vsub.f32 %v8124_v36, %v34347_v8  ;;  %v8072_v15 = vld [vmem:[#allocation2 + $0xd9] sm:$0xff]  ;;  %v8319_v36 = vand.u32 4294901760, %v8318_v29  ;;  %v34401_v29 = vand.u32 4294901760, %v8136_v62  ;;  %v40669_v34 = vand.u32 4294901760, %v34354_v33 }
 0x13a   : > { %40656 = vst [vmem:[#allocation84_spill] sm:$0xff] %v34365_v28  ;;  %28738 = vmatprep.subr.mxu0 %v34149_v10  ;;  %40660 = vst [vmem:[#allocation135_spill] sm:$0xff] %v34375_v54  ;;  %v34389_v13 = vsub.f32 %v8127_v59, %v34365_v28  ;;  %v40668_v59 = vand.u32 4294901760, %v33873_v3  ;;  %v8142_v32 = vsel %vm223_vm1, %v8073_v63, 0  ;;  %v40675_v63 = vand.u32 4294901760, %v33893_v52  ;;  %v8078_v52 = vld [vmem:[#allocation2 + $0x121] sm:$0xff] }
 0x13b   : > { %27624 = vmatmul.mubr.f32.gmra.mrb[22].mxu1 %v40658_v14  ;;  %40659 = vst [vmem:[#allocation91_spill] sm:$0xff] %v34373_v5  ;;  %v40662_v14 = vand.u32 4294901760, %v34339_v11  ;;  %40667 = vst [vmem:[#allocation139_spill] sm:$0xff] %v34401_v29  ;;  %v34428_v37 = vand.u32 4294901760, %v8142_v32 }
 0x13c   : > { %27626 = vmatprep.mubr.f32.mxu1 %v40661_v38  ;;  %28644 = vmatmul.mubr.f32.gmra.mrb[2].mxu0 %v8289_v48  ;;  %40663 = vst [vmem:[#allocation136_spill] sm:$0xff] %v34389_v13  ;;  %v34392_v48 = vsub.f32 %v8130_v47, %v34367_v0  ;;  %v8139_v38 = vsel %vm223_vm1, %v8072_v15, 0  ;;  %v8329_v47 = vand.u32 4294901760, %v8328_v61  ;;  %v8348_v15 = vsub.f32 %v34354_v33, %v40669_v34  ;;  %v40706_v33 = vld [vmem:[#allocation31_spill] sm:$0xff] }
 0x13d   : > { %28646 = vmatprep.mubr.f32.mxu0 %v8299_v46  ;;  %v8338_v41 = vsub.f32 %v34339_v11, %v40662_v14  ;;  %v34399_v46 = vsub.f32 %v8133_v30, %v34375_v54  ;;  %v8074_v14 = vld [vmem:[#allocation2 + $0xf1] sm:$0xff]  ;;  %v34412_v45 = vand.u32 4294901760, %v8139_v38  ;;  %v40673_v34 = vand.u32 4294901760, %v34373_v5  ;;  %v8076_v30 = vld [vmem:[#allocation2 + $0x109] sm:$0xff]  ;;  %40676 = vst [vmem:[#allocation142_spill] sm:$0xff] %v34428_v37 }
 0x13e   : > { %40664 = vst [vmem:[#allocation137_spill] sm:$0xff] %v34392_v48  ;;  %v8145_v61 = vsel %vm223_vm1, %v8074_v14, 0  ;;  %v8349_v3 = vand.u32 4294901760, %v8348_v15  ;;  %v34452_v20 = vsub.f32 %v8142_v32, %v34428_v37  ;;  %v376_v32 = vld [vmem:[%s39344_s1] sm:$0xf] }
 0x13f   : > { %27627 = vmatmul.mubr.f32.gmra.mrb[24].mxu1 %v40665_v44  ;;  %40666 = vst [vmem:[#allocation138_spill] sm:$0xff] %v34399_v46  ;;  %v8358_v44 = vsub.f32 %v34357_v12, %v40670_v23  ;;  %v8339_v49 = vand.u32 4294901760, %v8338_v41  ;;  %40671 = vst [vmem:[#allocation140_spill] sm:$0xff] %v34412_v45  ;;  %v8368_v23 = vsub.f32 %v34373_v5, %v40673_v34  ;;  %v34436_v41 = vand.u32 4294901760, %v8145_v61 }
 0x140   : > { %27629 = vmatprep.mubr.f32.mxu1 %v40668_v59  ;;  %28647 = vmatmul.mubr.f32.gmra.mrb[4].mxu0 %v8309_v51  ;;  %v8075_v51 = vld [vmem:[#allocation2 + $0xf9] sm:$0xff]  ;;  %v40672_v59 = vand.u32 4294901760, %v40598_v42  ;;  %v40677_v42 = vand.u32 4294901760, %v34389_v13  ;;  %v34434_v34 = vsub.f32 %v8139_v38, %v34412_v45  ;;  %40684 = vst [vmem:[#allocation145_spill] sm:$0xff] %v34452_v20 }
 0x141   : > { %28649 = vmatprep.mubr.f32.mxu0 %v8319_v36  ;;  %v34424_v36 = vsub.f32 %v8136_v62, %v34401_v29  ;;  %v8359_v14 = vand.u32 4294901760, %v8358_v44  ;;  %40679 = vst [vmem:[#allocation144_spill] sm:$0xff] %v34436_v41  ;;  %v8148_v62 = vsel %vm223_vm1, %v8075_v51, 0  ;;  %v8151_v44 = vsel %vm223_vm1, %v8076_v30, 0 }
 0x142   : > { %40678 = vst [vmem:[#allocation143_spill] sm:$0xff] %v34434_v34  ;;  %v40683_v51 = vand.u32 4294901760, %v33914_v35  ;;  %v8154_v30 = vsel %vm223_vm1, %v8077_v26, 0  ;;  %v34462_v16 = vand.u32 4294901760, %v8151_v44  ;;  %v8079_v35 = vld [vmem:[#allocation2 + $0x129] sm:$0xff]  ;;  %v40688_v26 = vand.u32 4294901760, %v33931_v56 }
 0x143   : > { %27630 = vmatmul.mubr.f32.gmra.mrb[26].mxu1 %v40672_v59  ;;  %40674 = vst [vmem:[#allocation141_spill] sm:$0xff] %v34424_v36  ;;  %v8378_v59 = vsub.f32 %v34389_v13, %v40677_v42  ;;  %v40682_v42 = vand.u32 4294901760, %v34399_v46 }
 0x144   : > { %27632 = vmatprep.mubr.f32.mxu1 %v40675_v63  ;;  %28650 = vmatmul.mubr.f32.gmra.mrb[6].mxu0 %v8329_v47  ;;  %v40680_v47 = vand.u32 4294901760, %v34392_v48  ;;  %v8369_v63 = vand.u32 4294901760, %v8368_v23  ;;  %40687 = vst [vmem:[#allocation148_spill] sm:$0xff] %v34462_v16 }
 0x145   : > { %28652 = vmatprep.mubr.f32.mxu0 %v8339_v49  ;;  %v40681_v49 = vand.u32 4294901760, %v33903_v9  ;;  %v8398_v38 = vsub.f32 %v34399_v46, %v40682_v42  ;;  %v8157_v9 = vsel %vm223_vm1, %v8078_v52, 0  ;;  %v8379_v23 = vand.u32 4294901760, %v8378_v59  ;;  %v8082_v46 = vld [vmem:[#allocation2 + $0x151] sm:$0xff] }
 0x146   : > { %v8388_v15 = vsub.f32 %v34392_v48, %v40680_v47  ;;  %v34454_v47 = vand.u32 4294901760, %v8148_v62  ;;  %v34460_v42 = vsub.f32 %v8145_v61, %v34436_v41  ;;  %v34472_v52 = vand.u32 4294901760, %v8154_v30 }
 0x147   : > { %27633 = vmatmul.mubr.f32.gmra.mrb[28].mxu1 %v40681_v49  ;;  %v34474_v61 = vand.u32 4294901760, %v8157_v9  ;;  %v34477_v49 = vsel %vm507_vm0, %v376_v32, 0  ;;  %v8399_v21 = vand.u32 4294901760, %v8398_v38  ;;  %v34490_v32 = vsub.f32 %v8151_v44, %v34462_v16  ;;  %v8081_v38 = vld [vmem:[#allocation2 + $0x141] sm:$0xff] }
 0x148   : > { %27635 = vmatprep.mubr.f32.mxu1 %v40683_v51  ;;  %28653 = vmatmul.mubr.f32.gmra.mrb[8].mxu0 %v8349_v3  ;;  %40685 = vst [vmem:[#allocation146_spill] sm:$0xff] %v34454_v47  ;;  %40686 = vst [vmem:[#allocation147_spill] sm:$0xff] %v34460_v42  ;;  %v8389_v3 = vand.u32 4294901760, %v8388_v15  ;;  %v8080_v51 = vld [vmem:[#allocation2 + $0x139] sm:$0xff]  ;;  %v34482_v56 = vsub.f32 %v8148_v62, %v34454_v47  ;;  %v34494_v15 = vand.u32 4294901760, %v34477_v49  ;;  %v40696_v62 = vld [vmem:[#allocation13_spill] sm:$0xff] }
 0x149   : > { %28655 = vmatprep.mubr.f32.mxu0 %v8359_v14  ;;  %v40689_v14 = vand.u32 4294901760, %v34424_v36  ;;  %40690 = vst [vmem:[#allocation149_spill] sm:$0xff] %v34472_v52  ;;  %40691 = vst [vmem:[#allocation150_spill] sm:$0xff] %v34474_v61  ;;  %v8166_v11 = vsel %vm223_vm1, %v8081_v38, 0 }
 0x14a   : > { %40693 = vst [vmem:[#allocation12_spill] sm:$0xff] %v34482_v56  ;;  %40695 = vst [vmem:[#allocation151_spill] sm:$0xff] %v34490_v32 }
 0x14b   : > { %27636 = vmatmul.mubr.f32.gmra.mrb[30].mxu1 %v40688_v26  ;;  %v8408_v59 = vsub.f32 %v34424_v36, %v40689_v14  ;;  %v8160_v26 = vsel %vm223_vm1, %v8079_v35, 0  ;;  %v40694_v14 = vand.u32 4294901760, %v34434_v34  ;;  %v34498_v35 = vsub.f32 %v8154_v30, %v34472_v52 }
 0x14c   : > { %27640 = vmatprep.mubr.f32.mxu1 %v40692_v31  ;;  %28656 = vmatmul.mubr.f32.gmra.mrb[10].mxu0 %v8369_v63  ;;  %v8163_v63 = vsel %vm223_vm1, %v8080_v51, 0  ;;  %v40701_v51 = vand.u32 4294901760, %v34452_v20 }
 0x14d   : > { %28658 = vmatprep.mubr.f32.mxu0 %v8379_v23  ;;  %v8418_v36 = vsub.f32 %v34434_v34, %v40694_v14  ;;  %40697 = vst [vmem:[#allocation13_spill] sm:$0xff] %v34498_v35  ;;  %v34501_v23 = vsub.f32 %v8157_v9, %v34474_v61  ;;  %v34503_v14 = vand.u32 4294901760, %v8160_v26  ;;  %v40700_v34 = vld [vmem:[#allocation23_spill] sm:$0xff]  ;;  %v8409_v44 = vand.u32 4294901760, %v8408_v59 }
 0x14e   : > { %v8428_v48 = vsub.f32 %v34452_v20, %v40701_v51  ;;  %v34510_v5 = vand.u32 4294901760, %v8163_v63  ;;  %v40703_v9 = vand.u32 4294901760, %v34460_v42  ;;  %v8083_v59 = vld [vmem:[#allocation2 + $0x159] sm:$0xff]  ;;  %v40704_v51 = vld [vmem:[#allocation24_spill] sm:$0xff]  ;;  %v34533_v20 = vand.u32 4294901760, %v8166_v11 }
 0x14f   : > { %27641 = vmatmul.mubr.f32.vlgmr.msra.gmra.mrb[0].mxu1 %v40696_v62  ;;  %40698 = vst [vmem:[#allocation152_spill] sm:$0xff] %v34501_v23  ;;  %40699 = vst [vmem:[#allocation153_spill] sm:$0xff] %v34503_v14  ;;  %v8419_v30 = vand.u32 4294901760, %v8418_v36  ;;  %v34524_v13 = vsub.f32 %v8160_v26, %v34503_v14  ;;  %v40710_v36 = vand.u32 4294901760, %v34490_v32 }
 0x150   : > { %27643 = vmatprep.mubr.f32.mxu1 %v40700_v34  ;;  %28659 = vmatmul.mubr.f32.gmra.mrb[12].mxu0 %v8389_v3  ;;  %40702 = vst [vmem:[#allocation23_spill] sm:$0xff] %v34510_v5  ;;  %v8438_v12 = vsub.f32 %v34460_v42, %v40703_v9  ;;  %v8169_v3 = vsel %vm223_vm1, %v8082_v46, 0  ;;  %v8084_v9 = vld [vmem:[#allocation2 + $0x169] sm:$0xff]  ;;  %v8429_v38 = vand.u32 4294901760, %v8428_v48  ;;  %v34531_v42 = vsub.f32 %v8163_v63, %v34510_v5 }
 0x151   : > { %28661 = vmatprep.mubr.f32.mxu0 %v8399_v21  ;;  %27689 = vmatpush3.msra.mxu1 %v33326_v6  ;;  %40705 = vst [vmem:[#allocation24_spill] sm:$0xff] %v34524_v13  ;;  %v40707_v6 = vand.u32 4294901760, %v34482_v56  ;;  %40709 = vst [vmem:[#allocation154_spill] sm:$0xff] %v34533_v20  ;;  %v8458_v26 = vsub.f32 %v34490_v32, %v40710_v36  ;;  %v34538_v17 = vand.u32 4294901760, %v8169_v3  ;;  %v8175_v48 = vsel %vm223_vm1, %v8084_v9, 0  ;;  %v8086_v36 = vld [vmem:[#allocation2 + $0x181] sm:$0xff] }
 0x152   : > { %27738 = vmatprep.subr.mxu1 %v34494_v15  ;;  %40708 = vst [vmem:[#allocation31_spill] sm:$0xff] %v34531_v42  ;;  %v8439_v21 = vand.u32 4294901760, %v8438_v12  ;;  %v40713_v63 = vand.u32 4294901760, %v34498_v35  ;;  %v40715_v32 = vld [vmem:[#allocation40_spill] sm:$0xff]  ;;  %v34553_v39 = vsub.f32 %v8166_v11, %v34533_v20  ;;  %v40721_v11 = vand.u32 4294901760, %v34524_v13 }
 0x153   : > { %27644 = vmatmul.mubr.f32.gmra.mrb[2].mxu1 %v40704_v51  ;;  %v8448_v46 = vsub.f32 %v34482_v56, %v40707_v6  ;;  %40711 = vst [vmem:[#allocation155_spill] sm:$0xff] %v34538_v17  ;;  %v8178_v56 = vsel %vm223_vm1, %v8085_v50, 0 }
 0x154   : > { %27646 = vmatprep.mubr.f32.mxu1 %v40706_v33  ;;  %28662 = vmatmul.mubr.f32.gmra.mrb[14].mxu0 %v8409_v44  ;;  %v8172_v44 = vsel %vm223_vm1, %v8083_v59, 0  ;;  %v8468_v6 = vsub.f32 %v34498_v35, %v40713_v63  ;;  %40716 = vst [vmem:[#allocation33_spill] sm:$0xff] %v34553_v39  ;;  %v8459_v63 = vand.u32 4294901760, %v8458_v26  ;;  %v34558_v35 = vsub.f32 %v8169_v3, %v34538_v17  ;;  %v40733_v17 = vld [vmem:[#allocation59_spill] sm:$0xff] }
 0x155   : > { %28664 = vmatprep.mubr.f32.mxu0 %v8419_v30  ;;  %v40714_v30 = vand.u32 4294901760, %v34501_v23  ;;  %v8449_v59 = vand.u32 4294901760, %v8448_v46  ;;  %v34555_v53 = vand.u32 4294901760, %v8172_v44  ;;  %v40720_v46 = vld [vmem:[#allocation41_spill] sm:$0xff]  ;;  %v8488_v55 = vsub.f32 %v34524_v13, %v40721_v11  ;;  %v40728_v13 = vld [vmem:[#allocation51_spill] sm:$0xff] }
 0x156   : > { %40718 = vst [vmem:[#allocation156_spill] sm:$0xff] %v34558_v35  ;;  %v8469_v9 = vand.u32 4294901760, %v8468_v6  ;;  %v40723_v3 = vand.u32 4294901760, %v34531_v42  ;;  %v39727_v50 = vand.u32 4294901760, %v34553_v39  ;;  %v34576_v1 = vand.u32 4294901760, %v8178_v56 }
 0x157   : > { %27647 = vmatmul.mubr.f32.gmra.mrb[4].mxu1 %v40712_v57  ;;  %v8478_v12 = vsub.f32 %v34501_v23, %v40714_v30  ;;  %40717 = vst [vmem:[#allocation40_spill] sm:$0xff] %v34555_v53  ;;  %v34560_v30 = vand.u32 4294901760, %v8175_v48  ;;  %v8181_v23 = vsel %vm223_vm1, %v8086_v36, 0  ;;  %v34574_v36 = vsub.f32 %v8172_v44, %v34555_v53 }
 0x158   : > { %27649 = vmatprep.mubr.f32.mxu1 %v40715_v32  ;;  %28665 = vmatmul.mubr.f32.gmra.mrb[16].mxu0 %v8429_v38  ;;  %v8087_v38 = vld [vmem:[#allocation2 + $0x189] sm:$0xff]  ;;  %v8498_v26 = vsub.f32 %v34531_v42, %v40723_v3  ;;  %v34582_v11 = vand.u32 4294901760, %v8181_v23  ;;  %v8489_v3 = vand.u32 4294901760, %v8488_v55  ;;  %v8508_v44 = vsub.f32 %v34553_v39, %v39727_v50 }
 0x159   : > { %28667 = vmatprep.mubr.f32.mxu0 %v8439_v21  ;;  %40719 = vst [vmem:[#allocation157_spill] sm:$0xff] %v34560_v30  ;;  %v8479_v18 = vand.u32 4294901760, %v8478_v12  ;;  %v40722_v21 = vld [vmem:[#allocation47_spill] sm:$0xff]  ;;  %40724 = vst [vmem:[#allocation41_spill] sm:$0xff] %v34574_v36  ;;  %v34580_v12 = vsub.f32 %v8175_v48, %v34560_v30  ;;  %v40729_v42 = vld [vmem:[#allocation56_spill] sm:$0xff]  ;;  %v34592_v6 = vsub.f32 %v8178_v56, %v34576_v1 }
 0x15a   : > { %40725 = vst [vmem:[#allocation47_spill] sm:$0xff] %v34576_v1  ;;  %40727 = vst [vmem:[#allocation159_spill] sm:$0xff] %v34582_v11  ;;  %v8499_v30 = vand.u32 4294901760, %v8498_v26  ;;  %v40734_v50 = vld [vmem:[#allocation65_spill] sm:$0xff]  ;;  %v8509_v56 = vand.u32 4294901760, %v8508_v44 }
 0x15b   : > { %27650 = vmatmul.mubr.f32.gmra.mrb[6].mxu1 %v40720_v46  ;;  %40726 = vst [vmem:[#allocation158_spill] sm:$0xff] %v34580_v12  ;;  %v39735_v53 = vand.u32 4294901760, %v34580_v12  ;;  %v39740_v26 = vand.u32 4294901760, %v34592_v6 }
 0x15c   : > { %27652 = vmatprep.mubr.f32.mxu1 %v40722_v21  ;;  %28668 = vmatmul.mubr.f32.gmra.mrb[18].mxu0 %v8449_v59  ;;  %v8184_v59 = vsel %vm223_vm1, %v8087_v38, 0  ;;  %v40731_v38 = vand.u32 4294901760, %v34558_v35 }
 0x15d   : > { %28670 = vmatprep.mubr.f32.mxu0 %v8459_v63  ;;  %v39734_v63 = vand.u32 4294901760, %v34574_v36  ;;  %v34594_v48 = vand.u32 4294901760, %v8184_v59 }
 0x15e   : > { %v8518_v55 = vsub.f32 %v34558_v35, %v40731_v38 }
 0x15f   : > { %27653 = vmatmul.mubr.f32.gmra.mrb[8].mxu1 %v40728_v13  ;;  %40730 = vst [vmem:[#allocation51_spill] sm:$0xff] %v34594_v48  ;;  %v34610_v39 = vsub.f32 %v8184_v59, %v34594_v48 }
 0x160   : > { %27655 = vmatprep.mubr.f32.mxu1 %v40729_v42  ;;  %28671 = vmatmul.mubr.f32.gmra.mrb[20].mxu0 %v8469_v9  ;;  %v34601_v9 = vsub.f32 %v8181_v23, %v34582_v11  ;;  %v8519_v38 = vand.u32 4294901760, %v8518_v55  ;;  %v8538_v23 = vsub.f32 %v34580_v12, %v39735_v53  ;;  %v40735_v11 = vld [vmem:[#allocation66_spill] sm:$0xff]  ;;  %v40738_v12 = vld [vmem:[#allocation81_spill] sm:$0xff] }
 0x161   : > { %28673 = vmatprep.mubr.f32.mxu0 %v8479_v18  ;;  %v8528_v18 = vsub.f32 %v34574_v36, %v39734_v63  ;;  %v8548_v63 = vsub.f32 %v34592_v6, %v39740_v26  ;;  %v39744_v59 = vand.u32 4294901760, %v34610_v39  ;;  %v40737_v53 = vld [vmem:[#allocation74_spill] sm:$0xff] }
 0x162   : > { %40732 = vst [vmem:[#allocation56_spill] sm:$0xff] %v34601_v9  ;;  %v39741_v35 = vand.u32 4294901760, %v34601_v9  ;;  %v40739_v26 = vld [vmem:[#allocation82_spill] sm:$0xff] }
 0x163   : > { %27656 = vmatmul.mubr.f32.gmra.mrb[10].mxu1 %v40733_v17  ;;  %v8529_v44 = vand.u32 4294901760, %v8528_v18  ;;  %v8549_v36 = vand.u32 4294901760, %v8548_v63  ;;  %v40743_v63 = vld [vmem:[#allocation99_spill] sm:$0xff] }
 0x164   : > { %27658 = vmatprep.mubr.f32.mxu1 %v40734_v50  ;;  %28674 = vmatmul.mubr.f32.gmra.mrb[22].mxu0 %v8489_v3  ;;  %v40736_v3 = vld [vmem:[#allocation72_spill] sm:$0xff]  ;;  %v8558_v55 = vsub.f32 %v34601_v9, %v39741_v35  ;;  %v40741_v35 = vld [vmem:[#allocation90_spill] sm:$0xff]  ;;  %v40742_v9 = vld [vmem:[#allocation95_spill] sm:$0xff] }
 0x165   : > { %28676 = vmatprep.mubr.f32.mxu0 %v8499_v30  ;;  %v8539_v30 = vand.u32 4294901760, %v8538_v23 }
 0x166   : > { %v8559_v18 = vand.u32 4294901760, %v8558_v55  ;;  %v40747_v55 = vld [vmem:[#allocation110_spill] sm:$0xff] }
 0x167   : > { %27659 = vmatmul.mubr.f32.gmra.mrb[12].mxu1 %v40735_v11 }
 0x168   : > { %27661 = vmatprep.mubr.f32.mxu1 %v40736_v3  ;;  %28677 = vmatmul.mubr.f32.gmra.mrb[24].mxu0 %v8509_v56  ;;  %v8568_v56 = vsub.f32 %v34610_v39, %v39744_v59  ;;  %v40751_v59 = vld [vmem:[#allocation116_spill] sm:$0xff] }
 0x169   : > { %28679 = vmatprep.mubr.f32.mxu0 %v8519_v38  ;;  %v40740_v38 = vld [vmem:[#allocation88_spill] sm:$0xff] }
 0x16a   : > { %v8569_v23 = vand.u32 4294901760, %v8568_v56  ;;  %v40748_v56 = vld [vmem:[#allocation112_spill] sm:$0xff] }
 0x16b   : > { %27662 = vmatmul.mubr.f32.gmra.mrb[14].mxu1 %v40737_v53 }
 0x16c   : > { %27664 = vmatprep.mubr.f32.mxu1 %v40738_v12  ;;  %28680 = vmatmul.mubr.f32.gmra.mrb[26].mxu0 %v8529_v44  ;;  %v40744_v44 = vld [vmem:[#allocation103_spill] sm:$0xff] }
 0x16d   : > { %28682 = vmatprep.mubr.f32.mxu0 %v8539_v30  ;;  %v40746_v30 = vld [vmem:[#allocation108_spill] sm:$0xff] }
 0x16f   : > { %27665 = vmatmul.mubr.f32.gmra.mrb[16].mxu1 %v40739_v26 }
 0x170   : > { %27667 = vmatprep.mubr.f32.mxu1 %v40740_v38  ;;  %28683 = vmatmul.mubr.f32.gmra.mrb[28].mxu0 %v8549_v36  ;;  %v40745_v36 = vld [vmem:[#allocation105_spill] sm:$0xff] }
 0x171   : > { %28685 = vmatprep.mubr.f32.mxu0 %v8559_v18  ;;  %v40750_v18 = vld [vmem:[#allocation115_spill] sm:$0xff] }
 0x173   : > { %27668 = vmatmul.mubr.f32.gmra.mrb[18].mxu1 %v40741_v35 }
 0x174   : > { %27670 = vmatprep.mubr.f32.mxu1 %v40742_v9  ;;  %28686 = vmatmul.mubr.f32.gmra.mrb[30].mxu0 %v8569_v23  ;;  %v34655_v23 = vsub.f32 %v34477_v49, %v34494_v15 }
 0x175   : > { %28690 = vmatprep.mubr.f32.mxu0 %v34229_v58  ;;  %v363_v58 = vld [vmem:[#allocation2 + $0xe0] sm:$0xff] }
 0x177   : > { %27671 = vmatmul.mubr.f32.gmra.mrb[20].mxu1 %v40743_v63 }
 0x178   : > { %27673 = vmatprep.mubr.f32.mxu1 %v40744_v44  ;;  %28691 = vmatmul.mubr.f32.vlgmr.msra.gmra.mrb[0].mxu0 %v34236_v60 }
 0x179   : > { %28739 = vmatpush3.msra.mxu0 %v34149_v10  ;;  %28693 = vmatprep.mubr.f32.mxu0 %v34244_v19  ;;  %v40749_v10 = vld [vmem:[#allocation113_spill] sm:$0xff] }
 0x17a   : > { %28788 = vmatprep.subr.mxu0 %v34090_v25 }
 0x17b   : > { %27674 = vmatmul.mubr.f32.gmra.mrb[22].mxu1 %v40745_v36 }
 0x17c   : > { %27676 = vmatprep.mubr.f32.mxu1 %v40746_v30  ;;  %28694 = vmatmul.mubr.f32.gmra.mrb[2].mxu0 %v34254_v43 }
 0x17d   : > { %28696 = vmatprep.mubr.f32.mxu0 %v34263_v7  ;;  %v34659_v7 = vand.u32 4294901760, %v34655_v23 }
 0x17f   : > { %27677 = vmatmul.mubr.f32.gmra.mrb[24].mxu1 %v40747_v55  ;;  %40752 = vst [vmem:[#allocation59_spill] sm:$0xff] %v34659_v7 }
 0x180   : > { %27679 = vmatprep.mubr.f32.mxu1 %v40748_v56  ;;  %28697 = vmatmul.mubr.f32.gmra.mrb[4].mxu0 %v34274_v4  ;;  %v40753_v4 = vld [vmem:[#allocation117_spill] sm:$0xff] }
 0x181   : > { %28699 = vmatprep.mubr.f32.mxu0 %v34287_v27  ;;  %v40754_v27 = vld [vmem:[#allocation118_spill] sm:$0xff] }
 0x183   : > { %27680 = vmatmul.mubr.f32.gmra.mrb[26].mxu1 %v40749_v10 }
 0x184   : > { %27682 = vmatprep.mubr.f32.mxu1 %v40750_v18  ;;  %28700 = vmatmul.mubr.f32.gmra.mrb[6].mxu0 %v34307_v22  ;;  %v2779_v22 = vsub.f32 %v34655_v23, %v34659_v7  ;;  %v40794_v7 = vld [vmem:[#allocation91_spill] sm:$0xff] }
 0x185   : > { %28702 = vmatprep.mubr.f32.mxu0 %v34313_v2  ;;  %v40813_v2 = vld [vmem:[#allocation143_spill] sm:$0xff] }
 0x186   : > { %v34670_v49 = vand.u32 4294901760, %v2779_v22  ;;  %v40755_v22 = vld [vmem:[#allocation155_spill] sm:$0xff] }
 0x187   : > { %27683 = vmatmul.mubr.f32.gmra.mrb[28].mxu1 %v40751_v59 }
 0x188   : > { %27685 = vmatprep.mubr.f32.mxu1 %v40753_v4  ;;  %28703 = vmatmul.mubr.f32.gmra.mrb[8].mxu0 %v34329_v40 }
 0x189   : > { %28705 = vmatprep.mubr.f32.mxu0 %v34331_v24 }
 0x18b   : > { %27686 = vmatmul.mubr.f32.gmra.mrb[30].mxu1 %v40754_v27 }
 0x18c   : > { %27690 = vmatprep.mubr.f32.mxu1 %v40692_v31  ;;  %28706 = vmatmul.mubr.f32.gmra.mrb[10].mxu0 %v34347_v8  ;;  %v40757_v31 = vld [vmem:[#allocation157_spill] sm:$0xff]  ;;  %v40805_v8 = vld [vmem:[#allocation138_spill] sm:$0xff] }
 0x18d   : > { %28708 = vmatprep.mubr.f32.mxu0 %v34365_v28 }
 0x18f   : > { %27691 = vmatmul.mubr.f32.vlgmr.msra.gmra.mrb[0].mxu1 %v40696_v62 }
 0x190   : > { %27693 = vmatprep.mubr.f32.mxu1 %v40700_v34  ;;  %28709 = vmatmul.mubr.f32.gmra.mrb[12].mxu0 %v34367_v0  ;;  %v40759_v34 = vld [vmem:[#allocation11_spill] sm:$0xff]  ;;  %v40797_v0 = vld [vmem:[#allocation136_spill] sm:$0xff] }
 0x191   : > { %28711 = vmatprep.mubr.f32.mxu0 %v34375_v54  ;;  %27739 = vmatpush3.msra.mxu1 %v34494_v15 }
 0x192   : > { %27788 = vmatprep.subr.mxu1 %v34670_v49 }
 0x193   : > { %27694 = vmatmul.mubr.f32.gmra.mrb[2].mxu1 %v40704_v51  ;;  %v40761_v51 = vld [vmem:[#allocation35_spill] sm:$0xff] }
 0x194   : > { %27696 = vmatprep.mubr.f32.mxu1 %v40706_v33  ;;  %28712 = vmatmul.mubr.f32.gmra.mrb[14].mxu0 %v34401_v29  ;;  %v344_v33 = vld [vmem:[#allocation2] sm:$0xff] }
 0x195   : > { %28714 = vmatprep.mubr.f32.mxu0 %v34412_v45 }
 0x197   : > { %27697 = vmatmul.mubr.f32.gmra.mrb[4].mxu1 %v40712_v57  ;;  %v40756_v57 = vld [vmem:[#allocation40_spill] sm:$0xff] }
 0x198   : > { %27699 = vmatprep.mubr.f32.mxu1 %v40715_v32  ;;  %28715 = vmatmul.mubr.f32.gmra.mrb[16].mxu0 %v34428_v37 }
 0x199   : > { %28717 = vmatprep.mubr.f32.mxu0 %v34436_v41  ;;  %v40789_v41 = vld [vmem:[#allocation114_spill] sm:$0xff] }
 0x19b   : > { %27700 = vmatmul.mubr.f32.gmra.mrb[6].mxu1 %v40720_v46  ;;  %v347_v46 = vld [vmem:[#allocation2 + $0x20] sm:$0xff] }
 0x19c   : > { %27702 = vmatprep.mubr.f32.mxu1 %v40722_v21  ;;  %28718 = vmatmul.mubr.f32.gmra.mrb[18].mxu0 %v34454_v47  ;;  %v40762_v21 = vld [vmem:[#allocation43_spill] sm:$0xff] }
 0x19d   : > { %28720 = vmatprep.mubr.f32.mxu0 %v34462_v16 }
 0x19f   : > { %27703 = vmatmul.mubr.f32.gmra.mrb[8].mxu1 %v40728_v13  ;;  %v345_v13 = vld [vmem:[#allocation2 + $0x8] sm:$0xff] }
 0x1a0   : > { %27705 = vmatprep.mubr.f32.mxu1 %v40729_v42  ;;  %28721 = vmatmul.mubr.f32.gmra.mrb[20].mxu0 %v34472_v52  ;;  %v346_v42 = vld [vmem:[#allocation2 + $0x18] sm:$0xff]  ;;  %v2294_v62 = vsel %vm223_vm1, %v345_v13, 0 }
 0x1a1   : > { %28723 = vmatprep.mubr.f32.mxu0 %v34474_v61 }
 0x1a3   : > { %27706 = vmatmul.mubr.f32.gmra.mrb[10].mxu1 %v40733_v17  ;;  %v40758_v17 = vld [vmem:[#allocation159_spill] sm:$0xff] }
 0x1a4   : > { %27708 = vmatprep.mubr.f32.mxu1 %v40734_v50  ;;  %28724 = vmatmul.mubr.f32.gmra.mrb[22].mxu0 %v34503_v14  ;;  %v348_v50 = vld [vmem:[#allocation2 + $0x30] sm:$0xff]  ;;  %v354_v14 = vld [vmem:[#allocation2 + $0x78] sm:$0xff] }
 0x1a5   : > { %28726 = vmatprep.mubr.f32.mxu0 %v34510_v5  ;;  %v353_v5 = vld [vmem:[#allocation2 + $0x68] sm:$0xff] }
 0x1a7   : > { %27709 = vmatmul.mubr.f32.gmra.mrb[12].mxu1 %v40735_v11  ;;  %v40764_v11 = vld [vmem:[#allocation14_spill] sm:$0xff] }
 0x1a8   : > { %27711 = vmatprep.mubr.f32.mxu1 %v40736_v3  ;;  %28727 = vmatmul.mubr.f32.gmra.mrb[24].mxu0 %v34533_v20  ;;  %v2300_v3 = vsel %vm223_vm1, %v347_v46, 0  ;;  %v40781_v20 = vld [vmem:[#allocation107_spill] sm:$0xff] }
 0x1a9   : > { %28729 = vmatprep.mubr.f32.mxu0 %v40755_v22 }
 0x1ab   : > { %27712 = vmatmul.mubr.f32.gmra.mrb[14].mxu1 %v40737_v53  ;;  %v2291_v53 = vsel %vm223_vm1, %v344_v33, 0  ;;  %v40768_v33 = vld [vmem:[#allocation58_spill] sm:$0xff] }
 0x1ac   : > { %27714 = vmatprep.mubr.f32.mxu1 %v40738_v12  ;;  %28730 = vmatmul.mubr.f32.gmra.mrb[26].mxu0 %v40756_v57  ;;  %v34716_v32 = vand.u32 4294901760, %v2291_v53  ;;  %v34724_v12 = vand.u32 4294901760, %v2294_v62 }
 0x1ad   : > { %28732 = vmatprep.mubr.f32.mxu0 %v40757_v31  ;;  %v352_v31 = vld [vmem:[#allocation2 + $0x60] sm:$0xff] }
 0x1ae   : > { %40760 = vst [vmem:[#allocation65_spill] sm:$0xff] %v34716_v32  ;;  %40763 = vst [vmem:[#allocation66_spill] sm:$0xff] %v34724_v12  ;;  %v34739_v13 = vsub.f32 %v2294_v62, %v34724_v12  ;;  %v351_v62 = vld [vmem:[#allocation2 + $0x50] sm:$0xff] }
 0x1af   : > { %27715 = vmatmul.mubr.f32.gmra.mrb[16].mxu1 %v40739_v26 }
 0x1b0   : > { %27717 = vmatprep.mubr.f32.mxu1 %v40740_v38  ;;  %28733 = vmatmul.mubr.f32.gmra.mrb[28].mxu0 %v34576_v1  ;;  %v40767_v38 = vld [vmem:[#allocation50_spill] sm:$0xff]  ;;  %40769 = vst [vmem:[#allocation81_spill] sm:$0xff] %v34739_v13 }
 0x1b1   : > { %28735 = vmatprep.mubr.f32.mxu0 %v40758_v17  ;;  %v40774_v17 = vld [vmem:[#allocation75_spill] sm:$0xff] }
 0x1b3   : > { %27718 = vmatmul.mubr.f32.gmra.mrb[18].mxu1 %v40741_v35  ;;  %v2297_v35 = vsel %vm223_vm1, %v346_v42, 0 }
 0x1b4   : > { %27720 = vmatprep.mubr.f32.mxu1 %v40742_v9  ;;  %28736 = vmatmul.mubr.f32.gmra.mrb[30].mxu0 %v34594_v48  ;;  %v34729_v9 = vsub.f32 %v2291_v53, %v34716_v32  ;;  %v34731_v26 = vand.u32 4294901760, %v2297_v35  ;;  %v350_v53 = vld [vmem:[#allocation2 + $0x48] sm:$0xff]  ;;  %v40773_v48 = vld [vmem:[#allocation67_spill] sm:$0xff] }
 0x1b5   : > { %28740 = vmatprep.mubr.f32.mxu0 %v40759_v34  ;;  %v2309_v1 = vsel %vm223_vm1, %v350_v53, 0  ;;  %v2312_v53 = vsel %vm223_vm1, %v351_v62, 0  ;;  %v40784_v62 = vand.u32 4294901760, %v34739_v13 }
 0x1b6   : > { %40765 = vst [vmem:[#allocation72_spill] sm:$0xff] %v34729_v9  ;;  %40766 = vst [vmem:[#allocation74_spill] sm:$0xff] %v34731_v26  ;;  %v34746_v46 = vsub.f32 %v2297_v35, %v34731_v26 }
 0x1b7   : > { %27721 = vmatmul.mubr.f32.gmra.mrb[20].mxu1 %v40743_v63  ;;  %v2303_v63 = vsel %vm223_vm1, %v348_v50, 0  ;;  %v2468_v61 = vsub.f32 %v34739_v13, %v40784_v62  ;;  %v355_v62 = vld [vmem:[#allocation2 + $0x80] sm:$0xff] }
 0x1b8   : > { %27723 = vmatprep.mubr.f32.mxu1 %v40744_v44  ;;  %28741 = vmatmul.mubr.f32.vlgmr.msra.gmra.mrb[0].mxu0 %v40761_v51  ;;  %v349_v44 = vld [vmem:[#allocation2 + $0x38] sm:$0xff]  ;;  %40771 = vst [vmem:[#allocation88_spill] sm:$0xff] %v34746_v46  ;;  %v40785_v52 = vand.u32 4294901760, %v34746_v46 }
 0x1b9   : > { %28789 = vmatpush3.msra.mxu0 %v34090_v25  ;;  %28743 = vmatprep.mubr.f32.mxu0 %v40762_v21  ;;  %v2306_v50 = vsel %vm223_vm1, %v349_v44, 0  ;;  %v40777_v44 = vand.u32 4294901760, %v34729_v9  ;;  %v2469_v45 = vand.u32 4294901760, %v2468_v61  ;;  %v358_v61 = vld [vmem:[#allocation2 + $0xa8] sm:$0xff] }
 0x1ba   : > { %28838 = vmatprep.subr.mxu0 %v40764_v11  ;;  %v34759_v35 = vand.u32 4294901760, %v2306_v50 }
 0x1bb   : > { %27724 = vmatmul.mubr.f32.gmra.mrb[22].mxu1 %v40745_v36  ;;  %v34741_v36 = vand.u32 4294901760, %v2300_v3 }
 0x1bc   : > { %27726 = vmatprep.mubr.f32.mxu1 %v40746_v30  ;;  %28744 = vmatmul.mubr.f32.gmra.mrb[2].mxu0 %v40767_v38  ;;  %v34748_v30 = vand.u32 4294901760, %v2303_v63  ;;  %40776 = vst [vmem:[#allocation99_spill] sm:$0xff] %v34759_v35  ;;  %v34778_v57 = vsub.f32 %v2306_v50, %v34759_v35 }
 0x1bd   : > { %28746 = vmatprep.mubr.f32.mxu0 %v40768_v33  ;;  %40770 = vst [vmem:[#allocation82_spill] sm:$0xff] %v34741_v36  ;;  %v34757_v42 = vsub.f32 %v2300_v3, %v34741_v36  ;;  %v40779_v3 = vld [vmem:[#allocation92_spill] sm:$0xff] }
 0x1be   : > { %40772 = vst [vmem:[#allocation90_spill] sm:$0xff] %v34748_v30  ;;  %v34767_v22 = vsub.f32 %v2303_v63, %v34748_v30  ;;  %40782 = vst [vmem:[#allocation108_spill] sm:$0xff] %v34778_v57  ;;  %v34780_v63 = vand.u32 4294901760, %v2312_v53 }
 0x1bf   : > { %27727 = vmatmul.mubr.f32.gmra.mrb[24].mxu1 %v40747_v55  ;;  %40775 = vst [vmem:[#allocation95_spill] sm:$0xff] %v34757_v42  ;;  %v34772_v55 = vand.u32 4294901760, %v2309_v1 }
 0x1c0   : > { %27729 = vmatprep.mubr.f32.mxu1 %v40748_v56  ;;  %28747 = vmatmul.mubr.f32.gmra.mrb[4].mxu0 %v40773_v48  ;;  %v2458_v56 = vsub.f32 %v34729_v9, %v40777_v44  ;;  %40778 = vst [vmem:[#allocation103_spill] sm:$0xff] %v34767_v22  ;;  %40783 = vst [vmem:[#allocation110_spill] sm:$0xff] %v34780_v63  ;;  %v40786_v44 = vld [vmem:[#allocation111_spill] sm:$0xff]  ;;  %v34805_v37 = vsub.f32 %v2312_v53, %v34780_v63 }
 0x1c1   : > { %28749 = vmatprep.mubr.f32.mxu0 %v40774_v17  ;;  %40780 = vst [vmem:[#allocation105_spill] sm:$0xff] %v34772_v55  ;;  %v34793_v50 = vsub.f32 %v2309_v1, %v34772_v55  ;;  %v356_v1 = vld [vmem:[#allocation2 + $0x90] sm:$0xff] }
 0x1c2   : > { %40791 = vst [vmem:[#allocation115_spill] sm:$0xff] %v34805_v37 }
 0x1c3   : > { %27730 = vmatmul.mubr.f32.gmra.mrb[26].mxu1 %v40749_v10  ;;  %v2315_v10 = vsel %vm223_vm1, %v352_v31, 0  ;;  %v2478_v31 = vsub.f32 %v34746_v46, %v40785_v52  ;;  %40787 = vst [vmem:[#allocation112_spill] sm:$0xff] %v34793_v50  ;;  %v40790_v52 = vand.u32 4294901760, %v34757_v42  ;;  %v2327_v46 = vsel %vm223_vm1, %v356_v1, 0 }
 0x1c4   : > { %27732 = vmatprep.mubr.f32.mxu1 %v40750_v18  ;;  %28750 = vmatmul.mubr.f32.gmra.mrb[6].mxu0 %v40779_v3  ;;  %v2459_v18 = vand.u32 4294901760, %v2458_v56  ;;  %v34795_v47 = vand.u32 4294901760, %v2315_v10  ;;  %v2321_v56 = vsel %vm223_vm1, %v354_v14, 0  ;;  %v2324_v14 = vsel %vm223_vm1, %v355_v62, 0 }
 0x1c5   : > { %28752 = vmatprep.mubr.f32.mxu0 %v40781_v20  ;;  %v2488_v16 = vsub.f32 %v34757_v42, %v40790_v52  ;;  %v2479_v54 = vand.u32 4294901760, %v2478_v31  ;;  %v40795_v52 = vand.u32 4294901760, %v34767_v22  ;;  %v34827_v28 = vand.u32 4294901760, %v2324_v14 }
 0x1c6   : > { %40788 = vst [vmem:[#allocation113_spill] sm:$0xff] %v34795_v47  ;;  %v34819_v42 = vsub.f32 %v2315_v10, %v34795_v47  ;;  %v2333_v1 = vsel %vm223_vm1, %v358_v61, 0  ;;  %v360_v61 = vld [vmem:[#allocation2 + $0xc0] sm:$0xff] }
 0x1c7   : > { %27733 = vmatmul.mubr.f32.gmra.mrb[28].mxu1 %v40751_v59  ;;  %v2318_v59 = vsel %vm223_vm1, %v353_v5, 0  ;;  %v34810_v5 = vand.u32 4294901760, %v2321_v56  ;;  %v2489_v62 = vand.u32 4294901760, %v2488_v16  ;;  %40799 = vst [vmem:[#allocation11_spill] sm:$0xff] %v34827_v28  ;;  %v40802_v16 = vld [vmem:[#allocation137_spill] sm:$0xff] }
 0x1c8   : > { %27735 = vmatprep.mubr.f32.mxu1 %v40753_v4  ;;  %28753 = vmatmul.mubr.f32.gmra.mrb[8].mxu0 %v40786_v44  ;;  %v34808_v29 = vand.u32 4294901760, %v2318_v59  ;;  %v2498_v4 = vsub.f32 %v34767_v22, %v40795_v52  ;;  %40796 = vst [vmem:[#allocation118_spill] sm:$0xff] %v34819_v42  ;;  %v40811_v24 = vand.u32 4294901760, %v34819_v42 }
 0x1c9   : > { %28755 = vmatprep.mubr.f32.mxu0 %v40789_v41  ;;  %40793 = vst [vmem:[#allocation117_spill] sm:$0xff] %v34810_v5  ;;  %v34833_v10 = vsub.f32 %v2321_v56, %v34810_v5 }
 0x1ca   : > { %40792 = vst [vmem:[#allocation116_spill] sm:$0xff] %v34808_v29  ;;  %v34830_v52 = vsub.f32 %v2318_v59, %v34808_v29  ;;  %v2499_v22 = vand.u32 4294901760, %v2498_v4  ;;  %v359_v59 = vld [vmem:[#allocation2 + $0xb0] sm:$0xff]  ;;  %v34851_v4 = vand.u32 4294901760, %v2333_v1  ;;  %v2538_v40 = vsub.f32 %v34819_v42, %v40811_v24 }
 0x1cb   : > { %27736 = vmatmul.mubr.f32.gmra.mrb[30].mxu1 %v40754_v27  ;;  %v357_v27 = vld [vmem:[#allocation2 + $0x98] sm:$0xff]  ;;  %40801 = vst [vmem:[#allocation43_spill] sm:$0xff] %v34833_v10 }
 0x1cc   : > { %27740 = vmatprep.mubr.f32.mxu1 %v2459_v18  ;;  %28756 = vmatmul.mubr.f32.gmra.mrb[10].mxu0 %v40794_v7  ;;  %v40798_v18 = vand.u32 4294901760, %v34778_v57  ;;  %40800 = vst [vmem:[#allocation35_spill] sm:$0xff] %v34830_v52  ;;  %v2330_v53 = vsel %vm223_vm1, %v357_v27, 0  ;;  %v34847_v27 = vsub.f32 %v2324_v14, %v34827_v28  ;;  %40808 = vst [vmem:[#allocation67_spill] sm:$0xff] %v34851_v4  ;;  %v40810_v14 = vld [vmem:[#allocation141_spill] sm:$0xff] }
 0x1cd   : > { %28758 = vmatprep.mubr.f32.mxu0 %v40797_v0 }
 0x1ce   : > { %v2508_v31 = vsub.f32 %v34778_v57, %v40798_v18  ;;  %v40803_v18 = vand.u32 4294901760, %v34793_v50  ;;  %v34842_v57 = vand.u32 4294901760, %v2327_v46  ;;  %40806 = vst [vmem:[#allocation50_spill] sm:$0xff] %v34847_v27 }
 0x1cf   : > { %27741 = vmatmul.mubr.f32.vlgmr.msra.gmra.mrb[0].mxu1 %v2469_v45 }
 0x1d0   : > { %27743 = vmatprep.mubr.f32.mxu1 %v2479_v54  ;;  %28759 = vmatmul.mubr.f32.gmra.mrb[12].mxu0 %v40802_v16  ;;  %v2518_v13 = vsub.f32 %v34793_v50, %v40803_v18  ;;  %40804 = vst [vmem:[#allocation14_spill] sm:$0xff] %v34842_v57  ;;  %v2509_v56 = vand.u32 4294901760, %v2508_v31  ;;  %v34849_v54 = vand.u32 4294901760, %v2330_v53  ;;  %v40809_v18 = vand.u32 4294901760, %v34805_v37  ;;  %v361_v50 = vld [vmem:[#allocation2 + $0xc8] sm:$0xff] }
 0x1d1   : > { %28761 = vmatprep.mubr.f32.mxu0 %v40805_v8  ;;  %27789 = vmatpush3.msra.mxu1 %v34670_v49  ;;  %v2336_v31 = vsel %vm223_vm1, %v359_v59, 0  ;;  %v40819_v49 = vld [vmem:[#allocation145_spill] sm:$0xff]  ;;  %v2342_v60 = vsel %vm223_vm1, %v361_v50, 0 }
 0x1d2   : > { %40807 = vst [vmem:[#allocation58_spill] sm:$0xff] %v34849_v54  ;;  %27838 = vmatprep.subr.mxu1 %v34655_v23  ;;  %v2528_v45 = vsub.f32 %v34805_v37, %v40809_v18  ;;  %v2519_v9 = vand.u32 4294901760, %v2518_v13  ;;  %v2339_v18 = vsel %vm223_vm1, %v360_v61, 0  ;;  %v34871_v59 = vsub.f32 %v2330_v53, %v34849_v54  ;;  %v362_v37 = vld [vmem:[#allocation2 + $0xd8] sm:$0xff] }
 0x1d3   : > { %27744 = vmatmul.mubr.f32.gmra.mrb[2].mxu1 %v2489_v62  ;;  %v34865_v62 = vsub.f32 %v2327_v46, %v34842_v57  ;;  %v34876_v13 = vand.u32 4294901760, %v2336_v31  ;;  %v40817_v46 = vand.u32 4294901760, %v34830_v52  ;;  %v40818_v61 = vand.u32 4294901760, %v34833_v10 }
 0x1d4   : > { %27746 = vmatprep.mubr.f32.mxu1 %v2499_v22  ;;  %28762 = vmatmul.mubr.f32.gmra.mrb[14].mxu0 %v40810_v14  ;;  %40814 = vst [vmem:[#allocation92_spill] sm:$0xff] %v34871_v59  ;;  %v34874_v22 = vsub.f32 %v2333_v1, %v34851_v4  ;;  %v2529_v24 = vand.u32 4294901760, %v2528_v45  ;;  %v2539_v53 = vand.u32 4294901760, %v2538_v40  ;;  %v34886_v19 = vand.u32 4294901760, %v2339_v18  ;;  %v364_v1 = vld [vmem:[#allocation2 + $0xf0] sm:$0xff] }
 0x1d5   : > { %40812 = vst [vmem:[#allocation75_spill] sm:$0xff] %v34865_v62  ;;  %28764 = vmatprep.mubr.f32.mxu0 %v40813_v2  ;;  %40816 = vst [vmem:[#allocation111_spill] sm:$0xff] %v34876_v13  ;;  %v2548_v42 = vsub.f32 %v34830_v52, %v40817_v46  ;;  %v2558_v43 = vsub.f32 %v34833_v10, %v40818_v61  ;;  %v2345_v45 = vsel %vm223_vm1, %v362_v37, 0  ;;  %v40822_v46 = vand.u32 4294901760, %v34847_v27  ;;  %v40825_v37 = vld [vmem:[#allocation12_spill] sm:$0xff] }
 0x1d6   : > { %40815 = vst [vmem:[#allocation107_spill] sm:$0xff] %v34874_v22  ;;  %40820 = vst [vmem:[#allocation114_spill] sm:$0xff] %v34886_v19  ;;  %v34897_v40 = vsub.f32 %v2336_v31, %v34876_v13  ;;  %v34899_v4 = vand.u32 4294901760, %v2342_v60  ;;  %v40826_v54 = vand.u32 4294901760, %v34865_v62  ;;  %v34908_v61 = vand.u32 4294901760, %v2345_v45 }
 0x1d7   : > { %27747 = vmatmul.mubr.f32.gmra.mrb[4].mxu1 %v2509_v56  ;;  %v40821_v56 = vld [vmem:[#allocation147_spill] sm:$0xff]  ;;  %v2568_v52 = vsub.f32 %v34847_v27, %v40822_v46  ;;  %v2549_v10 = vand.u32 4294901760, %v2548_v42  ;;  %v2559_v50 = vand.u32 4294901760, %v2558_v43  ;;  %v2348_v31 = vsel %vm223_vm1, %v363_v58, 0  ;;  %v365_v27 = vld [vmem:[#allocation2 + $0xf8] sm:$0xff] }
 0x1d8   : > { %27749 = vmatprep.mubr.f32.mxu1 %v2519_v9  ;;  %28765 = vmatmul.mubr.f32.gmra.mrb[16].mxu0 %v40819_v49  ;;  %40823 = vst [vmem:[#allocation91_spill] sm:$0xff] %v34897_v40  ;;  %40824 = vst [vmem:[#allocation136_spill] sm:$0xff] %v34899_v4  ;;  %v2578_v46 = vsub.f32 %v34865_v62, %v40826_v54  ;;  %v34906_v9 = vsub.f32 %v2339_v18, %v34886_v19  ;;  %v40829_v42 = vld [vmem:[#allocation151_spill] sm:$0xff]  ;;  %v2351_v43 = vsel %vm223_vm1, %v364_v1, 0  ;;  %v40834_v1 = vld [vmem:[#allocation13_spill] sm:$0xff] }
 0x1d9   : > { %28767 = vmatprep.mubr.f32.mxu0 %v40821_v56  ;;  %40828 = vst [vmem:[#allocation138_spill] sm:$0xff] %v34908_v61  ;;  %v40830_v13 = vand.u32 4294901760, %v34871_v59  ;;  %v40831_v54 = vand.u32 4294901760, %v34874_v22  ;;  %v34921_v58 = vsub.f32 %v2342_v60, %v34899_v4  ;;  %v34923_v19 = vand.u32 4294901760, %v2348_v31  ;;  %v40837_v60 = vld [vmem:[#allocation152_spill] sm:$0xff] }
 0x1da   : > { %40827 = vst [vmem:[#allocation137_spill] sm:$0xff] %v34906_v9  ;;  %v2354_v28 = vsel %vm223_vm1, %v365_v27, 0  ;;  %v34932_v62 = vand.u32 4294901760, %v2351_v43  ;;  %v40838_v27 = vand.u32 4294901760, %v34897_v40 }
 0x1db   : > { %27750 = vmatmul.mubr.f32.gmra.mrb[6].mxu1 %v2529_v24  ;;  %v366_v24 = vld [vmem:[#allocation2 + $0x108] sm:$0xff]  ;;  %v2588_v57 = vsub.f32 %v34871_v59, %v40830_v13  ;;  %v2598_v18 = vsub.f32 %v34874_v22, %v40831_v54  ;;  %40832 = vst [vmem:[#allocation141_spill] sm:$0xff] %v34921_v58  ;;  %40833 = vst [vmem:[#allocation143_spill] sm:$0xff] %v34923_v19  ;;  %v2579_v13 = vand.u32 4294901760, %v2578_v46  ;;  %v368_v22 = vld [vmem:[#allocation2 + $0x120] sm:$0xff] }
 0x1dc   : > { %27752 = vmatprep.mubr.f32.mxu1 %v2539_v53  ;;  %28768 = vmatmul.mubr.f32.gmra.mrb[18].mxu0 %v40825_v37  ;;  %v2569_v53 = vand.u32 4294901760, %v2568_v52  ;;  %v2357_v52 = vsel %vm223_vm1, %v366_v24, 0  ;;  %v34930_v54 = vsub.f32 %v2345_v45, %v34908_v61  ;;  %40836 = vst [vmem:[#allocation147_spill] sm:$0xff] %v34932_v62  ;;  %v2608_v24 = vsub.f32 %v34897_v40, %v40838_v27 }
 0x1dd   : > { %28770 = vmatprep.mubr.f32.mxu0 %v40829_v42  ;;  %v2589_v4 = vand.u32 4294901760, %v2588_v57  ;;  %v2599_v46 = vand.u32 4294901760, %v2598_v18  ;;  %v34944_v59 = vsub.f32 %v2348_v31, %v34923_v19  ;;  %v40843_v57 = vand.u32 4294901760, %v34906_v9  ;;  %v40845_v18 = vld [vmem:[#allocation31_spill] sm:$0xff]  ;;  %v369_v31 = vld [vmem:[#allocation2 + $0x128] sm:$0xff]  ;;  %v370_v19 = vld [vmem:[#allocation2 + $0x138] sm:$0xff] }
 0x1de   : > { %40835 = vst [vmem:[#allocation145_spill] sm:$0xff] %v34930_v54  ;;  %v34953_v5 = vsub.f32 %v2351_v43, %v34932_v62  ;;  %v40849_v40 = vand.u32 4294901760, %v34921_v58  ;;  %v40851_v62 = vld [vmem:[#allocation33_spill] sm:$0xff] }
 0x1df   : > { %27753 = vmatmul.mubr.f32.gmra.mrb[8].mxu1 %v2549_v10  ;;  %v367_v10 = vld [vmem:[#allocation2 + $0x110] sm:$0xff]  ;;  %40841 = vst [vmem:[#allocation160_spill] sm:$0xff] %v34944_v59  ;;  %v2618_v27 = vsub.f32 %v34906_v9, %v40843_v57  ;;  %v2609_v57 = vand.u32 4294901760, %v2608_v24  ;;  %v40853_v24 = vld [vmem:[#allocation156_spill] sm:$0xff] }
 0x1e0   : > { %27755 = vmatprep.mubr.f32.mxu1 %v2559_v50  ;;  %28771 = vmatmul.mubr.f32.gmra.mrb[20].mxu0 %v40834_v1  ;;  %v34938_v50 = vand.u32 4294901760, %v2354_v28  ;;  %v34940_v1 = vand.u32 4294901760, %v2357_v52  ;;  %v2360_v61 = vsel %vm223_vm1, %v367_v10, 0  ;;  %v2628_v43 = vsub.f32 %v34921_v58, %v40849_v40  ;;  %v371_v58 = vld [vmem:[#allocation2 + $0x140] sm:$0xff] }
 0x1e1   : > { %28773 = vmatprep.mubr.f32.mxu0 %v40837_v60  ;;  %v40842_v60 = vld [vmem:[#allocation24_spill] sm:$0xff]  ;;  %v34963_v10 = vand.u32 4294901760, %v2360_v61  ;;  %v2369_v40 = vsel %vm223_vm1, %v370_v19, 0  ;;  %v40857_v19 = vld [vmem:[#allocation41_spill] sm:$0xff] }
 0x1e2   : > { %40839 = vst [vmem:[#allocation12_spill] sm:$0xff] %v34938_v50  ;;  %40840 = vst [vmem:[#allocation151_spill] sm:$0xff] %v34940_v1  ;;  %v34958_v45 = vsub.f32 %v2354_v28, %v34938_v50  ;;  %v2619_v28 = vand.u32 4294901760, %v2618_v27  ;;  %v372_v27 = vld [vmem:[#allocation2 + $0x150] sm:$0xff] }
 0x1e3   : > { %27756 = vmatmul.mubr.f32.gmra.mrb[10].mxu1 %v2569_v53  ;;  %40844 = vst [vmem:[#allocation24_spill] sm:$0xff] %v34953_v5  ;;  %v2363_v53 = vsel %vm223_vm1, %v368_v22, 0  ;;  %40848 = vst [vmem:[#allocation163_spill] sm:$0xff] %v34963_v10 }
 0x1e4   : > { %27758 = vmatprep.mubr.f32.mxu1 %v2579_v13  ;;  %28774 = vmatmul.mubr.f32.gmra.mrb[22].mxu0 %v40842_v60  ;;  %40846 = vst [vmem:[#allocation161_spill] sm:$0xff] %v34958_v45  ;;  %v34961_v13 = vsub.f32 %v2357_v52, %v34940_v1  ;;  %v34969_v9 = vand.u32 4294901760, %v2363_v53  ;;  %v40852_v52 = vand.u32 4294901760, %v34930_v54 }
 0x1e5   : > { %28776 = vmatprep.mubr.f32.mxu0 %v40845_v18  ;;  %v2629_v18 = vand.u32 4294901760, %v2628_v43  ;;  %v40860_v43 = vld [vmem:[#allocation158_spill] sm:$0xff] }
 0x1e6   : > { %40847 = vst [vmem:[#allocation162_spill] sm:$0xff] %v34961_v13  ;;  %40850 = vst [vmem:[#allocation164_spill] sm:$0xff] %v34969_v9  ;;  %v2638_v1 = vsub.f32 %v34930_v54, %v40852_v52  ;;  %v40854_v52 = vand.u32 4294901760, %v34944_v59 }
 0x1e7   : > { %27759 = vmatmul.mubr.f32.gmra.mrb[12].mxu1 %v2589_v4  ;;  %v2366_v4 = vsel %vm223_vm1, %v369_v31, 0  ;;  %v34988_v31 = vsub.f32 %v2363_v53, %v34969_v9  ;;  %v373_v53 = vld [vmem:[#allocation2 + $0x158] sm:$0xff]  ;;  %v40862_v9 = vand.u32 4294901760, %v34961_v13 }
 0x1e8   : > { %27761 = vmatprep.mubr.f32.mxu1 %v2599_v46  ;;  %28777 = vmatmul.mubr.f32.gmra.mrb[24].mxu0 %v40851_v62  ;;  %v34982_v62 = vsub.f32 %v2360_v61, %v34963_v10  ;;  %v2648_v50 = vsub.f32 %v34944_v59, %v40854_v52  ;;  %v34990_v54 = vand.u32 4294901760, %v2366_v4  ;;  %v2639_v22 = vand.u32 4294901760, %v2638_v1 }
 0x1e9   : > { %28779 = vmatprep.mubr.f32.mxu0 %v40853_v24  ;;  %40855 = vst [vmem:[#allocation156_spill] sm:$0xff] %v34988_v31  ;;  %v40858_v46 = vand.u32 4294901760, %v34953_v5  ;;  %v34996_v10 = vand.u32 4294901760, %v2369_v40  ;;  %v2375_v52 = vsel %vm223_vm1, %v372_v27, 0  ;;  %v40861_v59 = vand.u32 4294901760, %v34958_v45 }
 0x1ea   : > { %40856 = vst [vmem:[#allocation165_spill] sm:$0xff] %v34990_v54  ;;  %v2678_v1 = vsub.f32 %v34961_v13, %v40862_v9  ;;  %v35018_v9 = vand.u32 4294901760, %v2375_v52 }
 0x1eb   : > { %27762 = vmatmul.mubr.f32.gmra.mrb[14].mxu1 %v2609_v57  ;;  %v2658_v61 = vsub.f32 %v34953_v5, %v40858_v46  ;;  %40859 = vst [vmem:[#allocation166_spill] sm:$0xff] %v34996_v10  ;;  %v2372_v57 = vsel %vm223_vm1, %v371_v58, 0  ;;  %v374_v46 = vld [vmem:[#allocation2 + $0x168] sm:$0xff]  ;;  %v2649_v5 = vand.u32 4294901760, %v2648_v50  ;;  %v375_v58 = vld [vmem:[#allocation2 + $0x170] sm:$0xff] }
 0x1ec   : > { %27764 = vmatprep.mubr.f32.mxu1 %v2619_v28  ;;  %28780 = vmatmul.mubr.f32.gmra.mrb[26].mxu0 %v40857_v19  ;;  %v2668_v28 = vsub.f32 %v34958_v45, %v40861_v59  ;;  %v35012_v27 = vand.u32 4294901760, %v2372_v57  ;;  %v35016_v45 = vsub.f32 %v2369_v40, %v34996_v10  ;;  %40864 = vst [vmem:[#allocation168_spill] sm:$0xff] %v35018_v9  ;;  %v2378_v19 = vsel %vm223_vm1, %v373_v53, 0 }
 0x1ed   : > { %28782 = vmatprep.mubr.f32.mxu0 %v40860_v43  ;;  %v35010_v43 = vsub.f32 %v2366_v4, %v34990_v54  ;;  %v2659_v59 = vand.u32 4294901760, %v2658_v61  ;;  %v2381_v50 = vsel %vm223_vm1, %v374_v46, 0  ;;  %v2679_v13 = vand.u32 4294901760, %v2678_v1 }
 0x1ee   : > { %40863 = vst [vmem:[#allocation167_spill] sm:$0xff] %v35012_v27  ;;  %v2669_v4 = vand.u32 4294901760, %v2668_v28  ;;  %v40866_v54 = vand.u32 4294901760, %v34982_v62  ;;  %v40867_v61 = vand.u32 4294901760, %v34988_v31  ;;  %v35031_v53 = vsub.f32 %v2372_v57, %v35012_v27 }
 0x1ef   : > { %27765 = vmatmul.mubr.f32.gmra.mrb[16].mxu1 %v2629_v18  ;;  %v40865_v18 = vld [vmem:[#allocation56_spill] sm:$0xff]  ;;  %v39890_v10 = vand.u32 4294901760, %v35010_v43  ;;  %v35038_v1 = vsub.f32 %v2375_v52, %v35018_v9  ;;  %v40870_v46 = vand.u32 4294901760, %v40759_v34  ;;  %v40873_v34 = vand.u32 4294901760, %v35016_v45 }
 0x1f0   : > { %27767 = vmatprep.mubr.f32.mxu1 %v2639_v22  ;;  %28783 = vmatmul.mubr.f32.gmra.mrb[28].mxu0 %v34592_v6  ;;  %v2688_v22 = vsub.f32 %v34982_v62, %v40866_v54  ;;  %v2698_v40 = vsub.f32 %v34988_v31, %v40867_v61  ;;  %v2384_v54 = vsel %vm223_vm1, %v375_v58, 0  ;;  %v40872_v31 = vand.u32 4294901760, %v40761_v51 }
 0x1f1   : > { %28785 = vmatprep.mubr.f32.mxu0 %v40865_v18  ;;  %v35033_v18 = vand.u32 4294901760, %v2378_v19  ;;  %v2708_v57 = vsub.f32 %v35010_v43, %v39890_v10  ;;  %v35052_v52 = vand.u32 4294901760, %v2384_v54  ;;  %v40948_v10 = vld [vmem:[#allocation103_spill] sm:$0xff] }
 0x1f2   : > { %v2689_v61 = vand.u32 4294901760, %v2688_v22  ;;  %v2699_v58 = vand.u32 4294901760, %v2698_v40  ;;  %v39888_v22 = vand.u32 4294901760, %v35038_v1 }
 0x1f3   : > { %27768 = vmatmul.mubr.f32.gmra.mrb[18].mxu1 %v2649_v5  ;;  %40868 = vst [vmem:[#allocation169_spill] sm:$0xff] %v35033_v18  ;;  %v35040_v5 = vand.u32 4294901760, %v2381_v50  ;;  %v35050_v28 = vsub.f32 %v2378_v19, %v35033_v18  ;;  %40871 = vst [vmem:[#allocation171_spill] sm:$0xff] %v35052_v52  ;;  %v40874_v19 = vand.u32 4294901760, %v40762_v21  ;;  %v2709_v51 = vand.u32 4294901760, %v2708_v57 }
 0x1f4   : > { %27770 = vmatprep.mubr.f32.mxu1 %v2659_v59  ;;  %28786 = vmatmul.mubr.f32.gmra.mrb[30].mxu0 %v34610_v39  ;;  %v39889_v59 = vand.u32 4294901760, %v35031_v53  ;;  %v35072_v40 = vsub.f32 %v2384_v54, %v35052_v52  ;;  %v2738_v21 = vsub.f32 %v35038_v1, %v39888_v22  ;;  %v40876_v57 = vand.u32 4294901760, %v40768_v33  ;;  %v40946_v22 = vld [vmem:[#allocation59_spill] sm:$0xff] }
 0x1f5   : > { %40869 = vst [vmem:[#allocation170_spill] sm:$0xff] %v35040_v5  ;;  %28790 = vmatprep.mubr.f32.mxu0 %v40870_v46  ;;  %v35061_v46 = vsub.f32 %v2381_v50, %v35040_v5  ;;  %v40875_v50 = vand.u32 4294901760, %v40767_v38  ;;  %v40877_v38 = vand.u32 4294901760, %v40773_v48  ;;  %v40878_v33 = vand.u32 4294901760, %v40774_v17 }
 0x1f6   : > { %v40881_v17 = vand.u32 4294901760, %v40786_v44  ;;  %v40886_v44 = vand.u32 4294901760, %v40805_v8  ;;  %v40889_v8 = vand.u32 4294901760, %v40819_v49 }
 0x1f7   : > { %27771 = vmatmul.mubr.f32.gmra.mrb[20].mxu1 %v2669_v4  ;;  %v2718_v4 = vsub.f32 %v35016_v45, %v40873_v34 }
 0x1f8   : > { %27773 = vmatprep.mubr.f32.mxu1 %v2679_v13  ;;  %28791 = vmatmul.mubr.f32.vlgmr.msra.gmra.mrb[0].mxu0 %v40872_v31  ;;  %v2728_v13 = vsub.f32 %v35031_v53, %v39889_v59  ;;  %v39887_v31 = vand.u32 4294901760, %v35050_v28  ;;  %v40947_v59 = vld [vmem:[#allocation95_spill] sm:$0xff] }
 0x1f9   : > { %28839 = vmatpush3.msra.mxu0 %v40764_v11  ;;  %28793 = vmatprep.mubr.f32.mxu0 %v40874_v19  ;;  %v2719_v11 = vand.u32 4294901760, %v2718_v4  ;;  %v2739_v4 = vand.u32 4294901760, %v2738_v21 }
 0x1fa   : > { %28888 = vmatprep.subr.mxu0 %v34090_v25  ;;  %v2729_v34 = vand.u32 4294901760, %v2728_v13  ;;  %v2748_v54 = vsub.f32 %v35050_v28, %v39887_v31  ;;  %v40945_v31 = vld [vmem:[#allocation135_spill] sm:$0xff] }
 0x1fb   : > { %27774 = vmatmul.mubr.f32.gmra.mrb[22].mxu1 %v2689_v61  ;;  %v39886_v61 = vand.u32 4294901760, %v35061_v46 }
 0x1fc   : > { %27776 = vmatprep.mubr.f32.mxu1 %v2699_v58  ;;  %28794 = vmatmul.mubr.f32.gmra.mrb[2].mxu0 %v40875_v50  ;;  %v39885_v58 = vand.u32 4294901760, %v35072_v40  ;;  %v40879_v50 = vand.u32 4294901760, %v40779_v3  ;;  %v40884_v3 = vand.u32 4294901760, %v40797_v0  ;;  %v40888_v0 = vand.u32 4294901760, %v40813_v2 }
 0x1fd   : > { %28796 = vmatprep.mubr.f32.mxu0 %v40876_v57  ;;  %v2758_v19 = vsub.f32 %v35061_v46, %v39886_v61  ;;  %v40882_v57 = vand.u32 4294901760, %v40789_v41  ;;  %v40890_v41 = vand.u32 4294901760, %v40821_v56  ;;  %v40892_v2 = vand.u32 4294901760, %v40829_v42  ;;  %v40944_v61 = vld [vmem:[#allocation85_spill] sm:$0xff] }
 0x1fe   : > { %v2768_v13 = vsub.f32 %v35072_v40, %v39885_v58  ;;  %v40943_v58 = vld [vmem:[#allocation88_spill] sm:$0xff] }
 0x1ff   : > { %27777 = vmatmul.mubr.f32.gmra.mrb[24].mxu1 %v2709_v51  ;;  %v2749_v51 = vand.u32 4294901760, %v2748_v54  ;;  %v2759_v48 = vand.u32 4294901760, %v2758_v19  ;;  %v40896_v54 = vld [vmem:[#allocation152_spill] sm:$0xff]  ;;  %v40901_v19 = vld [vmem:[#allocation31_spill] sm:$0xff] }
 0x200   : > { %27779 = vmatprep.mubr.f32.mxu1 %v2719_v11  ;;  %28797 = vmatmul.mubr.f32.gmra.mrb[4].mxu0 %v40877_v38  ;;  %v40880_v11 = vand.u32 4294901760, %v40781_v20  ;;  %v2769_v21 = vand.u32 4294901760, %v2768_v13  ;;  %v40885_v20 = vand.u32 4294901760, %v40802_v16  ;;  %v40893_v16 = vld [vmem:[#allocation117_spill] sm:$0xff]  ;;  %v40897_v56 = vand.u32 4294901760, %v40896_v54  ;;  %v40898_v38 = vld [vmem:[#allocation11_spill] sm:$0xff] }
 0x201   : > { %28799 = vmatprep.mubr.f32.mxu0 %v40878_v33  ;;  %v40902_v42 = vand.u32 4294901760, %v40901_v19  ;;  %v40903_v33 = vld [vmem:[#allocation58_spill] sm:$0xff]  ;;  %v40905_v13 = vld [vmem:[#allocation33_spill] sm:$0xff]  ;;  %v40924_v54 = vld [vmem:[#allocation151_spill] sm:$0xff] }
 0x202   : > { %v40927_v19 = vld [vmem:[#allocation163_spill] sm:$0xff] }
 0x203   : > { %27780 = vmatmul.mubr.f32.gmra.mrb[26].mxu1 %v2729_v34  ;;  %v40883_v34 = vand.u32 4294901760, %v40794_v7  ;;  %v40887_v7 = vand.u32 4294901760, %v40810_v14  ;;  %v40894_v14 = vld [vmem:[#allocation13_spill] sm:$0xff] }
 0x204   : > { %27782 = vmatprep.mubr.f32.mxu1 %v2739_v4  ;;  %28800 = vmatmul.mubr.f32.gmra.mrb[6].mxu0 %v40879_v50  ;;  %v40895_v49 = vand.u32 4294901760, %v40894_v14  ;;  %v40899_v4 = vld [vmem:[#allocation14_spill] sm:$0xff]  ;;  %v40906_v50 = vand.u32 4294901760, %v40905_v13  ;;  %v40922_v14 = vld [vmem:[#allocation15_spill] sm:$0xff]  ;;  %v40930_v13 = vld [vmem:[#allocation44_spill] sm:$0xff] }
 0x205   : > { %28802 = vmatprep.mubr.f32.mxu0 %v40880_v11  ;;  %v40908_v11 = vld [vmem:[#allocation111_spill] sm:$0xff] }
 0x207   : > { %27783 = vmatmul.mubr.f32.gmra.mrb[28].mxu1 %v2749_v51  ;;  %v40904_v51 = vld [vmem:[#allocation67_spill] sm:$0xff] }
 0x208   : > { %27785 = vmatprep.mubr.f32.mxu1 %v2759_v48  ;;  %28803 = vmatmul.mubr.f32.gmra.mrb[8].mxu0 %v40881_v17  ;;  %v40907_v48 = vand.u32 4294901760, %v40853_v24  ;;  %v40910_v17 = vld [vmem:[#allocation41_spill] sm:$0xff] }
 0x209   : > { %28805 = vmatprep.mubr.f32.mxu0 %v40882_v57  ;;  %v40912_v57 = vld [vmem:[#allocation158_spill] sm:$0xff]  ;;  %v25149_v24 = vld [vmem:[%s39344_s1 + $0x14] sm:$0xf] }
 0x20b   : > { %27786 = vmatmul.mubr.f32.gmra.mrb[30].mxu1 %v2769_v21  ;;  %v40909_v21 = vld [vmem:[#allocation114_spill] sm:$0xff] }
 0x20c   : > { %27790 = vmatprep.mubr.f32.mxu1 %v34716_v32  ;;  %28806 = vmatmul.mubr.f32.gmra.mrb[10].mxu0 %v40883_v34  ;;  %v40913_v34 = vand.u32 4294901760, %v40912_v57  ;;  %v40936_v57 = vld [vmem:[#allocation76_spill] sm:$0xff]  ;;  %v40979_v32 = vld [vmem:[#allocation159_spill] sm:$0xff] }
 0x20d   : > { %28808 = vmatprep.mubr.f32.mxu0 %v40884_v3  ;;  %v40914_v3 = vld [vmem:[#allocation136_spill] sm:$0xff] }
 0x20f   : > { %27791 = vmatmul.mubr.f32.vlgmr.msra.gmra.mrb[0].mxu1 %v34724_v12  ;;  %v40978_v12 = vld [vmem:[#allocation47_spill] sm:$0xff] }
 0x210   : > { %27793 = vmatprep.mubr.f32.mxu1 %v34731_v26  ;;  %28809 = vmatmul.mubr.f32.gmra.mrb[12].mxu0 %v40885_v20  ;;  %v40915_v20 = vld [vmem:[#allocation138_spill] sm:$0xff]  ;;  %v40977_v26 = vld [vmem:[#allocation145_spill] sm:$0xff] }
 0x211   : > { %28811 = vmatprep.mubr.f32.mxu0 %v40886_v44  ;;  %27839 = vmatpush3.msra.mxu1 %v34655_v23  ;;  %v40891_v23 = vand.u32 4294901760, %v40825_v37  ;;  %v40900_v37 = vand.u32 4294901760, %v40842_v60  ;;  %v40911_v60 = vand.u32 4294901760, %v40910_v17  ;;  %v40916_v44 = vand.u32 4294901760, %v34592_v6  ;;  %v40933_v17 = vld [vmem:[#allocation53_spill] sm:$0xff] }
 0x212   : > { %27888 = vmatprep.subr.mxu1 %v34494_v15 }
 0x213   : > { %27794 = vmatmul.mubr.f32.gmra.mrb[2].mxu1 %v34741_v36  ;;  %v40976_v36 = vld [vmem:[#allocation141_spill] sm:$0xff] }
 0x214   : > { %27796 = vmatprep.mubr.f32.mxu1 %v34748_v30  ;;  %28812 = vmatmul.mubr.f32.gmra.mrb[14].mxu0 %v40887_v7  ;;  %v40917_v7 = vld [vmem:[#allocation56_spill] sm:$0xff] }
 0x215   : > { %28814 = vmatprep.mubr.f32.mxu0 %v40888_v0  ;;  %v40918_v0 = vand.u32 4294901760, %v40917_v7  ;;  %v40940_v7 = vld [vmem:[#allocation109_spill] sm:$0xff] }
 0x217   : > { %27797 = vmatmul.mubr.f32.gmra.mrb[4].mxu1 %v34759_v35  ;;  %v40974_v35 = vld [vmem:[#allocation157_spill] sm:$0xff] }
 0x218   : > { %27799 = vmatprep.mubr.f32.mxu1 %v34772_v55  ;;  %28815 = vmatmul.mubr.f32.gmra.mrb[16].mxu0 %v40889_v8  ;;  %v40919_v8 = vld [vmem:[#allocation143_spill] sm:$0xff]  ;;  %v40973_v55 = vld [vmem:[#allocation40_spill] sm:$0xff] }
 0x219   : > { %28817 = vmatprep.mubr.f32.mxu0 %v40890_v41  ;;  %v10131_v41 = vsel %vm507_vm0, %v25149_v24, 0  ;;  %v40939_v24 = vld [vmem:[#allocation72_spill] sm:$0xff] }
 0x21a   : > { %v35174_v6 = vand.u32 4294901760, %v10131_v41 }
 0x21b   : > { %27800 = vmatmul.mubr.f32.gmra.mrb[6].mxu1 %v34780_v63  ;;  %v40972_v63 = vld [vmem:[#allocation137_spill] sm:$0xff] }
 0x21c   : > { %27802 = vmatprep.mubr.f32.mxu1 %v34795_v47  ;;  %28818 = vmatmul.mubr.f32.gmra.mrb[18].mxu0 %v40891_v23  ;;  %v40920_v23 = vld [vmem:[#allocation147_spill] sm:$0xff] }
 0x21d   : > { %28820 = vmatprep.mubr.f32.mxu0 %v40892_v2  ;;  %v40921_v2 = vand.u32 4294901760, %v34610_v39  ;;  %v40928_v39 = vld [vmem:[#allocation164_spill] sm:$0xff]  ;;  %v40971_v47 = vld [vmem:[#allocation91_spill] sm:$0xff] }
 0x21f   : > { %27803 = vmatmul.mubr.f32.gmra.mrb[8].mxu1 %v34808_v29  ;;  %v35233_v29 = vsub.f32 %v10131_v41, %v35174_v6 }
 0x220   : > { %27805 = vmatprep.mubr.f32.mxu1 %v40893_v16  ;;  %28821 = vmatmul.mubr.f32.gmra.mrb[20].mxu0 %v40895_v49  ;;  %v40923_v49 = vld [vmem:[#allocation12_spill] sm:$0xff]  ;;  %v40970_v16 = vld [vmem:[#allocation155_spill] sm:$0xff] }
 0x221   : > { %28823 = vmatprep.mubr.f32.mxu0 %v40897_v56  ;;  %v40925_v56 = vld [vmem:[#allocation26_spill] sm:$0xff]  ;;  %v35240_v30 = vand.u32 4294901760, %v35233_v29 }
 0x223   : > { %27806 = vmatmul.mubr.f32.gmra.mrb[10].mxu1 %v40898_v38  ;;  %v40969_v38 = vld [vmem:[#allocation154_spill] sm:$0xff]  ;;  %40975 = vst [vmem:[#allocation13_spill] sm:$0xff] %v35240_v30  ;;  %v10523_v41 = vsub.f32 %v35233_v29, %v35240_v30  ;;  %v40985_v30 = vld [vmem:[#allocation156_spill] sm:$0xff] }
 0x224   : > { %27808 = vmatprep.mubr.f32.mxu1 %v40899_v4  ;;  %28824 = vmatmul.mubr.f32.gmra.mrb[22].mxu0 %v40900_v37  ;;  %v40926_v37 = vld [vmem:[#allocation27_spill] sm:$0xff] }
 0x225   : > { %28826 = vmatprep.mubr.f32.mxu0 %v40902_v42  ;;  %v40929_v42 = vld [vmem:[#allocation36_spill] sm:$0xff]  ;;  %v40968_v4 = vld [vmem:[#allocation107_spill] sm:$0xff] }
 0x227   : > { %27809 = vmatmul.mubr.f32.gmra.mrb[12].mxu1 %v40903_v33  ;;  %v40967_v33 = vld [vmem:[#allocation92_spill] sm:$0xff] }
 0x228   : > { %27811 = vmatprep.mubr.f32.mxu1 %v40904_v51  ;;  %28827 = vmatmul.mubr.f32.gmra.mrb[24].mxu0 %v40906_v50  ;;  %v40931_v50 = vld [vmem:[#allocation165_spill] sm:$0xff]  ;;  %v40966_v51 = vld [vmem:[#allocation23_spill] sm:$0xff] }
 0x229   : > { %28829 = vmatprep.mubr.f32.mxu0 %v40907_v48  ;;  %v40932_v48 = vld [vmem:[#allocation166_spill] sm:$0xff] }
 0x22b   : > { %27812 = vmatmul.mubr.f32.gmra.mrb[14].mxu1 %v40908_v11  ;;  %v40965_v11 = vld [vmem:[#allocation153_spill] sm:$0xff] }
 0x22c   : > { %27814 = vmatprep.mubr.f32.mxu1 %v40909_v21  ;;  %28830 = vmatmul.mubr.f32.gmra.mrb[26].mxu0 %v40911_v60  ;;  %v40934_v60 = vld [vmem:[#allocation62_spill] sm:$0xff]  ;;  %v40964_v21 = vld [vmem:[#allocation75_spill] sm:$0xff] }
 0x22d   : > { %28832 = vmatprep.mubr.f32.mxu0 %v40913_v34  ;;  %v40937_v34 = vld [vmem:[#allocation98_spill] sm:$0xff] }
 0x22f   : > { %27815 = vmatmul.mubr.f32.gmra.mrb[16].mxu1 %v40914_v3  ;;  %v40963_v3 = vld [vmem:[#allocation50_spill] sm:$0xff] }
 0x230   : > { %27817 = vmatprep.mubr.f32.mxu1 %v40915_v20  ;;  %28833 = vmatmul.mubr.f32.gmra.mrb[28].mxu0 %v40916_v44  ;;  %v40938_v44 = vld [vmem:[#allocation100_spill] sm:$0xff]  ;;  %v40962_v20 = vld [vmem:[#allocation150_spill] sm:$0xff] }
 0x231   : > { %28835 = vmatprep.mubr.f32.mxu0 %v40918_v0  ;;  %v40941_v0 = vld [vmem:[#allocation84_spill] sm:$0xff] }
 0x233   : > { %27818 = vmatmul.mubr.f32.gmra.mrb[18].mxu1 %v40919_v8  ;;  %v40961_v8 = vld [vmem:[#allocation149_spill] sm:$0xff] }
 0x234   : > { %27820 = vmatprep.mubr.f32.mxu1 %v40920_v23  ;;  %28836 = vmatmul.mubr.f32.gmra.mrb[30].mxu0 %v40921_v2  ;;  %v40942_v2 = vld [vmem:[#allocation81_spill] sm:$0xff]  ;;  %v40960_v23 = vld [vmem:[#allocation43_spill] sm:$0xff] }
 0x235   : > { %28840 = vmatprep.mubr.f32.mxu0 %v40922_v14 }
 0x237   : > { %27821 = vmatmul.mubr.f32.gmra.mrb[20].mxu1 %v40923_v49  ;;  %v40959_v49 = vld [vmem:[#allocation35_spill] sm:$0xff] }
 0x238   : > { %27823 = vmatprep.mubr.f32.mxu1 %v40924_v54  ;;  %28841 = vmatmul.mubr.f32.vlgmr.msra.gmra.mrb[0].mxu0 %v40925_v56  ;;  %v40958_v54 = vld [vmem:[#allocation148_spill] sm:$0xff] }
 0x239   : > { %28889 = vmatpush3.msra.mxu0 %v34090_v25  ;;  %28843 = vmatprep.mubr.f32.mxu0 %v40926_v37  ;;  %v40935_v25 = vld [vmem:[#allocation69_spill] sm:$0xff] }
 0x23a   : > { %28938 = vmatprep.subr.mxu0 %v35174_v6 }
 0x23b   : > { %27824 = vmatmul.mubr.f32.gmra.mrb[22].mxu1 %v40927_v19  ;;  %v40957_v19 = vld [vmem:[#allocation146_spill] sm:$0xff] }
 0x23c   : > { %27826 = vmatprep.mubr.f32.mxu1 %v40928_v39  ;;  %28844 = vmatmul.mubr.f32.gmra.mrb[2].mxu0 %v40929_v42  ;;  %v40956_v39 = vld [vmem:[#allocation118_spill] sm:$0xff] }
 0x23d   : > { %28846 = vmatprep.mubr.f32.mxu0 %v40930_v13 }
 0x23f   : > { %27827 = vmatmul.mubr.f32.gmra.mrb[24].mxu1 %v40931_v50  ;;  %v40955_v50 = vld [vmem:[#allocation115_spill] sm:$0xff] }
 0x240   : > { %27829 = vmatprep.mubr.f32.mxu1 %v40932_v48  ;;  %28847 = vmatmul.mubr.f32.gmra.mrb[4].mxu0 %v40933_v17  ;;  %v40954_v48 = vld [vmem:[#allocation144_spill] sm:$0xff] }
 0x241   : > { %28849 = vmatprep.mubr.f32.mxu0 %v40934_v60 }
 0x243   : > { %27830 = vmatmul.mubr.f32.gmra.mrb[26].mxu1 %v35012_v27  ;;  %v40953_v27 = vld [vmem:[#allocation142_spill] sm:$0xff] }
 0x244   : > { %27832 = vmatprep.mubr.f32.mxu1 %v35018_v9  ;;  %28850 = vmatmul.mubr.f32.gmra.mrb[6].mxu0 %v40935_v25  ;;  %v40952_v9 = vld [vmem:[#allocation112_spill] sm:$0xff] }
 0x245   : > { %28852 = vmatprep.mubr.f32.mxu0 %v40936_v57 }
 0x247   : > { %27833 = vmatmul.mubr.f32.gmra.mrb[28].mxu1 %v35033_v18  ;;  %v40951_v18 = vld [vmem:[#allocation108_spill] sm:$0xff] }
 0x248   : > { %27835 = vmatprep.mubr.f32.mxu1 %v35040_v5  ;;  %28853 = vmatmul.mubr.f32.gmra.mrb[8].mxu0 %v40937_v34  ;;  %v40950_v5 = vld [vmem:[#allocation140_spill] sm:$0xff] }
 0x249   : > { %28855 = vmatprep.mubr.f32.mxu0 %v40938_v44 }
 0x24b   : > { %27836 = vmatmul.mubr.f32.gmra.mrb[30].mxu1 %v35052_v52  ;;  %v40949_v52 = vld [vmem:[#allocation139_spill] sm:$0xff] }
 0x24c   : > { %27840 = vmatprep.mubr.f32.mxu1 %v40939_v24  ;;  %28856 = vmatmul.mubr.f32.gmra.mrb[10].mxu0 %v40940_v7 }
 0x24d   : > { %28858 = vmatprep.mubr.f32.mxu0 %v40941_v0 }
 0x24f   : > { %27841 = vmatmul.mubr.f32.vlgmr.msra.gmra.mrb[0].mxu1 %v40942_v2 }
 0x250   : > { %27843 = vmatprep.mubr.f32.mxu1 %v40943_v58  ;;  %28859 = vmatmul.mubr.f32.gmra.mrb[12].mxu0 %v40944_v61 }
 0x251   : > { %28861 = vmatprep.mubr.f32.mxu0 %v40945_v31  ;;  %27889 = vmatpush3.msra.mxu1 %v34494_v15 }
 0x252   : > { %27938 = vmatprep.subr.mxu1 %v40946_v22 }
 0x253   : > { %27844 = vmatmul.mubr.f32.gmra.mrb[2].mxu1 %v40947_v59 }
 0x254   : > { %27846 = vmatprep.mubr.f32.mxu1 %v40948_v10  ;;  %28862 = vmatmul.mubr.f32.gmra.mrb[14].mxu0 %v40949_v52 }
 0x255   : > { %28864 = vmatprep.mubr.f32.mxu0 %v40950_v5 }
 0x257   : > { %27847 = vmatmul.mubr.f32.gmra.mrb[4].mxu1 %v40951_v18 }
 0x258   : > { %27849 = vmatprep.mubr.f32.mxu1 %v40952_v9  ;;  %28865 = vmatmul.mubr.f32.gmra.mrb[16].mxu0 %v40953_v27 }
 0x259   : > { %28867 = vmatprep.mubr.f32.mxu0 %v40954_v48 }
 0x25b   : > { %27850 = vmatmul.mubr.f32.gmra.mrb[6].mxu1 %v40955_v50 }
 0x25c   : > { %27852 = vmatprep.mubr.f32.mxu1 %v40956_v39  ;;  %28868 = vmatmul.mubr.f32.gmra.mrb[18].mxu0 %v40957_v19 }
 0x25d   : > { %28870 = vmatprep.mubr.f32.mxu0 %v40958_v54 }
 0x25f   : > { %27853 = vmatmul.mubr.f32.gmra.mrb[8].mxu1 %v40959_v49 }
 0x260   : > { %27855 = vmatprep.mubr.f32.mxu1 %v40960_v23  ;;  %28871 = vmatmul.mubr.f32.gmra.mrb[20].mxu0 %v40961_v8 }
 0x261   : > { %28873 = vmatprep.mubr.f32.mxu0 %v40962_v20 }
 0x263   : > { %27856 = vmatmul.mubr.f32.gmra.mrb[10].mxu1 %v40963_v3 }
 0x264   : > { %27858 = vmatprep.mubr.f32.mxu1 %v40964_v21  ;;  %28874 = vmatmul.mubr.f32.gmra.mrb[22].mxu0 %v40965_v11 }
 0x265   : > { %28876 = vmatprep.mubr.f32.mxu0 %v40966_v51 }
 0x267   : > { %27859 = vmatmul.mubr.f32.gmra.mrb[12].mxu1 %v40967_v33 }
 0x268   : > { %27861 = vmatprep.mubr.f32.mxu1 %v40968_v4  ;;  %28877 = vmatmul.mubr.f32.gmra.mrb[24].mxu0 %v40969_v38 }
 0x269   : > { %28879 = vmatprep.mubr.f32.mxu0 %v40970_v16 }
 0x26b   : > { %27862 = vmatmul.mubr.f32.gmra.mrb[14].mxu1 %v40971_v47  ;;  %v40980_v47 = vld [vmem:[#allocation160_spill] sm:$0xff] }
 0x26c   : > { %27864 = vmatprep.mubr.f32.mxu1 %v40972_v63  ;;  %28880 = vmatmul.mubr.f32.gmra.mrb[26].mxu0 %v40973_v55  ;;  %v40981_v63 = vld [vmem:[#allocation24_spill] sm:$0xff]  ;;  %v40982_v55 = vld [vmem:[#allocation51_spill] sm:$0xff] }
 0x26d   : > { %28882 = vmatprep.mubr.f32.mxu0 %v40974_v35  ;;  %v35252_v35 = vand.u32 4294901760, %v10523_v41 }
 0x26f   : > { %27865 = vmatmul.mubr.f32.gmra.mrb[16].mxu1 %v40976_v36  ;;  %v40983_v36 = vld [vmem:[#allocation161_spill] sm:$0xff] }
 0x270   : > { %27867 = vmatprep.mubr.f32.mxu1 %v40977_v26  ;;  %28883 = vmatmul.mubr.f32.gmra.mrb[28].mxu0 %v40978_v12  ;;  %v40984_v26 = vld [vmem:[#allocation162_spill] sm:$0xff] }
 0x271   : > { %28885 = vmatprep.mubr.f32.mxu0 %v40979_v32 }
 0x273   : > { %27868 = vmatmul.mubr.f32.gmra.mrb[18].mxu1 %v40980_v47 }
 0x274   : > { %27870 = vmatprep.mubr.f32.mxu1 %v40981_v63  ;;  %28886 = vmatmul.mubr.f32.gmra.mrb[30].mxu0 %v40982_v55 }
 0x275   : > { %28890 = vmatprep.mubr.f32.mxu0 %v40922_v14  ;;  %v40986_v14 = vand.u32 4294901760, %v40939_v24 }
 0x277   : > { %27871 = vmatmul.mubr.f32.gmra.mrb[20].mxu1 %v40983_v36 }
 0x278   : > { %27873 = vmatprep.mubr.f32.mxu1 %v40984_v26  ;;  %28891 = vmatmul.mubr.f32.vlgmr.msra.gmra.mrb[0].mxu0 %v40925_v56  ;;  %v40987_v56 = vand.u32 4294901760, %v40942_v2  ;;  %v41009_v2 = vld [vmem:[#allocation91_spill] sm:$0xff] }
 0x279   : > { %28939 = vmatpush3.msra.mxu0 %v35174_v6  ;;  %28893 = vmatprep.mubr.f32.mxu0 %v40926_v37  ;;  %v40988_v37 = vand.u32 4294901760, %v40943_v58  ;;  %v40991_v58 = vand.u32 4294901760, %v40951_v18 }
 0x27a   : > { %28988 = vmatprep.subr.mxu0 %v35252_v35 }
 0x27b   : > { %27874 = vmatmul.mubr.f32.gmra.mrb[22].mxu1 %v34982_v62 }
 0x27c   : > { %27876 = vmatprep.mubr.f32.mxu1 %v40985_v30  ;;  %28894 = vmatmul.mubr.f32.gmra.mrb[2].mxu0 %v40929_v42  ;;  %v40989_v42 = vand.u32 4294901760, %v40947_v59  ;;  %v40993_v59 = vand.u32 4294901760, %v40955_v50  ;;  %v10004_v50 = vld [vmem:[#allocation2 + $0x4a] sm:$0xff] }
 0x27d   : > { %28896 = vmatprep.mubr.f32.mxu0 %v40930_v13  ;;  %v40990_v13 = vand.u32 4294901760, %v40948_v10  ;;  %v40994_v10 = vand.u32 4294901760, %v40956_v39 }
 0x27f   : > { %27877 = vmatmul.mubr.f32.gmra.mrb[24].mxu1 %v35010_v43 }
 0x280   : > { %27879 = vmatprep.mubr.f32.mxu1 %v35016_v45  ;;  %28897 = vmatmul.mubr.f32.gmra.mrb[4].mxu0 %v40933_v17 }
 0x281   : > { %28899 = vmatprep.mubr.f32.mxu0 %v40934_v60  ;;  %v10047_v60 = vsel %vm223_vm1, %v10004_v50, 0  ;;  %v41025_v50 = vld [vmem:[#allocation145_spill] sm:$0xff] }
 0x282   : > { %v35349_v24 = vand.u32 4294901760, %v10047_v60 }
 0x283   : > { %27880 = vmatmul.mubr.f32.gmra.mrb[26].mxu1 %v35031_v53 }
 0x284   : > { %27882 = vmatprep.mubr.f32.mxu1 %v35038_v1  ;;  %28900 = vmatmul.mubr.f32.gmra.mrb[6].mxu0 %v40935_v25  ;;  %v41002_v25 = vand.u32 4294901760, %v40967_v33  ;;  %41008 = vst [vmem:[#allocation26_spill] sm:$0xff] %v35349_v24 }
 0x285   : > { %28902 = vmatprep.mubr.f32.mxu0 %v40936_v57 }
 0x287   : > { %27883 = vmatmul.mubr.f32.gmra.mrb[28].mxu1 %v35050_v28 }
 0x288   : > { %27885 = vmatprep.mubr.f32.mxu1 %v35061_v46  ;;  %28903 = vmatmul.mubr.f32.gmra.mrb[8].mxu0 %v40937_v34  ;;  %v41005_v34 = vand.u32 4294901760, %v40968_v4  ;;  %v41010_v4 = vand.u32 4294901760, %v41009_v2 }
 0x289   : > { %28905 = vmatprep.mubr.f32.mxu0 %v40938_v44 }
 0x28b   : > { %27886 = vmatmul.mubr.f32.gmra.mrb[30].mxu1 %v35072_v40 }
 0x28c   : > { %27890 = vmatprep.mubr.f32.mxu1 %v40986_v14  ;;  %28906 = vmatmul.mubr.f32.gmra.mrb[10].mxu0 %v40940_v7 }
 0x28d   : > { %28908 = vmatprep.mubr.f32.mxu0 %v40941_v0  ;;  %v10007_v0 = vld [vmem:[#allocation2 + $0x6a] sm:$0xff] }
 0x28f   : > { %27891 = vmatmul.mubr.f32.vlgmr.msra.gmra.mrb[0].mxu1 %v40987_v56  ;;  %v10008_v56 = vld [vmem:[#allocation2 + $0x7a] sm:$0xff] }
 0x290   : > { %27893 = vmatprep.mubr.f32.mxu1 %v40988_v37  ;;  %28909 = vmatmul.mubr.f32.gmra.mrb[12].mxu0 %v40944_v61  ;;  %v40992_v61 = vand.u32 4294901760, %v40952_v9  ;;  %v10002_v9 = vld [vmem:[#allocation2 + $0x32] sm:$0xff] }
 0x291   : > { %28911 = vmatprep.mubr.f32.mxu0 %v40945_v31  ;;  %27939 = vmatpush3.msra.mxu1 %v40946_v22  ;;  %v10000_v22 = vld [vmem:[#allocation2 + $0x1a] sm:$0xff]  ;;  %v41014_v37 = vld [vmem:[#allocation137_spill] sm:$0xff] }
 0x292   : > { %27988 = vmatprep.subr.mxu1 %v34494_v15  ;;  %v10035_v18 = vsel %vm223_vm1, %v10000_v22, 0  ;;  %v41019_v22 = vld [vmem:[#allocation157_spill] sm:$0xff] }
 0x293   : > { %27894 = vmatmul.mubr.f32.gmra.mrb[2].mxu1 %v40989_v42  ;;  %v35313_v31 = vand.u32 4294901760, %v10035_v18  ;;  %v41015_v42 = vand.u32 4294901760, %v41014_v37 }
 0x294   : > { %27896 = vmatprep.mubr.f32.mxu1 %v40990_v13  ;;  %28912 = vmatmul.mubr.f32.gmra.mrb[14].mxu0 %v40949_v52  ;;  %v40995_v52 = vand.u32 4294901760, %v40959_v49  ;;  %v41016_v13 = vld [vmem:[#allocation40_spill] sm:$0xff] }
 0x295   : > { %28914 = vmatprep.mubr.f32.mxu0 %v40950_v5  ;;  %v10001_v5 = vld [vmem:[#allocation2 + $0x22] sm:$0xff] }
 0x296   : > { %v10038_v39 = vsel %vm223_vm1, %v10001_v5, 0  ;;  %v10009_v5 = vld [vmem:[#allocation2 + $0x82] sm:$0xff] }
 0x297   : > { %27897 = vmatmul.mubr.f32.gmra.mrb[4].mxu1 %v40991_v58  ;;  %v35320_v49 = vand.u32 4294901760, %v10038_v39 }
 0x298   : > { %27899 = vmatprep.mubr.f32.mxu1 %v40992_v61  ;;  %28915 = vmatmul.mubr.f32.gmra.mrb[16].mxu0 %v40953_v27  ;;  %v40996_v27 = vand.u32 4294901760, %v40960_v23  ;;  %v40999_v23 = vand.u32 4294901760, %v40964_v21  ;;  %v35373_v61 = vsub.f32 %v10047_v60, %v35349_v24 }
 0x299   : > { %28917 = vmatprep.mubr.f32.mxu0 %v40954_v48  ;;  %v40997_v48 = vand.u32 4294901760, %v40963_v3  ;;  %40998 = vst [vmem:[#allocation152_spill] sm:$0xff] %v35320_v49  ;;  %v10005_v3 = vld [vmem:[#allocation2 + $0x52] sm:$0xff]  ;;  %v35336_v21 = vsub.f32 %v10038_v39, %v35320_v49 }
 0x29a   : > { %v10050_v33 = vsel %vm223_vm1, %v10005_v3, 0  ;;  %41018 = vst [vmem:[#allocation62_spill] sm:$0xff] %v35373_v61  ;;  %v35398_v60 = vand.u32 4294901760, %v35373_v61 }
 0x29b   : > { %27900 = vmatmul.mubr.f32.gmra.mrb[6].mxu1 %v40993_v59  ;;  %41003 = vst [vmem:[#allocation41_spill] sm:$0xff] %v35336_v21  ;;  %v35362_v14 = vand.u32 4294901760, %v10050_v33 }
 0x29c   : > { %27902 = vmatprep.mubr.f32.mxu1 %v40994_v10  ;;  %28918 = vmatmul.mubr.f32.gmra.mrb[18].mxu0 %v40957_v19  ;;  %v10003_v19 = vld [vmem:[#allocation2 + $0x3a] sm:$0xff]  ;;  %v10056_v10 = vsel %vm223_vm1, %v10007_v0, 0  ;;  %41028 = vst [vmem:[#allocation72_spill] sm:$0xff] %v35398_v60  ;;  %v41031_v0 = vand.u32 4294901760, %v40980_v47 }
 0x29d   : > { %28920 = vmatprep.mubr.f32.mxu0 %v40958_v54  ;;  %v10041_v54 = vsel %vm223_vm1, %v10002_v9, 0  ;;  %41013 = vst [vmem:[#allocation44_spill] sm:$0xff] %v35362_v14  ;;  %v10010_v9 = vld [vmem:[#allocation2 + $0x92] sm:$0xff]  ;;  %v35400_v3 = vand.u32 4294901760, %v10056_v10 }
 0x29e   : > { %v35328_v17 = vand.u32 4294901760, %v10041_v54 }
 0x29f   : > { %27903 = vmatmul.mubr.f32.gmra.mrb[8].mxu1 %v40995_v52  ;;  %v41021_v52 = vld [vmem:[#allocation141_spill] sm:$0xff]  ;;  %41029 = vst [vmem:[#allocation109_spill] sm:$0xff] %v35400_v3  ;;  %v35423_v37 = vsub.f32 %v10056_v10, %v35400_v3  ;;  %v10014_v10 = vld [vmem:[#allocation2 + $0xc2] sm:$0xff] }
 0x2a0   : > { %27905 = vmatprep.mubr.f32.mxu1 %v40996_v27  ;;  %28921 = vmatmul.mubr.f32.gmra.mrb[20].mxu0 %v40961_v8  ;;  %v35326_v8 = vsub.f32 %v10035_v18, %v35313_v31  ;;  %41001 = vst [vmem:[#allocation33_spill] sm:$0xff] %v35328_v17  ;;  %v10059_v18 = vsel %vm223_vm1, %v10008_v56, 0  ;;  %v41022_v27 = vand.u32 4294901760, %v41021_v52  ;;  %v41034_v56 = vand.u32 4294901760, %v40981_v63 }
 0x2a1   : > { %28923 = vmatprep.mubr.f32.mxu0 %v40962_v20  ;;  %v10044_v20 = vsel %vm223_vm1, %v10003_v19, 0  ;;  %v35388_v19 = vsub.f32 %v10050_v33, %v35362_v14  ;;  %v10011_v33 = vld [vmem:[#allocation2 + $0x9a] sm:$0xff]  ;;  %41035 = vst [vmem:[#allocation85_spill] sm:$0xff] %v35423_v37  ;;  %v10242_v63 = vsub.f32 %v35373_v61, %v35398_v60  ;;  %v41039_v52 = vand.u32 4294901760, %v40983_v36  ;;  %v10017_v60 = vld [vmem:[#allocation2 + $0xe2] sm:$0xff]  ;;  %v10029_v61 = vld [vmem:[#allocation2 + $0x172] sm:$0xff] }
 0x2a2   : > { %41000 = vst [vmem:[#allocation31_spill] sm:$0xff] %v35326_v8  ;;  %v35338_v57 = vand.u32 4294901760, %v10044_v20  ;;  %v35344_v44 = vand.u32 4294901760, %v35326_v8 }
 0x2a3   : > { %27906 = vmatmul.mubr.f32.gmra.mrb[10].mxu1 %v40997_v48  ;;  %41024 = vst [vmem:[#allocation98_spill] sm:$0xff] %v35388_v19  ;;  %v41026_v48 = vand.u32 4294901760, %v41025_v50 }
 0x2a4   : > { %27908 = vmatprep.mubr.f32.mxu1 %v40999_v23  ;;  %28924 = vmatmul.mubr.f32.gmra.mrb[22].mxu0 %v40965_v11  ;;  %41004 = vst [vmem:[#allocation158_spill] sm:$0xff] %v35338_v57  ;;  %v10006_v11 = vld [vmem:[#allocation2 + $0x62] sm:$0xff]  ;;  %41006 = vst [vmem:[#allocation56_spill] sm:$0xff] %v35344_v44  ;;  %v35360_v41 = vsub.f32 %v10044_v20, %v35338_v57 }
 0x2a5   : > { %28926 = vmatprep.mubr.f32.mxu0 %v40966_v51  ;;  %v35347_v51 = vsub.f32 %v10041_v54, %v35328_v17  ;;  %v10053_v7 = vsel %vm223_vm1, %v10006_v11, 0  ;;  %v35406_v11 = vand.u32 4294901760, %v10059_v18 }
 0x2a6   : > { %41012 = vst [vmem:[#allocation36_spill] sm:$0xff] %v35360_v41  ;;  %v35376_v59 = vand.u32 4294901760, %v10053_v7  ;;  %v35385_v54 = vand.u32 4294901760, %v35360_v41 }
 0x2a7   : > { %27909 = vmatmul.mubr.f32.gmra.mrb[12].mxu1 %v41002_v25  ;;  %41007 = vst [vmem:[#allocation15_spill] sm:$0xff] %v35347_v51  ;;  %v35370_v58 = vand.u32 4294901760, %v35347_v51 }
 0x2a8   : > { %27911 = vmatprep.mubr.f32.mxu1 %v41005_v34  ;;  %28927 = vmatmul.mubr.f32.gmra.mrb[24].mxu0 %v40969_v38  ;;  %v35357_v38 = vand.u32 4294901760, %v35336_v21  ;;  %41020 = vst [vmem:[#allocation69_spill] sm:$0xff] %v35376_v59  ;;  %41023 = vst [vmem:[#allocation76_spill] sm:$0xff] %v35385_v54  ;;  %v35404_v25 = vsub.f32 %v10053_v7, %v35376_v59  ;;  %v10062_v34 = vsel %vm223_vm1, %v10009_v5, 0  ;;  %v10012_v7 = vld [vmem:[#allocation2 + $0xaa] sm:$0xff] }
 0x2a9   : > { %28929 = vmatprep.mubr.f32.mxu0 %v40970_v16  ;;  %v10202_v16 = vsub.f32 %v35326_v8, %v35344_v44  ;;  %41017 = vst [vmem:[#allocation53_spill] sm:$0xff] %v35370_v58  ;;  %v10222_v20 = vsub.f32 %v35347_v51, %v35370_v58  ;;  %v41064_v44 = vand.u32 4294901760, %v35031_v53  ;;  %v41115_v51 = vld [vmem:[#allocation110_spill] sm:$0xff] }
 0x2aa   : > { %41011 = vst [vmem:[#allocation27_spill] sm:$0xff] %v35357_v38  ;;  %v10212_v39 = vsub.f32 %v35336_v21, %v35357_v38  ;;  %41030 = vst [vmem:[#allocation84_spill] sm:$0xff] %v35404_v25  ;;  %v35436_v5 = vand.u32 4294901760, %v35404_v25 }
 0x2ab   : > { %27912 = vmatmul.mubr.f32.gmra.mrb[14].mxu1 %v41010_v4  ;;  %v35393_v23 = vand.u32 4294901760, %v10202_v16  ;;  %v10232_v4 = vsub.f32 %v35360_v41, %v35385_v54  ;;  %v10013_v16 = vld [vmem:[#allocation2 + $0xb2] sm:$0xff]  ;;  %v41056_v54 = vand.u32 4294901760, %v35010_v43  ;;  %v10031_v41 = vld [vmem:[#allocation2 + $0x18a] sm:$0xff] }
 0x2ac   : > { %27914 = vmatprep.mubr.f32.mxu1 %v41015_v42  ;;  %28930 = vmatmul.mubr.f32.gmra.mrb[26].mxu0 %v41016_v13  ;;  %v35412_v2 = vand.u32 4294901760, %v10212_v39  ;;  %v35425_v42 = vand.u32 4294901760, %v10062_v34  ;;  %v10068_v13 = vsel %vm223_vm1, %v10011_v33, 0  ;;  %41037 = vst [vmem:[#allocation59_spill] sm:$0xff] %v35436_v5 }
 0x2ad   : > { %28932 = vmatprep.mubr.f32.mxu0 %v41019_v22  ;;  %41027 = vst [vmem:[#allocation100_spill] sm:$0xff] %v35393_v23  ;;  %v35431_v22 = vand.u32 4294901760, %v10222_v20  ;;  %v35448_v50 = vand.u32 4294901760, %v10068_v13  ;;  %v41041_v20 = vand.u32 4294901760, %v40984_v26  ;;  %v10262_v26 = vsub.f32 %v35404_v25, %v35436_v5 }
 0x2ae   : > { %41032 = vst [vmem:[#allocation81_spill] sm:$0xff] %v35412_v2  ;;  %v35458_v36 = vsub.f32 %v10062_v34, %v35425_v42  ;;  %v10015_v34 = vld [vmem:[#allocation2 + $0xca] sm:$0xff] }
 0x2af   : > { %27915 = vmatmul.mubr.f32.gmra.mrb[16].mxu1 %v41022_v27  ;;  %41036 = vst [vmem:[#allocation135_spill] sm:$0xff] %v35431_v22  ;;  %v35444_v27 = vand.u32 4294901760, %v10232_v4  ;;  %v35466_v4 = vand.u32 4294901760, %v10242_v63  ;;  %v35483_v63 = vsub.f32 %v10068_v13, %v35448_v50  ;;  %v10080_v13 = vsel %vm223_vm1, %v10015_v34, 0 }
 0x2b0   : > { %27917 = vmatprep.mubr.f32.mxu1 %v41026_v48  ;;  %28933 = vmatmul.mubr.f32.gmra.mrb[28].mxu0 %v40978_v12  ;;  %v10065_v12 = vsel %vm223_vm1, %v10010_v9, 0  ;;  %v10071_v9 = vsel %vm223_vm1, %v10012_v7, 0  ;;  %v10074_v48 = vsel %vm223_vm1, %v10013_v16, 0  ;;  %41043 = vst [vmem:[#allocation140_spill] sm:$0xff] %v35458_v36  ;;  %v35519_v58 = vand.u32 4294901760, %v10080_v13 }
 0x2b1   : > { %28935 = vmatprep.mubr.f32.mxu0 %v40979_v32  ;;  %v35417_v32 = vand.u32 4294901760, %v35388_v19  ;;  %v35427_v47 = vand.u32 4294901760, %v10065_v12  ;;  %41040 = vst [vmem:[#allocation103_spill] sm:$0xff] %v35444_v27  ;;  %41045 = vst [vmem:[#allocation112_spill] sm:$0xff] %v35466_v4  ;;  %v35475_v16 = vand.u32 4294901760, %v10074_v48  ;;  %v35514_v34 = vand.u32 4294901760, %v35483_v63 }
 0x2b2   : > { %41049 = vst [vmem:[#allocation115_spill] sm:$0xff] %v35483_v63 }
 0x2b3   : > { %27918 = vmatmul.mubr.f32.gmra.mrb[18].mxu1 %v41031_v0  ;;  %41033 = vst [vmem:[#allocation88_spill] sm:$0xff] %v35417_v32  ;;  %v10252_v39 = vsub.f32 %v35388_v19, %v35417_v32  ;;  %v35461_v33 = vsub.f32 %v10065_v12, %v35427_v47  ;;  %v10077_v0 = vsel %vm223_vm1, %v10014_v10, 0  ;;  %v41047_v12 = vand.u32 4294901760, %v34982_v62  ;;  %41057 = vst [vmem:[#allocation149_spill] sm:$0xff] %v35514_v34 }
 0x2b4   : > { %27920 = vmatprep.mubr.f32.mxu1 %v41034_v56  ;;  %28936 = vmatmul.mubr.f32.gmra.mrb[30].mxu0 %v40982_v55  ;;  %v35439_v55 = vsub.f32 %v10059_v18, %v35406_v11  ;;  %v35455_v18 = vand.u32 4294901760, %v35423_v37  ;;  %v35473_v56 = vand.u32 4294901760, %v10071_v9  ;;  %v35485_v10 = vand.u32 4294901760, %v10077_v0 }
 0x2b5   : > { %28940 = vmatprep.mubr.f32.mxu0 %v35393_v23  ;;  %41044 = vst [vmem:[#allocation108_spill] sm:$0xff] %v35461_v33  ;;  %v35493_v32 = vand.u32 4294901760, %v35458_v36  ;;  %v35496_v62 = vand.u32 4294901760, %v35461_v33 }
 0x2b6   : > { %41038 = vst [vmem:[#allocation95_spill] sm:$0xff] %v35439_v55  ;;  %41042 = vst [vmem:[#allocation139_spill] sm:$0xff] %v35455_v18  ;;  %v35471_v7 = vand.u32 4294901760, %v35439_v55  ;;  %v10272_v5 = vsub.f32 %v35423_v37, %v35455_v18 }
 0x2b7   : > { %27921 = vmatmul.mubr.f32.gmra.mrb[20].mxu1 %v41039_v52  ;;  %v10016_v52 = vld [vmem:[#allocation2 + $0xda] sm:$0xff]  ;;  %41051 = vst [vmem:[#allocation118_spill] sm:$0xff] %v35493_v32  ;;  %41052 = vst [vmem:[#allocation146_spill] sm:$0xff] %v35496_v62  ;;  %v10292_v43 = vsub.f32 %v35458_v36, %v35493_v32 }
 0x2b8   : > { %27923 = vmatprep.mubr.f32.mxu1 %v41041_v20  ;;  %28941 = vmatmul.mubr.f32.vlgmr.msra.gmra.mrb[0].mxu0 %v35412_v2  ;;  %41046 = vst [vmem:[#allocation142_spill] sm:$0xff] %v35471_v7  ;;  %v41050_v20 = vand.u32 4294901760, %v40985_v30  ;;  %v10282_v30 = vsub.f32 %v35439_v55, %v35471_v7  ;;  %v10083_v18 = vsel %vm223_vm1, %v10016_v52, 0  ;;  %v10018_v7 = vld [vmem:[#allocation2 + $0xf2] sm:$0xff]  ;;  %v10019_v32 = vld [vmem:[#allocation2 + $0xfa] sm:$0xff] }
 0x2b9   : > { %28989 = vmatpush3.msra.mxu0 %v35252_v35  ;;  %28943 = vmatprep.mubr.f32.mxu0 %v35431_v22  ;;  %v35480_v35 = vand.u32 4294901760, %v10252_v39  ;;  %v35500_v39 = vand.u32 4294901760, %v10262_v26  ;;  %v35517_v26 = vsub.f32 %v10077_v0, %v35485_v10  ;;  %v35536_v38 = vand.u32 4294901760, %v10083_v18 }
 0x2ba   : > { %29038 = vmatprep.subr.mxu0 %v35233_v29  ;;  %v35531_v0 = vand.u32 4294901760, %v10282_v30  ;;  %v10312_v30 = vsub.f32 %v35483_v63, %v35514_v34 }
 0x2bb   : > { %27924 = vmatmul.mubr.f32.gmra.mrb[22].mxu1 %v41047_v12  ;;  %41048 = vst [vmem:[#allocation144_spill] sm:$0xff] %v35480_v35  ;;  %41053 = vst [vmem:[#allocation148_spill] sm:$0xff] %v35500_v39  ;;  %v35505_v12 = vsub.f32 %v10071_v9, %v35473_v56  ;;  %v41059_v9 = vand.u32 4294901760, %v35016_v45  ;;  %v10086_v45 = vsel %vm223_vm1, %v10017_v60, 0  ;;  %v41067_v60 = vand.u32 4294901760, %v35038_v1 }
 0x2bc   : > { %27926 = vmatprep.mubr.f32.mxu1 %v41050_v20  ;;  %28944 = vmatmul.mubr.f32.gmra.mrb[2].mxu0 %v35444_v27  ;;  %v35508_v20 = vsub.f32 %v10074_v48, %v35475_v16  ;;  %41058 = vst [vmem:[#allocation150_spill] sm:$0xff] %v35517_v26  ;;  %v35524_v48 = vand.u32 4294901760, %v10272_v5  ;;  %41061 = vst [vmem:[#allocation75_spill] sm:$0xff] %v35531_v0  ;;  %v35560_v53 = vand.u32 4294901760, %v10086_v45  ;;  %v10092_v1 = vsel %vm223_vm1, %v10019_v32, 0 }
 0x2bd   : > { %28946 = vmatprep.mubr.f32.mxu0 %v35466_v4  ;;  %41054 = vst [vmem:[#allocation35_spill] sm:$0xff] %v35505_v12  ;;  %v35534_v52 = vand.u32 4294901760, %v35505_v12  ;;  %v41071_v27 = vand.u32 4294901760, %v35050_v28  ;;  %v41074_v32 = vand.u32 4294901760, %v35061_v46 }
 0x2be   : > { %41055 = vst [vmem:[#allocation43_spill] sm:$0xff] %v35508_v20  ;;  %41060 = vst [vmem:[#allocation50_spill] sm:$0xff] %v35524_v48  ;;  %v35540_v5 = vand.u32 4294901760, %v35508_v20 }
 0x2bf   : > { %27927 = vmatmul.mubr.f32.gmra.mrb[24].mxu1 %v41056_v54  ;;  %v10302_v54 = vsub.f32 %v35461_v33, %v35496_v62  ;;  %41062 = vst [vmem:[#allocation153_spill] sm:$0xff] %v35534_v52  ;;  %v35548_v62 = vand.u32 4294901760, %v35517_v26 }
 0x2c0   : > { %27929 = vmatprep.mubr.f32.mxu1 %v41059_v9  ;;  %28947 = vmatmul.mubr.f32.gmra.mrb[4].mxu0 %v35480_v35  ;;  %41063 = vst [vmem:[#allocation23_spill] sm:$0xff] %v35540_v5  ;;  %v10089_v9 = vsel %vm223_vm1, %v10018_v7, 0  ;;  %v10020_v35 = vld [vmem:[#allocation2 + $0x10a] sm:$0xff]  ;;  %v35556_v7 = vand.u32 4294901760, %v10292_v43  ;;  %v10332_v43 = vsub.f32 %v35508_v20, %v35540_v5  ;;  %v35587_v5 = vsub.f32 %v10086_v45, %v35560_v53 }
 0x2c1   : > { %28949 = vmatprep.mubr.f32.mxu0 %v35500_v39  ;;  %41065 = vst [vmem:[#allocation92_spill] sm:$0xff] %v35548_v62  ;;  %v35551_v39 = vsub.f32 %v10080_v13, %v35519_v58  ;;  %v35558_v4 = vand.u32 4294901760, %v10302_v54  ;;  %v35566_v13 = vsub.f32 %v10083_v18, %v35536_v38  ;;  %v35568_v34 = vand.u32 4294901760, %v10089_v9  ;;  %v10023_v45 = vld [vmem:[#allocation2 + $0x12a] sm:$0xff] }
 0x2c2   : > { %41068 = vst [vmem:[#allocation154_spill] sm:$0xff] %v35556_v7  ;;  %v10095_v54 = vsel %vm223_vm1, %v10020_v35, 0  ;;  %v10342_v18 = vsub.f32 %v35517_v26, %v35548_v62  ;;  %41075 = vst [vmem:[#allocation24_spill] sm:$0xff] %v35587_v5  ;;  %v35589_v35 = vand.u32 4294901760, %v10092_v1  ;;  %v41081_v26 = vld [vmem:[#allocation65_spill] sm:$0xff]  ;;  %v35625_v20 = vand.u32 4294901760, %v35587_v5 }
 0x2c3   : > { %27930 = vmatmul.mubr.f32.gmra.mrb[26].mxu1 %v41064_v44  ;;  %41066 = vst [vmem:[#allocation107_spill] sm:$0xff] %v35551_v39  ;;  %41069 = vst [vmem:[#allocation155_spill] sm:$0xff] %v35558_v4  ;;  %v10322_v44 = vsub.f32 %v35505_v12, %v35534_v52  ;;  %v35581_v52 = vand.u32 4294901760, %v35551_v39  ;;  %v35597_v62 = vand.u32 4294901760, %v35566_v13  ;;  %v35600_v46 = vsub.f32 %v10089_v9, %v35568_v34  ;;  %v41090_v12 = vld [vmem:[#allocation74_spill] sm:$0xff] }
 0x2c4   : > { %27932 = vmatprep.mubr.f32.mxu1 %v41067_v60  ;;  %28950 = vmatmul.mubr.f32.gmra.mrb[6].mxu0 %v35524_v48  ;;  %41070 = vst [vmem:[#allocation47_spill] sm:$0xff] %v35566_v13  ;;  %v10021_v60 = vld [vmem:[#allocation2 + $0x112] sm:$0xff]  ;;  %v10022_v48 = vld [vmem:[#allocation2 + $0x122] sm:$0xff]  ;;  %41083 = vst [vmem:[#allocation137_spill] sm:$0xff] %v35625_v20 }
 0x2c5   : > { %28952 = vmatprep.mubr.f32.mxu0 %v35531_v0  ;;  %v35576_v0 = vand.u32 4294901760, %v10312_v30  ;;  %41073 = vst [vmem:[#allocation160_spill] sm:$0xff] %v35581_v52  ;;  %v10098_v28 = vsel %vm223_vm1, %v10021_v60, 0  ;;  %v35594_v30 = vand.u32 4294901760, %v10322_v44  ;;  %41077 = vst [vmem:[#allocation161_spill] sm:$0xff] %v35597_v62  ;;  %v35607_v60 = vand.u32 4294901760, %v10332_v43 }
 0x2c6   : > { %41078 = vst [vmem:[#allocation162_spill] sm:$0xff] %v35600_v46  ;;  %v10352_v44 = vsub.f32 %v35551_v39, %v35581_v52  ;;  %v35613_v22 = vand.u32 4294901760, %v10098_v28  ;;  %v35622_v43 = vand.u32 4294901760, %v10342_v18  ;;  %v35635_v52 = vand.u32 4294901760, %v35600_v46  ;;  %v10025_v39 = vld [vmem:[#allocation2 + $0x142] sm:$0xff] }
 0x2c7   : > { %27933 = vmatmul.mubr.f32.gmra.mrb[28].mxu1 %v41071_v27  ;;  %41072 = vst [vmem:[#allocation159_spill] sm:$0xff] %v35576_v0  ;;  %v10101_v27 = vsel %vm223_vm1, %v10022_v48, 0  ;;  %41076 = vst [vmem:[#allocation51_spill] sm:$0xff] %v35594_v30  ;;  %v10024_v48 = vld [vmem:[#allocation2 + $0x13a] sm:$0xff] }
 0x2c8   : > { %27935 = vmatprep.mubr.f32.mxu1 %v41074_v32  ;;  %28953 = vmatmul.mubr.f32.gmra.mrb[8].mxu0 %v35556_v7  ;;  %v35602_v32 = vand.u32 4294901760, %v10095_v54  ;;  %v25146_v7 = vld [vmem:[%s39344_s1 + $0x8] sm:$0xf]  ;;  %41079 = vst [vmem:[#allocation156_spill] sm:$0xff] %v35607_v60  ;;  %v35615_v9 = vand.u32 4294901760, %v10101_v27  ;;  %41082 = vst [vmem:[#allocation91_spill] sm:$0xff] %v35622_v43  ;;  %v10382_v33 = vsub.f32 %v35600_v46, %v35635_v52 }
 0x2c9   : > { %28955 = vmatprep.mubr.f32.mxu0 %v35558_v4  ;;  %v41080_v4 = vand.u32 4294901760, %v35072_v40  ;;  %v35618_v2 = vsel %vm507_vm0, %v25146_v7, 0  ;;  %v35628_v40 = vsub.f32 %v10092_v1, %v35589_v35  ;;  %v10362_v7 = vsub.f32 %v35566_v13, %v35597_v62  ;;  %41085 = vst [vmem:[#allocation157_spill] sm:$0xff] %v35635_v52  ;;  %v41087_v1 = vld [vmem:[#allocation66_spill] sm:$0xff]  ;;  %v10028_v46 = vld [vmem:[#allocation2 + $0x16a] sm:$0xff] }
 0x2ca   : > { %v10107_v18 = vsel %vm223_vm1, %v10024_v48, 0  ;;  %v35642_v23 = vand.u32 4294901760, %v35618_v2  ;;  %v10026_v13 = vld [vmem:[#allocation2 + $0x152] sm:$0xff]  ;;  %v10372_v48 = vsub.f32 %v35587_v5, %v35625_v20  ;;  %v35698_v25 = vand.u32 4294901760, %v10382_v33 }
 0x2cb   : > { %27936 = vmatmul.mubr.f32.gmra.mrb[30].mxu1 %v41080_v4  ;;  %41084 = vst [vmem:[#allocation40_spill] sm:$0xff] %v35628_v40  ;;  %v10104_v4 = vsel %vm223_vm1, %v10023_v45, 0  ;;  %v35646_v45 = vsub.f32 %v10098_v28, %v35613_v22  ;;  %v35660_v63 = vand.u32 4294901760, %v35628_v40  ;;  %v35662_v28 = vand.u32 4294901760, %v10107_v18  ;;  %v41095_v5 = vld [vmem:[#allocation82_spill] sm:$0xff] }
 0x2cc   : > { %27940 = vmatprep.mubr.f32.mxu1 %v41081_v26  ;;  %28956 = vmatmul.mubr.f32.gmra.mrb[10].mxu0 %v35576_v0  ;;  %v35638_v0 = vsub.f32 %v10095_v54, %v35602_v32  ;;  %v35651_v62 = vand.u32 4294901760, %v10104_v4  ;;  %v35655_v54 = vand.u32 4294901760, %v10352_v44  ;;  %v10110_v44 = vsel %vm223_vm1, %v10025_v39, 0  ;;  %v41099_v39 = vld [vmem:[#allocation90_spill] sm:$0xff]  ;;  %41103 = vst [vmem:[#allocation178_spill] sm:$0xff] %v35698_v25 }
 0x2cd   : > { %28958 = vmatprep.mubr.f32.mxu0 %v35594_v30  ;;  %41088 = vst [vmem:[#allocation145_spill] sm:$0xff] %v35646_v45  ;;  %v35649_v30 = vsub.f32 %v10101_v27, %v35615_v9  ;;  %41092 = vst [vmem:[#allocation74_spill] sm:$0xff] %v35660_v63  ;;  %v35665_v27 = vand.u32 4294901760, %v10362_v7  ;;  %v10113_v20 = vsel %vm223_vm1, %v10026_v13, 0  ;;  %v35678_v7 = vand.u32 4294901760, %v35646_v45 }
 0x2ce   : > { %41086 = vst [vmem:[#allocation141_spill] sm:$0xff] %v35638_v0  ;;  %41091 = vst [vmem:[#allocation66_spill] sm:$0xff] %v35655_v54  ;;  %v35670_v36 = vand.u32 4294901760, %v35638_v0  ;;  %v35684_v52 = vsub.f32 %v10104_v4, %v35651_v62  ;;  %v10392_v13 = vsub.f32 %v35628_v40, %v35660_v63  ;;  %v35693_v55 = vsub.f32 %v10107_v18, %v35662_v28  ;;  %v41105_v63 = vld [vmem:[#allocation99_spill] sm:$0xff] }
 0x2cf   : > { %27941 = vmatmul.mubr.f32.vlgmr.msra.gmra.mrb[0].mxu1 %v41087_v1  ;;  %41089 = vst [vmem:[#allocation65_spill] sm:$0xff] %v35649_v30  ;;  %41093 = vst [vmem:[#allocation172_spill] sm:$0xff] %v35665_v27  ;;  %v35695_v37 = vand.u32 4294901760, %v10110_v44  ;;  %v35702_v19 = vand.u32 4294901760, %v10113_v20  ;;  %v10412_v18 = vsub.f32 %v35646_v45, %v35678_v7  ;;  %v10030_v40 = vld [vmem:[#allocation2 + $0x182] sm:$0xff] }
 0x2d0   : > { %27943 = vmatprep.mubr.f32.mxu1 %v41090_v12  ;;  %28959 = vmatmul.mubr.f32.gmra.mrb[12].mxu0 %v35607_v60  ;;  %41094 = vst [vmem:[#allocation173_spill] sm:$0xff] %v35670_v36  ;;  %v10027_v60 = vld [vmem:[#allocation2 + $0x15a] sm:$0xff]  ;;  %41096 = vst [vmem:[#allocation82_spill] sm:$0xff] %v35678_v7  ;;  %v10402_v4 = vsub.f32 %v35638_v0, %v35670_v36  ;;  %v35712_v33 = vand.u32 4294901760, %v35684_v52  ;;  %v41107_v36 = vld [vmem:[#allocation105_spill] sm:$0xff] }
 0x2d1   : > { %28961 = vmatprep.mubr.f32.mxu0 %v35622_v43  ;;  %27989 = vmatpush3.msra.mxu1 %v34494_v15  ;;  %v35681_v43 = vand.u32 4294901760, %v35649_v30  ;;  %41098 = vst [vmem:[#allocation175_spill] sm:$0xff] %v35684_v52  ;;  %v35688_v15 = vand.u32 4294901760, %v10372_v48  ;;  %41101 = vst [vmem:[#allocation176_spill] sm:$0xff] %v35693_v55  ;;  %v10116_v48 = vsel %vm223_vm1, %v10027_v60, 0  ;;  %v35716_v60 = vand.u32 4294901760, %v10392_v13 }
 0x2d2   : > { %28038 = vmatprep.subr.mxu1 %v35642_v23  ;;  %41102 = vst [vmem:[#allocation177_spill] sm:$0xff] %v35695_v37  ;;  %41104 = vst [vmem:[#allocation179_spill] sm:$0xff] %v35702_v19  ;;  %v35722_v0 = vsub.f32 %v10110_v44, %v35695_v37  ;;  %v35724_v7 = vand.u32 4294901760, %v10116_v48  ;;  %v10122_v13 = vsel %vm223_vm1, %v10029_v61, 0  ;;  %v35737_v44 = vand.u32 4294901760, %v10412_v18 }
 0x2d3   : > { %27944 = vmatmul.mubr.f32.gmra.mrb[2].mxu1 %v41095_v5  ;;  %41097 = vst [vmem:[#allocation174_spill] sm:$0xff] %v35681_v43  ;;  %41100 = vst [vmem:[#allocation90_spill] sm:$0xff] %v35688_v15  ;;  %v35753_v18 = vand.u32 4294901760, %v10122_v13 }
 0x2d4   : > { %27946 = vmatprep.mubr.f32.mxu1 %v41099_v39  ;;  %28962 = vmatmul.mubr.f32.gmra.mrb[14].mxu0 %v35655_v54  ;;  %v10119_v54 = vsel %vm223_vm1, %v10028_v46, 0  ;;  %41106 = vst [vmem:[#allocation99_spill] sm:$0xff] %v35712_v33  ;;  %41108 = vst [vmem:[#allocation105_spill] sm:$0xff] %v35716_v60  ;;  %v35719_v46 = vand.u32 4294901760, %v35693_v55  ;;  %v35748_v61 = vand.u32 4294901760, %v35722_v0 }
 0x2d5   : > { %28964 = vmatprep.mubr.f32.mxu0 %v35665_v27  ;;  %v10422_v27 = vsub.f32 %v35649_v30, %v35681_v43  ;;  %41110 = vst [vmem:[#allocation181_spill] sm:$0xff] %v35722_v0  ;;  %41111 = vst [vmem:[#allocation182_spill] sm:$0xff] %v35724_v7  ;;  %v35727_v43 = vand.u32 4294901760, %v10402_v4  ;;  %v35730_v30 = vsub.f32 %v10113_v20, %v35702_v19  ;;  %v35732_v45 = vand.u32 4294901760, %v10119_v54 }
 0x2d6   : > { %41109 = vst [vmem:[#allocation180_spill] sm:$0xff] %v35719_v46  ;;  %41116 = vst [vmem:[#allocation110_spill] sm:$0xff] %v35737_v44  ;;  %v10432_v4 = vsub.f32 %v35684_v52, %v35712_v33  ;;  %v10442_v20 = vsub.f32 %v35693_v55, %v35719_v46  ;;  %v10128_v46 = vsel %vm223_vm1, %v10031_v41, 0  ;;  %v41125_v55 = vld [vmem:[#allocation116_spill] sm:$0xff] }
 0x2d7   : > { %27947 = vmatmul.mubr.f32.gmra.mrb[4].mxu1 %v41105_v63  ;;  %41112 = vst [vmem:[#allocation183_spill] sm:$0xff] %v35727_v43  ;;  %41113 = vst [vmem:[#allocation184_spill] sm:$0xff] %v35730_v30  ;;  %v35739_v21 = vand.u32 4294901760, %v10422_v27  ;;  %v35757_v27 = vand.u32 4294901760, %v35730_v30  ;;  %v35760_v33 = vsub.f32 %v10119_v54, %v35732_v45  ;;  %v35776_v54 = vsub.f32 %v10122_v13, %v35753_v18 }
 0x2d8   : > { %27949 = vmatprep.mubr.f32.mxu1 %v41107_v36  ;;  %28965 = vmatmul.mubr.f32.gmra.mrb[16].mxu0 %v35688_v15  ;;  %41114 = vst [vmem:[#allocation185_spill] sm:$0xff] %v35732_v45  ;;  %v10125_v15 = vsel %vm223_vm1, %v10030_v40, 0  ;;  %v35751_v40 = vsub.f32 %v10116_v48, %v35724_v7  ;;  %41121 = vst [vmem:[#allocation188_spill] sm:$0xff] %v35753_v18  ;;  %v35766_v52 = vand.u32 4294901760, %v10432_v4  ;;  %v41127_v48 = vld [vmem:[#allocation117_spill] sm:$0xff]  ;;  %v35778_v45 = vand.u32 4294901760, %v10128_v46 }
 0x2d9   : > { %28967 = vmatprep.mubr.f32.mxu0 %v35698_v25  ;;  %41117 = vst [vmem:[#allocation186_spill] sm:$0xff] %v35739_v21  ;;  %v41118_v25 = vld [vmem:[#allocation113_spill] sm:$0xff]  ;;  %41122 = vst [vmem:[#allocation189_spill] sm:$0xff] %v35757_v27  ;;  %v35781_v41 = vand.u32 4294901760, %v10442_v20  ;;  %v10462_v4 = vsub.f32 %v35730_v30, %v35757_v27  ;;  %v41135_v7 = vld [vmem:[#allocation14_spill] sm:$0xff] }
 0x2da   : > { %41119 = vst [vmem:[#allocation113_spill] sm:$0xff] %v35748_v61  ;;  %41120 = vst [vmem:[#allocation187_spill] sm:$0xff] %v35751_v40  ;;  %v35773_v8 = vand.u32 4294901760, %v35751_v40  ;;  %v35802_v27 = vsub.f32 %v10128_v46, %v35778_v45 }
 0x2db   : > { %27950 = vmatmul.mubr.f32.gmra.mrb[6].mxu1 %v41115_v51  ;;  %41123 = vst [vmem:[#allocation190_spill] sm:$0xff] %v35760_v33  ;;  %41126 = vst [vmem:[#allocation116_spill] sm:$0xff] %v35766_v52 }
 0x2dc   : > { %27952 = vmatprep.mubr.f32.mxu1 %v41118_v25  ;;  %28968 = vmatmul.mubr.f32.gmra.mrb[18].mxu0 %v35716_v60  ;;  %v35762_v60 = vand.u32 4294901760, %v10125_v15  ;;  %41128 = vst [vmem:[#allocation117_spill] sm:$0xff] %v35773_v8  ;;  %41129 = vst [vmem:[#allocation192_spill] sm:$0xff] %v35776_v54  ;;  %v10472_v20 = vsub.f32 %v35751_v40, %v35773_v8  ;;  %v41143_v40 = vld [vmem:[#allocation114_spill] sm:$0xff] }
 0x2dd   : > { %28970 = vmatprep.mubr.f32.mxu0 %v35727_v43  ;;  %v10452_v43 = vsub.f32 %v35722_v0, %v35748_v61  ;;  %41130 = vst [vmem:[#allocation193_spill] sm:$0xff] %v35778_v45  ;;  %41131 = vst [vmem:[#allocation194_spill] sm:$0xff] %v35781_v41  ;;  %v41134_v0 = vld [vmem:[#allocation11_spill] sm:$0xff] }
 0x2de   : > { %41124 = vst [vmem:[#allocation191_spill] sm:$0xff] %v35762_v60  ;;  %v35789_v61 = vsub.f32 %v10125_v15, %v35762_v60  ;;  %v35805_v15 = vand.u32 4294901760, %v10462_v4  ;;  %v41140_v60 = vld [vmem:[#allocation67_spill] sm:$0xff]  ;;  %v35813_v8 = vand.u32 4294901760, %v10472_v20 }
 0x2df   : > { %27953 = vmatmul.mubr.f32.gmra.mrb[8].mxu1 %v41125_v55  ;;  %v35794_v13 = vand.u32 4294901760, %v10452_v43  ;;  %v41139_v43 = vld [vmem:[#allocation58_spill] sm:$0xff] }
 0x2e0   : > { %27955 = vmatprep.mubr.f32.mxu1 %v41127_v48  ;;  %28971 = vmatmul.mubr.f32.gmra.mrb[20].mxu0 %v35737_v44  ;;  %v35786_v44 = vand.u32 4294901760, %v35760_v33  ;;  %41133 = vst [vmem:[#allocation196_spill] sm:$0xff] %v35789_v61  ;;  %41138 = vst [vmem:[#allocation197_spill] sm:$0xff] %v35805_v15 }
 0x2e1   : > { %28973 = vmatprep.mubr.f32.mxu0 %v35739_v21  ;;  %41136 = vst [vmem:[#allocation11_spill] sm:$0xff] %v35794_v13  ;;  %v35799_v21 = vand.u32 4294901760, %v35776_v54  ;;  %41141 = vst [vmem:[#allocation58_spill] sm:$0xff] %v35813_v8 }
 0x2e2   : > { %41132 = vst [vmem:[#allocation195_spill] sm:$0xff] %v35786_v44  ;;  %v10482_v30 = vsub.f32 %v35760_v33, %v35786_v44  ;;  %v41142_v33 = vld [vmem:[#allocation111_spill] sm:$0xff] }
 0x2e3   : > { %27956 = vmatmul.mubr.f32.gmra.mrb[10].mxu1 %v41134_v0  ;;  %41137 = vst [vmem:[#allocation14_spill] sm:$0xff] %v35799_v21  ;;  %v10492_v46 = vsub.f32 %v35776_v54, %v35799_v21 }
 0x2e4   : > { %27958 = vmatprep.mubr.f32.mxu1 %v41135_v7  ;;  %28974 = vmatmul.mubr.f32.gmra.mrb[22].mxu0 %v35766_v52  ;;  %v40074_v52 = vand.u32 4294901760, %v35789_v61  ;;  %v35819_v4 = vand.u32 4294901760, %v10482_v30 }
 0x2e5   : > { %28976 = vmatprep.mubr.f32.mxu0 %v35781_v41  ;;  %v40078_v41 = vand.u32 4294901760, %v35802_v27  ;;  %v35827_v20 = vand.u32 4294901760, %v10492_v46  ;;  %v41148_v46 = vld [vmem:[#allocation12_spill] sm:$0xff] }
 0x2e6   : > { %v10502_v44 = vsub.f32 %v35789_v61, %v40074_v52  ;;  %v41146_v61 = vld [vmem:[#allocation143_spill] sm:$0xff] }
 0x2e7   : > { %27959 = vmatmul.mubr.f32.gmra.mrb[12].mxu1 %v41139_v43  ;;  %v10512_v21 = vsub.f32 %v35802_v27, %v40078_v41  ;;  %v41149_v41 = vld [vmem:[#allocation151_spill] sm:$0xff] }
 0x2e8   : > { %27961 = vmatprep.mubr.f32.mxu1 %v41140_v60  ;;  %28977 = vmatmul.mubr.f32.gmra.mrb[24].mxu0 %v35794_v13  ;;  %v10503_v30 = vand.u32 4294901760, %v10502_v44  ;;  %v41145_v13 = vld [vmem:[#allocation138_spill] sm:$0xff]  ;;  %v41151_v44 = vld [vmem:[#allocation164_spill] sm:$0xff] }
 0x2e9   : > { %28979 = vmatprep.mubr.f32.mxu0 %v35805_v15  ;;  %v41144_v15 = vld [vmem:[#allocation136_spill] sm:$0xff]  ;;  %v10513_v52 = vand.u32 4294901760, %v10512_v21  ;;  %v41150_v21 = vld [vmem:[#allocation163_spill] sm:$0xff] }
 0x2eb   : > { %27962 = vmatmul.mubr.f32.gmra.mrb[14].mxu1 %v41142_v33 }
 0x2ec   : > { %27964 = vmatprep.mubr.f32.mxu1 %v41143_v40  ;;  %28980 = vmatmul.mubr.f32.gmra.mrb[26].mxu0 %v35813_v8  ;;  %v41147_v8 = vld [vmem:[#allocation147_spill] sm:$0xff] }
 0x2ed   : > { %28982 = vmatprep.mubr.f32.mxu0 %v35819_v4 }
 0x2ef   : > { %27965 = vmatmul.mubr.f32.gmra.mrb[16].mxu1 %v41144_v15 }
 0x2f0   : > { %27967 = vmatprep.mubr.f32.mxu1 %v41145_v13  ;;  %28983 = vmatmul.mubr.f32.gmra.mrb[28].mxu0 %v35827_v20 }
 0x2f1   : > { %28985 = vmatprep.mubr.f32.mxu0 %v10503_v30  ;;  %v41153_v30 = vld [vmem:[#allocation166_spill] sm:$0xff] }
 0x2f3   : > { %27968 = vmatmul.mubr.f32.gmra.mrb[18].mxu1 %v41146_v61 }
 0x2f4   : > { %27970 = vmatprep.mubr.f32.mxu1 %v41147_v8  ;;  %28986 = vmatmul.mubr.f32.gmra.mrb[30].mxu0 %v10513_v52  ;;  %v41152_v52 = vld [vmem:[#allocation165_spill] sm:$0xff] }
 0x2f5   : > { %28990 = vmatprep.mubr.f32.mxu0 %v35313_v31 }
 0x2f7   : > { %27971 = vmatmul.mubr.f32.gmra.mrb[20].mxu1 %v41148_v46 }
 0x2f8   : > { %27973 = vmatprep.mubr.f32.mxu1 %v41149_v41  ;;  %28991 = vmatmul.mubr.f32.vlgmr.msra.gmra.mrb[0].mxu0 %v35320_v49 }
 0x2f9   : > { %29039 = vmatpush3.msra.mxu0 %v35233_v29  ;;  %28993 = vmatprep.mubr.f32.mxu0 %v35328_v17  ;;  %v41154_v29 = vld [vmem:[#allocation167_spill] sm:$0xff]  ;;  %v41155_v17 = vld [vmem:[#allocation168_spill] sm:$0xff] }
 0x2fa   : > { %29088 = vmatprep.subr.mxu0 %v35174_v6 }
 0x2fb   : > { %27974 = vmatmul.mubr.f32.gmra.mrb[22].mxu1 %v41150_v21 }
 0x2fc   : > { %27976 = vmatprep.mubr.f32.mxu1 %v41151_v44  ;;  %28994 = vmatmul.mubr.f32.gmra.mrb[2].mxu0 %v35338_v57  ;;  %v35859_v57 = vsub.f32 %v35618_v2, %v35642_v23 }
 0x2fd   : > { %28996 = vmatprep.mubr.f32.mxu0 %v35349_v24  ;;  %v41156_v24 = vld [vmem:[#allocation169_spill] sm:$0xff] }
 0x2fe   : > { %v35863_v49 = vand.u32 4294901760, %v35859_v57 }
 0x2ff   : > { %27977 = vmatmul.mubr.f32.gmra.mrb[24].mxu1 %v41152_v52 }
 0x300   : > { %27979 = vmatprep.mubr.f32.mxu1 %v41153_v30  ;;  %28997 = vmatmul.mubr.f32.gmra.mrb[4].mxu0 %v35362_v14  ;;  %v41157_v14 = vld [vmem:[#allocation170_spill] sm:$0xff] }
 0x301   : > { %28999 = vmatprep.mubr.f32.mxu0 %v35376_v59  ;;  %v41158_v59 = vld [vmem:[#allocation171_spill] sm:$0xff] }
 0x303   : > { %27980 = vmatmul.mubr.f32.gmra.mrb[26].mxu1 %v41154_v29 }
 0x304   : > { %27982 = vmatprep.mubr.f32.mxu1 %v41155_v17  ;;  %29000 = vmatmul.mubr.f32.gmra.mrb[6].mxu0 %v35400_v3  ;;  %v4691_v3 = vsub.f32 %v35859_v57, %v35863_v49 }
 0x305   : > { %29002 = vmatprep.mubr.f32.mxu0 %v35406_v11 }
 0x306   : > { %v35874_v2 = vand.u32 4294901760, %v4691_v3  ;;  %v41160_v3 = vld [vmem:[#allocation185_spill] sm:$0xff] }
 0x307   : > { %27983 = vmatmul.mubr.f32.gmra.mrb[28].mxu1 %v41156_v24 }
 0x308   : > { %27985 = vmatprep.mubr.f32.mxu1 %v41157_v14  ;;  %29003 = vmatmul.mubr.f32.gmra.mrb[8].mxu0 %v35425_v42 }
 0x309   : > { %29005 = vmatprep.mubr.f32.mxu0 %v35427_v47 }
 0x30b   : > { %27986 = vmatmul.mubr.f32.gmra.mrb[30].mxu1 %v41158_v59 }
 0x30c   : > { %27990 = vmatprep.mubr.f32.mxu1 %v41081_v26  ;;  %29006 = vmatmul.mubr.f32.gmra.mrb[10].mxu0 %v35448_v50  ;;  %v41163_v26 = vld [vmem:[#allocation41_spill] sm:$0xff] }
 0x30d   : > { %29008 = vmatprep.mubr.f32.mxu0 %v35473_v56 }
 0x30f   : > { %27991 = vmatmul.mubr.f32.vlgmr.msra.gmra.mrb[0].mxu1 %v41087_v1  ;;  %v41166_v1 = vld [vmem:[#allocation13_spill] sm:$0xff] }
 0x310   : > { %27993 = vmatprep.mubr.f32.mxu1 %v41090_v12  ;;  %29009 = vmatmul.mubr.f32.gmra.mrb[12].mxu0 %v35475_v16  ;;  %v4169_v12 = vld [vmem:[#allocation2 + $0xa] sm:$0xff] }
 0x311   : > { %29011 = vmatprep.mubr.f32.mxu0 %v35485_v10  ;;  %28039 = vmatpush3.msra.mxu1 %v35642_v23 }
 0x312   : > { %28088 = vmatprep.subr.mxu1 %v35874_v2 }
 0x313   : > { %27994 = vmatmul.mubr.f32.gmra.mrb[2].mxu1 %v41095_v5  ;;  %v4206_v5 = vsel %vm223_vm1, %v4169_v12, 0  ;;  %v41180_v12 = vld [vmem:[#allocation150_spill] sm:$0xff] }
 0x314   : > { %27996 = vmatprep.mubr.f32.mxu1 %v41099_v39  ;;  %29012 = vmatmul.mubr.f32.gmra.mrb[14].mxu0 %v35519_v58  ;;  %v41168_v39 = vld [vmem:[#allocation36_spill] sm:$0xff] }
 0x315   : > { %29014 = vmatprep.mubr.f32.mxu0 %v35536_v38 }
 0x317   : > { %27997 = vmatmul.mubr.f32.gmra.mrb[4].mxu1 %v41105_v63 }
 0x318   : > { %27999 = vmatprep.mubr.f32.mxu1 %v41107_v36  ;;  %29015 = vmatmul.mubr.f32.gmra.mrb[16].mxu0 %v35560_v53  ;;  %v41162_v36 = vld [vmem:[#allocation31_spill] sm:$0xff] }
 0x319   : > { %29017 = vmatprep.mubr.f32.mxu0 %v35568_v34 }
 0x31b   : > { %28000 = vmatmul.mubr.f32.gmra.mrb[6].mxu1 %v41115_v51  ;;  %v41159_v51 = vld [vmem:[#allocation182_spill] sm:$0xff] }
 0x31c   : > { %28002 = vmatprep.mubr.f32.mxu1 %v41118_v25  ;;  %29018 = vmatmul.mubr.f32.gmra.mrb[18].mxu0 %v35589_v35  ;;  %v41161_v25 = vld [vmem:[#allocation191_spill] sm:$0xff] }
 0x31d   : > { %29020 = vmatprep.mubr.f32.mxu0 %v35602_v32 }
 0x31f   : > { %28003 = vmatmul.mubr.f32.gmra.mrb[8].mxu1 %v41125_v55  ;;  %v4168_v55 = vld [vmem:[#allocation2 + $0x2] sm:$0xff] }
 0x320   : > { %28005 = vmatprep.mubr.f32.mxu1 %v41127_v48  ;;  %29021 = vmatmul.mubr.f32.gmra.mrb[20].mxu0 %v35613_v22  ;;  %v4203_v63 = vsel %vm223_vm1, %v4168_v55, 0  ;;  %v41177_v55 = vld [vmem:[#allocation35_spill] sm:$0xff] }
 0x321   : > { %29023 = vmatprep.mubr.f32.mxu0 %v35615_v9 }
 0x323   : > { %28006 = vmatmul.mubr.f32.gmra.mrb[10].mxu1 %v41134_v0  ;;  %v35922_v0 = vand.u32 4294901760, %v4203_v63 }
 0x324   : > { %28008 = vmatprep.mubr.f32.mxu1 %v41135_v7  ;;  %29024 = vmatmul.mubr.f32.gmra.mrb[22].mxu0 %v35651_v62  ;;  %v35929_v7 = vand.u32 4294901760, %v4206_v5 }
 0x325   : > { %29026 = vmatprep.mubr.f32.mxu0 %v35662_v28  ;;  %41164 = vst [vmem:[#allocation67_spill] sm:$0xff] %v35922_v0 }
 0x326   : > { %41167 = vst [vmem:[#allocation111_spill] sm:$0xff] %v35929_v7 }
 0x327   : > { %28009 = vmatmul.mubr.f32.gmra.mrb[12].mxu1 %v41139_v43 }
 0x328   : > { %28011 = vmatprep.mubr.f32.mxu1 %v41140_v60  ;;  %29027 = vmatmul.mubr.f32.gmra.mrb[24].mxu0 %v35695_v37  ;;  %v41169_v60 = vld [vmem:[#allocation62_spill] sm:$0xff] }
 0x329   : > { %29029 = vmatprep.mubr.f32.mxu0 %v35702_v19 }
 0x32b   : > { %28012 = vmatmul.mubr.f32.gmra.mrb[14].mxu1 %v41142_v33  ;;  %v35934_v33 = vsub.f32 %v4203_v63, %v35922_v0  ;;  %v41179_v63 = vld [vmem:[#allocation43_spill] sm:$0xff] }
 0x32c   : > { %28014 = vmatprep.mubr.f32.mxu1 %v41143_v40  ;;  %29030 = vmatmul.mubr.f32.gmra.mrb[26].mxu0 %v41159_v51  ;;  %v41170_v40 = vld [vmem:[#allocation98_spill] sm:$0xff] }
 0x32d   : > { %29032 = vmatprep.mubr.f32.mxu0 %v41160_v3  ;;  %v40094_v48 = vand.u32 4294901760, %v35934_v33 }
 0x32f   : > { %28015 = vmatmul.mubr.f32.gmra.mrb[16].mxu1 %v41144_v15  ;;  %v41172_v15 = vld [vmem:[#allocation85_spill] sm:$0xff]  ;;  %v4370_v43 = vsub.f32 %v35934_v33, %v40094_v48  ;;  %v41191_v48 = vld [vmem:[#allocation40_spill] sm:$0xff] }
 0x330   : > { %28017 = vmatprep.mubr.f32.mxu1 %v41145_v13  ;;  %29033 = vmatmul.mubr.f32.gmra.mrb[28].mxu0 %v35753_v18 }
 0x331   : > { %29035 = vmatprep.mubr.f32.mxu0 %v41161_v25  ;;  %v41195_v25 = vld [vmem:[#allocation145_spill] sm:$0xff] }
 0x333   : > { %28018 = vmatmul.mubr.f32.gmra.mrb[18].mxu1 %v41146_v61  ;;  %v35939_v61 = vsub.f32 %v4206_v5, %v35929_v7  ;;  %v41183_v5 = vld [vmem:[#allocation107_spill] sm:$0xff] }
 0x334   : > { %28020 = vmatprep.mubr.f32.mxu1 %v41147_v8  ;;  %29036 = vmatmul.mubr.f32.gmra.mrb[30].mxu0 %v35778_v45  ;;  %v41165_v8 = vld [vmem:[#allocation15_spill] sm:$0xff] }
 0x335   : > { %29040 = vmatprep.mubr.f32.mxu0 %v41162_v36  ;;  %v40093_v13 = vand.u32 4294901760, %v35939_v61  ;;  %v41194_v45 = vld [vmem:[#allocation75_spill] sm:$0xff] }
 0x337   : > { %28021 = vmatmul.mubr.f32.gmra.mrb[20].mxu1 %v41148_v46  ;;  %v41173_v46 = vld [vmem:[#allocation95_spill] sm:$0xff] }
 0x338   : > { %28023 = vmatprep.mubr.f32.mxu1 %v41149_v41  ;;  %29041 = vmatmul.mubr.f32.vlgmr.msra.gmra.mrb[0].mxu0 %v41163_v26  ;;  %v41171_v41 = vld [vmem:[#allocation84_spill] sm:$0xff] }
 0x339   : > { %29089 = vmatpush3.msra.mxu0 %v35174_v6  ;;  %29043 = vmatprep.mubr.f32.mxu0 %v41165_v8 }
 0x33a   : > { %29138 = vmatprep.subr.mxu0 %v41166_v1 }
 0x33b   : > { %28024 = vmatmul.mubr.f32.gmra.mrb[22].mxu1 %v41150_v21  ;;  %v4380_v21 = vsub.f32 %v35939_v61, %v40093_v13  ;;  %v41189_v13 = vld [vmem:[#allocation144_spill] sm:$0xff] }
 0x33c   : > { %28026 = vmatprep.mubr.f32.mxu1 %v41151_v44  ;;  %29044 = vmatmul.mubr.f32.gmra.mrb[2].mxu0 %v41168_v39  ;;  %v41174_v44 = vld [vmem:[#allocation140_spill] sm:$0xff] }
 0x33d   : > { %29046 = vmatprep.mubr.f32.mxu0 %v41169_v60 }
 0x33f   : > { %28027 = vmatmul.mubr.f32.gmra.mrb[24].mxu1 %v41152_v52  ;;  %v4371_v52 = vand.u32 4294901760, %v4370_v43  ;;  %v41184_v43 = vld [vmem:[#allocation47_spill] sm:$0xff] }
 0x340   : > { %28029 = vmatprep.mubr.f32.mxu1 %v41153_v30  ;;  %29047 = vmatmul.mubr.f32.gmra.mrb[4].mxu0 %v41170_v40  ;;  %v4381_v30 = vand.u32 4294901760, %v4380_v21  ;;  %v41185_v21 = vld [vmem:[#allocation103_spill] sm:$0xff] }
 0x341   : > { %29049 = vmatprep.mubr.f32.mxu0 %v41171_v41 }
 0x343   : > { %28030 = vmatmul.mubr.f32.gmra.mrb[26].mxu1 %v41154_v29  ;;  %v41176_v29 = vld [vmem:[#allocation115_spill] sm:$0xff] }
 0x344   : > { %28032 = vmatprep.mubr.f32.mxu1 %v41155_v17  ;;  %29050 = vmatmul.mubr.f32.gmra.mrb[6].mxu0 %v41172_v15  ;;  %v41175_v17 = vld [vmem:[#allocation108_spill] sm:$0xff] }
 0x345   : > { %29052 = vmatprep.mubr.f32.mxu0 %v41173_v46 }
 0x347   : > { %28033 = vmatmul.mubr.f32.gmra.mrb[28].mxu1 %v41156_v24  ;;  %v41178_v24 = vld [vmem:[#allocation100_spill] sm:$0xff] }
 0x348   : > { %28035 = vmatprep.mubr.f32.mxu1 %v41157_v14  ;;  %29053 = vmatmul.mubr.f32.gmra.mrb[8].mxu0 %v41174_v44  ;;  %v41181_v14 = vld [vmem:[#allocation81_spill] sm:$0xff] }
 0x349   : > { %29055 = vmatprep.mubr.f32.mxu0 %v41175_v17 }
 0x34b   : > { %28036 = vmatmul.mubr.f32.gmra.mrb[30].mxu1 %v41158_v59  ;;  %v41182_v59 = vld [vmem:[#allocation135_spill] sm:$0xff] }
 0x34c   : > { %28040 = vmatprep.mubr.f32.mxu1 %v4371_v52  ;;  %29056 = vmatmul.mubr.f32.gmra.mrb[10].mxu0 %v41176_v29  ;;  %v41186_v52 = vld [vmem:[#allocation112_spill] sm:$0xff] }
 0x34d   : > { %29058 = vmatprep.mubr.f32.mxu0 %v41177_v55 }
 0x34f   : > { %28041 = vmatmul.mubr.f32.vlgmr.msra.gmra.mrb[0].mxu1 %v4381_v30  ;;  %v41187_v30 = vld [vmem:[#allocation24_spill] sm:$0xff] }
 0x350   : > { %28043 = vmatprep.mubr.f32.mxu1 %v41178_v24  ;;  %29059 = vmatmul.mubr.f32.gmra.mrb[12].mxu0 %v41179_v63  ;;  %v41188_v24 = vld [vmem:[#allocation162_spill] sm:$0xff] }
 0x351   : > { %29061 = vmatprep.mubr.f32.mxu0 %v41180_v12  ;;  %28089 = vmatpush3.msra.mxu1 %v35874_v2  ;;  %v41190_v2 = vld [vmem:[#allocation148_spill] sm:$0xff] }
 0x352   : > { %28138 = vmatprep.subr.mxu1 %v35859_v57 }
 0x353   : > { %28044 = vmatmul.mubr.f32.gmra.mrb[2].mxu1 %v41181_v14  ;;  %v41192_v14 = vld [vmem:[#allocation141_spill] sm:$0xff] }
 0x354   : > { %28046 = vmatprep.mubr.f32.mxu1 %v41182_v59  ;;  %29062 = vmatmul.mubr.f32.gmra.mrb[14].mxu0 %v41183_v5  ;;  %v41193_v59 = vld [vmem:[#allocation50_spill] sm:$0xff] }
 0x355   : > { %29064 = vmatprep.mubr.f32.mxu0 %v41184_v43 }
 0x357   : > { %28047 = vmatmul.mubr.f32.gmra.mrb[4].mxu1 %v41185_v21  ;;  %v41196_v21 = vld [vmem:[#allocation65_spill] sm:$0xff] }
 0x358   : > { %28049 = vmatprep.mubr.f32.mxu1 %v41186_v52  ;;  %29065 = vmatmul.mubr.f32.gmra.mrb[16].mxu0 %v41187_v30  ;;  %v41197_v52 = vld [vmem:[#allocation154_spill] sm:$0xff]  ;;  %v41198_v30 = vld [vmem:[#allocation155_spill] sm:$0xff] }
 0x359   : > { %29067 = vmatprep.mubr.f32.mxu0 %v41188_v24  ;;  %v41199_v24 = vld [vmem:[#allocation175_spill] sm:$0xff] }
 0x35b   : > { %28050 = vmatmul.mubr.f32.gmra.mrb[6].mxu1 %v41189_v13  ;;  %v41200_v13 = vld [vmem:[#allocation176_spill] sm:$0xff] }
 0x35c   : > { %28052 = vmatprep.mubr.f32.mxu1 %v41190_v2  ;;  %29068 = vmatmul.mubr.f32.gmra.mrb[18].mxu0 %v41191_v48  ;;  %v41201_v2 = vld [vmem:[#allocation159_spill] sm:$0xff] }
 0x35d   : > { %29070 = vmatprep.mubr.f32.mxu0 %v41192_v14  ;;  %v41202_v48 = vld [vmem:[#allocation51_spill] sm:$0xff]  ;;  %v41203_v14 = vld [vmem:[#allocation181_spill] sm:$0xff] }
 0x35f   : > { %28053 = vmatmul.mubr.f32.gmra.mrb[8].mxu1 %v41193_v59  ;;  %v41204_v59 = vld [vmem:[#allocation184_spill] sm:$0xff] }
 0x360   : > { %28055 = vmatprep.mubr.f32.mxu1 %v41194_v45  ;;  %29071 = vmatmul.mubr.f32.gmra.mrb[20].mxu0 %v41195_v25  ;;  %v41205_v45 = vld [vmem:[#allocation156_spill] sm:$0xff]  ;;  %v41206_v25 = vld [vmem:[#allocation91_spill] sm:$0xff] }
 0x361   : > { %29073 = vmatprep.mubr.f32.mxu0 %v41196_v21  ;;  %v41207_v21 = vld [vmem:[#allocation187_spill] sm:$0xff] }
 0x363   : > { %28056 = vmatmul.mubr.f32.gmra.mrb[10].mxu1 %v41197_v52  ;;  %v41208_v52 = vld [vmem:[#allocation190_spill] sm:$0xff] }
 0x364   : > { %28058 = vmatprep.mubr.f32.mxu1 %v41198_v30  ;;  %29074 = vmatmul.mubr.f32.gmra.mrb[22].mxu0 %v41199_v24  ;;  %v41209_v30 = vld [vmem:[#allocation66_spill] sm:$0xff]  ;;  %v41210_v24 = vld [vmem:[#allocation172_spill] sm:$0xff] }
 0x365   : > { %29076 = vmatprep.mubr.f32.mxu0 %v41200_v13 }
 0x367   : > { %28059 = vmatmul.mubr.f32.gmra.mrb[12].mxu1 %v41201_v2  ;;  %v41211_v2 = vld [vmem:[#allocation196_spill] sm:$0xff] }
 0x368   : > { %28061 = vmatprep.mubr.f32.mxu1 %v41202_v48  ;;  %29077 = vmatmul.mubr.f32.gmra.mrb[24].mxu0 %v41203_v14  ;;  %v41212_v48 = vld [vmem:[#allocation90_spill] sm:$0xff] }
 0x369   : > { %29079 = vmatprep.mubr.f32.mxu0 %v41204_v59  ;;  %v41213_v14 = vld [vmem:[#allocation178_spill] sm:$0xff]  ;;  %v41229_v59 = vld [vmem:[#allocation139_spill] sm:$0xff] }
 0x36b   : > { %28062 = vmatmul.mubr.f32.gmra.mrb[14].mxu1 %v41205_v45  ;;  %v41214_v45 = vld [vmem:[#allocation56_spill] sm:$0xff] }
 0x36c   : > { %28064 = vmatprep.mubr.f32.mxu1 %v41206_v25  ;;  %29080 = vmatmul.mubr.f32.gmra.mrb[26].mxu0 %v41207_v21  ;;  %v41215_v25 = vld [vmem:[#allocation105_spill] sm:$0xff]  ;;  %v41216_v21 = vld [vmem:[#allocation183_spill] sm:$0xff] }
 0x36d   : > { %29082 = vmatprep.mubr.f32.mxu0 %v41208_v52  ;;  %v41217_v52 = vld [vmem:[#allocation27_spill] sm:$0xff] }
 0x36f   : > { %28065 = vmatmul.mubr.f32.gmra.mrb[16].mxu1 %v41209_v30  ;;  %v41219_v30 = vld [vmem:[#allocation110_spill] sm:$0xff] }
 0x370   : > { %28067 = vmatprep.mubr.f32.mxu1 %v41210_v24  ;;  %29083 = vmatmul.mubr.f32.gmra.mrb[28].mxu0 %v35776_v54  ;;  %v41218_v24 = vld [vmem:[#allocation53_spill] sm:$0xff]  ;;  %v41222_v54 = vld [vmem:[#allocation72_spill] sm:$0xff] }
 0x371   : > { %29085 = vmatprep.mubr.f32.mxu0 %v41211_v2 }
 0x373   : > { %28068 = vmatmul.mubr.f32.gmra.mrb[18].mxu1 %v41212_v48  ;;  %v41220_v48 = vld [vmem:[#allocation186_spill] sm:$0xff] }
 0x374   : > { %28070 = vmatprep.mubr.f32.mxu1 %v41213_v14  ;;  %29086 = vmatmul.mubr.f32.gmra.mrb[30].mxu0 %v35802_v27  ;;  %v41221_v14 = vld [vmem:[#allocation76_spill] sm:$0xff] }
 0x375   : > { %29090 = vmatprep.mubr.f32.mxu0 %v41214_v45  ;;  %v41223_v45 = vld [vmem:[#allocation116_spill] sm:$0xff] }
 0x377   : > { %28071 = vmatmul.mubr.f32.gmra.mrb[20].mxu1 %v41215_v25  ;;  %v41224_v25 = vld [vmem:[#allocation194_spill] sm:$0xff] }
 0x378   : > { %28073 = vmatprep.mubr.f32.mxu1 %v41216_v21  ;;  %29091 = vmatmul.mubr.f32.vlgmr.msra.gmra.mrb[0].mxu0 %v41217_v52  ;;  %v41225_v21 = vld [vmem:[#allocation88_spill] sm:$0xff]  ;;  %v41226_v52 = vld [vmem:[#allocation59_spill] sm:$0xff] }
 0x379   : > { %29139 = vmatpush3.msra.mxu0 %v41166_v1  ;;  %29093 = vmatprep.mubr.f32.mxu0 %v41218_v24  ;;  %v41227_v1 = vld [vmem:[#allocation11_spill] sm:$0xff]  ;;  %v41228_v24 = vld [vmem:[#allocation197_spill] sm:$0xff] }
 0x37a   : > { %29188 = vmatprep.subr.mxu0 %v35174_v6 }
 0x37b   : > { %28074 = vmatmul.mubr.f32.gmra.mrb[22].mxu1 %v41219_v30  ;;  %v41230_v30 = vld [vmem:[#allocation142_spill] sm:$0xff] }
 0x37c   : > { %28076 = vmatprep.mubr.f32.mxu1 %v41220_v48  ;;  %29094 = vmatmul.mubr.f32.gmra.mrb[2].mxu0 %v41221_v14  ;;  %v41231_v48 = vld [vmem:[#allocation58_spill] sm:$0xff] }
 0x37d   : > { %29096 = vmatprep.mubr.f32.mxu0 %v41222_v54  ;;  %v41232_v54 = vld [vmem:[#allocation118_spill] sm:$0xff] }
 0x37f   : > { %28077 = vmatmul.mubr.f32.gmra.mrb[24].mxu1 %v41223_v45  ;;  %v41233_v45 = vld [vmem:[#allocation146_spill] sm:$0xff] }
 0x380   : > { %28079 = vmatprep.mubr.f32.mxu1 %v41224_v25  ;;  %29097 = vmatmul.mubr.f32.gmra.mrb[4].mxu0 %v41225_v21  ;;  %v41234_v25 = vld [vmem:[#allocation149_spill] sm:$0xff] }
 0x381   : > { %29099 = vmatprep.mubr.f32.mxu0 %v41226_v52 }
 0x383   : > { %28080 = vmatmul.mubr.f32.gmra.mrb[26].mxu1 %v41227_v1  ;;  %v41235_v1 = vld [vmem:[#allocation153_spill] sm:$0xff] }
 0x384   : > { %28082 = vmatprep.mubr.f32.mxu1 %v41228_v24  ;;  %29100 = vmatmul.mubr.f32.gmra.mrb[6].mxu0 %v41229_v59  ;;  %v41236_v24 = vld [vmem:[#allocation23_spill] sm:$0xff]  ;;  %v41250_v59 = vld [vmem:[#allocation109_spill] sm:$0xff] }
 0x385   : > { %29102 = vmatprep.mubr.f32.mxu0 %v41230_v30  ;;  %v41249_v30 = vld [vmem:[#allocation173_spill] sm:$0xff] }
 0x387   : > { %28083 = vmatmul.mubr.f32.gmra.mrb[28].mxu1 %v41231_v48  ;;  %v41237_v48 = vld [vmem:[#allocation92_spill] sm:$0xff] }
 0x388   : > { %28085 = vmatprep.mubr.f32.mxu1 %v35819_v4  ;;  %29103 = vmatmul.mubr.f32.gmra.mrb[8].mxu0 %v41232_v54  ;;  %v41238_v4 = vld [vmem:[#allocation152_spill] sm:$0xff]  ;;  %v41248_v54 = vld [vmem:[#allocation74_spill] sm:$0xff] }
 0x389   : > { %29105 = vmatprep.mubr.f32.mxu0 %v41233_v45  ;;  %v41244_v45 = vld [vmem:[#allocation137_spill] sm:$0xff] }
 0x38b   : > { %28086 = vmatmul.mubr.f32.gmra.mrb[30].mxu1 %v35827_v20  ;;  %v41239_v20 = vld [vmem:[#allocation33_spill] sm:$0xff] }
 0x38c   : > { %28090 = vmatprep.mubr.f32.mxu1 %v35922_v0  ;;  %29106 = vmatmul.mubr.f32.gmra.mrb[10].mxu0 %v41234_v25  ;;  %v41240_v0 = vld [vmem:[#allocation160_spill] sm:$0xff]  ;;  %v41241_v25 = vld [vmem:[#allocation161_spill] sm:$0xff] }
 0x38d   : > { %29108 = vmatprep.mubr.f32.mxu0 %v41235_v1  ;;  %v41242_v1 = vld [vmem:[#allocation158_spill] sm:$0xff] }
 0x38f   : > { %28091 = vmatmul.mubr.f32.vlgmr.msra.gmra.mrb[0].mxu1 %v35929_v7  ;;  %v41243_v7 = vld [vmem:[#allocation26_spill] sm:$0xff] }
 0x390   : > { %28093 = vmatprep.mubr.f32.mxu1 %v35313_v31  ;;  %29109 = vmatmul.mubr.f32.gmra.mrb[12].mxu0 %v41236_v24  ;;  %v41245_v24 = vld [vmem:[#allocation157_spill] sm:$0xff] }
 0x391   : > { %29111 = vmatprep.mubr.f32.mxu0 %v41237_v48  ;;  %28139 = vmatpush3.msra.mxu1 %v35859_v57  ;;  %v41246_v48 = vld [vmem:[#allocation44_spill] sm:$0xff]  ;;  %v41247_v57 = vld [vmem:[#allocation69_spill] sm:$0xff] }
 0x392   : > { %28188 = vmatprep.subr.mxu1 %v35642_v23 }
 0x393   : > { %28094 = vmatmul.mubr.f32.gmra.mrb[2].mxu1 %v41238_v4 }
 0x394   : > { %28096 = vmatprep.mubr.f32.mxu1 %v41239_v20  ;;  %29112 = vmatmul.mubr.f32.gmra.mrb[14].mxu0 %v41240_v0  ;;  %v41252_v0 = vld [vmem:[#allocation174_spill] sm:$0xff] }
 0x395   : > { %29114 = vmatprep.mubr.f32.mxu0 %v41241_v25  ;;  %v41251_v25 = vld [vmem:[#allocation82_spill] sm:$0xff] }
 0x397   : > { %28097 = vmatmul.mubr.f32.gmra.mrb[4].mxu1 %v41242_v1 }
 0x398   : > { %28099 = vmatprep.mubr.f32.mxu1 %v41243_v7  ;;  %29115 = vmatmul.mubr.f32.gmra.mrb[16].mxu0 %v41244_v45  ;;  %v41254_v45 = vld [vmem:[#allocation180_spill] sm:$0xff] }
 0x399   : > { %29117 = vmatprep.mubr.f32.mxu0 %v41245_v24  ;;  %v41253_v24 = vld [vmem:[#allocation99_spill] sm:$0xff] }
 0x39b   : > { %28100 = vmatmul.mubr.f32.gmra.mrb[6].mxu1 %v41246_v48 }
 0x39c   : > { %28102 = vmatprep.mubr.f32.mxu1 %v41247_v57  ;;  %29118 = vmatmul.mubr.f32.gmra.mrb[18].mxu0 %v41248_v54  ;;  %v41256_v54 = vld [vmem:[#allocation189_spill] sm:$0xff] }
 0x39d   : > { %29120 = vmatprep.mubr.f32.mxu0 %v41249_v30  ;;  %v41255_v30 = vld [vmem:[#allocation113_spill] sm:$0xff] }
 0x39f   : > { %28103 = vmatmul.mubr.f32.gmra.mrb[8].mxu1 %v41250_v59 }
 0x3a0   : > { %28105 = vmatprep.mubr.f32.mxu1 %v35406_v11  ;;  %29121 = vmatmul.mubr.f32.gmra.mrb[20].mxu0 %v41251_v25  ;;  %v41258_v25 = vld [vmem:[#allocation195_spill] sm:$0xff] }
 0x3a1   : > { %29123 = vmatprep.mubr.f32.mxu0 %v41252_v0  ;;  %v41257_v0 = vld [vmem:[#allocation117_spill] sm:$0xff] }
 0x3a3   : > { %28106 = vmatmul.mubr.f32.gmra.mrb[10].mxu1 %v35425_v42 }
 0x3a4   : > { %28108 = vmatprep.mubr.f32.mxu1 %v35427_v47  ;;  %29124 = vmatmul.mubr.f32.gmra.mrb[22].mxu0 %v41253_v24 }
 0x3a5   : > { %29126 = vmatprep.mubr.f32.mxu0 %v41254_v45  ;;  %v41259_v45 = vld [vmem:[#allocation14_spill] sm:$0xff] }
 0x3a7   : > { %28109 = vmatmul.mubr.f32.gmra.mrb[12].mxu1 %v35448_v50 }
 0x3a8   : > { %28111 = vmatprep.mubr.f32.mxu1 %v35473_v56  ;;  %29127 = vmatmul.mubr.f32.gmra.mrb[24].mxu0 %v41255_v30  ;;  %v25150_v30 = vld [vmem:[%s39344_s1 + $0x18] sm:$0xf] }
 0x3a9   : > { %29129 = vmatprep.mubr.f32.mxu0 %v41256_v54  ;;  %v41260_v54 = vand.u32 4294901760, %v41211_v2  ;;  %v12076_v24 = vsel %vm507_vm0, %v25150_v30, 0  ;;  %v41280_v2 = vld [vmem:[#allocation27_spill] sm:$0xff]  ;;  %v11945_v30 = vld [vmem:[#allocation2 + $0x30] sm:$0xff] }
 0x3ab   : > { %28112 = vmatmul.mubr.f32.gmra.mrb[14].mxu1 %v35475_v16 }
 0x3ac   : > { %28114 = vmatprep.mubr.f32.mxu1 %v35485_v10  ;;  %29130 = vmatmul.mubr.f32.gmra.mrb[26].mxu0 %v41257_v0  ;;  %v36078_v0 = vand.u32 4294901760, %v12076_v24 }
 0x3ad   : > { %29132 = vmatprep.mubr.f32.mxu0 %v41258_v25  ;;  %v41261_v25 = vand.u32 4294901760, %v35802_v27 }
 0x3af   : > { %28115 = vmatmul.mubr.f32.gmra.mrb[16].mxu1 %v35519_v58 }
 0x3b0   : > { %28117 = vmatprep.mubr.f32.mxu1 %v35536_v38  ;;  %29133 = vmatmul.mubr.f32.gmra.mrb[28].mxu0 %v41259_v45 }
 0x3b1   : > { %29135 = vmatprep.mubr.f32.mxu0 %v41260_v54  ;;  %v41263_v54 = vld [vmem:[#allocation191_spill] sm:$0xff] }
 0x3b3   : > { %28118 = vmatmul.mubr.f32.gmra.mrb[18].mxu1 %v35560_v53 }
 0x3b4   : > { %28120 = vmatprep.mubr.f32.mxu1 %v35568_v34  ;;  %29136 = vmatmul.mubr.f32.gmra.mrb[30].mxu0 %v41261_v25  ;;  %v11946_v25 = vld [vmem:[#allocation2 + $0x38] sm:$0xff] }
 0x3b5   : > { %29140 = vmatprep.mubr.f32.mxu0 %v35313_v31 }
 0x3b7   : > { %28121 = vmatmul.mubr.f32.gmra.mrb[20].mxu1 %v35589_v35 }
 0x3b8   : > { %28123 = vmatprep.mubr.f32.mxu1 %v35602_v32  ;;  %29141 = vmatmul.mubr.f32.vlgmr.msra.gmra.mrb[0].mxu0 %v41238_v4 }
 0x3b9   : > { %29189 = vmatpush3.msra.mxu0 %v35174_v6  ;;  %29143 = vmatprep.mubr.f32.mxu0 %v41239_v20  ;;  %v36137_v6 = vsub.f32 %v12076_v24, %v36078_v0  ;;  %v11947_v24 = vld [vmem:[#allocation2 + $0x48] sm:$0xff] }
 0x3ba   : > { %29238 = vmatprep.subr.mxu0 %v36078_v0 }
 0x3bb   : > { %28124 = vmatmul.mubr.f32.gmra.mrb[22].mxu1 %v35613_v22  ;;  %v36144_v27 = vand.u32 4294901760, %v36137_v6 }
 0x3bc   : > { %28126 = vmatprep.mubr.f32.mxu1 %v35615_v9  ;;  %29144 = vmatmul.mubr.f32.gmra.mrb[2].mxu0 %v41242_v1 }
 0x3bd   : > { %29146 = vmatprep.mubr.f32.mxu0 %v41243_v7  ;;  %41262 = vst [vmem:[#allocation114_spill] sm:$0xff] %v36144_v27 }
 0x3bf   : > { %28127 = vmatmul.mubr.f32.gmra.mrb[24].mxu1 %v35651_v62 }
 0x3c0   : > { %28129 = vmatprep.mubr.f32.mxu1 %v35662_v28  ;;  %29147 = vmatmul.mubr.f32.gmra.mrb[4].mxu0 %v41246_v48 }
 0x3c1   : > { %29149 = vmatprep.mubr.f32.mxu0 %v41247_v57 }
 0x3c3   : > { %28130 = vmatmul.mubr.f32.gmra.mrb[26].mxu1 %v35695_v37 }
 0x3c4   : > { %28132 = vmatprep.mubr.f32.mxu1 %v35702_v19  ;;  %29150 = vmatmul.mubr.f32.gmra.mrb[6].mxu0 %v41250_v59 }
 0x3c5   : > { %29152 = vmatprep.mubr.f32.mxu0 %v35406_v11 }
 0x3c7   : > { %28133 = vmatmul.mubr.f32.gmra.mrb[28].mxu1 %v41159_v51 }
 0x3c8   : > { %28135 = vmatprep.mubr.f32.mxu1 %v41160_v3  ;;  %29153 = vmatmul.mubr.f32.gmra.mrb[8].mxu0 %v35425_v42 }
 0x3c9   : > { %29155 = vmatprep.mubr.f32.mxu0 %v35427_v47 }
 0x3cb   : > { %28136 = vmatmul.mubr.f32.gmra.mrb[30].mxu1 %v35753_v18 }
 0x3cc   : > { %28140 = vmatprep.mubr.f32.mxu1 %v35934_v33  ;;  %29156 = vmatmul.mubr.f32.gmra.mrb[10].mxu0 %v35448_v50 }
 0x3cd   : > { %29158 = vmatprep.mubr.f32.mxu0 %v35473_v56 }
 0x3cf   : > { %28141 = vmatmul.mubr.f32.vlgmr.msra.gmra.mrb[0].mxu1 %v35939_v61 }
 0x3d0   : > { %28143 = vmatprep.mubr.f32.mxu1 %v41162_v36  ;;  %29159 = vmatmul.mubr.f32.gmra.mrb[12].mxu0 %v35475_v16  ;;  %v12468_v36 = vsub.f32 %v36137_v6, %v36144_v27 }
 0x3d1   : > { %29161 = vmatprep.mubr.f32.mxu0 %v35485_v10  ;;  %28189 = vmatpush3.msra.mxu1 %v35642_v23 }
 0x3d2   : > { %28238 = vmatprep.subr.mxu1 %v35863_v49 }
 0x3d3   : > { %28144 = vmatmul.mubr.f32.gmra.mrb[2].mxu1 %v41163_v26  ;;  %v41264_v26 = vld [vmem:[#allocation24_spill] sm:$0xff] }
 0x3d4   : > { %28146 = vmatprep.mubr.f32.mxu1 %v41165_v8  ;;  %29162 = vmatmul.mubr.f32.gmra.mrb[14].mxu0 %v35519_v58  ;;  %v41265_v8 = vld [vmem:[#allocation162_spill] sm:$0xff] }
 0x3d5   : > { %29164 = vmatprep.mubr.f32.mxu0 %v35536_v38 }
 0x3d7   : > { %28147 = vmatmul.mubr.f32.gmra.mrb[4].mxu1 %v41168_v39  ;;  %v41266_v39 = vld [vmem:[#allocation193_spill] sm:$0xff] }
 0x3d8   : > { %28149 = vmatprep.mubr.f32.mxu1 %v41169_v60  ;;  %29165 = vmatmul.mubr.f32.gmra.mrb[16].mxu0 %v35560_v53  ;;  %v36156_v60 = vand.u32 4294901760, %v12468_v36  ;;  %v41284_v36 = vld [vmem:[#allocation142_spill] sm:$0xff] }
 0x3d9   : > { %29167 = vmatprep.mubr.f32.mxu0 %v35568_v34 }
 0x3db   : > { %28150 = vmatmul.mubr.f32.gmra.mrb[6].mxu1 %v41170_v40  ;;  %v41267_v40 = vld [vmem:[#allocation40_spill] sm:$0xff] }
 0x3dc   : > { %28152 = vmatprep.mubr.f32.mxu1 %v41171_v41  ;;  %29168 = vmatmul.mubr.f32.gmra.mrb[18].mxu0 %v35589_v35  ;;  %v41268_v41 = vld [vmem:[#allocation141_spill] sm:$0xff] }
 0x3dd   : > { %29170 = vmatprep.mubr.f32.mxu0 %v35602_v32 }
 0x3df   : > { %28153 = vmatmul.mubr.f32.gmra.mrb[8].mxu1 %v41172_v15  ;;  %v41269_v15 = vld [vmem:[#allocation145_spill] sm:$0xff] }
 0x3e0   : > { %28155 = vmatprep.mubr.f32.mxu1 %v41173_v46  ;;  %29171 = vmatmul.mubr.f32.gmra.mrb[20].mxu0 %v35613_v22  ;;  %v41270_v46 = vld [vmem:[#allocation65_spill] sm:$0xff] }
 0x3e1   : > { %29173 = vmatprep.mubr.f32.mxu0 %v35615_v9 }
 0x3e3   : > { %28156 = vmatmul.mubr.f32.gmra.mrb[10].mxu1 %v41174_v44  ;;  %v41271_v44 = vld [vmem:[#allocation175_spill] sm:$0xff] }
 0x3e4   : > { %28158 = vmatprep.mubr.f32.mxu1 %v41175_v17  ;;  %29174 = vmatmul.mubr.f32.gmra.mrb[22].mxu0 %v35651_v62  ;;  %v41272_v17 = vld [vmem:[#allocation181_spill] sm:$0xff] }
 0x3e5   : > { %29176 = vmatprep.mubr.f32.mxu0 %v35662_v28 }
 0x3e7   : > { %28159 = vmatmul.mubr.f32.gmra.mrb[12].mxu1 %v41176_v29  ;;  %v41273_v29 = vld [vmem:[#allocation184_spill] sm:$0xff] }
 0x3e8   : > { %28161 = vmatprep.mubr.f32.mxu1 %v41177_v55  ;;  %29177 = vmatmul.mubr.f32.gmra.mrb[24].mxu0 %v35695_v37  ;;  %v41274_v55 = vld [vmem:[#allocation187_spill] sm:$0xff] }
 0x3e9   : > { %29179 = vmatprep.mubr.f32.mxu0 %v35702_v19 }
 0x3eb   : > { %28162 = vmatmul.mubr.f32.gmra.mrb[14].mxu1 %v41179_v63  ;;  %v41275_v63 = vld [vmem:[#allocation190_spill] sm:$0xff] }
 0x3ec   : > { %28164 = vmatprep.mubr.f32.mxu1 %v41180_v12  ;;  %29180 = vmatmul.mubr.f32.gmra.mrb[26].mxu0 %v41159_v51  ;;  %v41276_v12 = vld [vmem:[#allocation192_spill] sm:$0xff] }
 0x3ed   : > { %29182 = vmatprep.mubr.f32.mxu0 %v41160_v3 }
 0x3ef   : > { %28165 = vmatmul.mubr.f32.gmra.mrb[16].mxu1 %v41183_v5  ;;  %v41277_v5 = vand.u32 4294901760, %v35934_v33  ;;  %v41281_v33 = vld [vmem:[#allocation53_spill] sm:$0xff] }
 0x3f0   : > { %28167 = vmatprep.mubr.f32.mxu1 %v41184_v43  ;;  %29183 = vmatmul.mubr.f32.gmra.mrb[28].mxu0 %v35753_v18  ;;  %v41278_v43 = vand.u32 4294901760, %v35939_v61  ;;  %v41282_v61 = vld [vmem:[#allocation72_spill] sm:$0xff] }
 0x3f1   : > { %29185 = vmatprep.mubr.f32.mxu0 %v41263_v54 }
 0x3f3   : > { %28168 = vmatmul.mubr.f32.gmra.mrb[18].mxu1 %v41264_v26 }
 0x3f4   : > { %28170 = vmatprep.mubr.f32.mxu1 %v41265_v8  ;;  %29186 = vmatmul.mubr.f32.gmra.mrb[30].mxu0 %v41266_v39  ;;  %v11948_v8 = vld [vmem:[#allocation2 + $0x50] sm:$0xff] }
 0x3f5   : > { %29190 = vmatprep.mubr.f32.mxu0 %v35313_v31 }
 0x3f7   : > { %28171 = vmatmul.mubr.f32.gmra.mrb[20].mxu1 %v41267_v40  ;;  %v11949_v40 = vld [vmem:[#allocation2 + $0x60] sm:$0xff] }
 0x3f8   : > { %28173 = vmatprep.mubr.f32.mxu1 %v41268_v41  ;;  %29191 = vmatmul.mubr.f32.vlgmr.msra.gmra.mrb[0].mxu0 %v41238_v4  ;;  %v41285_v41 = vld [vmem:[#allocation118_spill] sm:$0xff] }
 0x3f9   : > { %29239 = vmatpush3.msra.mxu0 %v36078_v0  ;;  %29193 = vmatprep.mubr.f32.mxu0 %v41239_v20 }
 0x3fa   : > { %29288 = vmatprep.subr.mxu0 %v36156_v60 }
 0x3fb   : > { %28174 = vmatmul.mubr.f32.gmra.mrb[22].mxu1 %v41269_v15 }
 0x3fc   : > { %28176 = vmatprep.mubr.f32.mxu1 %v41270_v46  ;;  %29194 = vmatmul.mubr.f32.gmra.mrb[2].mxu0 %v41242_v1  ;;  %v41286_v46 = vld [vmem:[#allocation146_spill] sm:$0xff] }
 0x3fd   : > { %29196 = vmatprep.mubr.f32.mxu0 %v41243_v7 }
 0x3ff   : > { %28177 = vmatmul.mubr.f32.gmra.mrb[24].mxu1 %v41271_v44 }
 0x400   : > { %28179 = vmatprep.mubr.f32.mxu1 %v41200_v13  ;;  %29197 = vmatmul.mubr.f32.gmra.mrb[4].mxu0 %v41246_v48  ;;  %v41279_v13 = vld [vmem:[#allocation56_spill] sm:$0xff] }
 0x401   : > { %29199 = vmatprep.mubr.f32.mxu0 %v41247_v57 }
 0x403   : > { %28180 = vmatmul.mubr.f32.gmra.mrb[26].mxu1 %v41272_v17 }
 0x404   : > { %28182 = vmatprep.mubr.f32.mxu1 %v41273_v29  ;;  %29200 = vmatmul.mubr.f32.gmra.mrb[6].mxu0 %v41250_v59  ;;  %v11989_v29 = vsel %vm223_vm1, %v11948_v8, 0 }
 0x405   : > { %29202 = vmatprep.mubr.f32.mxu0 %v35406_v11 }
 0x407   : > { %28183 = vmatmul.mubr.f32.gmra.mrb[28].mxu1 %v41274_v55  ;;  %v11992_v55 = vsel %vm223_vm1, %v11949_v40, 0  ;;  %v41294_v40 = vld [vmem:[#allocation92_spill] sm:$0xff] }
 0x408   : > { %28185 = vmatprep.mubr.f32.mxu1 %v41275_v63  ;;  %29203 = vmatmul.mubr.f32.gmra.mrb[8].mxu0 %v35425_v42  ;;  %v11950_v63 = vld [vmem:[#allocation2 + $0x68] sm:$0xff] }
 0x409   : > { %29205 = vmatprep.mubr.f32.mxu0 %v35427_v47 }
 0x40b   : > { %28186 = vmatmul.mubr.f32.gmra.mrb[30].mxu1 %v41276_v12  ;;  %v41288_v12 = vld [vmem:[#allocation149_spill] sm:$0xff] }
 0x40c   : > { %28190 = vmatprep.mubr.f32.mxu1 %v41277_v5  ;;  %29206 = vmatmul.mubr.f32.gmra.mrb[10].mxu0 %v35448_v50 }
 0x40d   : > { %29208 = vmatprep.mubr.f32.mxu0 %v35473_v56 }
 0x40f   : > { %28191 = vmatmul.mubr.f32.vlgmr.msra.gmra.mrb[0].mxu1 %v41278_v43  ;;  %v36230_v43 = vand.u32 4294901760, %v11989_v29 }
 0x410   : > { %28193 = vmatprep.mubr.f32.mxu1 %v41279_v13  ;;  %29209 = vmatmul.mubr.f32.gmra.mrb[12].mxu0 %v35475_v16  ;;  %v11951_v13 = vld [vmem:[#allocation2 + $0x78] sm:$0xff] }
 0x411   : > { %29211 = vmatprep.mubr.f32.mxu0 %v35485_v10  ;;  %28239 = vmatpush3.msra.mxu1 %v35863_v49  ;;  %v11980_v49 = vsel %vm223_vm1, %v11945_v30, 0  ;;  %v36238_v30 = vand.u32 4294901760, %v11992_v55 }
 0x412   : > { %28288 = vmatprep.subr.mxu1 %v35642_v23  ;;  %v36208_v26 = vand.u32 4294901760, %v11980_v49 }
 0x413   : > { %28194 = vmatmul.mubr.f32.gmra.mrb[2].mxu1 %v41280_v2  ;;  %v41290_v2 = vld [vmem:[#allocation153_spill] sm:$0xff] }
 0x414   : > { %28196 = vmatprep.mubr.f32.mxu1 %v41281_v33  ;;  %29212 = vmatmul.mubr.f32.gmra.mrb[14].mxu0 %v35519_v58  ;;  %v36219_v44 = vsub.f32 %v11980_v49, %v36208_v26  ;;  %v11995_v49 = vsel %vm223_vm1, %v11950_v63, 0  ;;  %v36257_v63 = vsub.f32 %v11992_v55, %v36238_v30  ;;  %v41300_v55 = vld [vmem:[#allocation161_spill] sm:$0xff] }
 0x415   : > { %29214 = vmatprep.mubr.f32.mxu0 %v35536_v38  ;;  %v36248_v8 = vand.u32 4294901760, %v11995_v49 }
 0x416   : > { %41287 = vst [vmem:[#allocation136_spill] sm:$0xff] %v36219_v44  ;;  %v40102_v33 = vand.u32 4294901760, %v36219_v44  ;;  %41295 = vst [vmem:[#allocation12_spill] sm:$0xff] %v36257_v63 }
 0x417   : > { %28197 = vmatmul.mubr.f32.gmra.mrb[4].mxu1 %v41221_v14  ;;  %v41283_v14 = vld [vmem:[#allocation139_spill] sm:$0xff] }
 0x418   : > { %28199 = vmatprep.mubr.f32.mxu1 %v41282_v61  ;;  %29215 = vmatmul.mubr.f32.gmra.mrb[16].mxu0 %v35560_v53 }
 0x419   : > { %29217 = vmatprep.mubr.f32.mxu0 %v35568_v34 }
 0x41b   : > { %28200 = vmatmul.mubr.f32.gmra.mrb[6].mxu1 %v41225_v21  ;;  %v11983_v21 = vsel %vm223_vm1, %v11946_v25, 0  ;;  %v11952_v25 = vld [vmem:[#allocation2 + $0x80] sm:$0xff] }
 0x41c   : > { %28202 = vmatprep.mubr.f32.mxu1 %v41226_v52  ;;  %29218 = vmatmul.mubr.f32.gmra.mrb[18].mxu0 %v35589_v35  ;;  %v11986_v52 = vsel %vm223_vm1, %v11947_v24, 0  ;;  %v36214_v15 = vand.u32 4294901760, %v11983_v21  ;;  %v11998_v24 = vsel %vm223_vm1, %v11951_v13, 0 }
 0x41d   : > { %29220 = vmatprep.mubr.f32.mxu0 %v35602_v32  ;;  %v36221_v17 = vand.u32 4294901760, %v11986_v52 }
 0x41e   : > { %v36228_v5 = vsub.f32 %v11983_v21, %v36214_v15  ;;  %v36246_v21 = vsub.f32 %v11989_v29, %v36230_v43  ;;  %v36261_v29 = vand.u32 4294901760, %v11998_v24 }
 0x41f   : > { %28203 = vmatmul.mubr.f32.gmra.mrb[8].mxu1 %v41283_v14  ;;  %v36236_v61 = vsub.f32 %v11986_v52, %v36221_v17  ;;  %v41292_v14 = vld [vmem:[#allocation23_spill] sm:$0xff]  ;;  %v11953_v52 = vld [vmem:[#allocation2 + $0x90] sm:$0xff] }
 0x420   : > { %28205 = vmatprep.mubr.f32.mxu1 %v41284_v36  ;;  %29221 = vmatmul.mubr.f32.gmra.mrb[20].mxu0 %v35613_v22  ;;  %41289 = vst [vmem:[#allocation138_spill] sm:$0xff] %v36228_v5  ;;  %41293 = vst [vmem:[#allocation147_spill] sm:$0xff] %v36246_v21  ;;  %v12004_v13 = vsel %vm223_vm1, %v11953_v52, 0  ;;  %v41301_v27 = vand.u32 4294901760, %v36228_v5 }
 0x421   : > { %29223 = vmatprep.mubr.f32.mxu0 %v35615_v9  ;;  %41291 = vst [vmem:[#allocation143_spill] sm:$0xff] %v36236_v61  ;;  %41296 = vst [vmem:[#allocation151_spill] sm:$0xff] %v36261_v29 }
 0x422   : > { %v12157_v52 = vsub.f32 %v36228_v5, %v41301_v27  ;;  %v41305_v27 = vand.u32 4294901760, %v36246_v21 }
 0x423   : > { %28206 = vmatmul.mubr.f32.gmra.mrb[10].mxu1 %v41285_v41  ;;  %v12147_v41 = vsub.f32 %v36219_v44, %v40102_v33  ;;  %v36267_v33 = vsub.f32 %v11995_v49, %v36248_v8  ;;  %v41302_v44 = vand.u32 4294901760, %v36236_v61  ;;  %v36282_v49 = vsub.f32 %v11998_v24, %v36261_v29  ;;  %v11957_v24 = vld [vmem:[#allocation2 + $0xc0] sm:$0xff] }
 0x424   : > { %28208 = vmatprep.mubr.f32.mxu1 %v41286_v46  ;;  %29224 = vmatmul.mubr.f32.gmra.mrb[22].mxu0 %v35651_v62 }
 0x425   : > { %29226 = vmatprep.mubr.f32.mxu0 %v35662_v28  ;;  %41298 = vst [vmem:[#allocation163_spill] sm:$0xff] %v36267_v33  ;;  %41303 = vst [vmem:[#allocation165_spill] sm:$0xff] %v36282_v49 }
 0x427   : > { %28209 = vmatmul.mubr.f32.gmra.mrb[12].mxu1 %v41288_v12  ;;  %v12001_v12 = vsel %vm223_vm1, %v11952_v25, 0  ;;  %v12148_v25 = vand.u32 4294901760, %v12147_v41 }
 0x428   : > { %28211 = vmatprep.mubr.f32.mxu1 %v41290_v2  ;;  %29227 = vmatmul.mubr.f32.gmra.mrb[24].mxu0 %v35695_v37  ;;  %v11954_v2 = vld [vmem:[#allocation2 + $0x98] sm:$0xff]  ;;  %v36269_v46 = vand.u32 4294901760, %v12001_v12 }
 0x429   : > { %29229 = vmatprep.mubr.f32.mxu0 %v35702_v19 }
 0x42a   : > { %41299 = vst [vmem:[#allocation164_spill] sm:$0xff] %v36269_v46 }
 0x42b   : > { %28212 = vmatmul.mubr.f32.gmra.mrb[14].mxu1 %v41292_v14  ;;  %v11955_v14 = vld [vmem:[#allocation2 + $0xa8] sm:$0xff] }
 0x42c   : > { %28214 = vmatprep.mubr.f32.mxu1 %v41294_v40  ;;  %29230 = vmatmul.mubr.f32.gmra.mrb[26].mxu0 %v41159_v51  ;;  %v41297_v40 = vld [vmem:[#allocation160_spill] sm:$0xff]  ;;  %v12010_v41 = vsel %vm223_vm1, %v11955_v14, 0  ;;  %v41304_v51 = vld [vmem:[#allocation137_spill] sm:$0xff] }
 0x42d   : > { %29232 = vmatprep.mubr.f32.mxu0 %v41160_v3  ;;  %v36284_v3 = vand.u32 4294901760, %v12004_v13  ;;  %v36300_v14 = vand.u32 4294901760, %v12010_v41 }
 0x42f   : > { %28215 = vmatmul.mubr.f32.gmra.mrb[16].mxu1 %v41297_v40  ;;  %v12167_v40 = vsub.f32 %v36236_v61, %v41302_v44  ;;  %v12177_v44 = vsub.f32 %v36246_v21, %v41305_v27  ;;  %v41307_v61 = vld [vmem:[#allocation157_spill] sm:$0xff]  ;;  %41309 = vst [vmem:[#allocation168_spill] sm:$0xff] %v36300_v14  ;;  %v41310_v27 = vand.u32 4294901760, %v36257_v63  ;;  %v36308_v21 = vsub.f32 %v12004_v13, %v36284_v3 }
 0x430   : > { %28217 = vmatprep.mubr.f32.mxu1 %v41300_v55  ;;  %29233 = vmatmul.mubr.f32.gmra.mrb[28].mxu0 %v35753_v18  ;;  %v12007_v55 = vsel %vm223_vm1, %v11954_v2, 0  ;;  %v11956_v18 = vld [vmem:[#allocation2 + $0xb0] sm:$0xff]  ;;  %v12158_v2 = vand.u32 4294901760, %v12157_v52  ;;  %v12016_v52 = vsel %vm223_vm1, %v11957_v24, 0 }
 0x431   : > { %29235 = vmatprep.mubr.f32.mxu0 %v41263_v54  ;;  %v36294_v54 = vsub.f32 %v12001_v12, %v36269_v46  ;;  %v36298_v5 = vand.u32 4294901760, %v12007_v55  ;;  %v12168_v19 = vand.u32 4294901760, %v12167_v40  ;;  %v12187_v36 = vsub.f32 %v36257_v63, %v41310_v27  ;;  %41311 = vst [vmem:[#allocation169_spill] sm:$0xff] %v36308_v21  ;;  %v41312_v46 = vld [vmem:[#allocation74_spill] sm:$0xff]  ;;  %v41315_v27 = vld [vmem:[#allocation173_spill] sm:$0xff] }
 0x432   : > { %v12178_v37 = vand.u32 4294901760, %v12177_v44  ;;  %v36323_v12 = vsub.f32 %v12010_v41, %v36300_v14  ;;  %v41319_v41 = vld [vmem:[#allocation82_spill] sm:$0xff]  ;;  %v41325_v63 = vand.u32 4294901760, %v36308_v21 }
 0x433   : > { %28218 = vmatmul.mubr.f32.gmra.mrb[18].mxu1 %v41304_v51  ;;  %41306 = vst [vmem:[#allocation166_spill] sm:$0xff] %v36294_v54  ;;  %41308 = vst [vmem:[#allocation167_spill] sm:$0xff] %v36298_v5  ;;  %v12013_v51 = vsel %vm223_vm1, %v11956_v18, 0  ;;  %v41313_v18 = vand.u32 4294901760, %v36267_v33  ;;  %v36320_v13 = vsub.f32 %v12007_v55, %v36298_v5  ;;  %v12188_v24 = vand.u32 4294901760, %v12187_v36  ;;  %v11960_v55 = vld [vmem:[#allocation2 + $0xe0] sm:$0xff] }
 0x434   : > { %28220 = vmatprep.mubr.f32.mxu1 %v41307_v61  ;;  %29236 = vmatmul.mubr.f32.gmra.mrb[30].mxu0 %v41266_v39  ;;  %v11958_v61 = vld [vmem:[#allocation2 + $0xc8] sm:$0xff]  ;;  %v11959_v39 = vld [vmem:[#allocation2 + $0xd8] sm:$0xff]  ;;  %v36316_v29 = vand.u32 4294901760, %v12013_v51  ;;  %41317 = vst [vmem:[#allocation31_spill] sm:$0xff] %v36323_v12  ;;  %v11961_v36 = vld [vmem:[#allocation2 + $0xf0] sm:$0xff] }
 0x435   : > { %29240 = vmatprep.mubr.f32.mxu0 %v12148_v25  ;;  %v12197_v25 = vsub.f32 %v36267_v33, %v41313_v18  ;;  %41316 = vst [vmem:[#allocation171_spill] sm:$0xff] %v36320_v13  ;;  %v12022_v44 = vsel %vm223_vm1, %v11959_v39, 0  ;;  %v41318_v18 = vand.u32 4294901760, %v36282_v49  ;;  %v41323_v33 = vld [vmem:[#allocation174_spill] sm:$0xff]  ;;  %v41327_v5 = vld [vmem:[#allocation99_spill] sm:$0xff] }
 0x436   : > { %41314 = vst [vmem:[#allocation170_spill] sm:$0xff] %v36316_v29  ;;  %v36337_v39 = vsub.f32 %v12013_v51, %v36316_v29  ;;  %v12227_v29 = vsub.f32 %v36308_v21, %v41325_v63  ;;  %v41331_v63 = vld [vmem:[#allocation180_spill] sm:$0xff] }
 0x437   : > { %28221 = vmatmul.mubr.f32.gmra.mrb[20].mxu1 %v41312_v46  ;;  %v12019_v46 = vsel %vm223_vm1, %v11958_v61, 0  ;;  %v12207_v40 = vsub.f32 %v36282_v49, %v41318_v18  ;;  %v12198_v61 = vand.u32 4294901760, %v12197_v25  ;;  %v41324_v18 = vand.u32 4294901760, %v36294_v54 }
 0x438   : > { %28223 = vmatprep.mubr.f32.mxu1 %v41315_v27  ;;  %29241 = vmatmul.mubr.f32.vlgmr.msra.gmra.mrb[0].mxu0 %v12158_v2  ;;  %v36332_v27 = vand.u32 4294901760, %v12016_v52  ;;  %41320 = vst [vmem:[#allocation41_spill] sm:$0xff] %v36337_v39  ;;  %v40143_v49 = vand.u32 4294901760, %v36320_v13  ;;  %v12025_v25 = vsel %vm223_vm1, %v11960_v55, 0  ;;  %v11963_v55 = vld [vmem:[#allocation2 + $0x108] sm:$0xff] }
 0x439   : > { %29289 = vmatpush3.msra.mxu0 %v36156_v60  ;;  %29243 = vmatprep.mubr.f32.mxu0 %v12168_v19  ;;  %v36339_v60 = vand.u32 4294901760, %v12019_v46  ;;  %v36341_v19 = vand.u32 4294901760, %v12022_v44  ;;  %v12217_v2 = vsub.f32 %v36294_v54, %v41324_v18  ;;  %v12208_v51 = vand.u32 4294901760, %v12207_v40 }
 0x43a   : > { %29338 = vmatprep.subr.mxu0 %v36137_v6  ;;  %v36354_v14 = vsub.f32 %v12016_v52, %v36332_v27  ;;  %v36365_v40 = vand.u32 4294901760, %v12025_v25 }
 0x43b   : > { %28224 = vmatmul.mubr.f32.gmra.mrb[22].mxu1 %v41319_v41  ;;  %41321 = vst [vmem:[#allocation15_spill] sm:$0xff] %v36339_v60  ;;  %41322 = vst [vmem:[#allocation13_spill] sm:$0xff] %v36341_v19  ;;  %v36360_v41 = vsub.f32 %v12019_v46, %v36339_v60  ;;  %v12218_v52 = vand.u32 4294901760, %v12217_v2  ;;  %v12228_v46 = vand.u32 4294901760, %v12227_v29  ;;  %v41334_v2 = vld [vmem:[#allocation113_spill] sm:$0xff]  ;;  %v41357_v60 = vld [vmem:[#allocation111_spill] sm:$0xff] }
 0x43c   : > { %28226 = vmatprep.mubr.f32.mxu1 %v41323_v33  ;;  %29244 = vmatmul.mubr.f32.gmra.mrb[2].mxu0 %v12178_v37  ;;  %41326 = vst [vmem:[#allocation36_spill] sm:$0xff] %v36354_v14  ;;  %v12028_v37 = vsel %vm223_vm1, %v11961_v36, 0  ;;  %v11962_v33 = vld [vmem:[#allocation2 + $0xf8] sm:$0xff]  ;;  %41330 = vst [vmem:[#allocation84_spill] sm:$0xff] %v36365_v40  ;;  %v12237_v36 = vsub.f32 %v36320_v13, %v40143_v49  ;;  %v36386_v29 = vsub.f32 %v12025_v25, %v36365_v40 }
 0x43d   : > { %29246 = vmatprep.mubr.f32.mxu0 %v12188_v24  ;;  %41328 = vst [vmem:[#allocation62_spill] sm:$0xff] %v36360_v41  ;;  %v36363_v24 = vsub.f32 %v12022_v44, %v36341_v19  ;;  %v36375_v21 = vand.u32 4294901760, %v12028_v37  ;;  %v12031_v54 = vsel %vm223_vm1, %v11962_v33, 0  ;;  %v41335_v19 = vand.u32 4294901760, %v36337_v39  ;;  %v41337_v44 = vld [vmem:[#allocation189_spill] sm:$0xff]  ;;  %v11967_v40 = vld [vmem:[#allocation2 + $0x138] sm:$0xff] }
 0x43e   : > { %41336 = vst [vmem:[#allocation95_spill] sm:$0xff] %v36386_v29  ;;  %v12238_v33 = vand.u32 4294901760, %v12237_v36  ;;  %v41342_v36 = vld [vmem:[#allocation117_spill] sm:$0xff] }
 0x43f   : > { %28227 = vmatmul.mubr.f32.gmra.mrb[24].mxu1 %v41327_v5  ;;  %41329 = vst [vmem:[#allocation98_spill] sm:$0xff] %v36363_v24  ;;  %v41332_v5 = vand.u32 4294901760, %v36323_v12  ;;  %41333 = vst [vmem:[#allocation85_spill] sm:$0xff] %v36375_v21  ;;  %v12257_v49 = vsub.f32 %v36337_v39, %v41335_v19  ;;  %v36395_v13 = vsub.f32 %v12028_v37, %v36375_v21  ;;  %v11966_v39 = vld [vmem:[#allocation2 + $0x128] sm:$0xff]  ;;  %v41345_v21 = vld [vmem:[#allocation195_spill] sm:$0xff] }
 0x440   : > { %28229 = vmatprep.mubr.f32.mxu1 %v41331_v63  ;;  %29247 = vmatmul.mubr.f32.gmra.mrb[4].mxu0 %v12198_v61  ;;  %v12034_v63 = vsel %vm223_vm1, %v11963_v55, 0  ;;  %v11964_v61 = vld [vmem:[#allocation2 + $0x110] sm:$0xff] }
 0x441   : > { %v12247_v18 = vsub.f32 %v36323_v12, %v41332_v5  ;;  %29249 = vmatprep.mubr.f32.mxu0 %v12208_v51  ;;  %v11965_v5 = vld [vmem:[#allocation2 + $0x120] sm:$0xff]  ;;  %v36389_v12 = vand.u32 4294901760, %v12031_v54  ;;  %41340 = vst [vmem:[#allocation108_spill] sm:$0xff] %v36395_v13  ;;  %v36397_v51 = vand.u32 4294901760, %v12034_v63  ;;  %v12037_v25 = vsel %vm223_vm1, %v11964_v61, 0 }
 0x443   : > { %28230 = vmatmul.mubr.f32.gmra.mrb[26].mxu1 %v41334_v2  ;;  %v12248_v55 = vand.u32 4294901760, %v12247_v18  ;;  %41338 = vst [vmem:[#allocation140_spill] sm:$0xff] %v36389_v12  ;;  %v41339_v2 = vand.u32 4294901760, %v36354_v14  ;;  %41341 = vst [vmem:[#allocation115_spill] sm:$0xff] %v36397_v51  ;;  %v12258_v18 = vand.u32 4294901760, %v12257_v49  ;;  %v36411_v61 = vsub.f32 %v12031_v54, %v36389_v12 }
 0x444   : > { %28232 = vmatprep.mubr.f32.mxu1 %v41337_v44  ;;  %29250 = vmatmul.mubr.f32.gmra.mrb[6].mxu0 %v12218_v52  ;;  %v12040_v52 = vsel %vm223_vm1, %v11965_v5, 0  ;;  %v36413_v5 = vand.u32 4294901760, %v12037_v25  ;;  %v12043_v49 = vsel %vm223_vm1, %v11966_v39, 0 }
 0x445   : > { %29252 = vmatprep.mubr.f32.mxu0 %v12228_v46  ;;  %v12267_v19 = vsub.f32 %v36354_v14, %v41339_v2  ;;  %v41343_v46 = vand.u32 4294901760, %v36360_v41  ;;  %v41344_v2 = vand.u32 4294901760, %v36363_v24  ;;  %41346 = vst [vmem:[#allocation35_spill] sm:$0xff] %v36411_v61  ;;  %v36421_v14 = vand.u32 4294901760, %v12040_v52 }
 0x446   : > { %41347 = vst [vmem:[#allocation100_spill] sm:$0xff] %v36413_v5  ;;  %v36427_v12 = vand.u32 4294901760, %v12043_v49 }
 0x447   : > { %28233 = vmatmul.mubr.f32.gmra.mrb[28].mxu1 %v41342_v36  ;;  %v12277_v44 = vsub.f32 %v36360_v41, %v41343_v46  ;;  %v12287_v37 = vsub.f32 %v36363_v24, %v41344_v2  ;;  %v12046_v36 = vsel %vm223_vm1, %v11967_v40, 0  ;;  %v12268_v46 = vand.u32 4294901760, %v12267_v19  ;;  %41349 = vst [vmem:[#allocation150_spill] sm:$0xff] %v36421_v14  ;;  %v11971_v19 = vld [vmem:[#allocation2 + $0x168] sm:$0xff] }
 0x448   : > { %28235 = vmatprep.mubr.f32.mxu1 %v41345_v21  ;;  %29253 = vmatmul.mubr.f32.gmra.mrb[8].mxu0 %v12238_v33  ;;  %v36419_v2 = vsub.f32 %v12034_v63, %v36397_v51  ;;  %v11968_v21 = vld [vmem:[#allocation2 + $0x140] sm:$0xff]  ;;  %v11969_v33 = vld [vmem:[#allocation2 + $0x150] sm:$0xff]  ;;  %v41350_v24 = vand.u32 4294901760, %v36386_v29  ;;  %41351 = vst [vmem:[#allocation81_spill] sm:$0xff] %v36427_v12  ;;  %v36429_v40 = vand.u32 4294901760, %v12046_v36  ;;  %v36434_v41 = vsub.f32 %v12037_v25, %v36413_v5 }
 0x449   : > { %29255 = vmatprep.mubr.f32.mxu0 %v12248_v55  ;;  %v12278_v54 = vand.u32 4294901760, %v12277_v44  ;;  %v41353_v55 = vld [vmem:[#allocation67_spill] sm:$0xff]  ;;  %v12288_v63 = vand.u32 4294901760, %v12287_v37  ;;  %v41355_v44 = vand.u32 4294901760, %v36395_v13  ;;  %v36442_v51 = vsub.f32 %v12040_v52, %v36421_v14  ;;  %v11970_v37 = vld [vmem:[#allocation2 + $0x158] sm:$0xff] }
 0x44a   : > { %41348 = vst [vmem:[#allocation43_spill] sm:$0xff] %v36419_v2  ;;  %v12297_v39 = vsub.f32 %v36386_v29, %v41350_v24  ;;  %41352 = vst [vmem:[#allocation135_spill] sm:$0xff] %v36429_v40  ;;  %v36447_v25 = vsub.f32 %v12043_v49, %v36427_v12  ;;  %v41361_v52 = vand.u32 4294901760, %v36411_v61  ;;  %v12055_v14 = vsel %vm223_vm1, %v11970_v37, 0 }
 0x44b   : > { %28236 = vmatmul.mubr.f32.gmra.mrb[30].mxu1 %v41259_v45  ;;  %41354 = vst [vmem:[#allocation107_spill] sm:$0xff] %v36434_v41  ;;  %v12049_v45 = vsel %vm223_vm1, %v11968_v21, 0  ;;  %v12307_v24 = vsub.f32 %v36395_v13, %v41355_v44  ;;  %41356 = vst [vmem:[#allocation47_spill] sm:$0xff] %v36442_v51  ;;  %v36450_v21 = vsub.f32 %v12046_v36, %v36429_v40  ;;  %v41363_v36 = vand.u32 4294901760, %v36419_v2 }
 0x44c   : > { %28240 = vmatprep.mubr.f32.mxu1 %v41353_v55  ;;  %29256 = vmatmul.mubr.f32.gmra.mrb[10].mxu0 %v12258_v18  ;;  %v12052_v18 = vsel %vm223_vm1, %v11969_v33, 0  ;;  %41358 = vst [vmem:[#allocation103_spill] sm:$0xff] %v36447_v25  ;;  %v12298_v44 = vand.u32 4294901760, %v12297_v39  ;;  %v12317_v33 = vsub.f32 %v36411_v61, %v41361_v52  ;;  %v11972_v39 = vld [vmem:[#allocation2 + $0x170] sm:$0xff] }
 0x44d   : > { %29258 = vmatprep.mubr.f32.mxu0 %v12268_v46  ;;  %41359 = vst [vmem:[#allocation112_spill] sm:$0xff] %v36450_v21  ;;  %v36452_v46 = vand.u32 4294901760, %v12049_v45  ;;  %v36459_v13 = vand.u32 4294901760, %v12052_v18  ;;  %v12308_v49 = vand.u32 4294901760, %v12307_v24  ;;  %v12327_v40 = vsub.f32 %v36419_v2, %v41363_v36  ;;  %v41364_v52 = vld [vmem:[#allocation9_spill] sm:$0xff]  ;;  %v11973_v36 = vld [vmem:[#allocation2 + $0x180] sm:$0xff] }
 0x44e   : > { %v12318_v37 = vand.u32 4294901760, %v12317_v33  ;;  %v36482_v2 = vand.u32 4294901760, %v12055_v14  ;;  %v41369_v24 = vand.u32 4294901760, %v36442_v51  ;;  %v12064_v33 = vsel %vm223_vm1, %v11973_v36, 0 }
 0x44f   : > { %28241 = vmatmul.mubr.f32.vlgmr.msra.gmra.mrb[0].mxu1 %v41357_v60  ;;  %41360 = vst [vmem:[#allocation144_spill] sm:$0xff] %v36452_v46  ;;  %41362 = vst [vmem:[#allocation148_spill] sm:$0xff] %v36459_v13  ;;  %v36473_v29 = vsub.f32 %v12049_v45, %v36452_v46  ;;  %v36480_v12 = vsub.f32 %v12052_v18, %v36459_v13  ;;  %v11974_v46 = vld [vmem:[#allocation2 + $0x188] sm:$0xff]  ;;  %v41371_v18 = vand.u32 4294901760, %v36447_v25 }
 0x450   : > { %28243 = vmatprep.mubr.f32.mxu1 %v35313_v31  ;;  %29259 = vmatmul.mubr.f32.gmra.mrb[12].mxu0 %v12278_v54  ;;  %v12058_v54 = vsel %vm223_vm1, %v11971_v19, 0  ;;  %41368 = vst [vmem:[#allocation154_spill] sm:$0xff] %v36482_v2  ;;  %v12347_v45 = vsub.f32 %v36442_v51, %v41369_v24  ;;  %v11975_v24 = vld [vmem:[#allocation2 + $0x198] sm:$0xff]  ;;  %v36502_v51 = vsub.f32 %v12055_v14, %v36482_v2 }
 0x451   : > { %29261 = vmatprep.mubr.f32.mxu0 %v12288_v63  ;;  %28289 = vmatpush3.msra.mxu1 %v35642_v23  ;;  %41365 = vst [vmem:[#allocation50_spill] sm:$0xff] %v36473_v29  ;;  %v41366_v23 = vand.u32 4294901760, %v36434_v41  ;;  %41367 = vst [vmem:[#allocation75_spill] sm:$0xff] %v36480_v12  ;;  %v12328_v63 = vand.u32 4294901760, %v12327_v40  ;;  %v36487_v61 = vand.u32 4294901760, %v12058_v54  ;;  %v41376_v14 = vand.u32 4294901760, %v36473_v29 }
 0x452   : > { %28338 = vmatprep.subr.mxu1 %v41364_v52 }
 0x453   : > { %28244 = vmatmul.mubr.f32.gmra.mrb[2].mxu1 %v41238_v4  ;;  %v12337_v19 = vsub.f32 %v36434_v41, %v41366_v23  ;;  %41370 = vst [vmem:[#allocation155_spill] sm:$0xff] %v36487_v61  ;;  %v12357_v23 = vsub.f32 %v36447_v25, %v41371_v18  ;;  %v12348_v18 = vand.u32 4294901760, %v12347_v45  ;;  %v36507_v25 = vsub.f32 %v12058_v54, %v36487_v61 }
 0x454   : > { %28246 = vmatprep.mubr.f32.mxu1 %v41239_v20  ;;  %29262 = vmatmul.mubr.f32.gmra.mrb[14].mxu0 %v12298_v44  ;;  %v12061_v44 = vsel %vm223_vm1, %v11972_v39, 0  ;;  %v12067_v41 = vsel %vm223_vm1, %v11974_v46, 0  ;;  %v12377_v2 = vsub.f32 %v36473_v29, %v41376_v14  ;;  %v41377_v54 = vand.u32 4294901760, %v36480_v12 }
 0x455   : > { %29264 = vmatprep.mubr.f32.mxu0 %v12308_v49  ;;  %v41372_v49 = vand.u32 4294901760, %v36450_v21  ;;  %v12338_v39 = vand.u32 4294901760, %v12337_v19  ;;  %v36504_v13 = vand.u32 4294901760, %v12061_v44  ;;  %41374 = vst [vmem:[#allocation159_spill] sm:$0xff] %v36507_v25  ;;  %v12358_v19 = vand.u32 4294901760, %v12357_v23 }
 0x456   : > { %v40198_v46 = vand.u32 4294901760, %v36502_v51 }
 0x457   : > { %28247 = vmatmul.mubr.f32.gmra.mrb[4].mxu1 %v41242_v1  ;;  %v12367_v40 = vsub.f32 %v36450_v21, %v41372_v49  ;;  %41373 = vst [vmem:[#allocation176_spill] sm:$0xff] %v36504_v13  ;;  %v36509_v49 = vand.u32 4294901760, %v12064_v33  ;;  %v12070_v21 = vsel %vm223_vm1, %v11975_v24, 0  ;;  %v36523_v45 = vsub.f32 %v12061_v44, %v36504_v13 }
 0x458   : > { %28249 = vmatprep.mubr.f32.mxu1 %v41243_v7  ;;  %29265 = vmatmul.mubr.f32.gmra.mrb[16].mxu0 %v12318_v37  ;;  %v11976_v37 = vld [vmem:[#allocation2 + $0x1a0] sm:$0xff]  ;;  %v36525_v24 = vand.u32 4294901760, %v12067_v41  ;;  %v36531_v14 = vand.u32 4294901760, %v12070_v21  ;;  %v12397_v44 = vsub.f32 %v36502_v51, %v40198_v46 }
 0x459   : > { %29267 = vmatprep.mubr.f32.mxu0 %v12328_v63  ;;  %41375 = vst [vmem:[#allocation51_spill] sm:$0xff] %v36509_v49  ;;  %v12368_v36 = vand.u32 4294901760, %v12367_v40  ;;  %v12387_v63 = vsub.f32 %v36480_v12, %v41377_v54  ;;  %v36529_v40 = vsub.f32 %v12064_v33, %v36509_v49  ;;  %v12378_v54 = vand.u32 4294901760, %v12377_v2 }
 0x45a   : > { %41378 = vst [vmem:[#allocation156_spill] sm:$0xff] %v36525_v24  ;;  %41379 = vst [vmem:[#allocation91_spill] sm:$0xff] %v36531_v14  ;;  %v36541_v23 = vsub.f32 %v12067_v41, %v36525_v24  ;;  %v12398_v41 = vand.u32 4294901760, %v12397_v44 }
 0x45b   : > { %28250 = vmatmul.mubr.f32.gmra.mrb[6].mxu1 %v41246_v48  ;;  %v12388_v12 = vand.u32 4294901760, %v12387_v63  ;;  %v40201_v29 = vand.u32 4294901760, %v36529_v40 }
 0x45c   : > { %28252 = vmatprep.mubr.f32.mxu1 %v41247_v57  ;;  %29268 = vmatmul.mubr.f32.gmra.mrb[18].mxu0 %v12338_v39  ;;  %v12073_v39 = vsel %vm223_vm1, %v11976_v37, 0  ;;  %v41381_v37 = vand.u32 4294901760, %v36507_v25  ;;  %v40204_v63 = vand.u32 4294901760, %v36541_v23 }
 0x45d   : > { %29270 = vmatprep.mubr.f32.mxu0 %v12348_v18  ;;  %v40205_v18 = vand.u32 4294901760, %v36523_v45  ;;  %v36543_v33 = vand.u32 4294901760, %v12073_v39 }
 0x45e   : > { %v12407_v2 = vsub.f32 %v36507_v25, %v41381_v37  ;;  %v12437_v44 = vsub.f32 %v36541_v23, %v40204_v63  ;;  %v41393_v63 = vld [vmem:[#allocation170_spill] sm:$0xff] }
 0x45f   : > { %28253 = vmatmul.mubr.f32.gmra.mrb[8].mxu1 %v41250_v59  ;;  %41380 = vst [vmem:[#allocation66_spill] sm:$0xff] %v36543_v33  ;;  %v36559_v46 = vsub.f32 %v12073_v39, %v36543_v33 }
 0x460   : > { %28255 = vmatprep.mubr.f32.mxu1 %v35406_v11  ;;  %29271 = vmatmul.mubr.f32.gmra.mrb[20].mxu0 %v12358_v19  ;;  %v36550_v19 = vsub.f32 %v12070_v21, %v36531_v14  ;;  %v12408_v37 = vand.u32 4294901760, %v12407_v2  ;;  %v12427_v21 = vsub.f32 %v36529_v40, %v40201_v29  ;;  %v12438_v29 = vand.u32 4294901760, %v12437_v44  ;;  %v41386_v44 = vld [vmem:[#allocation182_spill] sm:$0xff] }
 0x461   : > { %29273 = vmatprep.mubr.f32.mxu0 %v12368_v36  ;;  %v12417_v36 = vsub.f32 %v36523_v45, %v40205_v18  ;;  %v40202_v39 = vand.u32 4294901760, %v36559_v46 }
 0x462   : > { %v40203_v25 = vand.u32 4294901760, %v36550_v19 }
 0x463   : > { %28256 = vmatmul.mubr.f32.gmra.mrb[10].mxu1 %v35425_v42 }
 0x464   : > { %28258 = vmatprep.mubr.f32.mxu1 %v35427_v47  ;;  %29274 = vmatmul.mubr.f32.gmra.mrb[22].mxu0 %v12378_v54  ;;  %v12418_v54 = vand.u32 4294901760, %v12417_v36  ;;  %v12447_v2 = vsub.f32 %v36550_v19, %v40203_v25  ;;  %v41392_v25 = vld [vmem:[#allocation188_spill] sm:$0xff] }
 0x465   : > { %29276 = vmatprep.mubr.f32.mxu0 %v12388_v12  ;;  %v12428_v12 = vand.u32 4294901760, %v12427_v21  ;;  %v41384_v21 = vld [vmem:[#allocation179_spill] sm:$0xff] }
 0x466   : > { %v12448_v36 = vand.u32 4294901760, %v12447_v2  ;;  %v41388_v2 = vld [vmem:[#allocation167_spill] sm:$0xff] }
 0x467   : > { %28259 = vmatmul.mubr.f32.gmra.mrb[12].mxu1 %v35448_v50 }
 0x468   : > { %28261 = vmatprep.mubr.f32.mxu1 %v35473_v56  ;;  %29277 = vmatmul.mubr.f32.gmra.mrb[24].mxu0 %v12398_v41  ;;  %v12457_v41 = vsub.f32 %v36559_v46, %v40202_v39 }
 0x469   : > { %29279 = vmatprep.mubr.f32.mxu0 %v12408_v37 }
 0x46a   : > { %v12458_v37 = vand.u32 4294901760, %v12457_v41  ;;  %v41389_v41 = vld [vmem:[#allocation168_spill] sm:$0xff] }
 0x46b   : > { %28262 = vmatmul.mubr.f32.gmra.mrb[14].mxu1 %v35475_v16 }
 0x46c   : > { %28264 = vmatprep.mubr.f32.mxu1 %v35485_v10  ;;  %29280 = vmatmul.mubr.f32.gmra.mrb[26].mxu0 %v12418_v54  ;;  %v41385_v54 = vld [vmem:[#allocation164_spill] sm:$0xff] }
 0x46d   : > { %29282 = vmatprep.mubr.f32.mxu0 %v12428_v12  ;;  %v41387_v12 = vld [vmem:[#allocation185_spill] sm:$0xff] }
 0x46f   : > { %28265 = vmatmul.mubr.f32.gmra.mrb[16].mxu1 %v35519_v58 }
 0x470   : > { %28267 = vmatprep.mubr.f32.mxu1 %v35536_v38  ;;  %29283 = vmatmul.mubr.f32.gmra.mrb[28].mxu0 %v12438_v29  ;;  %v41382_v29 = vld [vmem:[#allocation151_spill] sm:$0xff] }
 0x471   : > { %29285 = vmatprep.mubr.f32.mxu0 %v12448_v36  ;;  %v41390_v36 = vld [vmem:[#allocation16_spill] sm:$0xff] }
 0x473   : > { %28268 = vmatmul.mubr.f32.gmra.mrb[18].mxu1 %v35560_v53 }
 0x474   : > { %28270 = vmatprep.mubr.f32.mxu1 %v35568_v34  ;;  %29286 = vmatmul.mubr.f32.gmra.mrb[30].mxu0 %v12458_v37  ;;  %v41391_v37 = vld [vmem:[#allocation10_spill] sm:$0xff] }
 0x475   : > { %29290 = vmatprep.mubr.f32.mxu0 %v36208_v26  ;;  %v6635_v39 = vsub.f32 %v41391_v37, %v41390_v36  ;;  %v41423_v36 = vld [vmem:[#allocation25_spill] sm:$0xff] }
 0x477   : > { %28271 = vmatmul.mubr.f32.gmra.mrb[20].mxu1 %v35589_v35  ;;  %v36612_v18 = vand.u32 4294901760, %v6635_v39  ;;  %v41397_v39 = vld [vmem:[#allocation85_spill] sm:$0xff] }
 0x478   : > { %28273 = vmatprep.mubr.f32.mxu1 %v35602_v32  ;;  %29291 = vmatmul.mubr.f32.vlgmr.msra.gmra.mrb[0].mxu0 %v36214_v15 }
 0x479   : > { %29339 = vmatpush3.msra.mxu0 %v36137_v6  ;;  %29293 = vmatprep.mubr.f32.mxu0 %v36221_v17  ;;  %v41383_v6 = vld [vmem:[#allocation177_spill] sm:$0xff] }
 0x47a   : > { %29388 = vmatprep.subr.mxu0 %v36078_v0 }
 0x47b   : > { %28274 = vmatmul.mubr.f32.gmra.mrb[22].mxu1 %v35613_v22 }
 0x47c   : > { %28276 = vmatprep.mubr.f32.mxu1 %v35615_v9  ;;  %29294 = vmatmul.mubr.f32.gmra.mrb[2].mxu0 %v36230_v43 }
 0x47d   : > { %29296 = vmatprep.mubr.f32.mxu0 %v36238_v30 }
 0x47f   : > { %28277 = vmatmul.mubr.f32.gmra.mrb[24].mxu1 %v35651_v62 }
 0x480   : > { %28279 = vmatprep.mubr.f32.mxu1 %v35662_v28  ;;  %29297 = vmatmul.mubr.f32.gmra.mrb[4].mxu0 %v36248_v8 }
 0x481   : > { %29299 = vmatprep.mubr.f32.mxu0 %v41382_v29 }
 0x483   : > { %28280 = vmatmul.mubr.f32.gmra.mrb[26].mxu1 %v41383_v6 }
 0x484   : > { %28282 = vmatprep.mubr.f32.mxu1 %v41384_v21  ;;  %29300 = vmatmul.mubr.f32.gmra.mrb[6].mxu0 %v41385_v54 }
 0x485   : > { %29302 = vmatprep.mubr.f32.mxu0 %v36284_v3 }
 0x487   : > { %28283 = vmatmul.mubr.f32.gmra.mrb[28].mxu1 %v41386_v44 }
 0x488   : > { %28285 = vmatprep.mubr.f32.mxu1 %v41387_v12  ;;  %29303 = vmatmul.mubr.f32.gmra.mrb[8].mxu0 %v41388_v2  ;;  %v41394_v2 = vld [vmem:[#allocation15_spill] sm:$0xff] }
 0x489   : > { %29305 = vmatprep.mubr.f32.mxu0 %v41389_v41  ;;  %v41395_v41 = vld [vmem:[#allocation13_spill] sm:$0xff] }
 0x48b   : > { %28286 = vmatmul.mubr.f32.gmra.mrb[30].mxu1 %v41392_v25 }
 0x48c   : > { %28290 = vmatprep.mubr.f32.mxu1 %v41353_v55  ;;  %29306 = vmatmul.mubr.f32.gmra.mrb[10].mxu0 %v41393_v63  ;;  %v41396_v55 = vld [vmem:[#allocation84_spill] sm:$0xff] }
 0x48d   : > { %29308 = vmatprep.mubr.f32.mxu0 %v36332_v27 }
 0x48f   : > { %28291 = vmatmul.mubr.f32.vlgmr.msra.gmra.mrb[0].mxu1 %v41357_v60  ;;  %v41399_v60 = vld [vmem:[#allocation115_spill] sm:$0xff] }
 0x490   : > { %28293 = vmatprep.mubr.f32.mxu1 %v35313_v31  ;;  %29309 = vmatmul.mubr.f32.gmra.mrb[12].mxu0 %v41394_v2  ;;  %v41398_v31 = vld [vmem:[#allocation140_spill] sm:$0xff] }
 0x491   : > { %29311 = vmatprep.mubr.f32.mxu0 %v41395_v41  ;;  %28339 = vmatpush3.msra.mxu1 %v41364_v52  ;;  %v41421_v52 = vld [vmem:[#allocation31_spill] sm:$0xff] }
 0x492   : > { %28388 = vmatprep.subr.mxu1 %v36612_v18 }
 0x493   : > { %28294 = vmatmul.mubr.f32.gmra.mrb[2].mxu1 %v41238_v4  ;;  %v41400_v4 = vld [vmem:[#allocation150_spill] sm:$0xff] }
 0x494   : > { %28296 = vmatprep.mubr.f32.mxu1 %v41239_v20  ;;  %29312 = vmatmul.mubr.f32.gmra.mrb[14].mxu0 %v41396_v55  ;;  %v41401_v20 = vld [vmem:[#allocation81_spill] sm:$0xff] }
 0x495   : > { %29314 = vmatprep.mubr.f32.mxu0 %v41397_v39 }
 0x497   : > { %28297 = vmatmul.mubr.f32.gmra.mrb[4].mxu1 %v41242_v1  ;;  %v41402_v1 = vld [vmem:[#allocation135_spill] sm:$0xff] }
 0x498   : > { %28299 = vmatprep.mubr.f32.mxu1 %v41243_v7  ;;  %29315 = vmatmul.mubr.f32.gmra.mrb[16].mxu0 %v41398_v31  ;;  %v41403_v7 = vld [vmem:[#allocation144_spill] sm:$0xff] }
 0x499   : > { %29317 = vmatprep.mubr.f32.mxu0 %v41399_v60  ;;  %v41464_v60 = vld [vmem:[#allocation75_spill] sm:$0xff] }
 0x49b   : > { %28300 = vmatmul.mubr.f32.gmra.mrb[6].mxu1 %v41246_v48  ;;  %v41404_v48 = vld [vmem:[#allocation148_spill] sm:$0xff] }
 0x49c   : > { %28302 = vmatprep.mubr.f32.mxu1 %v41247_v57  ;;  %29318 = vmatmul.mubr.f32.gmra.mrb[18].mxu0 %v36413_v5  ;;  %v41405_v57 = vld [vmem:[#allocation154_spill] sm:$0xff] }
 0x49d   : > { %29320 = vmatprep.mubr.f32.mxu0 %v41400_v4  ;;  %v41458_v4 = vld [vmem:[#allocation112_spill] sm:$0xff] }
 0x49f   : > { %28303 = vmatmul.mubr.f32.gmra.mrb[8].mxu1 %v41250_v59 }
 0x4a0   : > { %28305 = vmatprep.mubr.f32.mxu1 %v35406_v11  ;;  %29321 = vmatmul.mubr.f32.gmra.mrb[20].mxu0 %v41401_v20  ;;  %v41406_v11 = vld [vmem:[#allocation136_spill] sm:$0xff] }
 0x4a1   : > { %29323 = vmatprep.mubr.f32.mxu0 %v41402_v1  ;;  %v41452_v1 = vld [vmem:[#allocation47_spill] sm:$0xff] }
 0x4a3   : > { %28306 = vmatmul.mubr.f32.gmra.mrb[10].mxu1 %v35425_v42  ;;  %v41407_v42 = vld [vmem:[#allocation138_spill] sm:$0xff] }
 0x4a4   : > { %28308 = vmatprep.mubr.f32.mxu1 %v35427_v47  ;;  %29324 = vmatmul.mubr.f32.gmra.mrb[22].mxu0 %v41403_v7  ;;  %v41410_v47 = vld [vmem:[#allocation147_spill] sm:$0xff] }
 0x4a5   : > { %29326 = vmatprep.mubr.f32.mxu0 %v41404_v48  ;;  %v41446_v48 = vld [vmem:[#allocation43_spill] sm:$0xff] }
 0x4a7   : > { %28309 = vmatmul.mubr.f32.gmra.mrb[12].mxu1 %v35448_v50  ;;  %v41411_v50 = vld [vmem:[#allocation12_spill] sm:$0xff] }
 0x4a8   : > { %28311 = vmatprep.mubr.f32.mxu1 %v35473_v56  ;;  %29327 = vmatmul.mubr.f32.gmra.mrb[24].mxu0 %v41405_v57  ;;  %v41412_v56 = vld [vmem:[#allocation163_spill] sm:$0xff] }
 0x4a9   : > { %29329 = vmatprep.mubr.f32.mxu0 %v36487_v61  ;;  %v41441_v61 = vld [vmem:[#allocation49_spill] sm:$0xff] }
 0x4aa   : > { %v41442_v57 = vand.u32 4294901760, %v41441_v61 }
 0x4ab   : > { %28312 = vmatmul.mubr.f32.gmra.mrb[14].mxu1 %v35475_v16  ;;  %v41413_v16 = vld [vmem:[#allocation165_spill] sm:$0xff] }
 0x4ac   : > { %28314 = vmatprep.mubr.f32.mxu1 %v35485_v10  ;;  %29330 = vmatmul.mubr.f32.gmra.mrb[26].mxu0 %v36504_v13  ;;  %v41414_v10 = vld [vmem:[#allocation166_spill] sm:$0xff] }
 0x4ad   : > { %29332 = vmatprep.mubr.f32.mxu0 %v36509_v49  ;;  %v41431_v49 = vld [vmem:[#allocation62_spill] sm:$0xff] }
 0x4ae   : > { %v41434_v13 = vld [vmem:[#allocation98_spill] sm:$0xff] }
 0x4af   : > { %28315 = vmatmul.mubr.f32.gmra.mrb[16].mxu1 %v35519_v58  ;;  %v41409_v58 = vld [vmem:[#allocation114_spill] sm:$0xff] }
 0x4b0   : > { %28317 = vmatprep.mubr.f32.mxu1 %v35536_v38  ;;  %29333 = vmatmul.mubr.f32.gmra.mrb[28].mxu0 %v36525_v24  ;;  %v41408_v38 = vld [vmem:[#allocation143_spill] sm:$0xff]  ;;  %v41428_v24 = vld [vmem:[#allocation36_spill] sm:$0xff] }
 0x4b1   : > { %29335 = vmatprep.mubr.f32.mxu0 %v36531_v14 }
 0x4b3   : > { %28318 = vmatmul.mubr.f32.gmra.mrb[18].mxu1 %v35560_v53 }
 0x4b4   : > { %28320 = vmatprep.mubr.f32.mxu1 %v35568_v34  ;;  %29336 = vmatmul.mubr.f32.gmra.mrb[30].mxu0 %v36543_v33  ;;  %v41426_v33 = vld [vmem:[#allocation32_spill] sm:$0xff] }
 0x4b5   : > { %29340 = vmatprep.mubr.f32.mxu0 %v41406_v11 }
 0x4b7   : > { %28321 = vmatmul.mubr.f32.gmra.mrb[20].mxu1 %v35589_v35  ;;  %v41417_v35 = vld [vmem:[#allocation169_spill] sm:$0xff] }
 0x4b8   : > { %28323 = vmatprep.mubr.f32.mxu1 %v35602_v32  ;;  %29341 = vmatmul.mubr.f32.vlgmr.msra.gmra.mrb[0].mxu0 %v41407_v42 }
 0x4b9   : > { %29389 = vmatpush3.msra.mxu0 %v36078_v0  ;;  %29343 = vmatprep.mubr.f32.mxu0 %v41408_v38 }
 0x4ba   : > { %29438 = vmatprep.subr.mxu0 %v41409_v58 }
 0x4bb   : > { %28324 = vmatmul.mubr.f32.gmra.mrb[22].mxu1 %v35613_v22  ;;  %v41415_v22 = vld [vmem:[#allocation20_spill] sm:$0xff] }
 0x4bc   : > { %28326 = vmatprep.mubr.f32.mxu1 %v35615_v9  ;;  %29344 = vmatmul.mubr.f32.gmra.mrb[2].mxu0 %v41410_v47  ;;  %v41416_v34 = vand.u32 4294901760, %v41415_v22  ;;  %v41419_v9 = vld [vmem:[#allocation21_spill] sm:$0xff] }
 0x4bd   : > { %29346 = vmatprep.mubr.f32.mxu0 %v41411_v50 }
 0x4be   : > { %v6314_v53 = vsub.f32 %v41415_v22, %v41416_v34  ;;  %v41424_v22 = vand.u32 4294901760, %v41423_v36 }
 0x4bf   : > { %28327 = vmatmul.mubr.f32.gmra.mrb[24].mxu1 %v35651_v62  ;;  %v41418_v62 = vld [vmem:[#allocation171_spill] sm:$0xff] }
 0x4c0   : > { %28329 = vmatprep.mubr.f32.mxu1 %v35662_v28  ;;  %29347 = vmatmul.mubr.f32.gmra.mrb[4].mxu0 %v41412_v56  ;;  %v6315_v32 = vand.u32 4294901760, %v6314_v53  ;;  %v41420_v28 = vand.u32 4294901760, %v41419_v9  ;;  %v6344_v34 = vsub.f32 %v41423_v36, %v41424_v22  ;;  %v41427_v53 = vand.u32 4294901760, %v41426_v33 }
 0x4c1   : > { %29349 = vmatprep.mubr.f32.mxu0 %v41413_v16 }
 0x4c2   : > { %v6334_v59 = vsub.f32 %v41419_v9, %v41420_v28  ;;  %v6354_v14 = vsub.f32 %v41426_v33, %v41427_v53  ;;  %v6345_v9 = vand.u32 4294901760, %v6344_v34  ;;  %v41429_v28 = vld [vmem:[#allocation34_spill] sm:$0xff] }
 0x4c3   : > { %28330 = vmatmul.mubr.f32.gmra.mrb[26].mxu1 %v41383_v6  ;;  %v41422_v6 = vld [vmem:[#allocation29_spill] sm:$0xff] }
 0x4c4   : > { %28332 = vmatprep.mubr.f32.mxu1 %v41384_v21  ;;  %29350 = vmatmul.mubr.f32.gmra.mrb[6].mxu0 %v41414_v10  ;;  %v6325_v21 = vand.u32 4294901760, %v41422_v6  ;;  %v41430_v6 = vand.u32 4294901760, %v41429_v28  ;;  %v6355_v36 = vand.u32 4294901760, %v6354_v14 }
 0x4c5   : > { %29352 = vmatprep.mubr.f32.mxu0 %v41417_v35 }
 0x4c7   : > { %28333 = vmatmul.mubr.f32.gmra.mrb[28].mxu1 %v41386_v44  ;;  %v41425_v44 = vld [vmem:[#allocation41_spill] sm:$0xff] }
 0x4c8   : > { %28335 = vmatprep.mubr.f32.mxu1 %v41387_v12  ;;  %29353 = vmatmul.mubr.f32.gmra.mrb[8].mxu0 %v41418_v62  ;;  %v6335_v12 = vand.u32 4294901760, %v6334_v59 }
 0x4c9   : > { %29355 = vmatprep.mubr.f32.mxu0 %v41421_v52 }
 0x4cb   : > { %28336 = vmatmul.mubr.f32.gmra.mrb[30].mxu1 %v41392_v25  ;;  %v6364_v25 = vsub.f32 %v41429_v28, %v41430_v6  ;;  %v41438_v28 = vld [vmem:[#allocation48_spill] sm:$0xff] }
 0x4cc   : > { %28340 = vmatprep.mubr.f32.mxu1 %v6315_v32  ;;  %29356 = vmatmul.mubr.f32.gmra.mrb[10].mxu0 %v41425_v44  ;;  %v41432_v32 = vld [vmem:[#allocation38_spill] sm:$0xff]  ;;  %v41439_v6 = vand.u32 4294901760, %v41438_v28 }
 0x4cd   : > { %29358 = vmatprep.mubr.f32.mxu0 %v41428_v24  ;;  %v41433_v22 = vand.u32 4294901760, %v41432_v32  ;;  %v6365_v33 = vand.u32 4294901760, %v6364_v25  ;;  %v41443_v25 = vld [vmem:[#allocation35_spill] sm:$0xff] }
 0x4cf   : > { %28341 = vmatmul.mubr.f32.vlgmr.msra.gmra.mrb[0].mxu1 %v6325_v21  ;;  %v6374_v59 = vsub.f32 %v41432_v32, %v41433_v22  ;;  %v41435_v21 = vld [vmem:[#allocation42_spill] sm:$0xff]  ;;  %v6394_v32 = vsub.f32 %v41438_v28, %v41439_v6  ;;  %v41440_v22 = vld [vmem:[#allocation108_spill] sm:$0xff]  ;;  %v41447_v6 = vld [vmem:[#allocation57_spill] sm:$0xff] }
 0x4d0   : > { %28343 = vmatprep.mubr.f32.mxu1 %v6335_v12  ;;  %29359 = vmatmul.mubr.f32.gmra.mrb[12].mxu0 %v41431_v49  ;;  %v41436_v34 = vand.u32 4294901760, %v41435_v21  ;;  %v41437_v12 = vld [vmem:[#allocation95_spill] sm:$0xff]  ;;  %v41448_v7 = vand.u32 4294901760, %v41447_v6 }
 0x4d1   : > { %29361 = vmatprep.mubr.f32.mxu0 %v41434_v13  ;;  %28389 = vmatpush3.msra.mxu1 %v36612_v18  ;;  %v6375_v14 = vand.u32 4294901760, %v6374_v59 }
 0x4d2   : > { %30894 = vmatprep.subr.mxu1 %v41391_v37  ;;  %v6384_v53 = vsub.f32 %v41435_v21, %v41436_v34  ;;  %v6395_v21 = vand.u32 4294901760, %v6394_v32 }
 0x4d3   : > { %28344 = vmatmul.mubr.f32.gmra.mrb[2].mxu1 %v6345_v9  ;;  %v6404_v9 = vsub.f32 %v41441_v61, %v41442_v57  ;;  %v41450_v57 = vld [vmem:[#allocation63_spill] sm:$0xff] }
 0x4d4   : > { %28346 = vmatprep.mubr.f32.mxu1 %v6355_v36  ;;  %29362 = vmatmul.mubr.f32.gmra.mrb[14].mxu0 %v41437_v12  ;;  %v6385_v18 = vand.u32 4294901760, %v6384_v53  ;;  %v41444_v36 = vld [vmem:[#allocation55_spill] sm:$0xff] }
 0x4d5   : > { %29364 = vmatprep.mubr.f32.mxu0 %v41440_v22  ;;  %v41445_v34 = vand.u32 4294901760, %v41444_v36  ;;  %v6405_v28 = vand.u32 4294901760, %v6404_v9  ;;  %v41449_v53 = vld [vmem:[#allocation107_spill] sm:$0xff] }
 0x4d6   : > { %v41455_v9 = vld [vmem:[#allocation103_spill] sm:$0xff] }
 0x4d7   : > { %28347 = vmatmul.mubr.f32.gmra.mrb[4].mxu1 %v6365_v33  ;;  %v6414_v59 = vsub.f32 %v41444_v36, %v41445_v34  ;;  %v6424_v33 = vsub.f32 %v41447_v6, %v41448_v7  ;;  %v41453_v34 = vld [vmem:[#allocation64_spill] sm:$0xff] }
 0x4d8   : > { %28349 = vmatprep.mubr.f32.mxu1 %v6375_v14  ;;  %29365 = vmatmul.mubr.f32.gmra.mrb[16].mxu0 %v41443_v25  ;;  %v41451_v14 = vand.u32 4294901760, %v41450_v57  ;;  %v41454_v20 = vand.u32 4294901760, %v41453_v34 }
 0x4d9   : > { %29367 = vmatprep.mubr.f32.mxu0 %v41446_v48  ;;  %v6415_v61 = vand.u32 4294901760, %v6414_v59  ;;  %v6425_v36 = vand.u32 4294901760, %v6424_v33  ;;  %v41461_v33 = vld [vmem:[#allocation50_spill] sm:$0xff] }
 0x4da   : > { %v6434_v32 = vsub.f32 %v41450_v57, %v41451_v14  ;;  %v41459_v14 = vld [vmem:[#allocation73_spill] sm:$0xff] }
 0x4db   : > { %28350 = vmatmul.mubr.f32.gmra.mrb[6].mxu1 %v6385_v18  ;;  %v6444_v18 = vsub.f32 %v41453_v34, %v41454_v20  ;;  %v41460_v5 = vand.u32 4294901760, %v41459_v14 }
 0x4dc   : > { %28352 = vmatprep.mubr.f32.mxu1 %v6395_v21  ;;  %29368 = vmatmul.mubr.f32.gmra.mrb[18].mxu0 %v41449_v53  ;;  %v6435_v7 = vand.u32 4294901760, %v6434_v32  ;;  %v41456_v21 = vld [vmem:[#allocation71_spill] sm:$0xff] }
 0x4dd   : > { %29370 = vmatprep.mubr.f32.mxu0 %v41452_v1  ;;  %v41457_v6 = vand.u32 4294901760, %v41456_v21  ;;  %v6445_v57 = vand.u32 4294901760, %v6444_v18  ;;  %v41467_v18 = vld [vmem:[#allocation87_spill] sm:$0xff] }
 0x4df   : > { %28353 = vmatmul.mubr.f32.gmra.mrb[8].mxu1 %v6405_v28  ;;  %v6454_v59 = vsub.f32 %v41456_v21, %v41457_v6  ;;  %v6464_v28 = vsub.f32 %v41459_v14, %v41460_v5  ;;  %v41465_v6 = vld [vmem:[#allocation80_spill] sm:$0xff]  ;;  %v41469_v14 = vld [vmem:[#allocation159_spill] sm:$0xff] }
 0x4e0   : > { %28355 = vmatprep.mubr.f32.mxu1 %v6415_v61  ;;  %29371 = vmatmul.mubr.f32.gmra.mrb[20].mxu0 %v41455_v9  ;;  %v41462_v61 = vld [vmem:[#allocation79_spill] sm:$0xff]  ;;  %v41466_v31 = vand.u32 4294901760, %v41465_v6 }
 0x4e1   : > { %29373 = vmatprep.mubr.f32.mxu0 %v41458_v4  ;;  %v6455_v20 = vand.u32 4294901760, %v6454_v59  ;;  %v41463_v34 = vand.u32 4294901760, %v41462_v61  ;;  %v6465_v21 = vand.u32 4294901760, %v6464_v28  ;;  %v41472_v28 = vld [vmem:[#allocation96_spill] sm:$0xff] }
 0x4e3   : > { %28356 = vmatmul.mubr.f32.gmra.mrb[10].mxu1 %v6425_v36  ;;  %v6474_v32 = vsub.f32 %v41462_v61, %v41463_v34  ;;  %v6484_v36 = vsub.f32 %v41465_v6, %v41466_v31  ;;  %v41470_v34 = vld [vmem:[#allocation89_spill] sm:$0xff] }
 0x4e4   : > { %28358 = vmatprep.mubr.f32.mxu1 %v6435_v7  ;;  %29374 = vmatmul.mubr.f32.gmra.mrb[22].mxu0 %v41461_v33  ;;  %v41468_v7 = vand.u32 4294901760, %v41467_v18  ;;  %v41471_v39 = vand.u32 4294901760, %v41470_v34 }
 0x4e5   : > { %29376 = vmatprep.mubr.f32.mxu0 %v41464_v60  ;;  %v6475_v5 = vand.u32 4294901760, %v6474_v32  ;;  %v6485_v61 = vand.u32 4294901760, %v6484_v36  ;;  %v41476_v36 = vld [vmem:[#allocation104_spill] sm:$0xff] }
 0x4e6   : > { %v6494_v59 = vsub.f32 %v41467_v18, %v41468_v7  ;;  %v41474_v18 = vld [vmem:[#allocation97_spill] sm:$0xff] }
 0x4e7   : > { %28359 = vmatmul.mubr.f32.gmra.mrb[12].mxu1 %v6445_v57  ;;  %v6504_v57 = vsub.f32 %v41470_v34, %v41471_v39  ;;  %v41475_v7 = vand.u32 4294901760, %v41474_v18 }
 0x4e8   : > { %28361 = vmatprep.mubr.f32.mxu1 %v6455_v20  ;;  %29377 = vmatmul.mubr.f32.gmra.mrb[24].mxu0 %v36502_v51  ;;  %v6495_v31 = vand.u32 4294901760, %v6494_v59  ;;  %v41473_v20 = vand.u32 4294901760, %v41472_v28 }
 0x4e9   : > { %29379 = vmatprep.mubr.f32.mxu0 %v41469_v14  ;;  %v6505_v6 = vand.u32 4294901760, %v6504_v57 }
 0x4ea   : > { %v6514_v32 = vsub.f32 %v41472_v28, %v41473_v20  ;;  %v41478_v28 = vld [vmem:[#allocation106_spill] sm:$0xff] }
 0x4eb   : > { %28362 = vmatmul.mubr.f32.gmra.mrb[14].mxu1 %v6465_v21  ;;  %v6524_v21 = vsub.f32 %v41474_v18, %v41475_v7  ;;  %v41479_v20 = vand.u32 4294901760, %v41478_v28  ;;  %v41482_v7 = vand.u32 4294901760, %v41406_v11  ;;  %v41488_v11 = vand.u32 4294901760, %v41408_v38 }
 0x4ec   : > { %28364 = vmatprep.mubr.f32.mxu1 %v6475_v5  ;;  %29380 = vmatmul.mubr.f32.gmra.mrb[26].mxu0 %v36523_v45  ;;  %v6515_v39 = vand.u32 4294901760, %v6514_v32  ;;  %v41477_v5 = vand.u32 4294901760, %v41476_v36  ;;  %v41494_v38 = vand.u32 4294901760, %v41411_v50 }
 0x4ed   : > { %29382 = vmatprep.mubr.f32.mxu0 %v36529_v40  ;;  %v6525_v34 = vand.u32 4294901760, %v6524_v21 }
 0x4ee   : > { %v6534_v59 = vsub.f32 %v41476_v36, %v41477_v5  ;;  %v41483_v5 = vld [vmem:[#allocation123_spill] sm:$0xff] }
 0x4ef   : > { %28365 = vmatmul.mubr.f32.gmra.mrb[16].mxu1 %v6485_v61  ;;  %v6544_v61 = vsub.f32 %v41478_v28, %v41479_v20  ;;  %v41485_v28 = vand.u32 4294901760, %v41407_v42  ;;  %v41486_v20 = vld [vmem:[#allocation125_spill] sm:$0xff]  ;;  %v41491_v42 = vand.u32 4294901760, %v41410_v47 }
 0x4f0   : > { %28367 = vmatprep.mubr.f32.mxu1 %v6495_v31  ;;  %29383 = vmatmul.mubr.f32.gmra.mrb[28].mxu0 %v36541_v23  ;;  %v6535_v57 = vand.u32 4294901760, %v6534_v59  ;;  %v41480_v31 = vld [vmem:[#allocation121_spill] sm:$0xff]  ;;  %v41487_v59 = vand.u32 4294901760, %v41486_v20 }
 0x4f1   : > { %29385 = vmatprep.mubr.f32.mxu0 %v36550_v19  ;;  %v41481_v18 = vand.u32 4294901760, %v41480_v31  ;;  %v6545_v36 = vand.u32 4294901760, %v6544_v61  ;;  %v41489_v61 = vld [vmem:[#allocation127_spill] sm:$0xff] }
 0x4f2   : > { %v6574_v55 = vsub.f32 %v41486_v20, %v41487_v59 }
 0x4f3   : > { %28368 = vmatmul.mubr.f32.gmra.mrb[18].mxu1 %v6505_v6  ;;  %v6554_v32 = vsub.f32 %v41480_v31, %v41481_v18  ;;  %v41484_v6 = vand.u32 4294901760, %v41483_v5  ;;  %v41490_v18 = vand.u32 4294901760, %v41489_v61 }
 0x4f4   : > { %28370 = vmatprep.mubr.f32.mxu1 %v6515_v39  ;;  %29386 = vmatmul.mubr.f32.gmra.mrb[30].mxu0 %v36559_v46 }
 0x4f5   : > { %29390 = vmatprep.mubr.f32.mxu0 %v41482_v7  ;;  %v6564_v21 = vsub.f32 %v41483_v5, %v41484_v6  ;;  %v6555_v39 = vand.u32 4294901760, %v6554_v32  ;;  %v6575_v32 = vand.u32 4294901760, %v6574_v55  ;;  %v41492_v7 = vld [vmem:[#allocation129_spill] sm:$0xff] }
 0x4f6   : > { %v41493_v6 = vand.u32 4294901760, %v41492_v7 }
 0x4f7   : > { %28371 = vmatmul.mubr.f32.gmra.mrb[20].mxu1 %v6525_v34  ;;  %v6565_v34 = vand.u32 4294901760, %v6564_v21 }
 0x4f8   : > { %28373 = vmatprep.mubr.f32.mxu1 %v6535_v57  ;;  %29391 = vmatmul.mubr.f32.vlgmr.msra.gmra.mrb[0].mxu0 %v41485_v28  ;;  %v6584_v57 = vsub.f32 %v41489_v61, %v41490_v18 }
 0x4f9   : > { %29439 = vmatpush3.msra.mxu0 %v41409_v58  ;;  %29393 = vmatprep.mubr.f32.mxu0 %v41488_v11  ;;  %v6594_v58 = vsub.f32 %v41492_v7, %v41493_v6  ;;  %v41498_v11 = vld [vmem:[#allocation133_spill] sm:$0xff] }
 0x4fa   : > { %29488 = vmatprep.subr.mxu0 %v36078_v0  ;;  %v6585_v28 = vand.u32 4294901760, %v6584_v57  ;;  %v41499_v55 = vand.u32 4294901760, %v41498_v11 }
 0x4fb   : > { %28374 = vmatmul.mubr.f32.gmra.mrb[22].mxu1 %v6545_v36  ;;  %v41495_v36 = vld [vmem:[#allocation131_spill] sm:$0xff]  ;;  %v6595_v47 = vand.u32 4294901760, %v6594_v58  ;;  %v41504_v58 = vand.u32 4294901760, %v41417_v35  ;;  %v41510_v35 = vld [vmem:[#allocation18_spill] sm:$0xff] }
 0x4fc   : > { %28376 = vmatprep.mubr.f32.mxu1 %v6555_v39  ;;  %29394 = vmatmul.mubr.f32.gmra.mrb[2].mxu0 %v41491_v42  ;;  %v41496_v21 = vand.u32 4294901760, %v41495_v36  ;;  %v41497_v39 = vand.u32 4294901760, %v41412_v56  ;;  %v6614_v18 = vsub.f32 %v41498_v11, %v41499_v55  ;;  %v41500_v42 = vand.u32 4294901760, %v41413_v16  ;;  %v41515_v55 = vld [vmem:[#allocation28_spill] sm:$0xff] }
 0x4fd   : > { %29396 = vmatprep.mubr.f32.mxu0 %v41494_v38  ;;  %v41505_v16 = vand.u32 4294901760, %v41418_v62  ;;  %v41513_v62 = vand.u32 4294901760, %v41434_v13  ;;  %v41521_v13 = vand.u32 4294901760, %v41446_v48  ;;  %v41529_v48 = vand.u32 4294901760, %v41458_v4 }
 0x4fe   : > { %v6604_v59 = vsub.f32 %v41495_v36, %v41496_v21  ;;  %v6615_v56 = vand.u32 4294901760, %v6614_v18  ;;  %v41507_v21 = vld [vmem:[#allocation17_spill] sm:$0xff]  ;;  %v41518_v18 = vld [vmem:[#allocation30_spill] sm:$0xff]  ;;  %v41537_v4 = vand.u32 4294901760, %v41469_v14 }
 0x4ff   : > { %28377 = vmatmul.mubr.f32.gmra.mrb[24].mxu1 %v6565_v34  ;;  %v41501_v34 = vld [vmem:[#allocation134_spill] sm:$0xff] }
 0x500   : > { %28379 = vmatprep.mubr.f32.mxu1 %v6575_v32  ;;  %29397 = vmatmul.mubr.f32.gmra.mrb[4].mxu0 %v41497_v39  ;;  %v6605_v50 = vand.u32 4294901760, %v6604_v59  ;;  %v41502_v57 = vand.u32 4294901760, %v41501_v34  ;;  %v41503_v32 = vand.u32 4294901760, %v41414_v10  ;;  %v41508_v59 = vand.u32 4294901760, %v41425_v44  ;;  %v41511_v39 = vld [vmem:[#allocation19_spill] sm:$0xff] }
 0x501   : > { %29399 = vmatprep.mubr.f32.mxu0 %v41500_v42  ;;  %v41509_v10 = vand.u32 4294901760, %v41428_v24  ;;  %v41516_v44 = vand.u32 4294901760, %v41437_v12  ;;  %v41517_v24 = vand.u32 4294901760, %v41440_v22  ;;  %v41519_v42 = vld [vmem:[#allocation37_spill] sm:$0xff]  ;;  %v41524_v12 = vand.u32 4294901760, %v41449_v53 }
 0x502   : > { %v6624_v6 = vsub.f32 %v41501_v34, %v41502_v57  ;;  %v41525_v22 = vand.u32 4294901760, %v41452_v1  ;;  %v41526_v57 = vld [vmem:[#allocation46_spill] sm:$0xff]  ;;  %v41532_v53 = vand.u32 4294901760, %v41461_v33  ;;  %v41533_v1 = vand.u32 4294901760, %v41464_v60 }
 0x503   : > { %28380 = vmatmul.mubr.f32.gmra.mrb[26].mxu1 %v6585_v28  ;;  %v41506_v28 = vand.u32 4294901760, %v41421_v52  ;;  %v41514_v52 = vld [vmem:[#allocation22_spill] sm:$0xff]  ;;  %v41540_v33 = vand.u32 4294901760, %v36523_v45  ;;  %v41541_v60 = vand.u32 4294901760, %v36529_v40  ;;  %v41547_v40 = vld [vmem:[#allocation93_spill] sm:$0xff] }
 0x504   : > { %28382 = vmatprep.mubr.f32.mxu1 %v6595_v47  ;;  %29400 = vmatmul.mubr.f32.gmra.mrb[6].mxu0 %v41503_v32  ;;  %v6625_v38 = vand.u32 4294901760, %v6624_v6  ;;  %v41512_v47 = vand.u32 4294901760, %v41431_v49  ;;  %v41520_v49 = vand.u32 4294901760, %v41443_v25  ;;  %v41527_v6 = vld [vmem:[#allocation52_spill] sm:$0xff]  ;;  %v41528_v25 = vand.u32 4294901760, %v41455_v9  ;;  %v41530_v32 = vld [vmem:[#allocation54_spill] sm:$0xff] }
 0x505   : > { %29402 = vmatprep.mubr.f32.mxu0 %v41504_v58  ;;  %v41534_v58 = vld [vmem:[#allocation61_spill] sm:$0xff]  ;;  %v41536_v9 = vand.u32 4294901760, %v36502_v51  ;;  %v41544_v51 = vand.u32 4294901760, %v36541_v23  ;;  %v25151_v14 = vld [vmem:[%s39344_s1 + $0x1c] sm:$0xf] }
 0x506   : > { %v14020_v45 = vsel %vm507_vm0, %v25151_v14, 0 }
 0x507   : > { %28383 = vmatmul.mubr.f32.gmra.mrb[28].mxu1 %v6605_v50  ;;  %v41523_v50 = vld [vmem:[#allocation45_spill] sm:$0xff]  ;;  %v36889_v23 = vand.u32 4294901760, %v14020_v45 }
 0x508   : > { %28385 = vmatprep.mubr.f32.mxu1 %v6615_v56  ;;  %29403 = vmatmul.mubr.f32.gmra.mrb[8].mxu0 %v41505_v16  ;;  %v41531_v56 = vld [vmem:[#allocation60_spill] sm:$0xff]  ;;  %v41538_v16 = vld [vmem:[#allocation70_spill] sm:$0xff] }
 0x509   : > { %29405 = vmatprep.mubr.f32.mxu0 %v41506_v28  ;;  %v41539_v28 = vld [vmem:[#allocation77_spill] sm:$0xff] }
 0x50b   : > { %28386 = vmatmul.mubr.f32.gmra.mrb[30].mxu1 %v6625_v38  ;;  %v41535_v38 = vld [vmem:[#allocation68_spill] sm:$0xff] }
 0x50c   : > { %28390 = vmatprep.mubr.f32.mxu1 %v41507_v21  ;;  %29406 = vmatmul.mubr.f32.gmra.mrb[10].mxu0 %v41508_v59  ;;  %v41542_v21 = vld [vmem:[#allocation78_spill] sm:$0xff]  ;;  %v41543_v59 = vld [vmem:[#allocation83_spill] sm:$0xff] }
 0x50d   : > { %29408 = vmatprep.mubr.f32.mxu0 %v41509_v10  ;;  %v41545_v10 = vand.u32 4294901760, %v36550_v19  ;;  %v41551_v19 = vld [vmem:[#allocation102_spill] sm:$0xff] }
 0x50f   : > { %28391 = vmatmul.mubr.f32.vlgmr.msra.gmra.mrb[0].mxu1 %v41510_v35  ;;  %v41546_v35 = vld [vmem:[#allocation86_spill] sm:$0xff] }
 0x510   : > { %28393 = vmatprep.mubr.f32.mxu1 %v41511_v39  ;;  %29409 = vmatmul.mubr.f32.gmra.mrb[12].mxu0 %v41512_v47  ;;  %v41548_v39 = vand.u32 4294901760, %v36559_v46  ;;  %v41549_v47 = vld [vmem:[#allocation94_spill] sm:$0xff]  ;;  %v41552_v46 = vld [vmem:[#allocation119_spill] sm:$0xff] }
 0x511   : > { %29411 = vmatprep.mubr.f32.mxu0 %v41513_v62  ;;  %30895 = vmatpush3.msra.mxu1 %v41391_v37  ;;  %v41522_v37 = vld [vmem:[#allocation39_spill] sm:$0xff]  ;;  %v41550_v62 = vld [vmem:[#allocation101_spill] sm:$0xff] }
 0x513   : > { %28394 = vmatmul.mubr.f32.gmra.mrb[2].mxu1 %v41514_v52  ;;  %v41553_v52 = vld [vmem:[#allocation120_spill] sm:$0xff] }
 0x514   : > { %28396 = vmatprep.mubr.f32.mxu1 %v41515_v55  ;;  %29412 = vmatmul.mubr.f32.gmra.mrb[14].mxu0 %v41516_v44  ;;  %v41554_v55 = vld [vmem:[#allocation122_spill] sm:$0xff] }
 0x515   : > { %29414 = vmatprep.mubr.f32.mxu0 %v41517_v24  ;;  %v41556_v44 = vld [vmem:[#allocation126_spill] sm:$0xff]  ;;  %v41557_v24 = vld [vmem:[#allocation128_spill] sm:$0xff] }
 0x517   : > { %28397 = vmatmul.mubr.f32.gmra.mrb[4].mxu1 %v41518_v18  ;;  %v41558_v18 = vld [vmem:[#allocation130_spill] sm:$0xff] }
 0x518   : > { %28399 = vmatprep.mubr.f32.mxu1 %v41519_v42  ;;  %29415 = vmatmul.mubr.f32.gmra.mrb[16].mxu0 %v41520_v49  ;;  %v41559_v42 = vld [vmem:[#allocation167_spill] sm:$0xff]  ;;  %v41560_v49 = vld [vmem:[#allocation168_spill] sm:$0xff] }
 0x519   : > { %29417 = vmatprep.mubr.f32.mxu0 %v41521_v13  ;;  %v41561_v13 = vld [vmem:[#allocation132_spill] sm:$0xff] }
 0x51b   : > { %28400 = vmatmul.mubr.f32.gmra.mrb[6].mxu1 %v41522_v37  ;;  %v41562_v37 = vld [vmem:[#allocation84_spill] sm:$0xff] }
 0x51c   : > { %28402 = vmatprep.mubr.f32.mxu1 %v41523_v50  ;;  %29418 = vmatmul.mubr.f32.gmra.mrb[18].mxu0 %v41524_v12  ;;  %v41563_v50 = vld [vmem:[#allocation85_spill] sm:$0xff]  ;;  %v41567_v12 = vld [vmem:[#allocation150_spill] sm:$0xff] }
 0x51d   : > { %29420 = vmatprep.mubr.f32.mxu0 %v41525_v22  ;;  %v41570_v22 = vld [vmem:[#allocation144_spill] sm:$0xff] }
 0x51f   : > { %28403 = vmatmul.mubr.f32.gmra.mrb[8].mxu1 %v41526_v57  ;;  %v41571_v57 = vld [vmem:[#allocation148_spill] sm:$0xff] }
 0x520   : > { %28405 = vmatprep.mubr.f32.mxu1 %v41527_v6  ;;  %29421 = vmatmul.mubr.f32.gmra.mrb[20].mxu0 %v41528_v25  ;;  %v36939_v6 = vsub.f32 %v14020_v45, %v36889_v23  ;;  %v41575_v25 = vld [vmem:[#allocation51_spill] sm:$0xff] }
 0x521   : > { %29423 = vmatprep.mubr.f32.mxu0 %v41529_v48 }
 0x522   : > { %v36944_v48 = vand.u32 4294901760, %v36939_v6 }
 0x523   : > { %28406 = vmatmul.mubr.f32.gmra.mrb[10].mxu1 %v41530_v32  ;;  %v41576_v32 = vld [vmem:[#allocation156_spill] sm:$0xff] }
 0x524   : > { %28408 = vmatprep.mubr.f32.mxu1 %v41531_v56  ;;  %29424 = vmatmul.mubr.f32.gmra.mrb[22].mxu0 %v41532_v53  ;;  %v41577_v56 = vld [vmem:[#allocation91_spill] sm:$0xff]  ;;  %v14412_v53 = vsub.f32 %v36939_v6, %v36944_v48 }
 0x525   : > { %29426 = vmatprep.mubr.f32.mxu0 %v41533_v1  ;;  %v41578_v1 = vld [vmem:[#allocation66_spill] sm:$0xff] }
 0x527   : > { %28409 = vmatmul.mubr.f32.gmra.mrb[12].mxu1 %v41534_v58  ;;  %v36952_v58 = vand.u32 4294901760, %v14412_v53 }
 0x528   : > { %28411 = vmatprep.mubr.f32.mxu1 %v41535_v38  ;;  %29427 = vmatmul.mubr.f32.gmra.mrb[24].mxu0 %v41536_v9  ;;  %v13894_v9 = vld [vmem:[#allocation2 + $0x69] sm:$0xff] }
 0x529   : > { %29429 = vmatprep.mubr.f32.mxu0 %v41537_v4 }
 0x52b   : > { %28412 = vmatmul.mubr.f32.gmra.mrb[14].mxu1 %v41538_v16 }
 0x52c   : > { %28414 = vmatprep.mubr.f32.mxu1 %v41539_v28  ;;  %29430 = vmatmul.mubr.f32.gmra.mrb[26].mxu0 %v41540_v33  ;;  %v13895_v28 = vld [vmem:[#allocation2 + $0x79] sm:$0xff] }
 0x52d   : > { %29432 = vmatprep.mubr.f32.mxu0 %v41541_v60  ;;  %v13942_v14 = vsel %vm223_vm1, %v13895_v28, 0 }
 0x52f   : > { %28415 = vmatmul.mubr.f32.gmra.mrb[16].mxu1 %v41542_v21 }
 0x530   : > { %28417 = vmatprep.mubr.f32.mxu1 %v41543_v59  ;;  %29433 = vmatmul.mubr.f32.gmra.mrb[28].mxu0 %v41544_v51  ;;  %v13939_v59 = vsel %vm223_vm1, %v13894_v9, 0  ;;  %v13896_v51 = vld [vmem:[#allocation2 + $0x81] sm:$0xff] }
 0x531   : > { %29435 = vmatprep.mubr.f32.mxu0 %v41545_v10  ;;  %v37013_v45 = vand.u32 4294901760, %v13939_v59 }
 0x533   : > { %28418 = vmatmul.mubr.f32.gmra.mrb[18].mxu1 %v41546_v35 }
 0x534   : > { %28420 = vmatprep.mubr.f32.mxu1 %v41547_v40  ;;  %29436 = vmatmul.mubr.f32.gmra.mrb[30].mxu0 %v41548_v39  ;;  %v13897_v40 = vld [vmem:[#allocation2 + $0x91] sm:$0xff] }
 0x535   : > { %29440 = vmatprep.mubr.f32.mxu0 %v36208_v26 }
 0x537   : > { %28421 = vmatmul.mubr.f32.gmra.mrb[20].mxu1 %v41549_v47 }
 0x538   : > { %28423 = vmatprep.mubr.f32.mxu1 %v41550_v62  ;;  %29441 = vmatmul.mubr.f32.vlgmr.msra.gmra.mrb[0].mxu0 %v36214_v15 }
 0x539   : > { %29489 = vmatpush3.msra.mxu0 %v36078_v0  ;;  %29443 = vmatprep.mubr.f32.mxu0 %v36221_v17  ;;  %v41555_v0 = vld [vmem:[#allocation124_spill] sm:$0xff] }
 0x53a   : > { %29538 = vmatprep.subr.mxu0 %v36889_v23 }
 0x53b   : > { %28424 = vmatmul.mubr.f32.gmra.mrb[22].mxu1 %v41551_v19  ;;  %v13945_v19 = vsel %vm223_vm1, %v13896_v51, 0 }
 0x53c   : > { %28426 = vmatprep.mubr.f32.mxu1 %v41552_v46  ;;  %29444 = vmatmul.mubr.f32.gmra.mrb[2].mxu0 %v36230_v43  ;;  %v37025_v46 = vand.u32 4294901760, %v13942_v14 }
 0x53d   : > { %29446 = vmatprep.mubr.f32.mxu0 %v36238_v30 }
 0x53f   : > { %28427 = vmatmul.mubr.f32.gmra.mrb[24].mxu1 %v41553_v52  ;;  %v13948_v52 = vsel %vm223_vm1, %v13897_v40, 0  ;;  %v13904_v40 = vld [vmem:[#allocation2 + $0xe1] sm:$0xff] }
 0x540   : > { %28429 = vmatprep.mubr.f32.mxu1 %v41554_v55  ;;  %29447 = vmatmul.mubr.f32.gmra.mrb[4].mxu0 %v36248_v8  ;;  %v13898_v55 = vld [vmem:[#allocation2 + $0x99] sm:$0xff] }
 0x541   : > { %29449 = vmatprep.mubr.f32.mxu0 %v41382_v29 }
 0x543   : > { %28430 = vmatmul.mubr.f32.gmra.mrb[26].mxu1 %v41555_v0  ;;  %v13899_v0 = vld [vmem:[#allocation2 + $0xa9] sm:$0xff] }
 0x544   : > { %28432 = vmatprep.mubr.f32.mxu1 %v41556_v44  ;;  %29450 = vmatmul.mubr.f32.gmra.mrb[6].mxu0 %v41385_v54 }
 0x545   : > { %29452 = vmatprep.mubr.f32.mxu0 %v36284_v3 }
 0x547   : > { %28433 = vmatmul.mubr.f32.gmra.mrb[28].mxu1 %v41557_v24  ;;  %v37030_v24 = vsub.f32 %v13939_v59, %v37013_v45 }
 0x548   : > { %28435 = vmatprep.mubr.f32.mxu1 %v41558_v18  ;;  %29453 = vmatmul.mubr.f32.gmra.mrb[8].mxu0 %v41559_v42  ;;  %v37032_v18 = vand.u32 4294901760, %v13945_v19 }
 0x549   : > { %29455 = vmatprep.mubr.f32.mxu0 %v41560_v49 }
 0x54b   : > { %28436 = vmatmul.mubr.f32.gmra.mrb[30].mxu1 %v41561_v13 }
 0x54c   : > { %28476 = vmatprep.mubr.f32.mxu1 %v41480_v31  ;;  %29456 = vmatmul.mubr.f32.gmra.mrb[10].mxu0 %v41393_v63  ;;  %v41564_v31 = vld [vmem:[#allocation140_spill] sm:$0xff] }
 0x54d   : > { %29458 = vmatprep.mubr.f32.mxu0 %v36332_v27 }
 0x54f   : > { %28477 = vmatmul.mubr.f32.vlgmr.msra.gmra.mrb[24].mxu1 %v41483_v5  ;;  %v41565_v5 = vld [vmem:[#allocation115_spill] sm:$0xff] }
 0x550   : > { %28479 = vmatprep.mubr.f32.mxu1 %v41486_v20  ;;  %29459 = vmatmul.mubr.f32.gmra.mrb[12].mxu0 %v41394_v2  ;;  %v41566_v20 = vld [vmem:[#allocation100_spill] sm:$0xff] }
 0x551   : > { %29461 = vmatprep.mubr.f32.mxu0 %v41395_v41 }
 0x553   : > { %28480 = vmatmul.mubr.f32.gmra.mrb[26].mxu1 %v41489_v61  ;;  %v41568_v61 = vld [vmem:[#allocation81_spill] sm:$0xff] }
 0x554   : > { %28482 = vmatprep.mubr.f32.mxu1 %v41492_v7  ;;  %29462 = vmatmul.mubr.f32.gmra.mrb[14].mxu0 %v41562_v37  ;;  %v41569_v7 = vld [vmem:[#allocation135_spill] sm:$0xff] }
 0x555   : > { %29464 = vmatprep.mubr.f32.mxu0 %v41563_v50 }
 0x557   : > { %28483 = vmatmul.mubr.f32.gmra.mrb[28].mxu1 %v41495_v36  ;;  %v41572_v36 = vld [vmem:[#allocation154_spill] sm:$0xff] }
 0x558   : > { %28485 = vmatprep.mubr.f32.mxu1 %v41498_v11  ;;  %29465 = vmatmul.mubr.f32.gmra.mrb[16].mxu0 %v41564_v31  ;;  %v41573_v11 = vld [vmem:[#allocation155_spill] sm:$0xff] }
 0x559   : > { %29467 = vmatprep.mubr.f32.mxu0 %v41565_v5 }
 0x55b   : > { %28486 = vmatmul.mubr.f32.gmra.mrb[30].mxu1 %v41501_v34  ;;  %v41574_v34 = vld [vmem:[#allocation176_spill] sm:$0xff] }
 0x55c   : > { %29468 = vmatmul.mubr.f32.gmra.mrb[18].mxu0 %v41566_v20 }
 0x55d   : > { %29470 = vmatprep.mubr.f32.mxu0 %v41567_v12 }
 0x560   : > { %29471 = vmatmul.mubr.f32.gmra.mrb[20].mxu0 %v41568_v61 }
 0x561   : > { %29473 = vmatprep.mubr.f32.mxu0 %v41569_v7 }
 0x564   : > { %29474 = vmatmul.mubr.f32.gmra.mrb[22].mxu0 %v41570_v22 }
 0x565   : > { %29476 = vmatprep.mubr.f32.mxu0 %v41571_v57 }
 0x568   : > { %29477 = vmatmul.mubr.f32.gmra.mrb[24].mxu0 %v41572_v36 }
 0x569   : > { %29479 = vmatprep.mubr.f32.mxu0 %v41573_v11 }
 0x56c   : > { %29480 = vmatmul.mubr.f32.gmra.mrb[26].mxu0 %v41574_v34 }
 0x56d   : > { %29482 = vmatprep.mubr.f32.mxu0 %v41575_v25 }
 0x570   : > { %29483 = vmatmul.mubr.f32.gmra.mrb[28].mxu0 %v41576_v32 }
 0x571   : > { %29485 = vmatprep.mubr.f32.mxu0 %v41577_v56 }
 0x574   : > { %29486 = vmatmul.mubr.f32.gmra.mrb[30].mxu0 %v41578_v1 }
 0x575   : > { %29490 = vmatprep.mubr.f32.mxu0 %v36208_v26 }
 0x578   : > { %29491 = vmatmul.mubr.f32.vlgmr.msra.gmra.mrb[0].mxu0 %v36214_v15  ;;  %v13890_v15 = vld [vmem:[#allocation2 + $0x39] sm:$0xff] }
 0x579   : > { %29539 = vmatpush3.msra.mxu0 %v36889_v23  ;;  %29493 = vmatprep.mubr.f32.mxu0 %v36221_v17  ;;  %v13891_v17 = vld [vmem:[#allocation2 + $0x49] sm:$0xff] }
 0x57a   : > { %29588 = vmatprep.subr.mxu0 %v36952_v58 }
 0x57c   : > { %29494 = vmatmul.mubr.f32.gmra.mrb[2].mxu0 %v36230_v43 }
 0x57d   : > { %29496 = vmatprep.mubr.f32.mxu0 %v36238_v30  ;;  %v13927_v30 = vsel %vm223_vm1, %v13890_v15, 0 }
 0x580   : > { %29497 = vmatmul.mubr.f32.gmra.mrb[4].mxu0 %v36248_v8  ;;  %v13930_v8 = vsel %vm223_vm1, %v13891_v17, 0 }
 0x581   : > { %29499 = vmatprep.mubr.f32.mxu0 %v41382_v29  ;;  %v36983_v29 = vand.u32 4294901760, %v13927_v30 }
 0x583   : > { %v36995_v4 = vsub.f32 %v13927_v30, %v36983_v29 }
 0x584   : > { %29500 = vmatmul.mubr.f32.gmra.mrb[6].mxu0 %v41385_v54 }
 0x585   : > { %29502 = vmatprep.mubr.f32.mxu0 %v36284_v3  ;;  %v13889_v3 = vld [vmem:[#allocation2 + $0x31] sm:$0xff]  ;;  %v40233_v10 = vand.u32 4294901760, %v36995_v4 }
 0x586   : > { %v13924_v26 = vsel %vm223_vm1, %v13889_v3, 0 }
 0x587   : > { %v36978_v43 = vand.u32 4294901760, %v13924_v26 }
 0x588   : > { %29503 = vmatmul.mubr.f32.gmra.mrb[8].mxu0 %v41559_v42 }
 0x589   : > { %29505 = vmatprep.mubr.f32.mxu0 %v41560_v49  ;;  %v36987_v54 = vsub.f32 %v13924_v26, %v36978_v43  ;;  %v14101_v49 = vsub.f32 %v36995_v4, %v40233_v10  ;;  %v13902_v26 = vld [vmem:[#allocation2 + $0xc9] sm:$0xff] }
 0x58b   : > { %v40235_v33 = vand.u32 4294901760, %v36987_v54 }
 0x58c   : > { %29506 = vmatmul.mubr.f32.gmra.mrb[10].mxu0 %v41393_v63  ;;  %v13893_v63 = vld [vmem:[#allocation2 + $0x61] sm:$0xff] }
 0x58d   : > { %29508 = vmatprep.mubr.f32.mxu0 %v36332_v27  ;;  %v13892_v27 = vld [vmem:[#allocation2 + $0x51] sm:$0xff]  ;;  %v13936_v38 = vsel %vm223_vm1, %v13893_v63, 0  ;;  %v14091_v39 = vsub.f32 %v36987_v54, %v40235_v33 }
 0x58e   : > { %v37004_v21 = vand.u32 4294901760, %v13936_v38 }
 0x58f   : > { %v14092_v42 = vand.u32 4294901760, %v14091_v39 }
 0x590   : > { %29509 = vmatmul.mubr.f32.gmra.mrb[12].mxu0 %v41394_v2  ;;  %v36989_v2 = vand.u32 4294901760, %v13930_v8  ;;  %v37021_v62 = vsub.f32 %v13936_v38, %v37004_v21  ;;  %v13963_v38 = vsel %vm223_vm1, %v13902_v26, 0  ;;  %v13907_v26 = vld [vmem:[#allocation2 + $0x109] sm:$0xff] }
 0x591   : > { %29511 = vmatprep.mubr.f32.mxu0 %v41395_v41  ;;  %v13933_v41 = vsel %vm223_vm1, %v13892_v27, 0 }
 0x592   : > { %v36997_v16 = vand.u32 4294901760, %v13933_v41  ;;  %v37002_v60 = vsub.f32 %v13930_v8, %v36989_v2 }
 0x594   : > { %29512 = vmatmul.mubr.f32.gmra.mrb[14].mxu0 %v41562_v37  ;;  %v37011_v35 = vsub.f32 %v13933_v41, %v36997_v16  ;;  %v40232_v47 = vand.u32 4294901760, %v37002_v60  ;;  %v40229_v37 = vand.u32 4294901760, %v37021_v62 }
 0x595   : > { %29514 = vmatprep.mubr.f32.mxu0 %v41563_v50  ;;  %v37044_v50 = vsub.f32 %v13942_v14, %v37025_v46 }
 0x596   : > { %v40231_v44 = vand.u32 4294901760, %v37011_v35  ;;  %v14111_v13 = vsub.f32 %v37002_v60, %v40232_v47 }
 0x597   : > { %v40225_v53 = vand.u32 4294901760, %v37044_v50 }
 0x598   : > { %29515 = vmatmul.mubr.f32.gmra.mrb[16].mxu0 %v41564_v31  ;;  %v37046_v31 = vand.u32 4294901760, %v13948_v52 }
 0x599   : > { %29517 = vmatprep.mubr.f32.mxu0 %v41565_v5  ;;  %v13951_v5 = vsel %vm223_vm1, %v13898_v55, 0  ;;  %v14151_v59 = vsub.f32 %v37044_v50, %v40225_v53  ;;  %v13905_v55 = vld [vmem:[#allocation2 + $0xf1] sm:$0xff]  ;;  %v13911_v53 = vld [vmem:[#allocation2 + $0x139] sm:$0xff] }
 0x59a   : > { %v37068_v3 = vsub.f32 %v13948_v52, %v37046_v31  ;;  %v37096_v52 = vand.u32 4294901760, %v13963_v38 }
 0x59c   : > { %29518 = vmatmul.mubr.f32.gmra.mrb[18].mxu0 %v41566_v20  ;;  %v13954_v20 = vsel %vm223_vm1, %v13899_v0, 0  ;;  %v40222_v51 = vand.u32 4294901760, %v37068_v3 }
 0x59d   : > { %29520 = vmatprep.mubr.f32.mxu0 %v41567_v12  ;;  %v13900_v12 = vld [vmem:[#allocation2 + $0xb1] sm:$0xff] }
 0x5a0   : > { %29521 = vmatmul.mubr.f32.gmra.mrb[20].mxu0 %v41568_v61  ;;  %v14121_v61 = vsub.f32 %v37011_v35, %v40231_v44  ;;  %v13912_v44 = vld [vmem:[#allocation2 + $0x141] sm:$0xff] }
 0x5a1   : > { %29523 = vmatprep.mubr.f32.mxu0 %v41569_v7  ;;  %v40227_v7 = vand.u32 4294901760, %v37030_v24 }
 0x5a2   : > { %v14122_v17 = vand.u32 4294901760, %v14121_v61  ;;  %v13972_v61 = vsel %vm223_vm1, %v13905_v55, 0 }
 0x5a3   : > { %v14141_v30 = vsub.f32 %v37030_v24, %v40227_v7 }
 0x5a4   : > { %29524 = vmatmul.mubr.f32.gmra.mrb[22].mxu0 %v41570_v22  ;;  %v37055_v22 = vsub.f32 %v13945_v19, %v37032_v18 }
 0x5a5   : > { %29526 = vmatprep.mubr.f32.mxu0 %v41571_v57  ;;  %v13901_v57 = vld [vmem:[#allocation2 + $0xc1] sm:$0xff]  ;;  %v14142_v39 = vand.u32 4294901760, %v14141_v30 }
 0x5a6   : > { %v13960_v15 = vsel %vm223_vm1, %v13901_v57, 0  ;;  %v40224_v8 = vand.u32 4294901760, %v37055_v22  ;;  %v13906_v57 = vld [vmem:[#allocation2 + $0xf9] sm:$0xff] }
 0x5a7   : > { %v37090_v14 = vand.u32 4294901760, %v13960_v15 }
 0x5a8   : > { %29527 = vmatmul.mubr.f32.gmra.mrb[24].mxu0 %v41572_v36  ;;  %v14102_v36 = vand.u32 4294901760, %v14101_v49  ;;  %v14161_v0 = vsub.f32 %v37055_v22, %v40224_v8 }
 0x5a9   : > { %29529 = vmatprep.mubr.f32.mxu0 %v41573_v11  ;;  %v37058_v11 = vand.u32 4294901760, %v13951_v5 }
 0x5ab   : > { %v37078_v63 = vsub.f32 %v13951_v5, %v37058_v11  ;;  %v14152_v5 = vand.u32 4294901760, %v14151_v59  ;;  %v13978_v59 = vsel %vm223_vm1, %v13907_v26, 0 }
 0x5ac   : > { %29530 = vmatmul.mubr.f32.gmra.mrb[26].mxu0 %v41574_v34  ;;  %v37060_v34 = vand.u32 4294901760, %v13954_v20 }
 0x5ad   : > { %29532 = vmatprep.mubr.f32.mxu0 %v41575_v25  ;;  %v13957_v25 = vsel %vm223_vm1, %v13900_v12, 0  ;;  %41579 = vst [vmem:[#allocation172_spill] sm:$0xff] %v37078_v63  ;;  %v37110_v12 = vsub.f32 %v13960_v15, %v37090_v14 }
 0x5ae   : > { %v37075_v27 = vand.u32 4294901760, %v13957_v25  ;;  %v37081_v41 = vsub.f32 %v13954_v20, %v37060_v34  ;;  %v14171_v20 = vsub.f32 %v37068_v3, %v40222_v51 }
 0x5af   : > { %41582 = vst [vmem:[#allocation178_spill] sm:$0xff] %v37110_v12 }
 0x5b0   : > { %29533 = vmatmul.mubr.f32.gmra.mrb[28].mxu0 %v41576_v32  ;;  %v14112_v32 = vand.u32 4294901760, %v14111_v13  ;;  %41580 = vst [vmem:[#allocation196_spill] sm:$0xff] %v37081_v41  ;;  %v37094_v19 = vsub.f32 %v13957_v25, %v37075_v27  ;;  %v40220_v49 = vand.u32 4294901760, %v37081_v41  ;;  %v13969_v13 = vsel %vm223_vm1, %v13904_v40, 0  ;;  %v13908_v40 = vld [vmem:[#allocation2 + $0x111] sm:$0xff] }
 0x5b1   : > { %29535 = vmatprep.mubr.f32.mxu0 %v41577_v56  ;;  %v14131_v56 = vsub.f32 %v37021_v62, %v40229_v37  ;;  %v37115_v25 = vsub.f32 %v13963_v38, %v37096_v52  ;;  %v14172_v30 = vand.u32 4294901760, %v14171_v20  ;;  %v40226_v38 = vand.u32 4294901760, %v37110_v12  ;;  %v13909_v20 = vld [vmem:[#allocation2 + $0x121] sm:$0xff] }
 0x5b2   : > { %41581 = vst [vmem:[#allocation90_spill] sm:$0xff] %v37094_v19  ;;  %v13981_v8 = vsel %vm223_vm1, %v13908_v40, 0 }
 0x5b3   : > { %v14132_v28 = vand.u32 4294901760, %v14131_v56  ;;  %41583 = vst [vmem:[#allocation105_spill] sm:$0xff] %v37115_v25  ;;  %v37120_v56 = vand.u32 4294901760, %v13969_v13  ;;  %v40228_v55 = vand.u32 4294901760, %v37115_v25  ;;  %v37163_v40 = vand.u32 4294901760, %v13981_v8 }
 0x5b4   : > { %29536 = vmatmul.mubr.f32.gmra.mrb[30].mxu0 %v41578_v1  ;;  %v13903_v1 = vld [vmem:[#allocation2 + $0xd9] sm:$0xff] }
 0x5b5   : > { %29540 = vmatprep.mubr.f32.mxu0 %v14092_v42  ;;  %v13966_v9 = vsel %vm223_vm1, %v13903_v1, 0  ;;  %v40221_v42 = vand.u32 4294901760, %v37078_v63  ;;  %v14162_v1 = vand.u32 4294901760, %v14161_v0 }
 0x5b7   : > { %v14181_v15 = vsub.f32 %v37078_v63, %v40221_v42 }
 0x5b8   : > { %29541 = vmatmul.mubr.f32.vlgmr.msra.gmra.mrb[0].mxu0 %v14102_v36  ;;  %v40223_v36 = vand.u32 4294901760, %v37094_v19 }
 0x5b9   : > { %29589 = vmatpush3.msra.mxu0 %v36952_v58  ;;  %29543 = vmatprep.mubr.f32.mxu0 %v14112_v32  ;;  %v37098_v58 = vand.u32 4294901760, %v13966_v9 }
 0x5ba   : > { %29638 = vmatprep.subr.mxu0 %v36939_v6 }
 0x5bb   : > { %v37118_v32 = vsub.f32 %v13966_v9, %v37098_v58  ;;  %v13975_v9 = vsel %vm223_vm1, %v13906_v57, 0  ;;  %v14211_v57 = vsub.f32 %v37110_v12, %v40226_v38 }
 0x5bc   : > { %29544 = vmatmul.mubr.f32.gmra.mrb[2].mxu0 %v14122_v17  ;;  %v14191_v17 = vsub.f32 %v37081_v41, %v40220_v49  ;;  %v14182_v49 = vand.u32 4294901760, %v14181_v15  ;;  %v37141_v51 = vand.u32 4294901760, %v13975_v9 }
 0x5bd   : > { %29546 = vmatprep.mubr.f32.mxu0 %v14132_v28  ;;  %41584 = vst [vmem:[#allocation183_spill] sm:$0xff] %v37118_v32  ;;  %v37129_v28 = vand.u32 4294901760, %v13972_v61  ;;  %v40230_v0 = vand.u32 4294901760, %v37118_v32 }
 0x5be   : > { %v14192_v42 = vand.u32 4294901760, %v14191_v17  ;;  %v14221_v17 = vsub.f32 %v37115_v25, %v40228_v55  ;;  %v37161_v38 = vsub.f32 %v13975_v9, %v37141_v51 }
 0x5bf   : > { %v37147_v26 = vsub.f32 %v13972_v61, %v37129_v28 }
 0x5c0   : > { %29547 = vmatmul.mubr.f32.gmra.mrb[4].mxu0 %v14142_v39  ;;  %v14201_v39 = vsub.f32 %v37094_v19, %v40223_v36  ;;  %v37149_v36 = vand.u32 4294901760, %v13978_v59  ;;  %41587 = vst [vmem:[#allocation76_spill] sm:$0xff] %v37161_v38  ;;  %v14222_v47 = vand.u32 4294901760, %v14221_v17  ;;  %v13919_v19 = vld [vmem:[#allocation2 + $0x199] sm:$0xff] }
 0x5c1   : > { %29549 = vmatprep.mubr.f32.mxu0 %v14152_v5  ;;  %v37139_v5 = vsub.f32 %v13969_v13, %v37120_v56  ;;  %41586 = vst [vmem:[#allocation186_spill] sm:$0xff] %v37147_v26  ;;  %v13910_v13 = vld [vmem:[#allocation2 + $0x129] sm:$0xff]  ;;  %v40238_v55 = vand.u32 4294901760, %v37147_v26 }
 0x5c2   : > { %v14202_v15 = vand.u32 4294901760, %v14201_v39  ;;  %v13987_v7 = vsel %vm223_vm1, %v13910_v13, 0  ;;  %v13990_v39 = vsel %vm223_vm1, %v13911_v53, 0  ;;  %v37169_v37 = vsub.f32 %v13978_v59, %v37149_v36 }
 0x5c3   : > { %41585 = vst [vmem:[#allocation110_spill] sm:$0xff] %v37139_v5  ;;  %v40234_v61 = vand.u32 4294901760, %v37139_v5  ;;  %v37176_v10 = vand.u32 4294901760, %v13987_v7  ;;  %v37178_v13 = vand.u32 4294901760, %v13990_v39  ;;  %v37182_v59 = vsub.f32 %v13981_v8, %v37163_v40 }
 0x5c4   : > { %29550 = vmatmul.mubr.f32.gmra.mrb[6].mxu0 %v14162_v1  ;;  %v13984_v1 = vsel %vm223_vm1, %v13909_v20, 0  ;;  %v14212_v20 = vand.u32 4294901760, %v14211_v57  ;;  %41588 = vst [vmem:[#allocation116_spill] sm:$0xff] %v37169_v37  ;;  %v13993_v57 = vsel %vm223_vm1, %v13912_v44, 0  ;;  %v14251_v17 = vsub.f32 %v37147_v26, %v40238_v55 }
 0x5c5   : > { %29552 = vmatprep.mubr.f32.mxu0 %v14172_v30  ;;  %v14231_v30 = vsub.f32 %v37118_v32, %v40230_v0  ;;  %v37171_v0 = vand.u32 4294901760, %v13984_v1  ;;  %v14241_v9 = vsub.f32 %v37139_v5, %v40234_v61  ;;  %41589 = vst [vmem:[#allocation194_spill] sm:$0xff] %v37182_v59  ;;  %v37197_v8 = vsub.f32 %v13990_v39, %v37178_v13 }
 0x5c6   : > { %v37199_v44 = vand.u32 4294901760, %v13993_v57  ;;  %v41593_v55 = vand.u32 4294901760, %v37161_v38 }
 0x5c7   : > { %v14232_v53 = vand.u32 4294901760, %v14231_v30  ;;  %v37190_v33 = vsub.f32 %v13984_v1, %v37171_v0  ;;  %v13914_v30 = vld [vmem:[#allocation2 + $0x159] sm:$0xff]  ;;  %41592 = vst [vmem:[#allocation11_spill] sm:$0xff] %v37197_v8  ;;  %v14242_v5 = vand.u32 4294901760, %v14241_v9  ;;  %v13916_v9 = vld [vmem:[#allocation2 + $0x171] sm:$0xff] }
 0x5c8   : > { %29553 = vmatmul.mubr.f32.gmra.mrb[8].mxu0 %v14182_v49  ;;  %v13913_v49 = vld [vmem:[#allocation2 + $0x151] sm:$0xff]  ;;  %v14261_v61 = vsub.f32 %v37161_v38, %v41593_v55  ;;  %v13999_v25 = vsel %vm223_vm1, %v13914_v30, 0  ;;  %v37216_v1 = vsub.f32 %v13993_v57, %v37199_v44  ;;  %v41597_v38 = vand.u32 4294901760, %v37182_v59 }
 0x5c9   : > { %29555 = vmatprep.mubr.f32.mxu0 %v14192_v42  ;;  %41590 = vst [vmem:[#allocation88_spill] sm:$0xff] %v37190_v33  ;;  %v37194_v42 = vsub.f32 %v13987_v7, %v37176_v10  ;;  %v41595_v7 = vand.u32 4294901760, %v37169_v37  ;;  %v37224_v30 = vand.u32 4294901760, %v13999_v25  ;;  %v41600_v12 = vand.u32 4294901760, %v37190_v33 }
 0x5ca   : > { %41596 = vst [vmem:[#allocation58_spill] sm:$0xff] %v37216_v1 }
 0x5cb   : > { %41591 = vst [vmem:[#allocation59_spill] sm:$0xff] %v37194_v42  ;;  %v14271_v39 = vsub.f32 %v37169_v37, %v41595_v7  ;;  %v14281_v7 = vsub.f32 %v37182_v59, %v41597_v38  ;;  %41599 = vst [vmem:[#allocation33_spill] sm:$0xff] %v37224_v30  ;;  %v14291_v55 = vsub.f32 %v37190_v33, %v41600_v12  ;;  %v13918_v37 = vld [vmem:[#allocation2 + $0x189] sm:$0xff]  ;;  %v41602_v38 = vand.u32 4294901760, %v37194_v42 }
 0x5cc   : > { %29556 = vmatmul.mubr.f32.gmra.mrb[10].mxu0 %v14202_v15  ;;  %v13996_v15 = vsel %vm223_vm1, %v13913_v49, 0  ;;  %v14252_v49 = vand.u32 4294901760, %v14251_v17  ;;  %v14262_v17 = vand.u32 4294901760, %v14261_v61  ;;  %v41603_v59 = vand.u32 4294901760, %v37197_v8 }
 0x5cd   : > { %29558 = vmatprep.mubr.f32.mxu0 %v14212_v20  ;;  %v13915_v20 = vld [vmem:[#allocation2 + $0x169] sm:$0xff]  ;;  %v37205_v26 = vand.u32 4294901760, %v13996_v15  ;;  %v14282_v12 = vand.u32 4294901760, %v14281_v7  ;;  %v14292_v41 = vand.u32 4294901760, %v14291_v55  ;;  %v41607_v33 = vand.u32 4294901760, %v37216_v1 }
 0x5cf   : > { %41594 = vst [vmem:[#allocation197_spill] sm:$0xff] %v37205_v26  ;;  %v37222_v32 = vsub.f32 %v13996_v15, %v37205_v26  ;;  %v14301_v15 = vsub.f32 %v37194_v42, %v41602_v38 }
 0x5d0   : > { %29559 = vmatmul.mubr.f32.gmra.mrb[12].mxu0 %v14222_v47  ;;  %v14002_v47 = vsel %vm223_vm1, %v13915_v20, 0  ;;  %v14272_v20 = vand.u32 4294901760, %v14271_v39  ;;  %v14014_v39 = vsel %vm223_vm1, %v13919_v19, 0 }
 0x5d1   : > { %29561 = vmatprep.mubr.f32.mxu0 %v14232_v53  ;;  %v13917_v53 = vld [vmem:[#allocation2 + $0x181] sm:$0xff]  ;;  %41598 = vst [vmem:[#allocation152_spill] sm:$0xff] %v37222_v32  ;;  %v37229_v57 = vand.u32 4294901760, %v14002_v47  ;;  %v14302_v7 = vand.u32 4294901760, %v14301_v15 }
 0x5d2   : > { %v14008_v61 = vsel %vm223_vm1, %v13917_v53, 0 }
 0x5d3   : > { %41601 = vst [vmem:[#allocation158_spill] sm:$0xff] %v37229_v57  ;;  %v37247_v38 = vsub.f32 %v14002_v47, %v37229_v57  ;;  %v37249_v42 = vand.u32 4294901760, %v14008_v61 }
 0x5d4   : > { %29562 = vmatmul.mubr.f32.gmra.mrb[14].mxu0 %v14242_v5  ;;  %v14005_v5 = vsel %vm223_vm1, %v13916_v9, 0  ;;  %v37242_v9 = vsub.f32 %v13999_v25, %v37224_v30  ;;  %v14321_v25 = vsub.f32 %v37216_v1, %v41607_v33 }
 0x5d5   : > { %29564 = vmatprep.mubr.f32.mxu0 %v14252_v49  ;;  %v14311_v49 = vsub.f32 %v37197_v8, %v41603_v59  ;;  %v37244_v53 = vand.u32 4294901760, %v14005_v5  ;;  %41606 = vst [vmem:[#allocation69_spill] sm:$0xff] %v37249_v42  ;;  %v14011_v59 = vsel %vm223_vm1, %v13918_v37, 0  ;;  %v40272_v19 = vand.u32 4294901760, %v37247_v38 }
 0x5d6   : > { %41604 = vst [vmem:[#allocation26_spill] sm:$0xff] %v37242_v9  ;;  %v40269_v47 = vand.u32 4294901760, %v37242_v9  ;;  %v37263_v37 = vand.u32 4294901760, %v14011_v59  ;;  %v37267_v15 = vsub.f32 %v14008_v61, %v37249_v42 }
 0x5d7   : > { %41605 = vst [vmem:[#allocation44_spill] sm:$0xff] %v37244_v53  ;;  %v14312_v8 = vand.u32 4294901760, %v14311_v49  ;;  %v37261_v63 = vsub.f32 %v14005_v5, %v37244_v53  ;;  %v37269_v49 = vand.u32 4294901760, %v14014_v39  ;;  %v14351_v1 = vsub.f32 %v37247_v38, %v40272_v19 }
 0x5d8   : > { %29565 = vmatmul.mubr.f32.gmra.mrb[16].mxu0 %v14262_v17  ;;  %v13920_v17 = vld [vmem:[#allocation2 + $0x1a1] sm:$0xff]  ;;  %41609 = vst [vmem:[#allocation109_spill] sm:$0xff] %v37263_v37  ;;  %41610 = vst [vmem:[#allocation14_spill] sm:$0xff] %v37267_v15 }
 0x5d9   : > { %29567 = vmatprep.mubr.f32.mxu0 %v14272_v20  ;;  %v41608_v20 = vand.u32 4294901760, %v37222_v32  ;;  %41611 = vst [vmem:[#allocation191_spill] sm:$0xff] %v37269_v49  ;;  %v14017_v33 = vsel %vm223_vm1, %v13920_v17, 0  ;;  %v40273_v5 = vand.u32 4294901760, %v37261_v63  ;;  %v40274_v17 = vand.u32 4294901760, %v37267_v15 }
 0x5da   : > { %v14352_v19 = vand.u32 4294901760, %v14351_v1 }
 0x5db   : > { %v14331_v55 = vsub.f32 %v37222_v32, %v41608_v20  ;;  %v14341_v20 = vsub.f32 %v37242_v9, %v40269_v47  ;;  %v37277_v32 = vsub.f32 %v14011_v59, %v37263_v37 }
 0x5dc   : > { %29568 = vmatmul.mubr.f32.gmra.mrb[18].mxu0 %v14282_v12  ;;  %v14322_v12 = vand.u32 4294901760, %v14321_v25 }
 0x5dd   : > { %29570 = vmatprep.mubr.f32.mxu0 %v14292_v41  ;;  %v37279_v41 = vand.u32 4294901760, %v14017_v33  ;;  %v14332_v61 = vand.u32 4294901760, %v14331_v55  ;;  %v14342_v59 = vand.u32 4294901760, %v14341_v20  ;;  %v40277_v55 = vand.u32 4294901760, %v37277_v32 }
 0x5df   : > { %41612 = vst [vmem:[#allocation24_spill] sm:$0xff] %v37279_v41  ;;  %v37297_v9 = vsub.f32 %v14017_v33, %v37279_v41 }
 0x5e0   : > { %29571 = vmatmul.mubr.f32.gmra.mrb[20].mxu0 %v14302_v7  ;;  %v37286_v7 = vsub.f32 %v14014_v39, %v37269_v49  ;;  %v14371_v39 = vsub.f32 %v37267_v15, %v40274_v17 }
 0x5e1   : > { %29573 = vmatprep.mubr.f32.mxu0 %v14312_v8  ;;  %v14361_v8 = vsub.f32 %v37261_v63, %v40273_v5  ;;  %v14381_v5 = vsub.f32 %v37277_v32, %v40277_v55  ;;  %v40279_v33 = vand.u32 4294901760, %v37297_v9 }
 0x5e2   : > { %v37288_v25 = vpop.f32.mrb[0].mxu1  ;;  %v14372_v1 = vand.u32 4294901760, %v14371_v39 }
 0x5e3   : > { %41613 = vst [vmem:[#allocation162_spill] sm:$0xff] %v37288_v25  ;;  %v37290_v47 = vpop.f32.mrb[1].mxu1  ;;  %v40278_v25 = vand.u32 4294901760, %v37286_v7  ;;  %v14362_v20 = vand.u32 4294901760, %v14361_v8 }
 0x5e4   : > { %41614 = vst [vmem:[#allocation193_spill] sm:$0xff] %v37290_v47  ;;  %29574 = vmatmul.mubr.f32.gmra.mrb[22].mxu0 %v14322_v12 }
 0x5e5   : > { %29576 = vmatprep.mubr.f32.mxu0 %v14332_v61  ;;  %v14391_v61 = vsub.f32 %v37286_v7, %v40278_v25 }
 0x5e6   : > { %v37303_v47 = vpop.f32.mrb[2].mxu1 }
 0x5e7   : > { %41615 = vst [vmem:[#allocation40_spill] sm:$0xff] %v37303_v47  ;;  %v37305_v12 = vpop.f32.mrb[3].mxu1  ;;  %v14392_v8 = vand.u32 4294901760, %v14391_v61  ;;  %v41660_v47 = vld [vmem:[#allocation152_spill] sm:$0xff] }
 0x5e8   : > { %41616 = vst [vmem:[#allocation141_spill] sm:$0xff] %v37305_v12  ;;  %29577 = vmatmul.mubr.f32.gmra.mrb[24].mxu0 %v14342_v59  ;;  %v14382_v12 = vand.u32 4294901760, %v14381_v5  ;;  %v14401_v59 = vsub.f32 %v37297_v9, %v40279_v33 }
 0x5e9   : > { %29579 = vmatprep.mubr.f32.mxu0 %v14352_v19 }
 0x5ea   : > { %v37314_v17 = vpop.f32.mrb[4].mxu1  ;;  %v14402_v39 = vand.u32 4294901760, %v14401_v59 }
 0x5eb   : > { %41617 = vst [vmem:[#allocation145_spill] sm:$0xff] %v37314_v17  ;;  %v37316_v15 = vpop.f32.mrb[5].mxu1 }
 0x5ec   : > { %41618 = vst [vmem:[#allocation65_spill] sm:$0xff] %v37316_v15  ;;  %29580 = vmatmul.mubr.f32.gmra.mrb[26].mxu0 %v14362_v20  ;;  %v41659_v15 = vld [vmem:[#allocation58_spill] sm:$0xff] }
 0x5ed   : > { %29582 = vmatprep.mubr.f32.mxu0 %v14372_v1 }
 0x5ee   : > { %v37321_v55 = vpop.f32.mrb[6].mxu1 }
 0x5ef   : > { %41619 = vst [vmem:[#allocation175_spill] sm:$0xff] %v37321_v55  ;;  %v37323_v19 = vpop.f32.mrb[7].mxu1  ;;  %v41658_v55 = vld [vmem:[#allocation11_spill] sm:$0xff] }
 0x5f0   : > { %41620 = vst [vmem:[#allocation181_spill] sm:$0xff] %v37323_v19  ;;  %29583 = vmatmul.mubr.f32.gmra.mrb[28].mxu0 %v14382_v12  ;;  %v41657_v19 = vld [vmem:[#allocation59_spill] sm:$0xff] }
 0x5f1   : > { %29585 = vmatprep.mubr.f32.mxu0 %v14392_v8 }
 0x5f2   : > { %v37325_v25 = vpop.f32.mrb[8].mxu1 }
 0x5f3   : > { %41621 = vst [vmem:[#allocation184_spill] sm:$0xff] %v37325_v25  ;;  %v37327_v17 = vpop.f32.mrb[9].mxu1  ;;  %v41656_v25 = vld [vmem:[#allocation88_spill] sm:$0xff] }
 0x5f4   : > { %41622 = vst [vmem:[#allocation187_spill] sm:$0xff] %v37327_v17  ;;  %29586 = vmatmul.mubr.f32.gmra.mrb[30].mxu0 %v14402_v39  ;;  %v41655_v17 = vld [vmem:[#allocation194_spill] sm:$0xff] }
 0x5f5   : > { %29590 = vmatprep.mubr.f32.mxu0 %v36978_v43 }
 0x5f6   : > { %v37330_v5 = vpop.f32.mrb[10].mxu1 }
 0x5f7   : > { %41623 = vst [vmem:[#allocation190_spill] sm:$0xff] %v37330_v5  ;;  %v37332_v20 = vpop.f32.mrb[11].mxu1  ;;  %v41654_v5 = vld [vmem:[#allocation116_spill] sm:$0xff] }
 0x5f8   : > { %41624 = vst [vmem:[#allocation192_spill] sm:$0xff] %v37332_v20  ;;  %29591 = vmatmul.mubr.f32.vlgmr.msra.gmra.mrb[0].mxu0 %v36983_v29  ;;  %v41653_v20 = vld [vmem:[#allocation76_spill] sm:$0xff] }
 0x5f9   : > { %29639 = vmatpush3.msra.mxu0 %v36939_v6  ;;  %29593 = vmatprep.mubr.f32.mxu0 %v36989_v2 }
 0x5fa   : > { %v37337_v12 = vpop.f32.mrb[12].mxu1  ;;  %29688 = vmatprep.subr.mxu0 %v36889_v23 }
 0x5fb   : > { %41625 = vst [vmem:[#allocation56_spill] sm:$0xff] %v37337_v12  ;;  %v37340_v1 = vpop.f32.mrb[13].mxu1  ;;  %v41652_v12 = vld [vmem:[#allocation186_spill] sm:$0xff] }
 0x5fc   : > { %41626 = vst [vmem:[#allocation27_spill] sm:$0xff] %v37340_v1  ;;  %29594 = vmatmul.mubr.f32.gmra.mrb[2].mxu0 %v36997_v16  ;;  %v41651_v1 = vld [vmem:[#allocation110_spill] sm:$0xff] }
 0x5fd   : > { %29596 = vmatprep.mubr.f32.mxu0 %v37004_v21 }
 0x5fe   : > { %v37344_v61 = vpop.f32.mrb[14].mxu1 }
 0x5ff   : > { %41627 = vst [vmem:[#allocation53_spill] sm:$0xff] %v37344_v61  ;;  %v37346_v59 = vpop.f32.mrb[15].mxu1 }
 0x600   : > { %41628 = vst [vmem:[#allocation72_spill] sm:$0xff] %v37346_v59  ;;  %29597 = vmatmul.mubr.f32.gmra.mrb[4].mxu0 %v37013_v45 }
 0x601   : > { %29599 = vmatprep.mubr.f32.mxu0 %v37025_v46 }
 0x602   : > { %v37350_v6 = vpop.f32.mrb[16].mxu1 }
 0x603   : > { %41629 = vst [vmem:[#allocation139_spill] sm:$0xff] %v37350_v6  ;;  %v37352_v8 = vpop.f32.mrb[17].mxu1 }
 0x604   : > { %41630 = vst [vmem:[#allocation142_spill] sm:$0xff] %v37352_v8  ;;  %29600 = vmatmul.mubr.f32.gmra.mrb[6].mxu0 %v37032_v18 }
 0x605   : > { %29602 = vmatprep.mubr.f32.mxu0 %v37046_v31 }
 0x606   : > { %v37356_v39 = vpop.f32.mrb[18].mxu1 }
 0x607   : > { %41631 = vst [vmem:[#allocation118_spill] sm:$0xff] %v37356_v39  ;;  %v37358_v33 = vpop.f32.mrb[19].mxu1 }
 0x608   : > { %41632 = vst [vmem:[#allocation146_spill] sm:$0xff] %v37358_v33  ;;  %29603 = vmatmul.mubr.f32.gmra.mrb[8].mxu0 %v37058_v11 }
 0x609   : > { %29605 = vmatprep.mubr.f32.mxu0 %v37060_v34 }
 0x60a   : > { %v37362_v59 = vpop.f32.mrb[20].mxu1 }
 0x60b   : > { %41633 = vst [vmem:[#allocation149_spill] sm:$0xff] %v37362_v59  ;;  %v37364_v61 = vpop.f32.mrb[21].mxu1 }
 0x60c   : > { %41634 = vst [vmem:[#allocation153_spill] sm:$0xff] %v37364_v61  ;;  %29606 = vmatmul.mubr.f32.gmra.mrb[10].mxu0 %v37075_v27 }
 0x60d   : > { %29608 = vmatprep.mubr.f32.mxu0 %v37090_v14 }
 0x60e   : > { %v37368_v8 = vpop.f32.mrb[22].mxu1 }
 0x60f   : > { %41635 = vst [vmem:[#allocation23_spill] sm:$0xff] %v37368_v8  ;;  %v37370_v6 = vpop.f32.mrb[23].mxu1 }
 0x610   : > { %41636 = vst [vmem:[#allocation92_spill] sm:$0xff] %v37370_v6  ;;  %29609 = vmatmul.mubr.f32.gmra.mrb[12].mxu0 %v37096_v52 }
 0x611   : > { %29611 = vmatprep.mubr.f32.mxu0 %v37098_v58 }
 0x614   : > { %29612 = vmatmul.mubr.f32.gmra.mrb[14].mxu0 %v37120_v56 }
 0x615   : > { %29614 = vmatprep.mubr.f32.mxu0 %v37129_v28 }
 0x618   : > { %29615 = vmatmul.mubr.f32.gmra.mrb[16].mxu0 %v37141_v51 }
 0x619   : > { %29617 = vmatprep.mubr.f32.mxu0 %v37149_v36 }
 0x61c   : > { %29618 = vmatmul.mubr.f32.gmra.mrb[18].mxu0 %v37163_v40 }
 0x61d   : > { %29620 = vmatprep.mubr.f32.mxu0 %v37171_v0 }
 0x620   : > { %29621 = vmatmul.mubr.f32.gmra.mrb[20].mxu0 %v37176_v10 }
 0x621   : > { %29623 = vmatprep.mubr.f32.mxu0 %v37178_v13 }
 0x622   : > { %v37382_v6 = vpop.f32.mrb[24].mxu1 }
 0x623   : > { %41637 = vst [vmem:[#allocation160_spill] sm:$0xff] %v37382_v6  ;;  %v37384_v8 = vpop.f32.mrb[25].mxu1 }
 0x624   : > { %41638 = vst [vmem:[#allocation161_spill] sm:$0xff] %v37384_v8  ;;  %29624 = vmatmul.mubr.f32.gmra.mrb[22].mxu0 %v37199_v44 }
 0x625   : > { %29626 = vmatprep.mubr.f32.mxu0 %v37205_v26  ;;  %v41668_v26 = vand.u32 4294901760, %v37030_v24 }
 0x626   : > { %v37388_v61 = vpop.f32.mrb[26].mxu1 }
 0x627   : > { %41639 = vst [vmem:[#allocation137_spill] sm:$0xff] %v37388_v61  ;;  %v37390_v59 = vpop.f32.mrb[27].mxu1  ;;  %v41650_v61 = vld [vmem:[#allocation183_spill] sm:$0xff] }
 0x628   : > { %41640 = vst [vmem:[#allocation157_spill] sm:$0xff] %v37390_v59  ;;  %29627 = vmatmul.mubr.f32.gmra.mrb[24].mxu0 %v37224_v30  ;;  %v41649_v59 = vld [vmem:[#allocation105_spill] sm:$0xff]  ;;  %v41667_v30 = vand.u32 4294901760, %v37021_v62 }
 0x629   : > { %29629 = vmatprep.mubr.f32.mxu0 %v37229_v57  ;;  %v41666_v57 = vand.u32 4294901760, %v37011_v35 }
 0x62a   : > { %v37394_v33 = vpop.f32.mrb[28].mxu1 }
 0x62b   : > { %41641 = vst [vmem:[#allocation74_spill] sm:$0xff] %v37394_v33  ;;  %v37396_v39 = vpop.f32.mrb[29].mxu1  ;;  %v41648_v33 = vld [vmem:[#allocation178_spill] sm:$0xff] }
 0x62c   : > { %41642 = vst [vmem:[#allocation173_spill] sm:$0xff] %v37396_v39  ;;  %29630 = vmatmul.mubr.f32.gmra.mrb[26].mxu0 %v37244_v53  ;;  %v41647_v39 = vld [vmem:[#allocation90_spill] sm:$0xff]  ;;  %v41665_v53 = vand.u32 4294901760, %v37002_v60 }
 0x62d   : > { %29632 = vmatprep.mubr.f32.mxu0 %v37249_v42  ;;  %v41664_v42 = vand.u32 4294901760, %v36995_v4 }
 0x62e   : > { %v37400_v8 = vpop.f32.mrb[30].mxu1 }
 0x62f   : > { %41643 = vst [vmem:[#allocation82_spill] sm:$0xff] %v37400_v8  ;;  %v37402_v6 = vpop.f32.mrb[31].mxu1  ;;  %v41646_v8 = vld [vmem:[#allocation196_spill] sm:$0xff] }
 0x630   : > { %41644 = vst [vmem:[#allocation174_spill] sm:$0xff] %v37402_v6  ;;  %29633 = vmatmul.mubr.f32.gmra.mrb[28].mxu0 %v37263_v37  ;;  %v41645_v6 = vld [vmem:[#allocation172_spill] sm:$0xff]  ;;  %v41663_v37 = vand.u32 4294901760, %v36987_v54 }
 0x631   : > { %29635 = vmatprep.mubr.f32.mxu0 %v37269_v49  ;;  %v41662_v49 = vld [vmem:[#allocation14_spill] sm:$0xff] }
 0x634   : > { %29636 = vmatmul.mubr.f32.gmra.mrb[30].mxu0 %v37279_v41  ;;  %v41661_v41 = vld [vmem:[#allocation26_spill] sm:$0xff] }
 0x635   : > { %29640 = vmatprep.mubr.f32.mxu0 %v36987_v54  ;;  %v41669_v54 = vand.u32 4294901760, %v37044_v50 }
 0x638   : > { %29641 = vmatmul.mubr.f32.vlgmr.msra.gmra.mrb[0].mxu0 %v36995_v4  ;;  %v41670_v4 = vand.u32 4294901760, %v37055_v22 }
 0x639   : > { %29689 = vmatpush3.msra.mxu0 %v36889_v23  ;;  %29643 = vmatprep.mubr.f32.mxu0 %v37002_v60  ;;  %v41672_v60 = vand.u32 4294901760, %v41645_v6 }
 0x63a   : > { %29738 = vmatprep.subr.mxu0 %v36944_v48 }
 0x63c   : > { %29644 = vmatmul.mubr.f32.gmra.mrb[2].mxu0 %v37011_v35  ;;  %v41673_v35 = vand.u32 4294901760, %v41646_v8 }
 0x63d   : > { %29646 = vmatprep.mubr.f32.mxu0 %v37021_v62  ;;  %v41674_v62 = vand.u32 4294901760, %v41647_v39 }
 0x640   : > { %29647 = vmatmul.mubr.f32.gmra.mrb[4].mxu0 %v37030_v24  ;;  %v41675_v24 = vand.u32 4294901760, %v41648_v33 }
 0x641   : > { %29649 = vmatprep.mubr.f32.mxu0 %v37044_v50  ;;  %v41676_v50 = vand.u32 4294901760, %v41649_v59 }
 0x644   : > { %29650 = vmatmul.mubr.f32.gmra.mrb[6].mxu0 %v37055_v22  ;;  %v41677_v22 = vand.u32 4294901760, %v41650_v61 }
 0x645   : > { %29652 = vmatprep.mubr.f32.mxu0 %v37068_v3 }
 0x648   : > { %29653 = vmatmul.mubr.f32.gmra.mrb[8].mxu0 %v41645_v6  ;;  %v41701_v6 = vld [vmem:[#allocation191_spill] sm:$0xff] }
 0x649   : > { %29655 = vmatprep.mubr.f32.mxu0 %v41646_v8 }
 0x64c   : > { %29656 = vmatmul.mubr.f32.gmra.mrb[10].mxu0 %v41647_v39  ;;  %v41702_v39 = vld [vmem:[#allocation24_spill] sm:$0xff] }
 0x64d   : > { %29658 = vmatprep.mubr.f32.mxu0 %v41648_v33  ;;  %v41685_v33 = vand.u32 4294901760, %v41658_v55 }
 0x650   : > { %29659 = vmatmul.mubr.f32.gmra.mrb[12].mxu0 %v41649_v59  ;;  %v41700_v59 = vld [vmem:[#allocation109_spill] sm:$0xff] }
 0x651   : > { %29661 = vmatprep.mubr.f32.mxu0 %v41650_v61 }
 0x654   : > { %29662 = vmatmul.mubr.f32.gmra.mrb[14].mxu0 %v41651_v1 }
 0x655   : > { %29664 = vmatprep.mubr.f32.mxu0 %v41652_v12 }
 0x658   : > { %29665 = vmatmul.mubr.f32.gmra.mrb[16].mxu0 %v41653_v20 }
 0x659   : > { %29667 = vmatprep.mubr.f32.mxu0 %v41654_v5 }
 0x65c   : > { %29668 = vmatmul.mubr.f32.gmra.mrb[18].mxu0 %v41655_v17 }
 0x65d   : > { %29670 = vmatprep.mubr.f32.mxu0 %v41656_v25 }
 0x660   : > { %29671 = vmatmul.mubr.f32.gmra.mrb[20].mxu0 %v41657_v19 }
 0x661   : > { %29673 = vmatprep.mubr.f32.mxu0 %v41658_v55  ;;  %v41692_v55 = vand.u32 4294901760, %v37277_v32 }
 0x664   : > { %29674 = vmatmul.mubr.f32.gmra.mrb[22].mxu0 %v41659_v15 }
 0x665   : > { %29676 = vmatprep.mubr.f32.mxu0 %v41660_v47 }
 0x668   : > { %29677 = vmatmul.mubr.f32.gmra.mrb[24].mxu0 %v41661_v41 }
 0x669   : > { %29679 = vmatprep.mubr.f32.mxu0 %v37247_v38 }
 0x66c   : > { %29680 = vmatmul.mubr.f32.gmra.mrb[26].mxu0 %v37261_v63 }
 0x66d   : > { %29682 = vmatprep.mubr.f32.mxu0 %v41662_v49 }
 0x670   : > { %29683 = vmatmul.mubr.f32.gmra.mrb[28].mxu0 %v37277_v32  ;;  %v41696_v32 = vld [vmem:[#allocation33_spill] sm:$0xff] }
 0x671   : > { %29685 = vmatprep.mubr.f32.mxu0 %v37286_v7 }
 0x674   : > { %29686 = vmatmul.mubr.f32.gmra.mrb[30].mxu0 %v37297_v9 }
 0x675   : > { %29690 = vmatprep.mubr.f32.mxu0 %v41663_v37  ;;  %v41684_v37 = vand.u32 4294901760, %v41657_v19  ;;  %v41691_v19 = vand.u32 4294901760, %v41662_v49 }
 0x678   : > { %29691 = vmatmul.mubr.f32.vlgmr.msra.gmra.mrb[0].mxu0 %v41664_v42  ;;  %v41680_v42 = vand.u32 4294901760, %v41653_v20  ;;  %v41687_v20 = vand.u32 4294901760, %v41660_v47  ;;  %v25152_v47 = vld [vmem:[%s39344_s1 + $0x20] sm:$0xf] }
 0x679   : > { %29739 = vmatpush3.msra.mxu0 %v36944_v48  ;;  %29693 = vmatprep.mubr.f32.mxu0 %v41665_v53  ;;  %v41671_v48 = vand.u32 4294901760, %v37068_v3  ;;  %v41678_v3 = vand.u32 4294901760, %v41651_v1  ;;  %v41683_v53 = vand.u32 4294901760, %v41656_v25  ;;  %v41690_v25 = vand.u32 4294901760, %v37261_v63  ;;  %v41699_v1 = vld [vmem:[#allocation69_spill] sm:$0xff] }
 0x67a   : > { %29788 = vmatprep.subr.mxu0 %v36889_v23 }
 0x67c   : > { %29694 = vmatmul.mubr.f32.gmra.mrb[2].mxu0 %v41666_v57  ;;  %v41682_v57 = vand.u32 4294901760, %v41655_v17  ;;  %v41689_v17 = vand.u32 4294901760, %v37247_v38  ;;  %v41694_v38 = vand.u32 4294901760, %v37297_v9  ;;  %v41697_v9 = vld [vmem:[#allocation158_spill] sm:$0xff] }
 0x67d   : > { %29696 = vmatprep.mubr.f32.mxu0 %v41667_v30  ;;  %v41681_v30 = vand.u32 4294901760, %v41654_v5  ;;  %v41688_v5 = vand.u32 4294901760, %v41661_v41  ;;  %v15964_v41 = vsel %vm507_vm0, %v25152_v47, 0  ;;  %v15844_v47 = vld [vmem:[#allocation2 + $0xb2] sm:$0xff] }
 0x67e   : > { %v37512_v63 = vand.u32 4294901760, %v15964_v41 }
 0x680   : > { %29697 = vmatmul.mubr.f32.gmra.mrb[4].mxu0 %v41668_v26  ;;  %v41679_v26 = vand.u32 4294901760, %v41652_v12  ;;  %v41686_v12 = vand.u32 4294901760, %v41659_v15  ;;  %v41693_v15 = vand.u32 4294901760, %v37286_v7  ;;  %v37543_v49 = vsub.f32 %v15964_v41, %v37512_v63  ;;  %v41698_v7 = vld [vmem:[#allocation44_spill] sm:$0xff] }
 0x681   : > { %29699 = vmatprep.mubr.f32.mxu0 %v41669_v54 }
 0x682   : > { %v37548_v61 = vand.u32 4294901760, %v37543_v49 }
 0x684   : > { %29700 = vmatmul.mubr.f32.gmra.mrb[6].mxu0 %v41670_v4  ;;  %v16356_v8 = vsub.f32 %v37543_v49, %v37548_v61 }
 0x685   : > { %29702 = vmatprep.mubr.f32.mxu0 %v41671_v48 }
 0x686   : > { %v37556_v54 = vand.u32 4294901760, %v16356_v8 }
 0x688   : > { %29703 = vmatmul.mubr.f32.gmra.mrb[8].mxu0 %v41672_v60 }
 0x689   : > { %29705 = vmatprep.mubr.f32.mxu0 %v41673_v35  ;;  %v15841_v35 = vld [vmem:[#allocation2 + $0x92] sm:$0xff] }
 0x68c   : > { %29706 = vmatmul.mubr.f32.gmra.mrb[10].mxu0 %v41674_v62 }
 0x68d   : > { %29708 = vmatprep.mubr.f32.mxu0 %v41675_v24 }
 0x690   : > { %29709 = vmatmul.mubr.f32.gmra.mrb[12].mxu0 %v41676_v50 }
 0x691   : > { %29711 = vmatprep.mubr.f32.mxu0 %v41677_v22 }
 0x694   : > { %29712 = vmatmul.mubr.f32.gmra.mrb[14].mxu0 %v41678_v3 }
 0x695   : > { %29714 = vmatprep.mubr.f32.mxu0 %v41679_v26  ;;  %v15892_v26 = vsel %vm223_vm1, %v15841_v35, 0  ;;  %v15848_v35 = vld [vmem:[#allocation2 + $0xe2] sm:$0xff] }
 0x698   : > { %29715 = vmatmul.mubr.f32.gmra.mrb[16].mxu0 %v41680_v42  ;;  %v15842_v42 = vld [vmem:[#allocation2 + $0x9a] sm:$0xff] }
 0x699   : > { %29717 = vmatprep.mubr.f32.mxu0 %v41681_v30  ;;  %v15843_v30 = vld [vmem:[#allocation2 + $0xaa] sm:$0xff] }
 0x69c   : > { %29718 = vmatmul.mubr.f32.gmra.mrb[18].mxu0 %v41682_v57 }
 0x69d   : > { %29720 = vmatprep.mubr.f32.mxu0 %v41683_v53 }
 0x6a0   : > { %29721 = vmatmul.mubr.f32.gmra.mrb[20].mxu0 %v41684_v37 }
 0x6a1   : > { %29723 = vmatprep.mubr.f32.mxu0 %v41685_v33 }
 0x6a4   : > { %29724 = vmatmul.mubr.f32.gmra.mrb[22].mxu0 %v41686_v12 }
 0x6a5   : > { %29726 = vmatprep.mubr.f32.mxu0 %v41687_v20 }
 0x6a8   : > { %29727 = vmatmul.mubr.f32.gmra.mrb[24].mxu0 %v41688_v5 }
 0x6a9   : > { %29729 = vmatprep.mubr.f32.mxu0 %v41689_v17 }
 0x6ac   : > { %29730 = vmatmul.mubr.f32.gmra.mrb[26].mxu0 %v41690_v25  ;;  %v37650_v25 = vand.u32 4294901760, %v15892_v26 }
 0x6ad   : > { %29732 = vmatprep.mubr.f32.mxu0 %v41691_v19  ;;  %v15895_v19 = vsel %vm223_vm1, %v15842_v42, 0  ;;  %v15849_v42 = vld [vmem:[#allocation2 + $0xf2] sm:$0xff] }
 0x6b0   : > { %29733 = vmatmul.mubr.f32.gmra.mrb[28].mxu0 %v41692_v55  ;;  %v15898_v55 = vsel %vm223_vm1, %v15843_v30, 0 }
 0x6b1   : > { %29735 = vmatprep.mubr.f32.mxu0 %v41693_v15 }
 0x6b4   : > { %29736 = vmatmul.mubr.f32.gmra.mrb[30].mxu0 %v41694_v38 }
 0x6b5   : > { %29740 = vmatprep.mubr.f32.mxu0 %v36978_v43 }
 0x6b8   : > { %29741 = vmatmul.mubr.f32.vlgmr.msra.gmra.mrb[0].mxu0 %v36983_v29 }
 0x6b9   : > { %29789 = vmatpush3.msra.mxu0 %v36889_v23  ;;  %29743 = vmatprep.mubr.f32.mxu0 %v36989_v2  ;;  %v41695_v23 = vld [vmem:[#allocation197_spill] sm:$0xff] }
 0x6ba   : > { %29838 = vmatprep.subr.mxu0 %v37512_v63 }
 0x6bc   : > { %29744 = vmatmul.mubr.f32.gmra.mrb[2].mxu0 %v36997_v16 }
 0x6bd   : > { %29746 = vmatprep.mubr.f32.mxu0 %v37004_v21 }
 0x6c0   : > { %29747 = vmatmul.mubr.f32.gmra.mrb[4].mxu0 %v37013_v45 }
 0x6c1   : > { %29749 = vmatprep.mubr.f32.mxu0 %v37025_v46 }
 0x6c4   : > { %29750 = vmatmul.mubr.f32.gmra.mrb[6].mxu0 %v37032_v18 }
 0x6c5   : > { %29752 = vmatprep.mubr.f32.mxu0 %v37046_v31 }
 0x6c8   : > { %29753 = vmatmul.mubr.f32.gmra.mrb[8].mxu0 %v37058_v11 }
 0x6c9   : > { %29755 = vmatprep.mubr.f32.mxu0 %v37060_v34 }
 0x6cc   : > { %29756 = vmatmul.mubr.f32.gmra.mrb[10].mxu0 %v37075_v27 }
 0x6cd   : > { %29758 = vmatprep.mubr.f32.mxu0 %v37090_v14 }
 0x6d0   : > { %29759 = vmatmul.mubr.f32.gmra.mrb[12].mxu0 %v37096_v52 }
 0x6d1   : > { %29761 = vmatprep.mubr.f32.mxu0 %v37098_v58 }
 0x6d4   : > { %29762 = vmatmul.mubr.f32.gmra.mrb[14].mxu0 %v37120_v56 }
 0x6d5   : > { %29764 = vmatprep.mubr.f32.mxu0 %v37129_v28 }
 0x6d8   : > { %29765 = vmatmul.mubr.f32.gmra.mrb[16].mxu0 %v37141_v51 }
 0x6d9   : > { %29767 = vmatprep.mubr.f32.mxu0 %v37149_v36 }
 0x6dc   : > { %29768 = vmatmul.mubr.f32.gmra.mrb[18].mxu0 %v37163_v40 }
 0x6dd   : > { %29770 = vmatprep.mubr.f32.mxu0 %v37171_v0 }
 0x6e0   : > { %29771 = vmatmul.mubr.f32.gmra.mrb[20].mxu0 %v37176_v10 }
 0x6e1   : > { %29773 = vmatprep.mubr.f32.mxu0 %v37178_v13 }
 0x6e4   : > { %29774 = vmatmul.mubr.f32.gmra.mrb[22].mxu0 %v37199_v44 }
 0x6e5   : > { %29776 = vmatprep.mubr.f32.mxu0 %v41695_v23 }
 0x6e8   : > { %29777 = vmatmul.mubr.f32.gmra.mrb[24].mxu0 %v41696_v32 }
 0x6e9   : > { %29779 = vmatprep.mubr.f32.mxu0 %v41697_v9 }
 0x6ec   : > { %29780 = vmatmul.mubr.f32.gmra.mrb[26].mxu0 %v41698_v7 }
 0x6ed   : > { %29782 = vmatprep.mubr.f32.mxu0 %v41699_v1 }
 0x6f0   : > { %29783 = vmatmul.mubr.f32.gmra.mrb[28].mxu0 %v41700_v59 }
 0x6f1   : > { %29785 = vmatprep.mubr.f32.mxu0 %v41701_v6 }
 0x6f4   : > { %29786 = vmatmul.mubr.f32.gmra.mrb[30].mxu0 %v41702_v39 }
 0x6f5   : > { %29790 = vmatprep.mubr.f32.mxu0 %v36978_v43  ;;  %v15833_v43 = vld [vmem:[#allocation2 + $0x32] sm:$0xff] }
 0x6f8   : > { %29791 = vmatmul.mubr.f32.vlgmr.msra.gmra.mrb[0].mxu0 %v36983_v29  ;;  %v15868_v29 = vsel %vm223_vm1, %v15833_v43, 0  ;;  %v37672_v43 = vsub.f32 %v15892_v26, %v37650_v25 }
 0x6f9   : > { %29839 = vmatpush3.msra.mxu0 %v37512_v63  ;;  %29793 = vmatprep.mubr.f32.mxu0 %v36989_v2  ;;  %v15834_v2 = vld [vmem:[#allocation2 + $0x3a] sm:$0xff] }
 0x6fa   : > { %29888 = vmatprep.subr.mxu0 %v37556_v54 }
 0x6fc   : > { %29794 = vmatmul.mubr.f32.gmra.mrb[2].mxu0 %v36997_v16  ;;  %v15835_v16 = vld [vmem:[#allocation2 + $0x4a] sm:$0xff] }
 0x6fd   : > { %29796 = vmatprep.mubr.f32.mxu0 %v37004_v21  ;;  %v37582_v21 = vand.u32 4294901760, %v15868_v29 }
 0x700   : > { %29797 = vmatmul.mubr.f32.gmra.mrb[4].mxu0 %v37013_v45  ;;  %v15871_v45 = vsel %vm223_vm1, %v15834_v2, 0 }
 0x701   : > { %29799 = vmatprep.mubr.f32.mxu0 %v37025_v46  ;;  %v15874_v46 = vsel %vm223_vm1, %v15835_v16, 0 }
 0x704   : > { %29800 = vmatmul.mubr.f32.gmra.mrb[6].mxu0 %v37032_v18  ;;  %v15836_v18 = vld [vmem:[#allocation2 + $0x52] sm:$0xff] }
 0x705   : > { %29802 = vmatprep.mubr.f32.mxu0 %v37046_v31  ;;  %v15837_v31 = vld [vmem:[#allocation2 + $0x62] sm:$0xff] }
 0x708   : > { %29803 = vmatmul.mubr.f32.gmra.mrb[8].mxu0 %v37058_v11  ;;  %v37587_v11 = vand.u32 4294901760, %v15871_v45 }
 0x709   : > { %29805 = vmatprep.mubr.f32.mxu0 %v37060_v34  ;;  %v37591_v34 = vsub.f32 %v15868_v29, %v37582_v21  ;;  %v15846_v29 = vld [vmem:[#allocation2 + $0xca] sm:$0xff] }
 0x70c   : > { %29806 = vmatmul.mubr.f32.gmra.mrb[10].mxu0 %v37075_v27  ;;  %v37593_v27 = vand.u32 4294901760, %v15874_v46 }
 0x70d   : > { %29808 = vmatprep.mubr.f32.mxu0 %v37090_v14  ;;  %v15838_v14 = vld [vmem:[#allocation2 + $0x6a] sm:$0xff] }
 0x710   : > { %29809 = vmatmul.mubr.f32.gmra.mrb[12].mxu0 %v37096_v52  ;;  %v37599_v52 = vsub.f32 %v15871_v45, %v37587_v11 }
 0x711   : > { %29811 = vmatprep.mubr.f32.mxu0 %v37098_v58 }
 0x712   : > { %v40309_v4 = vand.u32 4294901760, %v37599_v52 }
 0x714   : > { %29812 = vmatmul.mubr.f32.gmra.mrb[14].mxu0 %v37120_v56  ;;  %v40311_v56 = vand.u32 4294901760, %v37591_v34  ;;  %v16045_v12 = vsub.f32 %v37599_v52, %v40309_v4 }
 0x715   : > { %29814 = vmatprep.mubr.f32.mxu0 %v37129_v28  ;;  %v37606_v28 = vsub.f32 %v15874_v46, %v37593_v27 }
 0x716   : > { %v16035_v62 = vsub.f32 %v37591_v34, %v40311_v56 }
 0x717   : > { %v40308_v24 = vand.u32 4294901760, %v37606_v28 }
 0x718   : > { %29815 = vmatmul.mubr.f32.gmra.mrb[16].mxu0 %v37141_v51  ;;  %v15880_v51 = vsel %vm223_vm1, %v15837_v31, 0  ;;  %v16036_v33 = vand.u32 4294901760, %v16035_v62 }
 0x719   : > { %29817 = vmatprep.mubr.f32.mxu0 %v37149_v36  ;;  %v15839_v36 = vld [vmem:[#allocation2 + $0x7a] sm:$0xff]  ;;  %v16055_v20 = vsub.f32 %v37606_v28, %v40308_v24 }
 0x71c   : > { %29818 = vmatmul.mubr.f32.gmra.mrb[18].mxu0 %v37163_v40  ;;  %v15883_v40 = vsel %vm223_vm1, %v15838_v14, 0 }
 0x71d   : > { %29820 = vmatprep.mubr.f32.mxu0 %v37171_v0  ;;  %v37608_v0 = vand.u32 4294901760, %v15880_v51  ;;  %v37617_v60 = vand.u32 4294901760, %v15883_v40 }
 0x71f   : > { %v37625_v50 = vsub.f32 %v15880_v51, %v37608_v0  ;;  %v37634_v53 = vsub.f32 %v15883_v40, %v37617_v60  ;;  %v15907_v51 = vsel %vm223_vm1, %v15846_v29, 0  ;;  %v15851_v29 = vld [vmem:[#allocation2 + $0x10a] sm:$0xff] }
 0x720   : > { %29821 = vmatmul.mubr.f32.gmra.mrb[20].mxu0 %v37176_v10  ;;  %v15877_v10 = vsel %vm223_vm1, %v15836_v18, 0  ;;  %v37700_v26 = vand.u32 4294901760, %v15907_v51 }
 0x721   : > { %29823 = vmatprep.mubr.f32.mxu0 %v37178_v13  ;;  %v37601_v58 = vand.u32 4294901760, %v15877_v10  ;;  %v15840_v13 = vld [vmem:[#allocation2 + $0x82] sm:$0xff]  ;;  %v40305_v5 = vand.u32 4294901760, %v37625_v50  ;;  %v40303_v41 = vand.u32 4294901760, %v37634_v53 }
 0x722   : > { %v15889_v22 = vsel %vm223_vm1, %v15840_v13, 0  ;;  %v40298_v13 = vand.u32 4294901760, %v37672_v43 }
 0x723   : > { %v37615_v48 = vsub.f32 %v15877_v10, %v37601_v58  ;;  %v37636_v37 = vand.u32 4294901760, %v15889_v22  ;;  %v16085_v45 = vsub.f32 %v37634_v53, %v40303_v41 }
 0x724   : > { %29824 = vmatmul.mubr.f32.gmra.mrb[22].mxu0 %v37199_v44  ;;  %v15886_v44 = vsel %vm223_vm1, %v15839_v36, 0 }
 0x725   : > { %29826 = vmatprep.mubr.f32.mxu0 %v41695_v23  ;;  %v37629_v3 = vand.u32 4294901760, %v15886_v44  ;;  %v40307_v57 = vand.u32 4294901760, %v37615_v48  ;;  %v37659_v38 = vsub.f32 %v15889_v22, %v37636_v37  ;;  %v15845_v23 = vld [vmem:[#allocation2 + $0xc2] sm:$0xff]  ;;  %v16086_v62 = vand.u32 4294901760, %v16085_v45 }
 0x726   : > { %v15904_v2 = vsel %vm223_vm1, %v15845_v23, 0  ;;  %v15850_v23 = vld [vmem:[#allocation2 + $0xfa] sm:$0xff] }
 0x727   : > { %v37648_v17 = vsub.f32 %v15886_v44, %v37629_v3  ;;  %v16065_v15 = vsub.f32 %v37615_v48, %v40307_v57  ;;  %v40300_v46 = vand.u32 4294901760, %v37659_v38  ;;  %v37694_v44 = vand.u32 4294901760, %v15904_v2  ;;  %v15856_v57 = vld [vmem:[#allocation2 + $0x142] sm:$0xff] }
 0x728   : > { %29827 = vmatmul.mubr.f32.gmra.mrb[24].mxu0 %v41696_v32  ;;  %v16046_v32 = vand.u32 4294901760, %v16045_v12 }
 0x729   : > { %29829 = vmatprep.mubr.f32.mxu0 %v41697_v9  ;;  %v37662_v9 = vand.u32 4294901760, %v15895_v19  ;;  %v40301_v8 = vand.u32 4294901760, %v37648_v17  ;;  %v16066_v16 = vand.u32 4294901760, %v16065_v15  ;;  %v16105_v30 = vsub.f32 %v37659_v38, %v40300_v46 }
 0x72a   : > { %v15916_v15 = vsel %vm223_vm1, %v15849_v42, 0 }
 0x72b   : > { %v37682_v31 = vsub.f32 %v15895_v19, %v37662_v9  ;;  %v16095_v40 = vsub.f32 %v37648_v17, %v40301_v8  ;;  %v15855_v8 = vld [vmem:[#allocation2 + $0x13a] sm:$0xff] }
 0x72c   : > { %29830 = vmatmul.mubr.f32.gmra.mrb[26].mxu0 %v41698_v7  ;;  %v37664_v7 = vand.u32 4294901760, %v15898_v55 }
 0x72d   : > { %29832 = vmatprep.mubr.f32.mxu0 %v41699_v1  ;;  %v15901_v1 = vsel %vm223_vm1, %v15844_v47, 0  ;;  %41703 = vst [vmem:[#allocation99_spill] sm:$0xff] %v37682_v31  ;;  %v16096_v19 = vand.u32 4294901760, %v16095_v40  ;;  %v37714_v47 = vsub.f32 %v15904_v2, %v37694_v44  ;;  %v15922_v40 = vsel %vm223_vm1, %v15851_v29, 0 }
 0x72e   : > { %v37679_v18 = vand.u32 4294901760, %v15901_v1  ;;  %v37685_v10 = vsub.f32 %v15898_v55, %v37664_v7  ;;  %v16115_v55 = vsub.f32 %v37672_v43, %v40298_v13 }
 0x72f   : > { %41706 = vst [vmem:[#allocation189_spill] sm:$0xff] %v37714_v47 }
 0x730   : > { %29833 = vmatmul.mubr.f32.gmra.mrb[28].mxu0 %v41700_v59  ;;  %v16056_v59 = vand.u32 4294901760, %v16055_v20  ;;  %41704 = vst [vmem:[#allocation180_spill] sm:$0xff] %v37685_v10  ;;  %v37698_v22 = vsub.f32 %v15901_v1, %v37679_v18  ;;  %v40296_v12 = vand.u32 4294901760, %v37685_v10  ;;  %v15913_v20 = vsel %vm223_vm1, %v15848_v35, 0  ;;  %v15852_v35 = vld [vmem:[#allocation2 + $0x112] sm:$0xff] }
 0x731   : > { %29835 = vmatprep.mubr.f32.mxu0 %v41701_v6  ;;  %v16075_v6 = vsub.f32 %v37625_v50, %v40305_v5  ;;  %v37719_v1 = vsub.f32 %v15907_v51, %v37700_v26  ;;  %v16116_v45 = vand.u32 4294901760, %v16115_v55  ;;  %v40302_v51 = vand.u32 4294901760, %v37714_v47  ;;  %v15853_v55 = vld [vmem:[#allocation2 + $0x122] sm:$0xff] }
 0x732   : > { %41705 = vst [vmem:[#allocation113_spill] sm:$0xff] %v37698_v22  ;;  %v15925_v46 = vsel %vm223_vm1, %v15852_v35, 0 }
 0x733   : > { %v16076_v36 = vand.u32 4294901760, %v16075_v6  ;;  %41707 = vst [vmem:[#allocation117_spill] sm:$0xff] %v37719_v1  ;;  %v37724_v6 = vand.u32 4294901760, %v15913_v20  ;;  %v40304_v42 = vand.u32 4294901760, %v37719_v1  ;;  %v37767_v35 = vand.u32 4294901760, %v15925_v46 }
 0x734   : > { %29836 = vmatmul.mubr.f32.gmra.mrb[30].mxu0 %v41702_v39  ;;  %v15847_v39 = vld [vmem:[#allocation2 + $0xda] sm:$0xff] }
 0x735   : > { %29840 = vmatprep.mubr.f32.mxu0 %v16036_v33  ;;  %v15910_v14 = vsel %vm223_vm1, %v15847_v39, 0  ;;  %v40297_v33 = vand.u32 4294901760, %v37682_v31  ;;  %v16106_v39 = vand.u32 4294901760, %v16105_v30 }
 0x737   : > { %v16125_v2 = vsub.f32 %v37682_v31, %v40297_v33 }
 0x738   : > { %29841 = vmatmul.mubr.f32.vlgmr.msra.gmra.mrb[0].mxu0 %v16046_v32  ;;  %v40299_v32 = vand.u32 4294901760, %v37698_v22 }
 0x739   : > { %29889 = vmatpush3.msra.mxu0 %v37556_v54  ;;  %29843 = vmatprep.mubr.f32.mxu0 %v16056_v59  ;;  %v37702_v54 = vand.u32 4294901760, %v15910_v14 }
 0x73a   : > { %29938 = vmatprep.subr.mxu0 %v37543_v49 }
 0x73b   : > { %v37722_v59 = vsub.f32 %v15910_v14, %v37702_v54  ;;  %v15919_v14 = vsel %vm223_vm1, %v15850_v23, 0  ;;  %v16155_v23 = vsub.f32 %v37714_v47, %v40302_v51 }
 0x73c   : > { %29844 = vmatmul.mubr.f32.gmra.mrb[2].mxu0 %v16066_v16  ;;  %v16135_v16 = vsub.f32 %v37685_v10, %v40296_v12  ;;  %v16126_v12 = vand.u32 4294901760, %v16125_v2  ;;  %v37745_v13 = vand.u32 4294901760, %v15919_v14 }
 0x73d   : > { %29846 = vmatprep.mubr.f32.mxu0 %v16076_v36  ;;  %41708 = vst [vmem:[#allocation195_spill] sm:$0xff] %v37722_v59  ;;  %v37733_v36 = vand.u32 4294901760, %v15916_v15  ;;  %v40306_v30 = vand.u32 4294901760, %v37722_v59 }
 0x73e   : > { %v16136_v33 = vand.u32 4294901760, %v16135_v16  ;;  %v16165_v16 = vsub.f32 %v37719_v1, %v40304_v42  ;;  %v37765_v51 = vsub.f32 %v15919_v14, %v37745_v13 }
 0x73f   : > { %v37751_v29 = vsub.f32 %v15916_v15, %v37733_v36 }
 0x740   : > { %29847 = vmatmul.mubr.f32.gmra.mrb[4].mxu0 %v16086_v62  ;;  %v16145_v62 = vsub.f32 %v37698_v22, %v40299_v32  ;;  %v37753_v32 = vand.u32 4294901760, %v15922_v40  ;;  %41711 = vst [vmem:[#allocation9_spill] sm:$0xff] %v37765_v51  ;;  %v16166_v24 = vand.u32 4294901760, %v16165_v16  ;;  %v15863_v22 = vld [vmem:[#allocation2 + $0x19a] sm:$0xff] }
 0x741   : > { %29849 = vmatprep.mubr.f32.mxu0 %v16096_v19  ;;  %v37743_v19 = vsub.f32 %v15913_v20, %v37724_v6  ;;  %41710 = vst [vmem:[#allocation111_spill] sm:$0xff] %v37751_v29  ;;  %v15854_v20 = vld [vmem:[#allocation2 + $0x12a] sm:$0xff]  ;;  %v40314_v42 = vand.u32 4294901760, %v37751_v29 }
 0x742   : > { %v16146_v2 = vand.u32 4294901760, %v16145_v62  ;;  %v15931_v41 = vsel %vm223_vm1, %v15854_v20, 0  ;;  %v15934_v62 = vsel %vm223_vm1, %v15855_v8, 0  ;;  %v37773_v5 = vsub.f32 %v15922_v40, %v37753_v32 }
 0x743   : > { %41709 = vst [vmem:[#allocation67_spill] sm:$0xff] %v37743_v19  ;;  %v40310_v15 = vand.u32 4294901760, %v37743_v19  ;;  %v37780_v4 = vand.u32 4294901760, %v15931_v41  ;;  %v37782_v20 = vand.u32 4294901760, %v15934_v62  ;;  %v37786_v40 = vsub.f32 %v15925_v46, %v37767_v35 }
 0x744   : > { %29850 = vmatmul.mubr.f32.gmra.mrb[6].mxu0 %v16106_v39  ;;  %v15928_v39 = vsel %vm223_vm1, %v15853_v55, 0  ;;  %v16156_v55 = vand.u32 4294901760, %v16155_v23  ;;  %41712 = vst [vmem:[#allocation151_spill] sm:$0xff] %v37773_v5  ;;  %v15937_v23 = vsel %vm223_vm1, %v15856_v57, 0  ;;  %v16195_v16 = vsub.f32 %v37751_v29, %v40314_v42 }
 0x745   : > { %29852 = vmatprep.mubr.f32.mxu0 %v16116_v45  ;;  %v16175_v45 = vsub.f32 %v37722_v59, %v40306_v30  ;;  %v37775_v30 = vand.u32 4294901760, %v15928_v39  ;;  %v16185_v14 = vsub.f32 %v37743_v19, %v40310_v15  ;;  %41713 = vst [vmem:[#allocation177_spill] sm:$0xff] %v37786_v40  ;;  %v37801_v46 = vsub.f32 %v15934_v62, %v37782_v20 }
 0x746   : > { %v37803_v57 = vand.u32 4294901760, %v15937_v23  ;;  %v41717_v42 = vand.u32 4294901760, %v37765_v51 }
 0x747   : > { %v16176_v8 = vand.u32 4294901760, %v16175_v45  ;;  %v37794_v56 = vsub.f32 %v15928_v39, %v37775_v30  ;;  %v15858_v45 = vld [vmem:[#allocation2 + $0x15a] sm:$0xff]  ;;  %41716 = vst [vmem:[#allocation182_spill] sm:$0xff] %v37801_v46  ;;  %v16186_v19 = vand.u32 4294901760, %v16185_v14  ;;  %v15860_v14 = vld [vmem:[#allocation2 + $0x172] sm:$0xff] }
 0x748   : > { %29853 = vmatmul.mubr.f32.gmra.mrb[8].mxu0 %v16126_v12  ;;  %v15857_v12 = vld [vmem:[#allocation2 + $0x152] sm:$0xff]  ;;  %v16205_v15 = vsub.f32 %v37765_v51, %v41717_v42  ;;  %v15943_v1 = vsel %vm223_vm1, %v15858_v45, 0  ;;  %v37820_v39 = vsub.f32 %v15937_v23, %v37803_v57  ;;  %v41721_v51 = vand.u32 4294901760, %v37786_v40 }
 0x749   : > { %29855 = vmatprep.mubr.f32.mxu0 %v16136_v33  ;;  %41714 = vst [vmem:[#allocation179_spill] sm:$0xff] %v37794_v56  ;;  %v37798_v33 = vsub.f32 %v15931_v41, %v37780_v4  ;;  %v41719_v41 = vand.u32 4294901760, %v37773_v5  ;;  %v37828_v45 = vand.u32 4294901760, %v15943_v1  ;;  %v41724_v47 = vand.u32 4294901760, %v37794_v56 }
 0x74a   : > { %41720 = vst [vmem:[#allocation16_spill] sm:$0xff] %v37820_v39 }
 0x74b   : > { %41715 = vst [vmem:[#allocation164_spill] sm:$0xff] %v37798_v33  ;;  %v16215_v62 = vsub.f32 %v37773_v5, %v41719_v41  ;;  %v16225_v41 = vsub.f32 %v37786_v40, %v41721_v51  ;;  %41723 = vst [vmem:[#allocation188_spill] sm:$0xff] %v37828_v45  ;;  %v16235_v42 = vsub.f32 %v37794_v56, %v41724_v47  ;;  %v15862_v5 = vld [vmem:[#allocation2 + $0x18a] sm:$0xff]  ;;  %v41726_v51 = vand.u32 4294901760, %v37798_v33 }
 0x74c   : > { %29856 = vmatmul.mubr.f32.gmra.mrb[10].mxu0 %v16146_v2  ;;  %v15940_v2 = vsel %vm223_vm1, %v15857_v12, 0  ;;  %v16196_v12 = vand.u32 4294901760, %v16195_v16  ;;  %v16206_v16 = vand.u32 4294901760, %v16205_v15  ;;  %v41727_v40 = vand.u32 4294901760, %v37801_v46 }
 0x74d   : > { %29858 = vmatprep.mubr.f32.mxu0 %v16156_v55  ;;  %v15859_v55 = vld [vmem:[#allocation2 + $0x16a] sm:$0xff]  ;;  %v37809_v29 = vand.u32 4294901760, %v15940_v2  ;;  %v16226_v47 = vand.u32 4294901760, %v16225_v41  ;;  %v16236_v10 = vand.u32 4294901760, %v16235_v42  ;;  %v41730_v56 = vand.u32 4294901760, %v37820_v39 }
 0x74f   : > { %41718 = vst [vmem:[#allocation185_spill] sm:$0xff] %v37809_v29  ;;  %v37826_v59 = vsub.f32 %v15940_v2, %v37809_v29  ;;  %v16245_v2 = vsub.f32 %v37798_v33, %v41726_v51 }
 0x750   : > { %29859 = vmatmul.mubr.f32.gmra.mrb[12].mxu0 %v16166_v24  ;;  %v15946_v24 = vsel %vm223_vm1, %v15859_v55, 0  ;;  %v16216_v55 = vand.u32 4294901760, %v16215_v62  ;;  %v15958_v62 = vsel %vm223_vm1, %v15863_v22, 0 }
 0x751   : > { %29861 = vmatprep.mubr.f32.mxu0 %v16176_v8  ;;  %v15861_v8 = vld [vmem:[#allocation2 + $0x182] sm:$0xff]  ;;  %41722 = vst [vmem:[#allocation10_spill] sm:$0xff] %v37826_v59  ;;  %v37833_v23 = vand.u32 4294901760, %v15946_v24  ;;  %v16246_v41 = vand.u32 4294901760, %v16245_v2 }
 0x752   : > { %v15952_v15 = vsel %vm223_vm1, %v15861_v8, 0 }
 0x753   : > { %41725 = vst [vmem:[#allocation170_spill] sm:$0xff] %v37833_v23  ;;  %v37851_v51 = vsub.f32 %v15946_v24, %v37833_v23  ;;  %v37853_v33 = vand.u32 4294901760, %v15952_v15 }
 0x754   : > { %29862 = vmatmul.mubr.f32.gmra.mrb[14].mxu0 %v16186_v19  ;;  %v15949_v19 = vsel %vm223_vm1, %v15860_v14, 0  ;;  %v37846_v14 = vsub.f32 %v15943_v1, %v37828_v45  ;;  %v16265_v1 = vsub.f32 %v37820_v39, %v41730_v56 }
 0x755   : > { %29864 = vmatprep.mubr.f32.mxu0 %v16196_v12  ;;  %v16255_v12 = vsub.f32 %v37801_v46, %v41727_v40  ;;  %v37848_v8 = vand.u32 4294901760, %v15949_v19  ;;  %41729 = vst [vmem:[#allocation13_spill] sm:$0xff] %v37853_v33  ;;  %v15955_v40 = vsel %vm223_vm1, %v15862_v5, 0  ;;  %v40346_v22 = vand.u32 4294901760, %v37851_v51 }
 0x756   : > { %v40345_v24 = vand.u32 4294901760, %v37846_v14  ;;  %v37867_v5 = vand.u32 4294901760, %v15955_v40  ;;  %v37871_v2 = vsub.f32 %v15952_v15, %v37853_v33 }
 0x757   : > { %41728 = vst [vmem:[#allocation15_spill] sm:$0xff] %v37848_v8  ;;  %v16256_v46 = vand.u32 4294901760, %v16255_v12  ;;  %v37865_v31 = vsub.f32 %v15949_v19, %v37848_v8  ;;  %v37873_v12 = vand.u32 4294901760, %v15958_v62  ;;  %v16295_v39 = vsub.f32 %v37851_v51, %v40346_v22 }
 0x758   : > { %29865 = vmatmul.mubr.f32.gmra.mrb[16].mxu0 %v16206_v16  ;;  %v15864_v16 = vld [vmem:[#allocation2 + $0x1a2] sm:$0xff]  ;;  %41733 = vst [vmem:[#allocation138_spill] sm:$0xff] %v37867_v5 }
 0x759   : > { %29867 = vmatprep.mubr.f32.mxu0 %v16216_v55  ;;  %v41731_v55 = vand.u32 4294901760, %v37826_v59  ;;  %41732 = vst [vmem:[#allocation136_spill] sm:$0xff] %v37865_v31  ;;  %41734 = vst [vmem:[#allocation143_spill] sm:$0xff] %v37873_v12  ;;  %v15961_v56 = vsel %vm223_vm1, %v15864_v16, 0  ;;  %v40347_v19 = vand.u32 4294901760, %v37865_v31  ;;  %v40353_v16 = vand.u32 4294901760, %v37871_v2 }
 0x75b   : > { %v16275_v42 = vsub.f32 %v37826_v59, %v41731_v55  ;;  %v16285_v55 = vsub.f32 %v37846_v14, %v40345_v24  ;;  %v37881_v59 = vsub.f32 %v15955_v40, %v37867_v5  ;;  %v16305_v40 = vsub.f32 %v37865_v31, %v40347_v19 }
 0x75c   : > { %29868 = vmatmul.mubr.f32.gmra.mrb[18].mxu0 %v16226_v47  ;;  %v16266_v47 = vand.u32 4294901760, %v16265_v1  ;;  %v16315_v22 = vsub.f32 %v37871_v2, %v40353_v16  ;;  %v41750_v16 = vld [vmem:[#allocation16_spill] sm:$0xff] }
 0x75d   : > { %29870 = vmatprep.mubr.f32.mxu0 %v16236_v10  ;;  %v37883_v10 = vand.u32 4294901760, %v15961_v56  ;;  %v16276_v15 = vand.u32 4294901760, %v16275_v42  ;;  %v16286_v1 = vand.u32 4294901760, %v16285_v55  ;;  %v40352_v24 = vand.u32 4294901760, %v37881_v59 }
 0x75e   : > { %v16296_v42 = vand.u32 4294901760, %v16295_v39  ;;  %v16316_v31 = vand.u32 4294901760, %v16315_v22  ;;  %v41738_v22 = vld [vmem:[#allocation113_spill] sm:$0xff] }
 0x75f   : > { %41735 = vst [vmem:[#allocation114_spill] sm:$0xff] %v37883_v10  ;;  %v16325_v55 = vsub.f32 %v37881_v59, %v40352_v24  ;;  %v41749_v24 = vld [vmem:[#allocation182_spill] sm:$0xff] }
 0x760   : > { %29871 = vmatmul.mubr.f32.gmra.mrb[20].mxu0 %v16246_v41  ;;  %v37890_v41 = vsub.f32 %v15958_v62, %v37873_v12 }
 0x761   : > { %29873 = vmatprep.mubr.f32.mxu0 %v16256_v46  ;;  %v37897_v46 = vsub.f32 %v15961_v56, %v37883_v10  ;;  %v16326_v56 = vand.u32 4294901760, %v16325_v55  ;;  %v41741_v55 = vld [vmem:[#allocation195_spill] sm:$0xff] }
 0x762   : > { %v40351_v62 = vand.u32 4294901760, %v37890_v41 }
 0x763   : > { %v40350_v19 = vand.u32 4294901760, %v37897_v46 }
 0x764   : > { %29874 = vmatmul.mubr.f32.gmra.mrb[22].mxu0 %v16266_v47  ;;  %v16306_v47 = vand.u32 4294901760, %v16305_v40  ;;  %v16335_v39 = vsub.f32 %v37890_v41, %v40351_v62  ;;  %v41748_v62 = vld [vmem:[#allocation164_spill] sm:$0xff] }
 0x765   : > { %29876 = vmatprep.mubr.f32.mxu0 %v16276_v15  ;;  %v16345_v15 = vsub.f32 %v37897_v46, %v40350_v19  ;;  %v41747_v19 = vld [vmem:[#allocation179_spill] sm:$0xff] }
 0x767   : > { %v16346_v40 = vand.u32 4294901760, %v16345_v15  ;;  %v41744_v15 = vld [vmem:[#allocation9_spill] sm:$0xff] }
 0x768   : > { %29877 = vmatmul.mubr.f32.gmra.mrb[24].mxu0 %v16286_v1  ;;  %v16336_v1 = vand.u32 4294901760, %v16335_v39  ;;  %v41742_v39 = vld [vmem:[#allocation67_spill] sm:$0xff] }
 0x769   : > { %29879 = vmatprep.mubr.f32.mxu0 %v16296_v42  ;;  %v41739_v42 = vld [vmem:[#allocation189_spill] sm:$0xff] }
 0x76c   : > { %29880 = vmatmul.mubr.f32.gmra.mrb[26].mxu0 %v16306_v47  ;;  %v41740_v47 = vld [vmem:[#allocation117_spill] sm:$0xff] }
 0x76d   : > { %29882 = vmatprep.mubr.f32.mxu0 %v16316_v31  ;;  %v41737_v31 = vld [vmem:[#allocation180_spill] sm:$0xff] }
 0x770   : > { %29883 = vmatmul.mubr.f32.gmra.mrb[28].mxu0 %v16326_v56  ;;  %v41743_v56 = vld [vmem:[#allocation111_spill] sm:$0xff] }
 0x771   : > { %29885 = vmatprep.mubr.f32.mxu0 %v16336_v1  ;;  %v41745_v1 = vld [vmem:[#allocation151_spill] sm:$0xff] }
 0x774   : > { %29886 = vmatmul.mubr.f32.gmra.mrb[30].mxu0 %v16346_v40  ;;  %v41746_v40 = vld [vmem:[#allocation177_spill] sm:$0xff] }
 0x775   : > { %29890 = vmatprep.mubr.f32.mxu0 %v37582_v21 }
 0x778   : > { %29891 = vmatmul.mubr.f32.vlgmr.msra.gmra.mrb[0].mxu0 %v37587_v11 }
 0x779   : > { %29939 = vmatpush3.msra.mxu0 %v37543_v49  ;;  %29893 = vmatprep.mubr.f32.mxu0 %v37593_v27  ;;  %v41736_v49 = vld [vmem:[#allocation99_spill] sm:$0xff] }
 0x77a   : > { %29988 = vmatprep.subr.mxu0 %v37512_v63 }
 0x77c   : > { %29894 = vmatmul.mubr.f32.gmra.mrb[2].mxu0 %v37601_v58 }
 0x77d   : > { %29896 = vmatprep.mubr.f32.mxu0 %v37608_v0 }
 0x780   : > { %29897 = vmatmul.mubr.f32.gmra.mrb[4].mxu0 %v37617_v60 }
 0x781   : > { %29899 = vmatprep.mubr.f32.mxu0 %v37629_v3 }
 0x784   : > { %29900 = vmatmul.mubr.f32.gmra.mrb[6].mxu0 %v37636_v37 }
 0x785   : > { %29902 = vmatprep.mubr.f32.mxu0 %v37650_v25 }
 0x788   : > { %29903 = vmatmul.mubr.f32.gmra.mrb[8].mxu0 %v37662_v9 }
 0x789   : > { %29905 = vmatprep.mubr.f32.mxu0 %v37664_v7 }
 0x78c   : > { %29906 = vmatmul.mubr.f32.gmra.mrb[10].mxu0 %v37679_v18 }
 0x78d   : > { %29908 = vmatprep.mubr.f32.mxu0 %v37694_v44 }
 0x790   : > { %29909 = vmatmul.mubr.f32.gmra.mrb[12].mxu0 %v37700_v26 }
 0x791   : > { %29911 = vmatprep.mubr.f32.mxu0 %v37702_v54 }
 0x794   : > { %29912 = vmatmul.mubr.f32.gmra.mrb[14].mxu0 %v37724_v6 }
 0x795   : > { %29914 = vmatprep.mubr.f32.mxu0 %v37733_v36 }
 0x798   : > { %29915 = vmatmul.mubr.f32.gmra.mrb[16].mxu0 %v37745_v13 }
 0x799   : > { %29917 = vmatprep.mubr.f32.mxu0 %v37753_v32 }
 0x79c   : > { %29918 = vmatmul.mubr.f32.gmra.mrb[18].mxu0 %v37767_v35 }
 0x79d   : > { %29920 = vmatprep.mubr.f32.mxu0 %v37775_v30 }
 0x7a0   : > { %29921 = vmatmul.mubr.f32.gmra.mrb[20].mxu0 %v37780_v4 }
 0x7a1   : > { %29923 = vmatprep.mubr.f32.mxu0 %v37782_v20 }
 0x7a4   : > { %29924 = vmatmul.mubr.f32.gmra.mrb[22].mxu0 %v37803_v57 }
 0x7a5   : > { %29926 = vmatprep.mubr.f32.mxu0 %v37809_v29  ;;  %v41758_v29 = vand.u32 4294901760, %v37634_v53 }
 0x7a8   : > { %29927 = vmatmul.mubr.f32.gmra.mrb[24].mxu0 %v37828_v45  ;;  %v41757_v45 = vand.u32 4294901760, %v37625_v50 }
 0x7a9   : > { %29929 = vmatprep.mubr.f32.mxu0 %v37833_v23  ;;  %v41756_v23 = vand.u32 4294901760, %v37615_v48 }
 0x7ac   : > { %29930 = vmatmul.mubr.f32.gmra.mrb[26].mxu0 %v37848_v8  ;;  %v41755_v8 = vand.u32 4294901760, %v37606_v28 }
 0x7ad   : > { %29932 = vmatprep.mubr.f32.mxu0 %v37853_v33  ;;  %v41754_v33 = vand.u32 4294901760, %v37599_v52 }
 0x7b0   : > { %29933 = vmatmul.mubr.f32.gmra.mrb[28].mxu0 %v37867_v5  ;;  %v41753_v5 = vand.u32 4294901760, %v37591_v34 }
 0x7b1   : > { %29935 = vmatprep.mubr.f32.mxu0 %v37873_v12  ;;  %v41752_v12 = vld [vmem:[#allocation136_spill] sm:$0xff] }
 0x7b4   : > { %29936 = vmatmul.mubr.f32.gmra.mrb[30].mxu0 %v37883_v10  ;;  %v41751_v10 = vld [vmem:[#allocation10_spill] sm:$0xff] }
 0x7b5   : > { %29940 = vmatprep.mubr.f32.mxu0 %v37591_v34  ;;  %v41759_v34 = vand.u32 4294901760, %v37648_v17 }
 0x7b8   : > { %29941 = vmatmul.mubr.f32.vlgmr.msra.gmra.mrb[0].mxu0 %v37599_v52  ;;  %v41760_v52 = vand.u32 4294901760, %v37659_v38 }
 0x7b9   : > { %29989 = vmatpush3.msra.mxu0 %v37512_v63  ;;  %29943 = vmatprep.mubr.f32.mxu0 %v37606_v28  ;;  %v41762_v28 = vand.u32 4294901760, %v41736_v49 }
 0x7ba   : > { %30038 = vmatprep.subr.mxu0 %v37548_v61 }
 0x7bc   : > { %29944 = vmatmul.mubr.f32.gmra.mrb[2].mxu0 %v37615_v48  ;;  %v41763_v48 = vand.u32 4294901760, %v41737_v31 }
 0x7bd   : > { %29946 = vmatprep.mubr.f32.mxu0 %v37625_v50  ;;  %v41764_v50 = vand.u32 4294901760, %v41738_v22 }
 0x7c0   : > { %29947 = vmatmul.mubr.f32.gmra.mrb[4].mxu0 %v37634_v53  ;;  %v41765_v53 = vand.u32 4294901760, %v41739_v42 }
 0x7c1   : > { %29949 = vmatprep.mubr.f32.mxu0 %v37648_v17  ;;  %v41766_v17 = vand.u32 4294901760, %v41740_v47 }
 0x7c4   : > { %29950 = vmatmul.mubr.f32.gmra.mrb[6].mxu0 %v37659_v38  ;;  %v41767_v38 = vand.u32 4294901760, %v41741_v55 }
 0x7c5   : > { %29952 = vmatprep.mubr.f32.mxu0 %v37672_v43 }
 0x7c8   : > { %29953 = vmatmul.mubr.f32.gmra.mrb[8].mxu0 %v41736_v49  ;;  %v41775_v49 = vand.u32 4294901760, %v41749_v24 }
 0x7c9   : > { %29955 = vmatprep.mubr.f32.mxu0 %v41737_v31  ;;  %v41776_v31 = vand.u32 4294901760, %v41750_v16 }
 0x7cc   : > { %29956 = vmatmul.mubr.f32.gmra.mrb[10].mxu0 %v41738_v22  ;;  %v41777_v22 = vand.u32 4294901760, %v41751_v10 }
 0x7cd   : > { %29958 = vmatprep.mubr.f32.mxu0 %v41739_v42  ;;  %v41778_v42 = vand.u32 4294901760, %v37846_v14 }
 0x7d0   : > { %29959 = vmatmul.mubr.f32.gmra.mrb[12].mxu0 %v41740_v47  ;;  %v41779_v47 = vand.u32 4294901760, %v37851_v51 }
 0x7d1   : > { %29961 = vmatprep.mubr.f32.mxu0 %v41741_v55 }
 0x7d4   : > { %29962 = vmatmul.mubr.f32.gmra.mrb[14].mxu0 %v41742_v39 }
 0x7d5   : > { %29964 = vmatprep.mubr.f32.mxu0 %v41743_v56 }
 0x7d8   : > { %29965 = vmatmul.mubr.f32.gmra.mrb[16].mxu0 %v41744_v15 }
 0x7d9   : > { %29967 = vmatprep.mubr.f32.mxu0 %v41745_v1 }
 0x7dc   : > { %29968 = vmatmul.mubr.f32.gmra.mrb[18].mxu0 %v41746_v40 }
 0x7dd   : > { %29970 = vmatprep.mubr.f32.mxu0 %v41747_v19 }
 0x7e0   : > { %29971 = vmatmul.mubr.f32.gmra.mrb[20].mxu0 %v41748_v62 }
 0x7e1   : > { %29973 = vmatprep.mubr.f32.mxu0 %v41749_v24  ;;  %v41782_v24 = vand.u32 4294901760, %v37881_v59 }
 0x7e4   : > { %29974 = vmatmul.mubr.f32.gmra.mrb[22].mxu0 %v41750_v16  ;;  %v41783_v16 = vand.u32 4294901760, %v37890_v41 }
 0x7e5   : > { %29976 = vmatprep.mubr.f32.mxu0 %v41751_v10  ;;  %v41784_v10 = vand.u32 4294901760, %v37897_v46 }
 0x7e8   : > { %29977 = vmatmul.mubr.f32.gmra.mrb[24].mxu0 %v37846_v14  ;;  %v41787_v14 = vld [vmem:[#allocation170_spill] sm:$0xff] }
 0x7e9   : > { %29979 = vmatprep.mubr.f32.mxu0 %v37851_v51  ;;  %v41788_v51 = vld [vmem:[#allocation15_spill] sm:$0xff] }
 0x7ec   : > { %29980 = vmatmul.mubr.f32.gmra.mrb[26].mxu0 %v41752_v12 }
 0x7ed   : > { %29982 = vmatprep.mubr.f32.mxu0 %v37871_v2 }
 0x7f0   : > { %29983 = vmatmul.mubr.f32.gmra.mrb[28].mxu0 %v37881_v59  ;;  %v41786_v59 = vld [vmem:[#allocation188_spill] sm:$0xff] }
 0x7f1   : > { %29985 = vmatprep.mubr.f32.mxu0 %v37890_v41  ;;  %v41791_v41 = vld [vmem:[#allocation143_spill] sm:$0xff] }
 0x7f4   : > { %29986 = vmatmul.mubr.f32.gmra.mrb[30].mxu0 %v37897_v46  ;;  %v41792_v46 = vld [vmem:[#allocation114_spill] sm:$0xff] }
 0x7f5   : > { %29990 = vmatprep.mubr.f32.mxu0 %v41753_v5  ;;  %v41774_v5 = vand.u32 4294901760, %v41748_v62  ;;  %v41781_v62 = vand.u32 4294901760, %v37871_v2  ;;  %v41789_v2 = vld [vmem:[#allocation13_spill] sm:$0xff] }
 0x7f8   : > { %29991 = vmatmul.mubr.f32.vlgmr.msra.gmra.mrb[0].mxu0 %v41754_v33  ;;  %v41770_v33 = vand.u32 4294901760, %v41744_v15 }
 0x7f9   : > { %30039 = vmatpush3.msra.mxu0 %v37548_v61  ;;  %29993 = vmatprep.mubr.f32.mxu0 %v41755_v8  ;;  %v41761_v61 = vand.u32 4294901760, %v37672_v43  ;;  %v41768_v43 = vand.u32 4294901760, %v41742_v39  ;;  %v41773_v8 = vand.u32 4294901760, %v41747_v19  ;;  %v41780_v19 = vand.u32 4294901760, %v41752_v12  ;;  %v41790_v12 = vld [vmem:[#allocation138_spill] sm:$0xff]  ;;  %v41797_v39 = vld [vmem:[#allocation141_spill] sm:$0xff] }
 0x7fa   : > { %30088 = vmatprep.subr.mxu0 %v37512_v63 }
 0x7fc   : > { %29994 = vmatmul.mubr.f32.gmra.mrb[2].mxu0 %v41756_v23  ;;  %v41772_v23 = vand.u32 4294901760, %v41746_v40 }
 0x7fd   : > { %29996 = vmatprep.mubr.f32.mxu0 %v41757_v45  ;;  %v41771_v45 = vand.u32 4294901760, %v41745_v1 }
 0x800   : > { %29997 = vmatmul.mubr.f32.gmra.mrb[4].mxu0 %v41758_v29  ;;  %v41769_v29 = vand.u32 4294901760, %v41743_v56 }
 0x801   : > { %29999 = vmatprep.mubr.f32.mxu0 %v41759_v34 }
 0x804   : > { %30000 = vmatmul.mubr.f32.gmra.mrb[6].mxu0 %v41760_v52 }
 0x805   : > { %30002 = vmatprep.mubr.f32.mxu0 %v41761_v61 }
 0x808   : > { %30003 = vmatmul.mubr.f32.gmra.mrb[8].mxu0 %v41762_v28  ;;  %v41798_v28 = vld [vmem:[#allocation145_spill] sm:$0xff] }
 0x809   : > { %30005 = vmatprep.mubr.f32.mxu0 %v41763_v48 }
 0x80c   : > { %30006 = vmatmul.mubr.f32.gmra.mrb[10].mxu0 %v41764_v50 }
 0x80d   : > { %30008 = vmatprep.mubr.f32.mxu0 %v41765_v53 }
 0x810   : > { %30009 = vmatmul.mubr.f32.gmra.mrb[12].mxu0 %v41766_v17  ;;  %v41799_v17 = vld [vmem:[#allocation65_spill] sm:$0xff] }
 0x811   : > { %30011 = vmatprep.mubr.f32.mxu0 %v41767_v38 }
 0x814   : > { %30012 = vmatmul.mubr.f32.gmra.mrb[14].mxu0 %v41768_v43 }
 0x815   : > { %30014 = vmatprep.mubr.f32.mxu0 %v41769_v29  ;;  %v41800_v29 = vld [vmem:[#allocation175_spill] sm:$0xff] }
 0x818   : > { %30015 = vmatmul.mubr.f32.gmra.mrb[16].mxu0 %v41770_v33 }
 0x819   : > { %30017 = vmatprep.mubr.f32.mxu0 %v41771_v45 }
 0x81c   : > { %30018 = vmatmul.mubr.f32.gmra.mrb[18].mxu0 %v41772_v23  ;;  %v41801_v23 = vld [vmem:[#allocation181_spill] sm:$0xff] }
 0x81d   : > { %30020 = vmatprep.mubr.f32.mxu0 %v41773_v8 }
 0x820   : > { %30021 = vmatmul.mubr.f32.gmra.mrb[20].mxu0 %v41774_v5 }
 0x821   : > { %30023 = vmatprep.mubr.f32.mxu0 %v41775_v49 }
 0x824   : > { %30024 = vmatmul.mubr.f32.gmra.mrb[22].mxu0 %v41776_v31 }
 0x825   : > { %30026 = vmatprep.mubr.f32.mxu0 %v41777_v22 }
 0x828   : > { %30027 = vmatmul.mubr.f32.gmra.mrb[24].mxu0 %v41778_v42 }
 0x829   : > { %30029 = vmatprep.mubr.f32.mxu0 %v41779_v47 }
 0x82c   : > { %30030 = vmatmul.mubr.f32.gmra.mrb[26].mxu0 %v41780_v19  ;;  %v41802_v19 = vld [vmem:[#allocation184_spill] sm:$0xff] }
 0x82d   : > { %30032 = vmatprep.mubr.f32.mxu0 %v41781_v62 }
 0x830   : > { %30033 = vmatmul.mubr.f32.gmra.mrb[28].mxu0 %v41782_v24 }
 0x831   : > { %30035 = vmatprep.mubr.f32.mxu0 %v41783_v16 }
 0x834   : > { %30036 = vmatmul.mubr.f32.gmra.mrb[30].mxu0 %v41784_v10  ;;  %v41803_v10 = vld [vmem:[#allocation187_spill] sm:$0xff] }
 0x835   : > { %30040 = vmatprep.mubr.f32.mxu0 %v37582_v21 }
 0x838   : > { %30041 = vmatmul.mubr.f32.vlgmr.msra.gmra.mrb[0].mxu0 %v37587_v11 }
 0x839   : > { %30089 = vmatpush3.msra.mxu0 %v37512_v63  ;;  %30043 = vmatprep.mubr.f32.mxu0 %v37593_v27  ;;  %v41785_v63 = vld [vmem:[#allocation185_spill] sm:$0xff] }
 0x83c   : > { %30044 = vmatmul.mubr.f32.gmra.mrb[2].mxu0 %v37601_v58 }
 0x83d   : > { %30046 = vmatprep.mubr.f32.mxu0 %v37608_v0 }
 0x840   : > { %30047 = vmatmul.mubr.f32.gmra.mrb[4].mxu0 %v37617_v60 }
 0x841   : > { %30049 = vmatprep.mubr.f32.mxu0 %v37629_v3 }
 0x844   : > { %30050 = vmatmul.mubr.f32.gmra.mrb[6].mxu0 %v37636_v37 }
 0x845   : > { %30052 = vmatprep.mubr.f32.mxu0 %v37650_v25 }
 0x848   : > { %30053 = vmatmul.mubr.f32.gmra.mrb[8].mxu0 %v37662_v9 }
 0x849   : > { %30055 = vmatprep.mubr.f32.mxu0 %v37664_v7 }
 0x84c   : > { %30056 = vmatmul.mubr.f32.gmra.mrb[10].mxu0 %v37679_v18 }
 0x84d   : > { %30058 = vmatprep.mubr.f32.mxu0 %v37694_v44 }
 0x850   : > { %30059 = vmatmul.mubr.f32.gmra.mrb[12].mxu0 %v37700_v26 }
 0x851   : > { %30061 = vmatprep.mubr.f32.mxu0 %v37702_v54 }
 0x854   : > { %30062 = vmatmul.mubr.f32.gmra.mrb[14].mxu0 %v37724_v6 }
 0x855   : > { %30064 = vmatprep.mubr.f32.mxu0 %v37733_v36 }
 0x858   : > { %30065 = vmatmul.mubr.f32.gmra.mrb[16].mxu0 %v37745_v13 }
 0x859   : > { %30067 = vmatprep.mubr.f32.mxu0 %v37753_v32 }
 0x85c   : > { %30068 = vmatmul.mubr.f32.gmra.mrb[18].mxu0 %v37767_v35 }
 0x85d   : > { %30070 = vmatprep.mubr.f32.mxu0 %v37775_v30 }
 0x860   : > { %30071 = vmatmul.mubr.f32.gmra.mrb[20].mxu0 %v37780_v4 }
 0x861   : > { %30073 = vmatprep.mubr.f32.mxu0 %v37782_v20 }
 0x864   : > { %30074 = vmatmul.mubr.f32.gmra.mrb[22].mxu0 %v37803_v57 }
 0x865   : > { %30076 = vmatprep.mubr.f32.mxu0 %v41785_v63 }
 0x868   : > { %30077 = vmatmul.mubr.f32.gmra.mrb[24].mxu0 %v41786_v59 }
 0x869   : > { %30079 = vmatprep.mubr.f32.mxu0 %v41787_v14 }
 0x86c   : > { %30080 = vmatmul.mubr.f32.gmra.mrb[26].mxu0 %v41788_v51 }
 0x86d   : > { %30082 = vmatprep.mubr.f32.mxu0 %v41789_v2 }
 0x870   : > { %30083 = vmatmul.mubr.f32.gmra.mrb[28].mxu0 %v41790_v12 }
 0x871   : > { %30085 = vmatprep.mubr.f32.mxu0 %v41791_v41 }
 0x874   : > { %30086 = vmatmul.mubr.f32.gmra.mrb[30].mxu0 %v41792_v46 }
 0x875   : > { %30090 = vmatprep.mubr.f32.mxu0 %v37582_v21  ;;  %v41793_v21 = vmov 0.0  }
 0x876   : > { %17896 = vst.msk [vmem:[#allocation4] sm:$0xff] %vm17832_vm3, %v41793_v21  ;;  %17899 = vst.msk [vmem:[#allocation4 + $0x10] sm:$0xff] %vm17832_vm3, %v41793_v21 }
 0x877   : > { %17901 = vst.msk [vmem:[#allocation4 + $0x20] sm:$0xff] %vm17832_vm3, %v41793_v21  ;;  %17903 = vst.msk [vmem:[#allocation4 + $0x30] sm:$0xff] %vm17832_vm3, %v41793_v21 }
 0x878   : > { %30091 = vmatmul.mubr.f32.vlgmr.msra.gmra.mrb[0].mxu0 %v37587_v11  ;;  %17905 = vst.msk [vmem:[#allocation4 + $0x40] sm:$0xff] %vm17832_vm3, %v41793_v21  ;;  %17907 = vst.msk [vmem:[#allocation4 + $0x50] sm:$0xff] %vm17832_vm3, %v41793_v21 }
 0x879   : > { %30093 = vmatprep.mubr.f32.mxu0 %v37593_v27  ;;  %17909 = vst.msk [vmem:[#allocation4 + $0x60] sm:$0xff] %vm17832_vm3, %v41793_v21  ;;  %17911 = vst.msk [vmem:[#allocation4 + $0x70] sm:$0xff] %vm17832_vm3, %v41793_v21 }
 0x87a   : > { %17913 = vst.msk [vmem:[#allocation4 + $0x80] sm:$0xff] %vm17832_vm3, %v41793_v21  ;;  %17915 = vst.msk [vmem:[#allocation4 + $0x90] sm:$0xff] %vm17832_vm3, %v41793_v21 }
 0x87b   : > { %17900 = vst.msk [vmem:[#allocation4 + $0x18] sm:$0x3] %vm17897_vm4, %v41793_v21  ;;  %17898 = vst.msk [vmem:[#allocation4 + $0x8] sm:$0x3] %vm17897_vm4, %v41793_v21 }
 0x87c   : > { %30094 = vmatmul.mubr.f32.gmra.mrb[2].mxu0 %v37601_v58  ;;  %17902 = vst.msk [vmem:[#allocation4 + $0x28] sm:$0x3] %vm17897_vm4, %v41793_v21  ;;  %17904 = vst.msk [vmem:[#allocation4 + $0x38] sm:$0x3] %vm17897_vm4, %v41793_v21 }
 0x87d   : > { %30096 = vmatprep.mubr.f32.mxu0 %v37608_v0  ;;  %17906 = vst.msk [vmem:[#allocation4 + $0x48] sm:$0x3] %vm17897_vm4, %v41793_v21  ;;  %17908 = vst.msk [vmem:[#allocation4 + $0x58] sm:$0x3] %vm17897_vm4, %v41793_v21 }
 0x87e   : > { %17910 = vst.msk [vmem:[#allocation4 + $0x68] sm:$0x3] %vm17897_vm4, %v41793_v21  ;;  %17912 = vst.msk [vmem:[#allocation4 + $0x78] sm:$0x3] %vm17897_vm4, %v41793_v21 }
 0x87f   : > { %17914 = vst.msk [vmem:[#allocation4 + $0x88] sm:$0x3] %vm17897_vm4, %v41793_v21  ;;  %17916 = vst.msk [vmem:[#allocation4 + $0x98] sm:$0x3] %vm17897_vm4, %v41793_v21 }
 0x880   : > { %30097 = vmatmul.mubr.f32.gmra.mrb[4].mxu0 %v37617_v60  ;;  %v25154_v60 = vld [vmem:[%s39346_s3 + $0x8] sm:$0xff] }
 0x881   : > { %30099 = vmatprep.mubr.f32.mxu0 %v37629_v3 }
 0x882   : > { %v17935_v11 = vld [vmem:[#allocation4 + $0x1] sm:$0xff] }
 0x883   : > { %v17946_v27 = vsel %vm17832_vm3, %v17935_v11, 0  ;;  %v41805_v11 = vld [vmem:[#allocation192_spill] sm:$0xff] }
 0x884   : > { %30100 = vmatmul.mubr.f32.gmra.mrb[6].mxu0 %v37636_v37  ;;  %v38143_v58 = vand.u32 4294901760, %v17946_v27  ;;  %v38155_v37 = vand.u32 4294901760, %v25154_v60 }
 0x885   : > { %30102 = vmatprep.mubr.f32.mxu0 %v37650_v25 }
 0x886   : > { %v38146_v0 = vsub.f32 %v17946_v27, %v38143_v58  ;;  %30138 = vmatprep.subr.mxu1 %v38155_v37 }
 0x887   : > { %30139 = vmatpush3.msra.mxu1 %v38155_v37 }
 0x888   : > { %30103 = vmatmul.mubr.f32.gmra.mrb[8].mxu0 %v37662_v9  ;;  %v38160_v9 = vsub.f32 %v25154_v60, %v38155_v37 }
 0x889   : > { %30105 = vmatprep.mubr.f32.mxu0 %v37664_v7 }
 0x88a   : > { %v38163_v7 = vand.u32 4294901760, %v38160_v9 }
 0x88c   : > { %30106 = vmatmul.mubr.f32.gmra.mrb[10].mxu0 %v37679_v18  ;;  %v18119_v18 = vsub.f32 %v38160_v9, %v38163_v7 }
 0x88d   : > { %30108 = vmatprep.mubr.f32.mxu0 %v37694_v44 }
 0x890   : > { %30109 = vmatmul.mubr.f32.gmra.mrb[12].mxu0 %v37700_v26  ;;  %v41794_v26 = vld [vmem:[#allocation162_spill] sm:$0xff] }
 0x891   : > { %30111 = vmatprep.mubr.f32.mxu0 %v37702_v54 }
 0x894   : > { %30112 = vmatmul.mubr.f32.gmra.mrb[14].mxu0 %v37724_v6  ;;  %v41795_v6 = vld [vmem:[#allocation193_spill] sm:$0xff] }
 0x895   : > { %30114 = vmatprep.mubr.f32.mxu0 %v37733_v36 }
 0x898   : > { %30115 = vmatmul.mubr.f32.gmra.mrb[16].mxu0 %v37745_v13  ;;  %v38167_v13 = vand.u32 4294901760, %v18119_v18 }
 0x899   : > { %30117 = vmatprep.mubr.f32.mxu0 %v37753_v32 }
 0x89a   : > { %30152 = vmatprep.subr.mxu1 %v38167_v13 }
 0x89c   : > { %30118 = vmatmul.mubr.f32.gmra.mrb[18].mxu0 %v37767_v35 }
 0x89d   : > { %30120 = vmatprep.mubr.f32.mxu0 %v37775_v30  ;;  %v38175_v30 = vld [vmem:[%s39345_s2] ss:$0 sm:$0xff] }
 0x8a0   : > { %30121 = vmatmul.mubr.f32.gmra.mrb[20].mxu0 %v37780_v4  ;;  %v18037_v4 = vand.u32 4294901760, %v38146_v0 }
 0x8a1   : > { %30123 = vmatprep.mubr.f32.mxu0 %v37782_v20  ;;  %v41796_v20 = vld [vmem:[#allocation40_spill] sm:$0xff] }
 0x8a2   : > { %v18038_v3 = vsub.f32 %v38146_v0, %v18037_v4 }
 0x8a4   : > { %30124 = vmatmul.mubr.f32.gmra.mrb[22].mxu0 %v37803_v57  ;;  %v18039_v25 = vand.u32 4294901760, %v18038_v3 }
 0x8a5   : > { %30126 = vmatprep.mubr.f32.mxu0 %v41785_v63 }
 0x8a6   : > { %30140 = vmatprep.mubr.f32.mxu1 %v18039_v25 }
 0x8a8   : > { %30127 = vmatmul.mubr.f32.gmra.mrb[24].mxu0 %v41786_v59 }
 0x8a9   : > { %30129 = vmatprep.mubr.f32.mxu0 %v41787_v14 }
 0x8ac   : > { %30130 = vmatmul.mubr.f32.gmra.mrb[26].mxu0 %v41788_v51 }
 0x8ad   : > { %30132 = vmatprep.mubr.f32.mxu0 %v41789_v2 }
 0x8b0   : > { %30133 = vmatmul.mubr.f32.gmra.mrb[28].mxu0 %v41790_v12  ;;  %v41804_v12 = vld [vmem:[#allocation190_spill] sm:$0xff] }
 0x8b1   : > { %30135 = vmatprep.mubr.f32.mxu0 %v41791_v41 }
 0x8b4   : > { %30136 = vmatmul.mubr.f32.gmra.mrb[30].mxu0 %v41792_v46 }
 0x94b   : > { %v30092_v44 = vpop.f32.mrb[0].mxu0 }
 0x94c   : > { %v30896_v54 = vadd.f32 %v30092_v44, %v41794_v26  ;;  %v17555_v32 = vpop.f32.mrb[1].mxu0 }
 0x94d   : > { %v30897_v36 = vadd.f32 %v17555_v32, %v41795_v6 }
 0x94e   : > { %v17785_v15 = vadd.f32 %v30896_v54, %v38175_v30  ;;  %v41806_v54 = vld [vmem:[#allocation56_spill] sm:$0xff] }
 0x94f   : > { %v30095_v35 = vpop.f32.mrb[2].mxu0  ;;  %v17784_v40 = vadd.f32 %v30897_v36, %v38175_v30 }
 0x950   : > { %v30898_v57 = vadd.f32 %v30095_v35, %v41796_v20  ;;  %v17567_v55 = vpop.f32.mrb[3].mxu0  ;;  %v41807_v35 = vld [vmem:[#allocation27_spill] sm:$0xff] }
 0x951   : > { %v30899_v56 = vadd.f32 %v17567_v55, %v41797_v39 }
 0x952   : > { %v17787_v1 = vadd.f32 %v30898_v57, %v38175_v30 }
 0x953   : > { %v17786_v34 = vadd.f32 %v30899_v56, %v38175_v30  ;;  %v30098_v52 = vpop.f32.mrb[4].mxu0 }
 0x954   : > { %v17817_v61 = vmax.f32 %v17785_v15, %v17787_v1  ;;  %v30900_v48 = vadd.f32 %v30098_v52, %v41798_v28  ;;  %v17579_v50 = vpop.f32.mrb[5].mxu0  ;;  %v41808_v15 = vld [vmem:[#allocation53_spill] sm:$0xff]  ;;  %v41809_v52 = vld [vmem:[#allocation72_spill] sm:$0xff] }
 0x955   : > { %v17816_v53 = vmax.f32 %v17784_v40, %v17786_v34  ;;  %v30901_v38 = vadd.f32 %v17579_v50, %v41799_v17 }
 0x956   : > { %17834 = vst.msk [vmem:[#allocation3 + $0x8] sm:$0xff] %vm17832_vm3, %v17817_v61  ;;  %v17789_v5 = vadd.f32 %v30900_v48, %v38175_v30 }
 0x957   : > { %17833 = vst.msk [vmem:[#allocation3] sm:$0xff] %vm17832_vm3, %v17816_v53  ;;  %v30101_v43 = vpop.f32.mrb[6].mxu0  ;;  %v17788_v31 = vadd.f32 %v30901_v38, %v38175_v30 }
 0x958   : > { %v30902_v33 = vadd.f32 %v30101_v43, %v41800_v29  ;;  %v17591_v45 = vpop.f32.mrb[7].mxu0 }
 0x959   : > { %v30903_v8 = vadd.f32 %v17591_v45, %v41801_v23 }
 0x95a   : > { %v17791_v49 = vadd.f32 %v30902_v33, %v38175_v30  ;;  %v41810_v33 = vld [vmem:[#allocation139_spill] sm:$0xff] }
 0x95b   : > { %v17790_v22 = vadd.f32 %v30903_v8, %v38175_v30  ;;  %v30104_v42 = vpop.f32.mrb[8].mxu0 }
 0x95c   : > { %v17819_v47 = vmax.f32 %v17789_v5, %v17791_v49  ;;  %v30904_v62 = vadd.f32 %v30104_v42, %v41802_v19  ;;  %v17603_v24 = vpop.f32.mrb[9].mxu0  ;;  %v41811_v49 = vld [vmem:[#allocation142_spill] sm:$0xff] }
 0x95d   : > { %v17818_v16 = vmax.f32 %v17788_v31, %v17790_v22  ;;  %v30905_v63 = vadd.f32 %v17603_v24, %v41803_v10  ;;  %v41812_v24 = vld [vmem:[#allocation118_spill] sm:$0xff] }
 0x95e   : > { %v17849_v59 = vld [vmem:[#allocation3] ss:$2 sm:$0xff]  ;;  %v17865_v14 = vld [vmem:[#allocation3 + $0x1] ss:$2 sm:$0xff]  ;;  %17836 = vst.msk [vmem:[#allocation3 + $0x18] sm:$0xff] %vm17832_vm3, %v17819_v47  ;;  %v17793_v60 = vadd.f32 %v30904_v62, %v38175_v30 }
 0x95f   : > { %v17880_v51 = vmax.f32 %v17849_v59, %v17865_v14  ;;  %17835 = vst.msk [vmem:[#allocation3 + $0x10] sm:$0xff] %vm17832_vm3, %v17818_v16  ;;  %v30107_v2 = vpop.f32.mrb[10].mxu0  ;;  %v17792_v25 = vadd.f32 %v30905_v63, %v38175_v30  ;;  %v41813_v14 = vld [vmem:[#allocation146_spill] sm:$0xff] }
 0x960   : > { %v30906_v41 = vadd.f32 %v30107_v2, %v41804_v12  ;;  %v17615_v46 = vpop.f32.mrb[11].mxu0 }
 0x961   : > { %v17888_v21 = vmax.f32 %v17880_v51, 0.0  ;;  %v30907_v27 = vadd.f32 %v17615_v46, %v41805_v11 }
 0x962   : > { %v17795_v3 = vadd.f32 %v30906_v41, %v38175_v30 }
 0x963   : > { %17918 = vst.msk [vmem:[#allocation4 + $0x11] sm:$0xff] %vm17832_vm3, %v17888_v21  ;;  %v17794_v18 = vadd.f32 %v30907_v27, %v38175_v30  ;;  %v30110_v44 = vpop.f32.mrb[12].mxu0 }
 0x964   : > { %v17821_v26 = vmax.f32 %v17793_v60, %v17795_v3  ;;  %v30908_v32 = vadd.f32 %v30110_v44, %v41806_v54  ;;  %v17627_v6 = vpop.f32.mrb[13].mxu0 }
 0x965   : > { %v17820_v36 = vmax.f32 %v17792_v25, %v17794_v18  ;;  %v30909_v20 = vadd.f32 %v17627_v6, %v41807_v35  ;;  %v41814_v25 = vld [vmem:[#allocation149_spill] sm:$0xff] }
 0x966   : > { %v17851_v57 = vld [vmem:[#allocation3 + $0x10] ss:$2 sm:$0xff]  ;;  %v17867_v55 = vld [vmem:[#allocation3 + $0x11] ss:$2 sm:$0xff]  ;;  %17838 = vst.msk [vmem:[#allocation3 + $0x28] sm:$0xff] %vm17832_vm3, %v17821_v26  ;;  %v17797_v28 = vadd.f32 %v30908_v32, %v38175_v30  ;;  %v41815_v6 = vld [vmem:[#allocation153_spill] sm:$0xff] }
 0x967   : > { %v17881_v39 = vmax.f32 %v17851_v57, %v17867_v55  ;;  %17837 = vst.msk [vmem:[#allocation3 + $0x20] sm:$0xff] %vm17832_vm3, %v17820_v36  ;;  %v30113_v56 = vpop.f32.mrb[14].mxu0  ;;  %v17796_v53 = vadd.f32 %v30909_v20, %v38175_v30 }
 0x968   : > { %v30910_v1 = vadd.f32 %v30113_v56, %v41808_v15  ;;  %v17639_v40 = vpop.f32.mrb[15].mxu0  ;;  %v41816_v56 = vld [vmem:[#allocation23_spill] sm:$0xff] }
 0x969   : > { %v17889_v34 = vmax.f32 %v17881_v39, 0.0  ;;  %v30911_v61 = vadd.f32 %v17639_v40, %v41809_v52  ;;  %v41817_v52 = vld [vmem:[#allocation92_spill] sm:$0xff] }
 0x96a   : > { %v17799_v48 = vadd.f32 %v30910_v1, %v38175_v30  ;;  %v17936_v50 = vld [vmem:[#allocation4 + $0x11] sm:$0xff] }
 0x96b   : > { %17919 = vst.msk [vmem:[#allocation4 + $0x21] sm:$0xff] %vm17832_vm3, %v17889_v34  ;;  %v17798_v17 = vadd.f32 %v30911_v61, %v38175_v30  ;;  %v30116_v38 = vpop.f32.mrb[16].mxu0  ;;  %v17949_v43 = vsel %vm17832_vm3, %v17936_v50, 0 }
 0x96c   : > { %v17823_v29 = vmax.f32 %v17797_v28, %v17799_v48  ;;  %v30912_v45 = vadd.f32 %v30116_v38, %v41810_v33  ;;  %v17651_v23 = vpop.f32.mrb[17].mxu0  ;;  %v38217_v8 = vand.u32 4294901760, %v17949_v43  ;;  %v41818_v33 = vld [vmem:[#allocation160_spill] sm:$0xff] }
 0x96d   : > { %v17822_v5 = vmax.f32 %v17796_v53, %v17798_v17  ;;  %v30913_v31 = vadd.f32 %v17651_v23, %v41811_v49 }
 0x96e   : > { %v17853_v22 = vld [vmem:[#allocation3 + $0x20] ss:$2 sm:$0xff]  ;;  %v17869_v42 = vld [vmem:[#allocation3 + $0x21] ss:$2 sm:$0xff]  ;;  %17840 = vst.msk [vmem:[#allocation3 + $0x38] sm:$0xff] %vm17832_vm3, %v17823_v29  ;;  %v38222_v47 = vsub.f32 %v17949_v43, %v38217_v8  ;;  %v17801_v2 = vadd.f32 %v30912_v45, %v38175_v30 }
 0x96f   : > { %v17882_v19 = vmax.f32 %v17853_v22, %v17869_v42  ;;  %17839 = vst.msk [vmem:[#allocation3 + $0x30] sm:$0xff] %vm17832_vm3, %v17822_v5  ;;  %v30119_v62 = vpop.f32.mrb[18].mxu0  ;;  %v17800_v21 = vadd.f32 %v30913_v31, %v38175_v30  ;;  %v41820_v22 = vld [vmem:[#allocation161_spill] sm:$0xff] }
 0x970   : > { %v30914_v16 = vadd.f32 %v30119_v62, %v41812_v24  ;;  %v17663_v10 = vpop.f32.mrb[19].mxu0  ;;  %v18047_v63 = vand.u32 4294901760, %v38222_v47 }
 0x971   : > { %v17890_v59 = vmax.f32 %v17882_v19, 0.0  ;;  %v30915_v51 = vadd.f32 %v17663_v10, %v41813_v14 }
 0x972   : > { %v17803_v12 = vadd.f32 %v30914_v16, %v38175_v30  ;;  %v18048_v41 = vsub.f32 %v38222_v47, %v18047_v63  ;;  %v17937_v46 = vld [vmem:[#allocation4 + $0x21] sm:$0xff] }
 0x973   : > { %17920 = vst.msk [vmem:[#allocation4 + $0x31] sm:$0xff] %vm17832_vm3, %v17890_v59  ;;  %v17802_v11 = vadd.f32 %v30915_v51, %v38175_v30  ;;  %v30122_v27 = vpop.f32.mrb[20].mxu0  ;;  %v17952_v60 = vsel %vm17832_vm3, %v17937_v46, 0  ;;  %v41822_v59 = vld [vmem:[#allocation137_spill] sm:$0xff] }
 0x974   : > { %v17825_v3 = vmax.f32 %v17801_v2, %v17803_v12  ;;  %v30916_v18 = vadd.f32 %v30122_v27, %v41814_v25  ;;  %v17675_v44 = vpop.f32.mrb[21].mxu0  ;;  %v18049_v26 = vand.u32 4294901760, %v18048_v41  ;;  %v38238_v54 = vand.u32 4294901760, %v17952_v60  ;;  %v41824_v41 = vld [vmem:[#allocation157_spill] sm:$0xff] }
 0x975   : > { %v17824_v32 = vmax.f32 %v17800_v21, %v17802_v11  ;;  %v30917_v36 = vadd.f32 %v17675_v44, %v41815_v6 }
 0x976   : > { %v17855_v35 = vld [vmem:[#allocation3 + $0x30] ss:$2 sm:$0xff]  ;;  %v17871_v20 = vld [vmem:[#allocation3 + $0x31] ss:$2 sm:$0xff]  ;;  %17842 = vst.msk [vmem:[#allocation3 + $0x48] sm:$0xff] %vm17832_vm3, %v17825_v3  ;;  %30141 = vmatmul.mubr.f32.vlgmr.msra.gmra.mrb[32].mxu1 %v18049_v26  ;;  %v38243_v57 = vsub.f32 %v17952_v60, %v38238_v54  ;;  %v17805_v28 = vadd.f32 %v30916_v18, %v38175_v30 }
 0x977   : > { %v17883_v55 = vmax.f32 %v17855_v35, %v17871_v20  ;;  %17841 = vst.msk [vmem:[#allocation3 + $0x40] sm:$0xff] %vm17832_vm3, %v17824_v32  ;;  %v30125_v39 = vpop.f32.mrb[22].mxu0  ;;  %30153 = vmatpush3.msra.mxu1 %v38167_v13  ;;  %v17804_v13 = vadd.f32 %v30917_v36, %v38175_v30  ;;  %v41825_v32 = vld [vmem:[#allocation74_spill] sm:$0xff] }
 0x978   : > { %v30918_v15 = vadd.f32 %v30125_v39, %v41816_v56  ;;  %v17687_v1 = vpop.f32.mrb[23].mxu0  ;;  %v18057_v40 = vand.u32 4294901760, %v38243_v57  ;;  %30166 = vmatprep.subr.mxu1 %v38160_v9  ;;  %v41827_v39 = vld [vmem:[#allocation173_spill] sm:$0xff] }
 0x979   : > { %v17891_v34 = vmax.f32 %v17883_v55, 0.0  ;;  %v30919_v61 = vadd.f32 %v17687_v1, %v41817_v52 }
 0x97a   : > { %v17807_v48 = vadd.f32 %v30918_v15, %v38175_v30  ;;  %v18058_v50 = vsub.f32 %v38243_v57, %v18057_v40  ;;  %v17938_v53 = vld [vmem:[#allocation4 + $0x31] sm:$0xff] }
 0x97b   : > { %17921 = vst.msk [vmem:[#allocation4 + $0x41] sm:$0xff] %vm17832_vm3, %v17891_v34  ;;  %v17806_v17 = vadd.f32 %v30919_v61, %v38175_v30  ;;  %v30128_v38 = vpop.f32.mrb[24].mxu0  ;;  %v17955_v43 = vsel %vm17832_vm3, %v17938_v53, 0 }
 0x97c   : > { %v17827_v29 = vmax.f32 %v17805_v28, %v17807_v48  ;;  %v30920_v45 = vadd.f32 %v30128_v38, %v41818_v33  ;;  %v17699_v23 = vpop.f32.mrb[25].mxu0  ;;  %v18059_v5 = vand.u32 4294901760, %v18058_v50  ;;  %v38261_v49 = vand.u32 4294901760, %v17955_v43  ;;  %v41829_v28 = vld [vmem:[#allocation82_spill] sm:$0xff] }
 0x97d   : > { %v17826_v31 = vmax.f32 %v17804_v13, %v17806_v17  ;;  %v30921_v42 = vadd.f32 %v17699_v23, %v41820_v22  ;;  %v41831_v17 = vld [vmem:[#allocation174_spill] sm:$0xff] }
 0x97e   : > { %41819 = vst [vmem:[#allocation147_spill] sm:$0xff] %v38261_v49  ;;  %v17857_v19 = vld [vmem:[#allocation3 + $0x40] ss:$2 sm:$0xff]  ;;  %v17873_v62 = vld [vmem:[#allocation3 + $0x41] ss:$2 sm:$0xff]  ;;  %17844 = vst.msk [vmem:[#allocation3 + $0x58] sm:$0xff] %vm17832_vm3, %v17827_v29  ;;  %30143 = vmatprep.mubr.f32.mxu1 %v18059_v5  ;;  %v38266_v24 = vsub.f32 %v17955_v43, %v38261_v49  ;;  %v17809_v21 = vadd.f32 %v30920_v45, %v38175_v30 }
 0x97f   : > { %v17884_v16 = vmax.f32 %v17857_v19, %v17873_v62  ;;  %17843 = vst.msk [vmem:[#allocation3 + $0x50] sm:$0xff] %vm17832_vm3, %v17826_v31  ;;  %v30131_v10 = vpop.f32.mrb[26].mxu0  ;;  %v17808_v3 = vadd.f32 %v30921_v42, %v38175_v30 }
 0x980   : > { %41821 = vst [vmem:[#allocation12_spill] sm:$0xff] %v38266_v24  ;;  %v30922_v14 = vadd.f32 %v30131_v10, %v41822_v59  ;;  %v17711_v51 = vpop.f32.mrb[27].mxu0  ;;  %v38271_v2 = vand.u32 4294901760, %v38266_v24 }
 0x981   : > { %v17892_v12 = vmax.f32 %v17884_v16, 0.0  ;;  %v30923_v46 = vadd.f32 %v17711_v51, %v41824_v41 }
 0x982   : > { %41823 = vst [vmem:[#allocation163_spill] sm:$0xff] %v38271_v2  ;;  %v17811_v11 = vadd.f32 %v30922_v14, %v38175_v30  ;;  %v18068_v27 = vsub.f32 %v38266_v24, %v38271_v2  ;;  %v17939_v60 = vld [vmem:[#allocation4 + $0x41] sm:$0xff] }
 0x983   : > { %17922 = vst.msk [vmem:[#allocation4 + $0x51] sm:$0xff] %vm17832_vm3, %v17892_v12  ;;  %v17810_v25 = vadd.f32 %v30923_v46, %v38175_v30  ;;  %v30134_v18 = vpop.f32.mrb[28].mxu0  ;;  %v17958_v44 = vsel %vm17832_vm3, %v17939_v60, 0 }
 0x984   : > { %v17829_v26 = vmax.f32 %v17809_v21, %v17811_v11  ;;  %v30924_v6 = vadd.f32 %v30134_v18, %v41825_v32  ;;  %v17723_v36 = vpop.f32.mrb[29].mxu0  ;;  %v38283_v35 = vand.u32 4294901760, %v18068_v27  ;;  %v38285_v20 = vand.u32 4294901760, %v17958_v44 }
 0x985   : > { %v17828_v55 = vmax.f32 %v17808_v3, %v17810_v25  ;;  %v30925_v56 = vadd.f32 %v17723_v36, %v41827_v39 }
 0x986   : > { %41826 = vst [vmem:[#allocation165_spill] sm:$0xff] %v38285_v20  ;;  %v17859_v15 = vld [vmem:[#allocation3 + $0x50] ss:$2 sm:$0xff]  ;;  %v17875_v1 = vld [vmem:[#allocation3 + $0x51] ss:$2 sm:$0xff]  ;;  %17846 = vst.msk [vmem:[#allocation3 + $0x68] sm:$0xff] %vm17832_vm3, %v17829_v26  ;;  %30144 = vmatmul.mubr.f32.gmra.mrb[34].mxu1 %v38283_v35  ;;  %v38291_v34 = vsub.f32 %v17958_v44, %v38285_v20  ;;  %v17813_v43 = vadd.f32 %v30924_v6, %v38175_v30 }
 0x987   : > { %v17885_v52 = vmax.f32 %v17859_v15, %v17875_v1  ;;  %17845 = vst.msk [vmem:[#allocation3 + $0x60] sm:$0xff] %vm17832_vm3, %v17828_v55  ;;  %v30137_v61 = vpop.f32.mrb[30].mxu0  ;;  %v17812_v23 = vadd.f32 %v30925_v56, %v38175_v30 }
 0x988   : > { %41828 = vst [vmem:[#allocation166_spill] sm:$0xff] %v38291_v34  ;;  %v30926_v48 = vadd.f32 %v30137_v61, %v41829_v28  ;;  %v17735_v50 = vpop.f32.mrb[31].mxu0  ;;  %v38296_v53 = vand.u32 4294901760, %v38291_v34 }
 0x989   : > { %v17893_v13 = vmax.f32 %v17885_v52, 0.0  ;;  %v30927_v38 = vadd.f32 %v17735_v50, %v41831_v17 }
 0x98a   : > { %41830 = vst [vmem:[#allocation20_spill] sm:$0xff] %v38296_v53  ;;  %v17815_v29 = vadd.f32 %v30926_v48, %v38175_v30  ;;  %v18078_v33 = vsub.f32 %v38291_v34, %v38296_v53  ;;  %v17940_v45 = vld [vmem:[#allocation4 + $0x51] sm:$0xff] }
 0x98b   : > { %17923 = vst.msk [vmem:[#allocation4 + $0x61] sm:$0xff] %vm17832_vm3, %v17893_v13  ;;  %v17814_v5 = vadd.f32 %v30927_v38, %v38175_v30  ;;  %v17961_v31 = vsel %vm17832_vm3, %v17940_v45, 0  ;;  %v17929_v48 = vld [vmem:[#allocation4 + $0x30] sm:$0xff]  ;;  %v17930_v13 = vld [vmem:[#allocation4 + $0x40] sm:$0xff] }
 0x98c   : > { %v17831_v22 = vmax.f32 %v17813_v43, %v17815_v29  ;;  %v38307_v42 = vand.u32 4294901760, %v18078_v33  ;;  %v38309_v19 = vand.u32 4294901760, %v17961_v31  ;;  %v18726_v29 = vsel %vm17832_vm3, %v17929_v48, 0  ;;  %v17931_v45 = vld [vmem:[#allocation4 + $0x50] sm:$0xff] }
 0x98d   : > { %v17830_v62 = vmax.f32 %v17812_v23, %v17814_v5  ;;  %v18729_v33 = vsel %vm17832_vm3, %v17930_v13, 0 }
 0x98e   : > { %41832 = vst [vmem:[#allocation169_spill] sm:$0xff] %v38307_v42  ;;  %41833 = vst [vmem:[#allocation171_spill] sm:$0xff] %v38309_v19  ;;  %v17861_v16 = vld [vmem:[#allocation3 + $0x60] ss:$2 sm:$0xff]  ;;  %v17877_v10 = vld [vmem:[#allocation3 + $0x61] ss:$2 sm:$0xff]  ;;  %30146 = vmatprep.mubr.f32.mxu1 %v38307_v42  ;;  %v38314_v59 = vsub.f32 %v17961_v31, %v38309_v19 }
 0x98f   : > { %17848 = vst.msk [vmem:[#allocation3 + $0x78] sm:$0xff] %vm17832_vm3, %v17831_v22  ;;  %v17886_v14 = vmax.f32 %v17861_v16, %v17877_v10  ;;  %17847 = vst.msk [vmem:[#allocation3 + $0x70] sm:$0xff] %vm17832_vm3, %v17830_v62  ;;  %v38433_v31 = vand.u32 4294901760, %v18726_v29  ;;  %v18732_v62 = vsel %vm17832_vm3, %v17931_v45, 0 }
 0x990   : > { %41834 = vst [vmem:[#allocation21_spill] sm:$0xff] %v38314_v59  ;;  %v38318_v30 = vand.u32 4294901760, %v38314_v59 }
 0x991   : > { %v17894_v51 = vmax.f32 %v17886_v14, 0.0 }
 0x992   : > { %41835 = vst [vmem:[#allocation31_spill] sm:$0xff] %v38318_v30  ;;  %v18088_v12 = vsub.f32 %v38314_v59, %v38318_v30  ;;  %v17941_v41 = vld [vmem:[#allocation4 + $0x61] sm:$0xff] }
 0x993   : > { %17924 = vst.msk [vmem:[#allocation4 + $0x71] sm:$0xff] %vm17832_vm3, %v17894_v51  ;;  %v17964_v46 = vsel %vm17832_vm3, %v17941_v41, 0  ;;  %v17932_v23 = vld [vmem:[#allocation4 + $0x60] sm:$0xff]  ;;  %v38451_v51 = vsub.f32 %v18726_v29, %v38433_v31 }
 0x994   : > { %v38324_v21 = vand.u32 4294901760, %v18088_v12  ;;  %v38326_v11 = vand.u32 4294901760, %v17964_v46  ;;  %v38453_v12 = vand.u32 4294901760, %v18732_v62 }
 0x996   : > { %41836 = vst [vmem:[#allocation29_spill] sm:$0xff] %v38324_v21  ;;  %41837 = vst [vmem:[#allocation25_spill] sm:$0xff] %v38326_v11  ;;  %v17863_v27 = vld [vmem:[#allocation3 + $0x70] ss:$2 sm:$0xff]  ;;  %v17879_v60 = vld [vmem:[#allocation3 + $0x71] ss:$2 sm:$0xff]  ;;  %30147 = vmatmul.mubr.f32.gmra.mrb[36].mxu1 %v38324_v21  ;;  %v38330_v3 = vsub.f32 %v17964_v46, %v38326_v11 }
 0x997   : > { %v17887_v25 = vmax.f32 %v17863_v27, %v17879_v60 }
 0x998   : > { %41838 = vst [vmem:[#allocation41_spill] sm:$0xff] %v38330_v3  ;;  %v38333_v18 = vand.u32 4294901760, %v38330_v3 }
 0x999   : > { %v17895_v44 = vmax.f32 %v17887_v25, 0.0 }
 0x99a   : > { %41839 = vst [vmem:[#allocation32_spill] sm:$0xff] %v38333_v18  ;;  %v18098_v26 = vsub.f32 %v38330_v3, %v38333_v18  ;;  %v17942_v32 = vld [vmem:[#allocation4 + $0x71] sm:$0xff] }
 0x99b   : > { %17925 = vst.msk [vmem:[#allocation4 + $0x81] sm:$0xff] %vm17832_vm3, %v17895_v44  ;;  %v17967_v6 = vsel %vm17832_vm3, %v17942_v32, 0  ;;  %v17933_v16 = vld [vmem:[#allocation4 + $0x70] sm:$0xff]  ;;  %v38472_v32 = vsub.f32 %v18732_v62, %v38453_v12 }
 0x99c   : > { %v38339_v36 = vand.u32 4294901760, %v18098_v26  ;;  %v38341_v55 = vand.u32 4294901760, %v17967_v6  ;;  %v18738_v60 = vsel %vm17832_vm3, %v17933_v16, 0  ;;  %v38469_v26 = vand.u32 4294901760, %v38451_v51 }
 0x99e   : > { %41840 = vst [vmem:[#allocation36_spill] sm:$0xff] %v38339_v36  ;;  %41841 = vst [vmem:[#allocation34_spill] sm:$0xff] %v38341_v55  ;;  %30149 = vmatprep.mubr.f32.mxu1 %v38339_v36  ;;  %v38345_v39 = vsub.f32 %v17967_v6, %v38341_v55  ;;  %v38474_v6 = vand.u32 4294901760, %v18738_v60 }
 0x9a0   : > { %41842 = vst [vmem:[#allocation62_spill] sm:$0xff] %v38345_v39  ;;  %v38348_v56 = vand.u32 4294901760, %v38345_v39 }
 0x9a2   : > { %41843 = vst [vmem:[#allocation38_spill] sm:$0xff] %v38348_v56  ;;  %v18108_v15 = vsub.f32 %v38345_v39, %v38348_v56 }
 0x9a4   : > { %v38352_v1 = vand.u32 4294901760, %v18108_v15 }
 0x9a6   : > { %41844 = vst [vmem:[#allocation98_spill] sm:$0xff] %v38352_v1  ;;  %30150 = vmatmul.mubr.f32.gmra.mrb[38].mxu1 %v38352_v1 }
 0x9a7   : > { %30154 = vmatprep.mubr.f32.mxu1 %v38143_v58 }
 0x9aa   : > { %30155 = vmatmul.mubr.f32.vlgmr.msra.gmra.mrb[32].mxu1 %v38217_v8 }
 0x9ab   : > { %30167 = vmatpush3.msra.mxu1 %v38160_v9  ;;  %30157 = vmatprep.mubr.f32.mxu1 %v38238_v54 }
 0x9ac   : > { %30180 = vmatprep.subr.mxu1 %v38155_v37 }
 0x9ae   : > { %30158 = vmatmul.mubr.f32.gmra.mrb[34].mxu1 %v38261_v49 }
 0x9af   : > { %30160 = vmatprep.mubr.f32.mxu1 %v38285_v20 }
 0x9b2   : > { %30161 = vmatmul.mubr.f32.gmra.mrb[36].mxu1 %v38309_v19 }
 0x9b3   : > { %30163 = vmatprep.mubr.f32.mxu1 %v38326_v11 }
 0x9b6   : > { %30164 = vmatmul.mubr.f32.gmra.mrb[38].mxu1 %v38341_v55 }
 0x9b7   : > { %30168 = vmatprep.mubr.f32.mxu1 %v38146_v0  ;;  %v17934_v0 = vld [vmem:[%s39346_s3] sm:$0xff] }
 0x9ba   : > { %30169 = vmatmul.mubr.f32.vlgmr.msra.gmra.mrb[32].mxu1 %v38222_v47 }
 0x9bb   : > { %30181 = vmatpush3.msra.mxu1 %v38155_v37  ;;  %30171 = vmatprep.mubr.f32.mxu1 %v38243_v57 }
 0x9bc   : > { %30194 = vmatprep.subr.mxu1 %v38163_v7 }
 0x9be   : > { %30172 = vmatmul.mubr.f32.gmra.mrb[34].mxu1 %v38266_v24 }
 0x9bf   : > { %30174 = vmatprep.mubr.f32.mxu1 %v38291_v34 }
 0x9c2   : > { %30175 = vmatmul.mubr.f32.gmra.mrb[36].mxu1 %v38314_v59 }
 0x9c3   : > { %30177 = vmatprep.mubr.f32.mxu1 %v38330_v3 }
 0x9c6   : > { %30178 = vmatmul.mubr.f32.gmra.mrb[38].mxu1 %v38345_v39  ;;  %v19494_v39 = vld [vmem:[#allocation4 + $0x72] sm:$0xff] }
 0x9c7   : > { %30182 = vmatprep.mubr.f32.mxu1 %v18037_v4  ;;  %v38392_v4 = vand.u32 4294901760, %v17934_v0  ;;  %v19519_v24 = vsel %vm17832_vm3, %v19494_v39, 0 }
 0x9c9   : > { %v38399_v9 = vsub.f32 %v17934_v0, %v38392_v4 }
 0x9ca   : > { %30183 = vmatmul.mubr.f32.vlgmr.msra.gmra.mrb[32].mxu1 %v18047_v63 }
 0x9cb   : > { %30195 = vmatpush3.msra.mxu1 %v38163_v7  ;;  %30185 = vmatprep.mubr.f32.mxu1 %v18057_v40  ;;  %v17926_v7 = vld [vmem:[#allocation4] sm:$0xff]  ;;  %v38405_v63 = vand.u32 4294901760, %v38399_v9 }
 0x9cc   : > { %30208 = vmatprep.subr.mxu1 %v38155_v37  ;;  %v18717_v47 = vsel %vm17832_vm3, %v17926_v7, 0  ;;  %v17928_v40 = vld [vmem:[#allocation4 + $0x20] sm:$0xff] }
 0x9cd   : > { %v38409_v57 = vand.u32 4294901760, %v18717_v47  ;;  %v18890_v52 = vsub.f32 %v38399_v9, %v38405_v63  ;;  %v18723_v28 = vsel %vm17832_vm3, %v17928_v40, 0  ;;  %v38490_v40 = vand.u32 4294901760, %v38472_v32 }
 0x9ce   : > { %30186 = vmatmul.mubr.f32.gmra.mrb[34].mxu1 %v38271_v2  ;;  %v38422_v43 = vand.u32 4294901760, %v18723_v28 }
 0x9cf   : > { %30188 = vmatprep.mubr.f32.mxu1 %v38296_v53  ;;  %v38418_v50 = vsub.f32 %v18717_v47, %v38409_v57  ;;  %v18891_v17 = vand.u32 4294901760, %v18890_v52  ;;  %v38493_v52 = vsub.f32 %v18738_v60, %v38474_v6  ;;  %v18859_v29 = vsub.f32 %v38472_v32, %v38490_v40 }
 0x9d0   : > { %v38436_v22 = vsub.f32 %v18723_v28, %v38422_v43 }
 0x9d2   : > { %30189 = vmatmul.mubr.f32.gmra.mrb[36].mxu1 %v38318_v30  ;;  %v38456_v41 = vand.u32 4294901760, %v38436_v22  ;;  %v19492_v30 = vld [vmem:[#allocation4 + $0x52] sm:$0xff] }
 0x9d3   : > { %30191 = vmatprep.mubr.f32.mxu1 %v38333_v18 }
 0x9d4   : > { %v18829_v15 = vsub.f32 %v38436_v22, %v38456_v41 }
 0x9d6   : > { %30192 = vmatmul.mubr.f32.gmra.mrb[38].mxu1 %v38348_v56 }
 0x9d7   : > { %30196 = vmatprep.mubr.f32.mxu1 %v38143_v58 }
 0x9da   : > { %30197 = vmatmul.mubr.f32.vlgmr.msra.gmra.mrb[32].mxu1 %v38217_v8 }
 0x9db   : > { %30209 = vmatpush3.msra.mxu1 %v38155_v37  ;;  %30199 = vmatprep.mubr.f32.mxu1 %v38238_v54  ;;  %v17927_v37 = vld [vmem:[#allocation4 + $0x10] sm:$0xff] }
 0x9dc   : > { %30222 = vmatprep.subr.mxu1 %v38392_v4  ;;  %v18720_v61 = vsel %vm17832_vm3, %v17927_v37, 0  ;;  %v18839_v37 = vsub.f32 %v38451_v51, %v38469_v26 }
 0x9dd   : > { %v38420_v38 = vand.u32 4294901760, %v18720_v61 }
 0x9de   : > { %30200 = vmatmul.mubr.f32.gmra.mrb[34].mxu1 %v38261_v49  ;;  %v38504_v13 = vand.u32 4294901760, %v18839_v37 }
 0x9df   : > { %30202 = vmatprep.mubr.f32.mxu1 %v38285_v20  ;;  %v38431_v5 = vsub.f32 %v18720_v61, %v38420_v38  ;;  %v38495_v61 = vand.u32 4294901760, %v18829_v15 }
 0x9e1   : > { %v38448_v14 = vand.u32 4294901760, %v38431_v5 }
 0x9e2   : > { %30203 = vmatmul.mubr.f32.gmra.mrb[36].mxu1 %v38309_v19 }
 0x9e3   : > { %30205 = vmatprep.mubr.f32.mxu1 %v38326_v11  ;;  %v18819_v44 = vsub.f32 %v38431_v5, %v38448_v14 }
 0x9e5   : > { %v38485_v47 = vand.u32 4294901760, %v18819_v44  ;;  %v19489_v44 = vld [vmem:[#allocation4 + $0x22] sm:$0xff] }
 0x9e6   : > { %30206 = vmatmul.mubr.f32.gmra.mrb[38].mxu1 %v38341_v55 }
 0x9e7   : > { %30210 = vmatprep.mubr.f32.mxu1 %v38143_v58  ;;  %v18808_v58 = vand.u32 4294901760, %v38418_v50 }
 0x9e9   : > { %v18809_v10 = vsub.f32 %v38418_v50, %v18808_v58 }
 0x9ea   : > { %30211 = vmatmul.mubr.f32.vlgmr.msra.gmra.mrb[32].mxu1 %v38217_v8  ;;  %v38438_v8 = vand.u32 4294901760, %v18729_v33 }
 0x9eb   : > { %30223 = vmatpush3.msra.mxu1 %v38392_v4  ;;  %30213 = vmatprep.mubr.f32.mxu1 %v38238_v54  ;;  %v18735_v54 = vsel %vm17832_vm3, %v17932_v23, 0  ;;  %v18810_v25 = vand.u32 4294901760, %v18809_v10 }
 0x9ec   : > { %30236 = vmatprep.subr.mxu1 %v18891_v17  ;;  %v38459_v46 = vsub.f32 %v18729_v33, %v38438_v8  ;;  %v38461_v27 = vand.u32 4294901760, %v18735_v54  ;;  %v38509_v33 = vand.u32 4294901760, %v38493_v52 }
 0x9ee   : > { %30214 = vmatmul.mubr.f32.gmra.mrb[34].mxu1 %v38261_v49  ;;  %v38479_v0 = vand.u32 4294901760, %v38459_v46  ;;  %v38482_v7 = vsub.f32 %v18735_v54, %v38461_v27  ;;  %v18879_v62 = vsub.f32 %v38493_v52, %v38509_v33 }
 0x9ef   : > { %30216 = vmatprep.mubr.f32.mxu1 %v38285_v20 }
 0x9f0   : > { %v18849_v28 = vsub.f32 %v38459_v46, %v38479_v0  ;;  %v38500_v48 = vand.u32 4294901760, %v38482_v7  ;;  %v38526_v16 = vand.u32 4294901760, %v18879_v62  ;;  %v19491_v62 = vld [vmem:[#allocation4 + $0x42] sm:$0xff] }
 0x9f2   : > { %30217 = vmatmul.mubr.f32.gmra.mrb[36].mxu1 %v38309_v19  ;;  %v38512_v45 = vand.u32 4294901760, %v18849_v28  ;;  %v18869_v23 = vsub.f32 %v38482_v7, %v38500_v48  ;;  %v19504_v28 = vsel %vm17832_vm3, %v19489_v44, 0 }
 0x9f3   : > { %30219 = vmatprep.mubr.f32.mxu1 %v38326_v11  ;;  %v38594_v56 = vand.u32 4294901760, %v19504_v28 }
 0x9f4   : > { %v38522_v54 = vand.u32 4294901760, %v18869_v23 }
 0x9f6   : > { %30220 = vmatmul.mubr.f32.gmra.mrb[38].mxu1 %v38341_v55 }
 0x9f7   : > { %30224 = vmatprep.mubr.f32.mxu1 %v18810_v25 }
 0x9fa   : > { %30225 = vmatmul.mubr.f32.vlgmr.msra.gmra.mrb[32].mxu1 %v38485_v47 }
 0x9fb   : > { %30237 = vmatpush3.msra.mxu1 %v18891_v17  ;;  %30227 = vmatprep.mubr.f32.mxu1 %v38495_v61  ;;  %v38518_v17 = vand.u32 4294901760, %v18859_v29  ;;  %v19490_v29 = vld [vmem:[#allocation4 + $0x32] sm:$0xff] }
 0x9fc   : > { %30250 = vmatprep.subr.mxu1 %v38399_v9  ;;  %v19507_v18 = vsel %vm17832_vm3, %v19490_v29, 0  ;;  %v38608_v29 = vsub.f32 %v19504_v28, %v38594_v56 }
 0x9fe   : > { %30228 = vmatmul.mubr.f32.gmra.mrb[34].mxu1 %v38504_v13 }
 0x9ff   : > { %30230 = vmatprep.mubr.f32.mxu1 %v38512_v45 }
 0xa02   : > { %30231 = vmatmul.mubr.f32.gmra.mrb[36].mxu1 %v38518_v17 }
 0xa03   : > { %30233 = vmatprep.mubr.f32.mxu1 %v38522_v54 }
 0xa06   : > { %30234 = vmatmul.mubr.f32.gmra.mrb[38].mxu1 %v38526_v16 }
 0xa07   : > { %30238 = vmatprep.mubr.f32.mxu1 %v38409_v57 }
 0xa0a   : > { %30239 = vmatmul.mubr.f32.vlgmr.msra.gmra.mrb[32].mxu1 %v38420_v38 }
 0xa0b   : > { %30251 = vmatpush3.msra.mxu1 %v38399_v9  ;;  %30241 = vmatprep.mubr.f32.mxu1 %v38422_v43  ;;  %v25155_v9 = vld [vmem:[%s39346_s3 + $0x10] sm:$0xff] }
 0xa0c   : > { %30264 = vmatprep.subr.mxu1 %v38392_v4 }
 0xa0e   : > { %30242 = vmatmul.mubr.f32.gmra.mrb[34].mxu1 %v38433_v31 }
 0xa0f   : > { %30244 = vmatprep.mubr.f32.mxu1 %v38438_v8 }
 0xa12   : > { %30245 = vmatmul.mubr.f32.gmra.mrb[36].mxu1 %v38453_v12 }
 0xa13   : > { %30247 = vmatprep.mubr.f32.mxu1 %v38461_v27 }
 0xa16   : > { %30248 = vmatmul.mubr.f32.gmra.mrb[38].mxu1 %v38474_v6 }
 0xa17   : > { %30252 = vmatprep.mubr.f32.mxu1 %v38418_v50 }
 0xa1a   : > { %30253 = vmatmul.mubr.f32.vlgmr.msra.gmra.mrb[32].mxu1 %v38431_v5 }
 0xa1b   : > { %30265 = vmatpush3.msra.mxu1 %v38392_v4  ;;  %30255 = vmatprep.mubr.f32.mxu1 %v38436_v22 }
 0xa1c   : > { %30278 = vmatprep.subr.mxu1 %v38405_v63 }
 0xa1e   : > { %30256 = vmatmul.mubr.f32.gmra.mrb[34].mxu1 %v38451_v51 }
 0xa1f   : > { %30258 = vmatprep.mubr.f32.mxu1 %v38459_v46 }
 0xa22   : > { %30259 = vmatmul.mubr.f32.gmra.mrb[36].mxu1 %v38472_v32 }
 0xa23   : > { %30261 = vmatprep.mubr.f32.mxu1 %v38482_v7 }
 0xa26   : > { %30262 = vmatmul.mubr.f32.gmra.mrb[38].mxu1 %v38493_v52 }
 0xa27   : > { %30266 = vmatprep.mubr.f32.mxu1 %v18808_v58  ;;  %v19487_v58 = vld [vmem:[#allocation4 + $0x2] sm:$0xff] }
 0xa28   : > { %v19498_v10 = vsel %vm17832_vm3, %v19487_v58, 0 }
 0xa29   : > { %v38581_v25 = vand.u32 4294901760, %v19498_v10 }
 0xa2a   : > { %30267 = vmatmul.mubr.f32.vlgmr.msra.gmra.mrb[32].mxu1 %v38448_v14 }
 0xa2b   : > { %30279 = vmatpush3.msra.mxu1 %v38405_v63  ;;  %30269 = vmatprep.mubr.f32.mxu1 %v38456_v41  ;;  %v38564_v63 = vand.u32 4294901760, %v25155_v9  ;;  %v38590_v23 = vsub.f32 %v19498_v10, %v38581_v25  ;;  %v19493_v10 = vld [vmem:[#allocation4 + $0x62] sm:$0xff] }
 0xa2c   : > { %30292 = vmatprep.subr.mxu1 %v38392_v4  ;;  %v19516_v2 = vsel %vm17832_vm3, %v19493_v10, 0 }
 0xa2d   : > { %v38571_v50 = vsub.f32 %v25155_v9, %v38564_v63  ;;  %v38633_v34 = vand.u32 4294901760, %v19516_v2 }
 0xa2e   : > { %30270 = vmatmul.mubr.f32.gmra.mrb[34].mxu1 %v38469_v26 }
 0xa2f   : > { %30272 = vmatprep.mubr.f32.mxu1 %v38479_v0  ;;  %v38577_v60 = vand.u32 4294901760, %v38571_v50  ;;  %v38654_v20 = vsub.f32 %v19516_v2, %v38633_v34 }
 0xa31   : > { %v19671_v15 = vsub.f32 %v38571_v50, %v38577_v60  ;;  %v38672_v21 = vand.u32 4294901760, %v38654_v20 }
 0xa32   : > { %30273 = vmatmul.mubr.f32.gmra.mrb[36].mxu1 %v38490_v40 }
 0xa33   : > { %30275 = vmatprep.mubr.f32.mxu1 %v38500_v48  ;;  %v19672_v9 = vand.u32 4294901760, %v19671_v15  ;;  %v38605_v15 = vand.u32 4294901760, %v19507_v18  ;;  %v19650_v42 = vsub.f32 %v38654_v20, %v38672_v21 }
 0xa35   : > { %v38623_v28 = vsub.f32 %v19507_v18, %v38605_v15 }
 0xa36   : > { %30276 = vmatmul.mubr.f32.gmra.mrb[38].mxu1 %v38509_v33 }
 0xa37   : > { %30280 = vmatprep.mubr.f32.mxu1 %v38409_v57  ;;  %v38641_v55 = vand.u32 4294901760, %v38623_v28 }
 0xa3a   : > { %30281 = vmatmul.mubr.f32.vlgmr.msra.gmra.mrb[32].mxu1 %v38420_v38 }
 0xa3b   : > { %30293 = vmatpush3.msra.mxu1 %v38392_v4  ;;  %30283 = vmatprep.mubr.f32.mxu1 %v38422_v43  ;;  %v19488_v4 = vld [vmem:[#allocation4 + $0x12] sm:$0xff] }
 0xa3c   : > { %30306 = vmatprep.subr.mxu1 %v38564_v63  ;;  %v19501_v37 = vsel %vm17832_vm3, %v19488_v4, 0  ;;  %v19510_v4 = vsel %vm17832_vm3, %v19491_v62, 0  ;;  %v19513_v62 = vsel %vm17832_vm3, %v19492_v30, 0  ;;  %v38628_v30 = vand.u32 4294901760, %v38608_v29 }
 0xa3d   : > { %v38592_v58 = vand.u32 4294901760, %v19501_v37  ;;  %v38610_v53 = vand.u32 4294901760, %v19510_v4  ;;  %v38625_v59 = vand.u32 4294901760, %v19513_v62 }
 0xa3e   : > { %30284 = vmatmul.mubr.f32.gmra.mrb[34].mxu1 %v38433_v31  ;;  %v19610_v19 = vsub.f32 %v38608_v29, %v38628_v30 }
 0xa3f   : > { %30286 = vmatprep.mubr.f32.mxu1 %v38438_v8  ;;  %v38603_v44 = vsub.f32 %v19501_v37, %v38592_v58  ;;  %v38631_v10 = vsub.f32 %v19510_v4, %v38610_v53  ;;  %v38644_v11 = vsub.f32 %v19513_v62, %v38625_v59  ;;  %v38646_v4 = vand.u32 4294901760, %v19519_v24 }
 0xa40   : > { %v19620_v62 = vsub.f32 %v38623_v28, %v38641_v55  ;;  %v38667_v36 = vand.u32 4294901760, %v19610_v19 }
 0xa41   : > { %v38620_v3 = vand.u32 4294901760, %v38603_v44  ;;  %v38651_v39 = vand.u32 4294901760, %v38631_v10  ;;  %v38662_v49 = vand.u32 4294901760, %v38644_v11  ;;  %v38665_v1 = vsub.f32 %v19519_v24, %v38646_v4 }
 0xa42   : > { %30287 = vmatmul.mubr.f32.gmra.mrb[36].mxu1 %v38453_v12  ;;  %41845 = vst [vmem:[#allocation42_spill] sm:$0xff] %v38667_v36 }
 0xa43   : > { %30289 = vmatprep.mubr.f32.mxu1 %v38461_v27  ;;  %v19600_v18 = vsub.f32 %v38603_v44, %v38620_v3  ;;  %v19630_v2 = vsub.f32 %v38631_v10, %v38651_v39  ;;  %v38681_v24 = vand.u32 4294901760, %v38665_v1 }
 0xa45   : > { %41846 = vst [vmem:[#allocation95_spill] sm:$0xff] %v38681_v24  ;;  %v38684_v19 = vand.u32 4294901760, %v19630_v2 }
 0xa46   : > { %30290 = vmatmul.mubr.f32.gmra.mrb[38].mxu1 %v38474_v6 }
 0xa47   : > { %30294 = vmatprep.mubr.f32.mxu1 %v38409_v57  ;;  %v40380_v57 = vand.u32 4294901760, %v38590_v23 }
 0xa49   : > { %v19590_v37 = vsub.f32 %v38590_v23, %v40380_v57 }
 0xa4a   : > { %30295 = vmatmul.mubr.f32.vlgmr.msra.gmra.mrb[32].mxu1 %v38420_v38 }
 0xa4b   : > { %30307 = vmatpush3.msra.mxu1 %v38564_v63  ;;  %30297 = vmatprep.mubr.f32.mxu1 %v38422_v43  ;;  %v19591_v57 = vand.u32 4294901760, %v19590_v37  ;;  %v38657_v37 = vand.u32 4294901760, %v19600_v18  ;;  %v19640_v18 = vsub.f32 %v38644_v11, %v38662_v49 }
 0xa4c   : > { %30320 = vmatprep.subr.mxu1 %v19672_v9 }
 0xa4e   : > { %30298 = vmatmul.mubr.f32.gmra.mrb[34].mxu1 %v38433_v31 }
 0xa4f   : > { %30300 = vmatprep.mubr.f32.mxu1 %v38438_v8 }
 0xa52   : > { %30301 = vmatmul.mubr.f32.gmra.mrb[36].mxu1 %v38453_v12 }
 0xa53   : > { %30303 = vmatprep.mubr.f32.mxu1 %v38461_v27 }
 0xa56   : > { %30304 = vmatmul.mubr.f32.gmra.mrb[38].mxu1 %v38474_v6 }
 0xa57   : > { %30308 = vmatprep.mubr.f32.mxu1 %v19591_v57  ;;  %v38676_v57 = vand.u32 4294901760, %v19620_v62  ;;  %v19660_v62 = vsub.f32 %v38665_v1, %v38681_v24 }
 0xa59   : > { %v38698_v2 = vand.u32 4294901760, %v19660_v62 }
 0xa5a   : > { %30309 = vmatmul.mubr.f32.vlgmr.msra.gmra.mrb[32].mxu1 %v38657_v37 }
 0xa5b   : > { %30321 = vmatpush3.msra.mxu1 %v19672_v9  ;;  %30311 = vmatprep.mubr.f32.mxu1 %v38667_v36  ;;  %v38690_v9 = vand.u32 4294901760, %v19640_v18  ;;  %v38694_v36 = vand.u32 4294901760, %v19650_v42  ;;  %v41847_v42 = vand.u32 4294901760, %v38590_v23 }
 0xa5c   : > { %30334 = vmatprep.subr.mxu1 %v38571_v50 }
 0xa5e   : > { %30312 = vmatmul.mubr.f32.gmra.mrb[34].mxu1 %v38676_v57 }
 0xa5f   : > { %30314 = vmatprep.mubr.f32.mxu1 %v38684_v19 }
 0xa62   : > { %30315 = vmatmul.mubr.f32.gmra.mrb[36].mxu1 %v38690_v9 }
 0xa63   : > { %30317 = vmatprep.mubr.f32.mxu1 %v38694_v36 }
 0xa66   : > { %30318 = vmatmul.mubr.f32.gmra.mrb[38].mxu1 %v38698_v2 }
 0xa67   : > { %30322 = vmatprep.mubr.f32.mxu1 %v38581_v25 }
 0xa6a   : > { %30323 = vmatmul.mubr.f32.vlgmr.msra.gmra.mrb[32].mxu1 %v38592_v58 }
 0xa6b   : > { %30335 = vmatpush3.msra.mxu1 %v38571_v50  ;;  %30325 = vmatprep.mubr.f32.mxu1 %v38594_v56  ;;  %v25156_v50 = vld [vmem:[%s39346_s3 + $0x18] sm:$0xff] }
 0xa6c   : > { %30348 = vmatprep.subr.mxu1 %v38564_v63 }
 0xa6e   : > { %30326 = vmatmul.mubr.f32.gmra.mrb[34].mxu1 %v38605_v15 }
 0xa6f   : > { %30328 = vmatprep.mubr.f32.mxu1 %v38610_v53 }
 0xa72   : > { %30329 = vmatmul.mubr.f32.gmra.mrb[36].mxu1 %v38625_v59 }
 0xa73   : > { %30331 = vmatprep.mubr.f32.mxu1 %v38633_v34 }
 0xa76   : > { %30332 = vmatmul.mubr.f32.gmra.mrb[38].mxu1 %v38646_v4 }
 0xa77   : > { %30336 = vmatprep.mubr.f32.mxu1 %v38590_v23 }
 0xa7a   : > { %30337 = vmatmul.mubr.f32.vlgmr.msra.gmra.mrb[32].mxu1 %v38603_v44 }
 0xa7b   : > { %30349 = vmatpush3.msra.mxu1 %v38564_v63  ;;  %30339 = vmatprep.mubr.f32.mxu1 %v38608_v29 }
 0xa7c   : > { %30362 = vmatprep.subr.mxu1 %v38577_v60 }
 0xa7e   : > { %30340 = vmatmul.mubr.f32.gmra.mrb[34].mxu1 %v38623_v28 }
 0xa7f   : > { %30342 = vmatprep.mubr.f32.mxu1 %v38631_v10 }
 0xa82   : > { %30343 = vmatmul.mubr.f32.gmra.mrb[36].mxu1 %v38644_v11 }
 0xa83   : > { %30345 = vmatprep.mubr.f32.mxu1 %v38654_v20 }
 0xa86   : > { %30346 = vmatmul.mubr.f32.gmra.mrb[38].mxu1 %v38665_v1 }
 0xa87   : > { %30350 = vmatprep.mubr.f32.mxu1 %v41847_v42  ;;  %v20283_v42 = vld [vmem:[#allocation4 + $0x80] sm:$0xff] }
 0xa8a   : > { %30351 = vmatmul.mubr.f32.vlgmr.msra.gmra.mrb[32].mxu1 %v38620_v3 }
 0xa8b   : > { %30363 = vmatpush3.msra.mxu1 %v38577_v60  ;;  %30353 = vmatprep.mubr.f32.mxu1 %v38628_v30  ;;  %v38736_v60 = vand.u32 4294901760, %v25156_v50 }
 0xa8c   : > { %30376 = vmatprep.subr.mxu1 %v38564_v63 }
 0xa8d   : > { %v20458_v23 = vsub.f32 %v25156_v50, %v38736_v60  ;;  %v20308_v50 = vsel %vm17832_vm3, %v20283_v42, 0 }
 0xa8e   : > { %30354 = vmatmul.mubr.f32.gmra.mrb[34].mxu1 %v38641_v55 }
 0xa8f   : > { %30356 = vmatprep.mubr.f32.mxu1 %v38651_v39  ;;  %v20459_v18 = vand.u32 4294901760, %v20458_v23 }
 0xa91   : > { %v20460_v62 = vsub.f32 %v20458_v23, %v20459_v18 }
 0xa92   : > { %30357 = vmatmul.mubr.f32.gmra.mrb[36].mxu1 %v38662_v49 }
 0xa93   : > { %30359 = vmatprep.mubr.f32.mxu1 %v38672_v21 }
 0xa96   : > { %30360 = vmatmul.mubr.f32.gmra.mrb[38].mxu1 %v38681_v24 }
 0xa97   : > { %30364 = vmatprep.mubr.f32.mxu1 %v38581_v25 }
 0xa9a   : > { %30365 = vmatmul.mubr.f32.vlgmr.msra.gmra.mrb[32].mxu1 %v38592_v58 }
 0xa9b   : > { %30377 = vmatpush3.msra.mxu1 %v38564_v63  ;;  %30367 = vmatprep.mubr.f32.mxu1 %v38594_v56  ;;  %v20461_v63 = vand.u32 4294901760, %v20460_v62 }
 0xa9c   : > { %30390 = vmatprep.subr.mxu1 %v38736_v60 }
 0xa9e   : > { %30368 = vmatmul.mubr.f32.gmra.mrb[34].mxu1 %v38605_v15 }
 0xa9f   : > { %30370 = vmatprep.mubr.f32.mxu1 %v38610_v53 }
 0xaa2   : > { %30371 = vmatmul.mubr.f32.gmra.mrb[36].mxu1 %v38625_v59 }
 0xaa3   : > { %30373 = vmatprep.mubr.f32.mxu1 %v38633_v34 }
 0xaa6   : > { %30374 = vmatmul.mubr.f32.gmra.mrb[38].mxu1 %v38646_v4 }
 0xaa7   : > { %30378 = vmatprep.mubr.f32.mxu1 %v38581_v25  ;;  %v38757_v25 = vand.u32 4294901760, %v20308_v50 }
 0xaa9   : > { %v38762_v62 = vsub.f32 %v20308_v50, %v38757_v25  ;;  %v41854_v50 = vld [vmem:[#allocation171_spill] sm:$0xff] }
 0xaaa   : > { %30379 = vmatmul.mubr.f32.vlgmr.msra.gmra.mrb[32].mxu1 %v38592_v58 }
 0xaab   : > { %30391 = vmatpush3.msra.mxu1 %v38736_v60  ;;  %30381 = vmatprep.mubr.f32.mxu1 %v38594_v56  ;;  %v38767_v42 = vand.u32 4294901760, %v38762_v62 }
 0xaac   : > { %30404 = vmatprep.subr.mxu1 %v20461_v63 }
 0xaad   : > { %v20449_v24 = vsub.f32 %v38762_v62, %v38767_v42 }
 0xaae   : > { %30382 = vmatmul.mubr.f32.gmra.mrb[34].mxu1 %v38605_v15 }
 0xaaf   : > { %30384 = vmatprep.mubr.f32.mxu1 %v38610_v53 }
 0xab2   : > { %30385 = vmatmul.mubr.f32.gmra.mrb[36].mxu1 %v38625_v59 }
 0xab3   : > { %30387 = vmatprep.mubr.f32.mxu1 %v38633_v34 }
 0xab6   : > { %30388 = vmatmul.mubr.f32.gmra.mrb[38].mxu1 %v38646_v4 }
 0xab7   : > { %30392 = vmatprep.mubr.f32.mxu1 %v38485_v47  ;;  %v38775_v47 = vand.u32 4294901760, %v20449_v24 }
 0xaba   : > { %30393 = vmatmul.mubr.f32.vlgmr.msra.gmra.mrb[32].mxu1 %v38495_v61 }
 0xabb   : > { %30405 = vmatpush3.msra.mxu1 %v20461_v63  ;;  %30395 = vmatprep.mubr.f32.mxu1 %v38504_v13  ;;  %v41853_v63 = vld [vmem:[#allocation165_spill] sm:$0xff] }
 0xabc   : > { %30418 = vmatprep.subr.mxu1 %v20458_v23 }
 0xabe   : > { %30396 = vmatmul.mubr.f32.gmra.mrb[34].mxu1 %v38512_v45 }
 0xabf   : > { %30398 = vmatprep.mubr.f32.mxu1 %v38518_v17 }
 0xac2   : > { %30399 = vmatmul.mubr.f32.gmra.mrb[36].mxu1 %v38522_v54 }
 0xac3   : > { %30401 = vmatprep.mubr.f32.mxu1 %v38526_v16  ;;  %v41849_v16 = vld [vmem:[#allocation29_spill] sm:$0xff] }
 0xac6   : > { %30402 = vmatmul.mubr.f32.gmra.mrb[38].mxu1 %v38775_v47 }
 0xac7   : > { %30406 = vmatprep.mubr.f32.mxu1 %v38420_v38 }
 0xaca   : > { %30407 = vmatmul.mubr.f32.vlgmr.msra.gmra.mrb[32].mxu1 %v38422_v43 }
 0xacb   : > { %30419 = vmatpush3.msra.mxu1 %v20458_v23  ;;  %30409 = vmatprep.mubr.f32.mxu1 %v38433_v31  ;;  %v41851_v23 = vld [vmem:[#allocation98_spill] sm:$0xff] }
 0xacc   : > { %30432 = vmatprep.subr.mxu1 %v38736_v60 }
 0xace   : > { %30410 = vmatmul.mubr.f32.gmra.mrb[34].mxu1 %v38438_v8 }
 0xacf   : > { %30412 = vmatprep.mubr.f32.mxu1 %v38453_v12 }
 0xad2   : > { %30413 = vmatmul.mubr.f32.gmra.mrb[36].mxu1 %v38461_v27 }
 0xad3   : > { %30415 = vmatprep.mubr.f32.mxu1 %v38474_v6 }
 0xad6   : > { %30416 = vmatmul.mubr.f32.gmra.mrb[38].mxu1 %v38757_v25 }
 0xad7   : > { %30420 = vmatprep.mubr.f32.mxu1 %v38431_v5  ;;  %v25157_v5 = vld [vmem:[%s39346_s3 + $0x20] sm:$0xff] }
 0xada   : > { %30421 = vmatmul.mubr.f32.vlgmr.msra.gmra.mrb[32].mxu1 %v38436_v22  ;;  %v38809_v22 = vand.u32 4294901760, %v25157_v5 }
 0xadb   : > { %30433 = vmatpush3.msra.mxu1 %v38736_v60  ;;  %30423 = vmatprep.mubr.f32.mxu1 %v38451_v51  ;;  %v21065_v51 = vld [vmem:[#allocation4 + $0x11] sm:$0xff] }
 0xadc   : > { %30446 = vmatprep.subr.mxu1 %v20459_v18 }
 0xade   : > { %30424 = vmatmul.mubr.f32.gmra.mrb[34].mxu1 %v38459_v46  ;;  %v21076_v46 = vsel %vm17832_vm3, %v21065_v51, 0  ;;  %v41856_v51 = vld [vmem:[#allocation34_spill] sm:$0xff] }
 0xadf   : > { %30426 = vmatprep.mubr.f32.mxu1 %v38472_v32 }
 0xae2   : > { %30427 = vmatmul.mubr.f32.gmra.mrb[36].mxu1 %v38482_v7 }
 0xae3   : > { %30429 = vmatprep.mubr.f32.mxu1 %v38493_v52 }
 0xae6   : > { %30430 = vmatmul.mubr.f32.gmra.mrb[38].mxu1 %v38762_v62 }
 0xae7   : > { %30434 = vmatprep.mubr.f32.mxu1 %v38448_v14  ;;  %v21247_v14 = vsub.f32 %v25157_v5, %v38809_v22  ;;  %v41855_v5 = vld [vmem:[#allocation25_spill] sm:$0xff] }
 0xaea   : > { %30435 = vmatmul.mubr.f32.vlgmr.msra.gmra.mrb[32].mxu1 %v38456_v41  ;;  %v38818_v41 = vand.u32 4294901760, %v21247_v14 }
 0xaeb   : > { %30447 = vmatpush3.msra.mxu1 %v20459_v18  ;;  %30437 = vmatprep.mubr.f32.mxu1 %v38469_v26  ;;  %v21066_v26 = vld [vmem:[#allocation4 + $0x21] sm:$0xff] }
 0xaec   : > { %30460 = vmatprep.subr.mxu1 %v38736_v60  ;;  %v21249_v32 = vsub.f32 %v21247_v14, %v38818_v41  ;;  %v21079_v7 = vsel %vm17832_vm3, %v21066_v26, 0  ;;  %v41859_v26 = vld [vmem:[#allocation21_spill] sm:$0xff] }
 0xaed   : > { %v38829_v52 = vand.u32 4294901760, %v21079_v7 }
 0xaee   : > { %30438 = vmatmul.mubr.f32.gmra.mrb[34].mxu1 %v38479_v0  ;;  %v38824_v0 = vand.u32 4294901760, %v21076_v46 }
 0xaef   : > { %30440 = vmatprep.mubr.f32.mxu1 %v38490_v40  ;;  %v21250_v40 = vand.u32 4294901760, %v21249_v32  ;;  %v41860_v32 = vld [vmem:[#allocation41_spill] sm:$0xff] }
 0xaf0   : > { %v21166_v61 = vsub.f32 %v21076_v46, %v38824_v0  ;;  %v41858_v46 = vld [vmem:[#allocation166_spill] sm:$0xff] }
 0xaf2   : > { %30441 = vmatmul.mubr.f32.gmra.mrb[36].mxu1 %v38500_v48  ;;  %v38836_v48 = vsub.f32 %v21079_v7, %v38829_v52  ;;  %v21167_v13 = vand.u32 4294901760, %v21166_v61  ;;  %v41861_v7 = vld [vmem:[#allocation62_spill] sm:$0xff] }
 0xaf3   : > { %30443 = vmatprep.mubr.f32.mxu1 %v38509_v33  ;;  %v21072_v33 = vld [vmem:[#allocation4 + $0x81] sm:$0xff] }
 0xaf4   : > { %v21168_v45 = vsub.f32 %v21166_v61, %v21167_v13 }
 0xaf6   : > { %30444 = vmatmul.mubr.f32.gmra.mrb[38].mxu1 %v38767_v42  ;;  %v21169_v54 = vand.u32 4294901760, %v21168_v45  ;;  %v41865_v45 = vld [vmem:[#allocation32_spill] sm:$0xff] }
 0xaf7   : > { %30448 = vmatprep.mubr.f32.mxu1 %v38420_v38 }
 0xafa   : > { %30449 = vmatmul.mubr.f32.vlgmr.msra.gmra.mrb[32].mxu1 %v38422_v43 }
 0xafb   : > { %30461 = vmatpush3.msra.mxu1 %v38736_v60  ;;  %30451 = vmatprep.mubr.f32.mxu1 %v38433_v31  ;;  %v41850_v60 = vld [vmem:[#allocation36_spill] sm:$0xff] }
 0xafc   : > { %30474 = vmatprep.subr.mxu1 %v38809_v22 }
 0xafe   : > { %30452 = vmatmul.mubr.f32.gmra.mrb[34].mxu1 %v38438_v8 }
 0xaff   : > { %30454 = vmatprep.mubr.f32.mxu1 %v38453_v12 }
 0xb02   : > { %30455 = vmatmul.mubr.f32.gmra.mrb[36].mxu1 %v38461_v27 }
 0xb03   : > { %30457 = vmatprep.mubr.f32.mxu1 %v38474_v6 }
 0xb06   : > { %30458 = vmatmul.mubr.f32.gmra.mrb[38].mxu1 %v38757_v25 }
 0xb07   : > { %30462 = vmatprep.mubr.f32.mxu1 %v38420_v38  ;;  %v38841_v38 = vand.u32 4294901760, %v38836_v48 }
 0xb0a   : > { %30463 = vmatmul.mubr.f32.vlgmr.msra.gmra.mrb[32].mxu1 %v38422_v43  ;;  %v21097_v43 = vsel %vm17832_vm3, %v21072_v33, 0  ;;  %v41864_v33 = vld [vmem:[#allocation31_spill] sm:$0xff] }
 0xb0b   : > { %30475 = vmatpush3.msra.mxu1 %v38809_v22  ;;  %30465 = vmatprep.mubr.f32.mxu1 %v38433_v31  ;;  %v21178_v31 = vsub.f32 %v38836_v48, %v38841_v38  ;;  %v38848_v17 = vand.u32 4294901760, %v21097_v43 }
 0xb0c   : > { %30488 = vmatprep.subr.mxu1 %v21250_v40 }
 0xb0e   : > { %30466 = vmatmul.mubr.f32.gmra.mrb[34].mxu1 %v38438_v8  ;;  %v38851_v8 = vand.u32 4294901760, %v21178_v31 }
 0xb0f   : > { %30468 = vmatprep.mubr.f32.mxu1 %v38453_v12  ;;  %v38854_v12 = vsub.f32 %v21097_v43, %v38848_v17  ;;  %v41866_v43 = vld [vmem:[#allocation38_spill] sm:$0xff] }
 0xb12   : > { %30469 = vmatmul.mubr.f32.gmra.mrb[36].mxu1 %v38461_v27  ;;  %v38859_v27 = vand.u32 4294901760, %v38854_v12 }
 0xb13   : > { %30471 = vmatprep.mubr.f32.mxu1 %v38474_v6  ;;  %v41848_v6 = vld [vmem:[#allocation169_spill] sm:$0xff] }
 0xb14   : > { %v21238_v24 = vsub.f32 %v38854_v12, %v38859_v27 }
 0xb16   : > { %30472 = vmatmul.mubr.f32.gmra.mrb[38].mxu1 %v38757_v25  ;;  %v38867_v18 = vand.u32 4294901760, %v21238_v24 }
 0xb17   : > { %30476 = vmatprep.mubr.f32.mxu1 %v21169_v54 }
 0xb1a   : > { %30477 = vmatmul.mubr.f32.vlgmr.msra.gmra.mrb[32].mxu1 %v38851_v8 }
 0xb1b   : > { %30489 = vmatpush3.msra.mxu1 %v21250_v40  ;;  %30479 = vmatprep.mubr.f32.mxu1 %v38283_v35  ;;  %v41852_v35 = vld [vmem:[#allocation147_spill] sm:$0xff] }
 0xb1c   : > { %30502 = vmatprep.subr.mxu1 %v21247_v14  ;;  %v41862_v40 = vld [vmem:[#allocation163_spill] sm:$0xff] }
 0xb1e   : > { %30480 = vmatmul.mubr.f32.gmra.mrb[34].mxu1 %v41848_v6 }
 0xb1f   : > { %30482 = vmatprep.mubr.f32.mxu1 %v41849_v16  ;;  %v21861_v16 = vld [vmem:[#allocation4 + $0x82] sm:$0xff] }
 0xb20   : > { %v21886_v24 = vsel %vm17832_vm3, %v21861_v16, 0 }
 0xb22   : > { %30483 = vmatmul.mubr.f32.gmra.mrb[36].mxu1 %v41850_v60 }
 0xb23   : > { %30485 = vmatprep.mubr.f32.mxu1 %v41851_v23  ;;  %v41867_v23 = vld [vmem:[#allocation42_spill] sm:$0xff] }
 0xb26   : > { %30486 = vmatmul.mubr.f32.gmra.mrb[38].mxu1 %v38867_v18 }
 0xb27   : > { %30490 = vmatprep.mubr.f32.mxu1 %v38824_v0 }
 0xb2a   : > { %30491 = vmatmul.mubr.f32.vlgmr.msra.gmra.mrb[32].mxu1 %v38829_v52 }
 0xb2b   : > { %30503 = vmatpush3.msra.mxu1 %v21247_v14  ;;  %30493 = vmatprep.mubr.f32.mxu1 %v41852_v35  ;;  %v41857_v14 = vld [vmem:[#allocation12_spill] sm:$0xff] }
 0xb2c   : > { %30516 = vmatprep.subr.mxu1 %v38809_v22 }
 0xb2e   : > { %30494 = vmatmul.mubr.f32.gmra.mrb[34].mxu1 %v41853_v63 }
 0xb2f   : > { %30496 = vmatprep.mubr.f32.mxu1 %v41854_v50 }
 0xb32   : > { %30497 = vmatmul.mubr.f32.gmra.mrb[36].mxu1 %v41855_v5 }
 0xb33   : > { %30499 = vmatprep.mubr.f32.mxu1 %v41856_v51 }
 0xb36   : > { %30500 = vmatmul.mubr.f32.gmra.mrb[38].mxu1 %v38848_v17 }
 0xb37   : > { %30504 = vmatprep.mubr.f32.mxu1 %v21166_v61  ;;  %v41863_v61 = vld [vmem:[#allocation20_spill] sm:$0xff] }
 0xb3a   : > { %30505 = vmatmul.mubr.f32.vlgmr.msra.gmra.mrb[32].mxu1 %v38836_v48 }
 0xb3b   : > { %30517 = vmatpush3.msra.mxu1 %v38809_v22  ;;  %30507 = vmatprep.mubr.f32.mxu1 %v41857_v14  ;;  %v22649_v14 = vld [vmem:[#allocation4 + $0x70] sm:$0xff] }
 0xb3c   : > { %30530 = vmatprep.subr.mxu1 %v38818_v41 }
 0xb3e   : > { %30508 = vmatmul.mubr.f32.gmra.mrb[34].mxu1 %v41858_v46 }
 0xb3f   : > { %30510 = vmatprep.mubr.f32.mxu1 %v41859_v26  ;;  %v22651_v26 = vld [vmem:[#allocation4 + $0x90] sm:$0xff] }
 0xb42   : > { %30511 = vmatmul.mubr.f32.gmra.mrb[36].mxu1 %v41860_v32 }
 0xb43   : > { %30513 = vmatprep.mubr.f32.mxu1 %v41861_v7 }
 0xb46   : > { %30514 = vmatmul.mubr.f32.gmra.mrb[38].mxu1 %v38854_v12 }
 0xb47   : > { %30518 = vmatprep.mubr.f32.mxu1 %v21167_v13  ;;  %v25158_v13 = vld [vmem:[%s39346_s3 + $0x28] sm:$0xff] }
 0xb4a   : > { %30519 = vmatmul.mubr.f32.vlgmr.msra.gmra.mrb[32].mxu1 %v38841_v38 }
 0xb4b   : > { %30531 = vmatpush3.msra.mxu1 %v38818_v41  ;;  %30521 = vmatprep.mubr.f32.mxu1 %v41862_v40  ;;  %v38901_v41 = vand.u32 4294901760, %v25158_v13  ;;  %v22670_v40 = vsel %vm17832_vm3, %v22649_v14, 0 }
 0xb4c   : > { %30544 = vmatprep.subr.mxu1 %v38809_v22 }
 0xb4d   : > { %v22036_v31 = vsub.f32 %v25158_v13, %v38901_v41 }
 0xb4e   : > { %30522 = vmatmul.mubr.f32.gmra.mrb[34].mxu1 %v41863_v61 }
 0xb4f   : > { %30524 = vmatprep.mubr.f32.mxu1 %v41864_v33  ;;  %v22037_v54 = vand.u32 4294901760, %v22036_v31 }
 0xb51   : > { %v22038_v6 = vsub.f32 %v22036_v31, %v22037_v54 }
 0xb52   : > { %30525 = vmatmul.mubr.f32.gmra.mrb[36].mxu1 %v41865_v45  ;;  %v39030_v45 = vand.u32 4294901760, %v22670_v40 }
 0xb53   : > { %30527 = vmatprep.mubr.f32.mxu1 %v41866_v43 }
 0xb56   : > { %30528 = vmatmul.mubr.f32.gmra.mrb[38].mxu1 %v38859_v27 }
 0xb57   : > { %30532 = vmatprep.mubr.f32.mxu1 %v38824_v0 }
 0xb5a   : > { %30533 = vmatmul.mubr.f32.vlgmr.msra.gmra.mrb[32].mxu1 %v38829_v52 }
 0xb5b   : > { %30545 = vmatpush3.msra.mxu1 %v38809_v22  ;;  %30535 = vmatprep.mubr.f32.mxu1 %v41852_v35  ;;  %v22039_v22 = vand.u32 4294901760, %v22038_v6 }
 0xb5c   : > { %30558 = vmatprep.subr.mxu1 %v38901_v41 }
 0xb5e   : > { %30536 = vmatmul.mubr.f32.gmra.mrb[34].mxu1 %v41853_v63 }
 0xb5f   : > { %30538 = vmatprep.mubr.f32.mxu1 %v41854_v50 }
 0xb62   : > { %30539 = vmatmul.mubr.f32.gmra.mrb[36].mxu1 %v41855_v5 }
 0xb63   : > { %30541 = vmatprep.mubr.f32.mxu1 %v41856_v51 }
 0xb66   : > { %30542 = vmatmul.mubr.f32.gmra.mrb[38].mxu1 %v38848_v17 }
 0xb67   : > { %30546 = vmatprep.mubr.f32.mxu1 %v38824_v0  ;;  %v38922_v0 = vand.u32 4294901760, %v21886_v24 }
 0xb69   : > { %v38927_v60 = vsub.f32 %v21886_v24, %v38922_v0 }
 0xb6a   : > { %30547 = vmatmul.mubr.f32.vlgmr.msra.gmra.mrb[32].mxu1 %v38829_v52 }
 0xb6b   : > { %30559 = vmatpush3.msra.mxu1 %v38901_v41  ;;  %30549 = vmatprep.mubr.f32.mxu1 %v41852_v35  ;;  %v38932_v35 = vand.u32 4294901760, %v38927_v60 }
 0xb6c   : > { %30572 = vmatprep.subr.mxu1 %v22039_v22 }
 0xb6e   : > { %30550 = vmatmul.mubr.f32.gmra.mrb[34].mxu1 %v41853_v63  ;;  %v22027_v63 = vsub.f32 %v38927_v60, %v38932_v35 }
 0xb6f   : > { %30552 = vmatprep.mubr.f32.mxu1 %v41854_v50 }
 0xb72   : > { %30553 = vmatmul.mubr.f32.gmra.mrb[36].mxu1 %v41855_v5 }
 0xb73   : > { %30555 = vmatprep.mubr.f32.mxu1 %v41856_v51 }
 0xb76   : > { %30556 = vmatmul.mubr.f32.gmra.mrb[38].mxu1 %v38848_v17 }
 0xb77   : > { %30560 = vmatprep.mubr.f32.mxu1 %v38657_v37  ;;  %v38940_v37 = vand.u32 4294901760, %v22027_v63 }
 0xb7a   : > { %30561 = vmatmul.mubr.f32.vlgmr.msra.gmra.mrb[32].mxu1 %v41867_v23 }
 0xb7b   : > { %30573 = vmatpush3.msra.mxu1 %v22039_v22  ;;  %30563 = vmatprep.mubr.f32.mxu1 %v38676_v57  ;;  %v22648_v57 = vld [vmem:[#allocation4 + $0x60] sm:$0xff] }
 0xb7c   : > { %30586 = vmatprep.subr.mxu1 %v22036_v31  ;;  %v22667_v51 = vsel %vm17832_vm3, %v22648_v57, 0 }
 0xb7e   : > { %30564 = vmatmul.mubr.f32.gmra.mrb[34].mxu1 %v38684_v19 }
 0xb7f   : > { %30566 = vmatprep.mubr.f32.mxu1 %v38690_v9 }
 0xb82   : > { %30567 = vmatmul.mubr.f32.gmra.mrb[36].mxu1 %v38694_v36 }
 0xb83   : > { %30569 = vmatprep.mubr.f32.mxu1 %v38698_v2 }
 0xb86   : > { %30570 = vmatmul.mubr.f32.gmra.mrb[38].mxu1 %v38940_v37 }
 0xb87   : > { %30574 = vmatprep.mubr.f32.mxu1 %v38592_v58 }
 0xb8a   : > { %30575 = vmatmul.mubr.f32.vlgmr.msra.gmra.mrb[32].mxu1 %v38594_v56 }
 0xb8b   : > { %30587 = vmatpush3.msra.mxu1 %v22036_v31  ;;  %30577 = vmatprep.mubr.f32.mxu1 %v38605_v15 }
 0xb8c   : > { %30600 = vmatprep.subr.mxu1 %v38901_v41 }
 0xb8e   : > { %30578 = vmatmul.mubr.f32.gmra.mrb[34].mxu1 %v38610_v53 }
 0xb8f   : > { %30580 = vmatprep.mubr.f32.mxu1 %v38625_v59 }
 0xb92   : > { %30581 = vmatmul.mubr.f32.gmra.mrb[36].mxu1 %v38633_v34 }
 0xb93   : > { %30583 = vmatprep.mubr.f32.mxu1 %v38646_v4 }
 0xb96   : > { %30584 = vmatmul.mubr.f32.gmra.mrb[38].mxu1 %v38922_v0 }
 0xb97   : > { %30588 = vmatprep.mubr.f32.mxu1 %v38603_v44  ;;  %v22646_v44 = vld [vmem:[#allocation4 + $0x40] sm:$0xff] }
 0xb9a   : > { %30589 = vmatmul.mubr.f32.vlgmr.msra.gmra.mrb[32].mxu1 %v38608_v29 }
 0xb9b   : > { %30601 = vmatpush3.msra.mxu1 %v38901_v41  ;;  %30591 = vmatprep.mubr.f32.mxu1 %v38623_v28 }
 0xb9c   : > { %30614 = vmatprep.subr.mxu1 %v22037_v54 }
 0xb9e   : > { %30592 = vmatmul.mubr.f32.gmra.mrb[34].mxu1 %v38631_v10  ;;  %v22661_v10 = vsel %vm17832_vm3, %v22646_v44, 0 }
 0xb9f   : > { %30594 = vmatprep.mubr.f32.mxu1 %v38644_v11  ;;  %v25159_v11 = vld [vmem:[%s39346_s3 + $0x30] sm:$0xff]  ;;  %v39004_v50 = vand.u32 4294901760, %v22661_v10 }
 0xba1   : > { %v39018_v7 = vsub.f32 %v22661_v10, %v39004_v50 }
 0xba2   : > { %30595 = vmatmul.mubr.f32.gmra.mrb[36].mxu1 %v38654_v20  ;;  %v41868_v20 = vld [vmem:[#allocation95_spill] sm:$0xff] }
 0xba3   : > { %30597 = vmatprep.mubr.f32.mxu1 %v38665_v1  ;;  %v22645_v1 = vld [vmem:[#allocation4 + $0x30] sm:$0xff]  ;;  %v22766_v13 = vand.u32 4294901760, %v39018_v7 }
 0xba5   : > { %v22767_v22 = vsub.f32 %v39018_v7, %v22766_v13 }
 0xba6   : > { %30598 = vmatmul.mubr.f32.gmra.mrb[38].mxu1 %v38927_v60 }
 0xba7   : > { %30602 = vmatprep.mubr.f32.mxu1 %v38620_v3  ;;  %v38974_v3 = vand.u32 4294901760, %v25159_v11 }
 0xbaa   : > { %30603 = vmatmul.mubr.f32.vlgmr.msra.gmra.mrb[32].mxu1 %v38628_v30  ;;  %v22658_v30 = vsel %vm17832_vm3, %v22645_v1, 0 }
 0xbab   : > { %30615 = vmatpush3.msra.mxu1 %v22037_v54  ;;  %30605 = vmatprep.mubr.f32.mxu1 %v38641_v55  ;;  %v38999_v9 = vand.u32 4294901760, %v22658_v30  ;;  %v22795_v54 = vsub.f32 %v22670_v40, %v39030_v45  ;;  %v23440_v40 = vld [vmem:[#allocation4 + $0x91] sm:$0xff] }
 0xbac   : > { %30628 = vmatprep.subr.mxu1 %v38901_v41 }
 0xbad   : > { %v22796_v63 = vand.u32 4294901760, %v22795_v54 }
 0xbae   : > { %30606 = vmatmul.mubr.f32.gmra.mrb[34].mxu1 %v38651_v39  ;;  %v22647_v39 = vld [vmem:[#allocation4 + $0x50] sm:$0xff] }
 0xbaf   : > { %30608 = vmatprep.mubr.f32.mxu1 %v38662_v49  ;;  %v38981_v49 = vsub.f32 %v25159_v11, %v38974_v3  ;;  %v22664_v5 = vsel %vm17832_vm3, %v22647_v39, 0 }
 0xbb0   : > { %v39014_v46 = vand.u32 4294901760, %v22664_v5 }
 0xbb1   : > { %v38986_v36 = vand.u32 4294901760, %v38981_v49 }
 0xbb2   : > { %30609 = vmatmul.mubr.f32.gmra.mrb[36].mxu1 %v38672_v21  ;;  %v22644_v21 = vld [vmem:[#allocation4 + $0x20] sm:$0xff]  ;;  %v39028_v33 = vsub.f32 %v22664_v5, %v39014_v46 }
 0xbb3   : > { %30611 = vmatprep.mubr.f32.mxu1 %v41868_v20  ;;  %v22655_v55 = vsel %vm17832_vm3, %v22644_v21, 0  ;;  %v22828_v29 = vsub.f32 %v38981_v49, %v38986_v36 }
 0xbb4   : > { %v38993_v28 = vand.u32 4294901760, %v22655_v55  ;;  %v22776_v31 = vand.u32 4294901760, %v39028_v33 }
 0xbb5   : > { %v22829_v19 = vand.u32 4294901760, %v22828_v29 }
 0xbb6   : > { %30612 = vmatmul.mubr.f32.gmra.mrb[38].mxu1 %v38932_v35  ;;  %v39002_v2 = vsub.f32 %v22655_v55, %v38993_v28  ;;  %v22777_v23 = vsub.f32 %v39028_v33, %v22776_v31  ;;  %v22797_v55 = vsub.f32 %v22795_v54, %v22796_v63 }
 0xbb7   : > { %30616 = vmatprep.mubr.f32.mxu1 %v38592_v58 }
 0xbb8   : > { %v22746_v32 = vand.u32 4294901760, %v39002_v2  ;;  %v22778_v21 = vand.u32 4294901760, %v22777_v23  ;;  %v22798_v29 = vand.u32 4294901760, %v22797_v55 }
 0xbba   : > { %30617 = vmatmul.mubr.f32.vlgmr.msra.gmra.mrb[32].mxu1 %v38594_v56  ;;  %v22747_v43 = vsub.f32 %v39002_v2, %v22746_v32 }
 0xbbb   : > { %30629 = vmatpush3.msra.mxu1 %v38901_v41  ;;  %30619 = vmatprep.mubr.f32.mxu1 %v38605_v15 }
 0xbbc   : > { %30642 = vmatprep.subr.mxu1 %v38974_v3  ;;  %v22748_v6 = vand.u32 4294901760, %v22747_v43 }
 0xbbe   : > { %30620 = vmatmul.mubr.f32.gmra.mrb[34].mxu1 %v38610_v53 }
 0xbbf   : > { %30622 = vmatprep.mubr.f32.mxu1 %v38625_v59 }
 0xbc2   : > { %30623 = vmatmul.mubr.f32.gmra.mrb[36].mxu1 %v38633_v34 }
 0xbc3   : > { %30625 = vmatprep.mubr.f32.mxu1 %v38646_v4 }
 0xbc6   : > { %30626 = vmatmul.mubr.f32.gmra.mrb[38].mxu1 %v38922_v0 }
 0xbc7   : > { %30630 = vmatprep.mubr.f32.mxu1 %v38592_v58  ;;  %v39012_v58 = vsub.f32 %v22658_v30, %v38999_v9 }
 0xbc9   : > { %v22756_v61 = vand.u32 4294901760, %v39012_v58 }
 0xbca   : > { %30631 = vmatmul.mubr.f32.vlgmr.msra.gmra.mrb[32].mxu1 %v38594_v56  ;;  %v39020_v56 = vand.u32 4294901760, %v22667_v51 }
 0xbcb   : > { %30643 = vmatpush3.msra.mxu1 %v38974_v3  ;;  %30633 = vmatprep.mubr.f32.mxu1 %v38605_v15  ;;  %v22676_v15 = vsel %vm17832_vm3, %v22651_v26, 0 }
 0xbcc   : > { %30656 = vmatprep.subr.mxu1 %v22829_v19  ;;  %v22785_v41 = vsub.f32 %v22667_v51, %v39020_v56 }
 0xbce   : > { %30634 = vmatmul.mubr.f32.gmra.mrb[34].mxu1 %v38610_v53  ;;  %v39038_v53 = vand.u32 4294901760, %v22676_v15  ;;  %v22786_v16 = vand.u32 4294901760, %v22785_v41 }
 0xbcf   : > { %30636 = vmatprep.mubr.f32.mxu1 %v38625_v59  ;;  %v22757_v59 = vsub.f32 %v39012_v58, %v22756_v61 }
 0xbd0   : > { %v22815_v24 = vsub.f32 %v22676_v15, %v39038_v53  ;;  %v22787_v20 = vsub.f32 %v22785_v41, %v22786_v16 }
 0xbd2   : > { %30637 = vmatmul.mubr.f32.gmra.mrb[36].mxu1 %v38633_v34  ;;  %v22758_v34 = vand.u32 4294901760, %v22757_v59  ;;  %v22816_v11 = vand.u32 4294901760, %v22815_v24  ;;  %v22788_v1 = vand.u32 4294901760, %v22787_v20 }
 0xbd3   : > { %30639 = vmatprep.mubr.f32.mxu1 %v38646_v4  ;;  %v22768_v4 = vand.u32 4294901760, %v22767_v22 }
 0xbd4   : > { %v22817_v44 = vsub.f32 %v22815_v24, %v22816_v11 }
 0xbd6   : > { %30640 = vmatmul.mubr.f32.gmra.mrb[38].mxu1 %v38922_v0  ;;  %v22818_v30 = vand.u32 4294901760, %v22817_v44  ;;  %v24224_v44 = vld [vmem:[#allocation4 + $0x42] sm:$0xff] }
 0xbd7   : > { %30644 = vmatprep.mubr.f32.mxu1 %v22748_v6 }
 0xbda   : > { %30645 = vmatmul.mubr.f32.vlgmr.msra.gmra.mrb[32].mxu1 %v22758_v34 }
 0xbdb   : > { %30657 = vmatpush3.msra.mxu1 %v22829_v19  ;;  %30647 = vmatprep.mubr.f32.mxu1 %v22768_v4  ;;  %v23436_v19 = vld [vmem:[#allocation4 + $0x51] sm:$0xff] }
 0xbdc   : > { %30670 = vmatprep.subr.mxu1 %v38981_v49 }
 0xbde   : > { %30648 = vmatmul.mubr.f32.gmra.mrb[34].mxu1 %v22778_v21 }
 0xbdf   : > { %30650 = vmatprep.mubr.f32.mxu1 %v22788_v1  ;;  %v24223_v1 = vld [vmem:[#allocation4 + $0x32] sm:$0xff] }
 0xbe2   : > { %30651 = vmatmul.mubr.f32.gmra.mrb[36].mxu1 %v22798_v29 }
 0xbe3   : > { %30653 = vmatprep.mubr.f32.mxu1 %v38775_v47  ;;  %v25160_v47 = vld [vmem:[%s39346_s3 + $0x38] sm:$0xff] }
 0xbe6   : > { %30654 = vmatmul.mubr.f32.gmra.mrb[38].mxu1 %v22818_v30 }
 0xbe7   : > { %30658 = vmatprep.mubr.f32.mxu1 %v38993_v28 }
 0xbea   : > { %30659 = vmatmul.mubr.f32.vlgmr.msra.gmra.mrb[32].mxu1 %v38999_v9 }
 0xbeb   : > { %30671 = vmatpush3.msra.mxu1 %v38981_v49  ;;  %30661 = vmatprep.mubr.f32.mxu1 %v39004_v50 }
 0xbec   : > { %30684 = vmatprep.subr.mxu1 %v38974_v3 }
 0xbee   : > { %30662 = vmatmul.mubr.f32.gmra.mrb[34].mxu1 %v39014_v46 }
 0xbef   : > { %30664 = vmatprep.mubr.f32.mxu1 %v39020_v56 }
 0xbf2   : > { %30665 = vmatmul.mubr.f32.gmra.mrb[36].mxu1 %v39030_v45 }
 0xbf3   : > { %30667 = vmatprep.mubr.f32.mxu1 %v38757_v25 }
 0xbf6   : > { %30668 = vmatmul.mubr.f32.gmra.mrb[38].mxu1 %v39038_v53 }
 0xbf7   : > { %30672 = vmatprep.mubr.f32.mxu1 %v39002_v2  ;;  %v23437_v2 = vld [vmem:[#allocation4 + $0x61] sm:$0xff] }
 0xbf8   : > { %v23456_v26 = vsel %vm17832_vm3, %v23437_v2, 0  ;;  %v24227_v2 = vld [vmem:[#allocation4 + $0x72] sm:$0xff] }
 0xbfa   : > { %30673 = vmatmul.mubr.f32.vlgmr.msra.gmra.mrb[32].mxu1 %v39012_v58  ;;  %v23453_v58 = vsel %vm17832_vm3, %v23436_v19, 0 }
 0xbfb   : > { %30685 = vmatpush3.msra.mxu1 %v38974_v3  ;;  %30675 = vmatprep.mubr.f32.mxu1 %v39018_v7  ;;  %v39110_v7 = vand.u32 4294901760, %v23453_v58 }
 0xbfc   : > { %30698 = vmatprep.subr.mxu1 %v38986_v36 }
 0xbfd   : > { %v23564_v43 = vsub.f32 %v23453_v58, %v39110_v7  ;;  %v24229_v58 = vld [vmem:[#allocation4 + $0x92] sm:$0xff] }
 0xbfe   : > { %30676 = vmatmul.mubr.f32.gmra.mrb[34].mxu1 %v39028_v33 }
 0xbff   : > { %30678 = vmatprep.mubr.f32.mxu1 %v22785_v41 }
 0xc02   : > { %30679 = vmatmul.mubr.f32.gmra.mrb[36].mxu1 %v22795_v54 }
 0xc03   : > { %30681 = vmatprep.mubr.f32.mxu1 %v38762_v62  ;;  %v39076_v62 = vand.u32 4294901760, %v25160_v47 }
 0xc05   : > { %v39083_v49 = vsub.f32 %v25160_v47, %v39076_v62  ;;  %v24236_v47 = vsel %vm17832_vm3, %v24223_v1, 0 }
 0xc06   : > { %30682 = vmatmul.mubr.f32.gmra.mrb[38].mxu1 %v22815_v24 }
 0xc07   : > { %30686 = vmatprep.mubr.f32.mxu1 %v22746_v32  ;;  %v23438_v32 = vld [vmem:[#allocation4 + $0x71] sm:$0xff] }
 0xc0a   : > { %30687 = vmatmul.mubr.f32.vlgmr.msra.gmra.mrb[32].mxu1 %v22756_v61  ;;  %v39115_v61 = vand.u32 4294901760, %v23456_v26 }
 0xc0b   : > { %30699 = vmatpush3.msra.mxu1 %v38986_v36  ;;  %30689 = vmatprep.mubr.f32.mxu1 %v22766_v13  ;;  %v23434_v36 = vld [vmem:[#allocation4 + $0x31] sm:$0xff] }
 0xc0c   : > { %30712 = vmatprep.subr.mxu1 %v38974_v3  ;;  %v23447_v39 = vsel %vm17832_vm3, %v23434_v36, 0  ;;  %v23574_v59 = vsub.f32 %v23456_v26, %v39115_v61 }
 0xc0d   : > { %v39098_v51 = vand.u32 4294901760, %v23447_v39 }
 0xc0e   : > { %30690 = vmatmul.mubr.f32.gmra.mrb[34].mxu1 %v22776_v31  ;;  %v23575_v22 = vand.u32 4294901760, %v23574_v59 }
 0xc0f   : > { %30692 = vmatprep.mubr.f32.mxu1 %v22786_v16 }
 0xc12   : > { %30693 = vmatmul.mubr.f32.gmra.mrb[36].mxu1 %v22796_v63  ;;  %v23576_v63 = vsub.f32 %v23574_v59, %v23575_v22 }
 0xc13   : > { %30695 = vmatprep.mubr.f32.mxu1 %v38767_v42  ;;  %v39088_v42 = vand.u32 4294901760, %v39083_v49 }
 0xc15   : > { %v23617_v10 = vsub.f32 %v39083_v49, %v39088_v42 }
 0xc16   : > { %30696 = vmatmul.mubr.f32.gmra.mrb[38].mxu1 %v22816_v11  ;;  %v23577_v11 = vand.u32 4294901760, %v23576_v63 }
 0xc17   : > { %30700 = vmatprep.mubr.f32.mxu1 %v38993_v28  ;;  %v23618_v5 = vand.u32 4294901760, %v23617_v10 }
 0xc1a   : > { %30701 = vmatmul.mubr.f32.vlgmr.msra.gmra.mrb[32].mxu1 %v38999_v9 }
 0xc1b   : > { %30713 = vmatpush3.msra.mxu1 %v38974_v3  ;;  %30703 = vmatprep.mubr.f32.mxu1 %v39004_v50  ;;  %v23435_v3 = vld [vmem:[#allocation4 + $0x41] sm:$0xff] }
 0xc1c   : > { %30726 = vmatprep.subr.mxu1 %v39076_v62  ;;  %v23450_v57 = vsel %vm17832_vm3, %v23435_v3, 0  ;;  %v39188_v3 = vand.u32 4294901760, %v24236_v47 }
 0xc1d   : > { %v39100_v14 = vand.u32 4294901760, %v23450_v57 }
 0xc1e   : > { %30704 = vmatmul.mubr.f32.gmra.mrb[34].mxu1 %v39014_v46 }
 0xc1f   : > { %30706 = vmatprep.mubr.f32.mxu1 %v39020_v56  ;;  %v39113_v15 = vsub.f32 %v23450_v57, %v39100_v14 }
 0xc21   : > { %v23555_v41 = vand.u32 4294901760, %v39113_v15 }
 0xc22   : > { %30707 = vmatmul.mubr.f32.gmra.mrb[36].mxu1 %v39030_v45 }
 0xc23   : > { %30709 = vmatprep.mubr.f32.mxu1 %v38757_v25  ;;  %v23556_v6 = vsub.f32 %v39113_v15, %v23555_v41 }
 0xc25   : > { %v23557_v23 = vand.u32 4294901760, %v23556_v6 }
 0xc26   : > { %30710 = vmatmul.mubr.f32.gmra.mrb[38].mxu1 %v39038_v53 }
 0xc27   : > { %30714 = vmatprep.mubr.f32.mxu1 %v38993_v28  ;;  %v39108_v28 = vsub.f32 %v23447_v39, %v39098_v51 }
 0xc29   : > { %v23545_v33 = vand.u32 4294901760, %v39108_v28 }
 0xc2a   : > { %30715 = vmatmul.mubr.f32.vlgmr.msra.gmra.mrb[32].mxu1 %v38999_v9  ;;  %v23459_v9 = vsel %vm17832_vm3, %v23438_v32, 0 }
 0xc2b   : > { %30727 = vmatpush3.msra.mxu1 %v39076_v62  ;;  %30717 = vmatprep.mubr.f32.mxu1 %v39004_v50  ;;  %v23465_v50 = vsel %vm17832_vm3, %v23440_v40, 0  ;;  %v39123_v13 = vand.u32 4294901760, %v23459_v9 }
 0xc2c   : > { %30740 = vmatprep.subr.mxu1 %v23618_v5  ;;  %v39128_v31 = vand.u32 4294901760, %v23465_v50 }
 0xc2d   : > { %v23584_v54 = vsub.f32 %v23459_v9, %v39123_v13 }
 0xc2e   : > { %30718 = vmatmul.mubr.f32.gmra.mrb[34].mxu1 %v39014_v46  ;;  %v23546_v46 = vsub.f32 %v39108_v28, %v23545_v33  ;;  %v23604_v16 = vsub.f32 %v23465_v50, %v39128_v31 }
 0xc2f   : > { %30720 = vmatprep.mubr.f32.mxu1 %v39020_v56  ;;  %v23565_v56 = vand.u32 4294901760, %v23564_v43  ;;  %v23585_v34 = vand.u32 4294901760, %v23584_v54 }
 0xc30   : > { %v23547_v24 = vand.u32 4294901760, %v23546_v46 }
 0xc31   : > { %v23586_v20 = vsub.f32 %v23584_v54, %v23585_v34 }
 0xc32   : > { %30721 = vmatmul.mubr.f32.gmra.mrb[36].mxu1 %v39030_v45  ;;  %v23566_v45 = vsub.f32 %v23564_v43, %v23565_v56 }
 0xc33   : > { %30723 = vmatprep.mubr.f32.mxu1 %v38757_v25  ;;  %v23605_v25 = vand.u32 4294901760, %v23604_v16  ;;  %v23587_v21 = vand.u32 4294901760, %v23586_v20 }
 0xc34   : > { %v23567_v4 = vand.u32 4294901760, %v23566_v45 }
 0xc36   : > { %30724 = vmatmul.mubr.f32.gmra.mrb[38].mxu1 %v39038_v53  ;;  %v23606_v53 = vsub.f32 %v23604_v16, %v23605_v25 }
 0xc37   : > { %30728 = vmatprep.mubr.f32.mxu1 %v38851_v8 }
 0xc38   : > { %v23607_v8 = vand.u32 4294901760, %v23606_v53 }
 0xc3a   : > { %30729 = vmatmul.mubr.f32.vlgmr.msra.gmra.mrb[32].mxu1 %v23547_v24 }
 0xc3b   : > { %30741 = vmatpush3.msra.mxu1 %v23618_v5  ;;  %30731 = vmatprep.mubr.f32.mxu1 %v23557_v23 }
 0xc3c   : > { %30754 = vmatprep.subr.mxu1 %v39083_v49 }
 0xc3e   : > { %30732 = vmatmul.mubr.f32.gmra.mrb[34].mxu1 %v23567_v4 }
 0xc3f   : > { %30734 = vmatprep.mubr.f32.mxu1 %v23577_v11 }
 0xc42   : > { %30735 = vmatmul.mubr.f32.gmra.mrb[36].mxu1 %v23587_v21 }
 0xc43   : > { %30737 = vmatprep.mubr.f32.mxu1 %v38867_v18 }
 0xc46   : > { %30738 = vmatmul.mubr.f32.gmra.mrb[38].mxu1 %v23607_v8 }
 0xc47   : > { %30742 = vmatprep.mubr.f32.mxu1 %v38829_v52 }
 0xc4a   : > { %30743 = vmatmul.mubr.f32.vlgmr.msra.gmra.mrb[32].mxu1 %v39098_v51 }
 0xc4b   : > { %30755 = vmatpush3.msra.mxu1 %v39083_v49  ;;  %30745 = vmatprep.mubr.f32.mxu1 %v39100_v14  ;;  %v24225_v49 = vld [vmem:[#allocation4 + $0x52] sm:$0xff] }
 0xc4c   : > { %30768 = vmatprep.subr.mxu1 %v39076_v62  ;;  %v24242_v57 = vsel %vm17832_vm3, %v24225_v49, 0 }
 0xc4d   : > { %v39203_v5 = vand.u32 4294901760, %v24242_v57 }
 0xc4e   : > { %30746 = vmatmul.mubr.f32.gmra.mrb[34].mxu1 %v39110_v7 }
 0xc4f   : > { %30748 = vmatprep.mubr.f32.mxu1 %v39115_v61 }
 0xc52   : > { %30749 = vmatmul.mubr.f32.gmra.mrb[36].mxu1 %v39123_v13 }
 0xc53   : > { %30751 = vmatprep.mubr.f32.mxu1 %v38848_v17 }
 0xc56   : > { %30752 = vmatmul.mubr.f32.gmra.mrb[38].mxu1 %v39128_v31 }
 0xc57   : > { %30756 = vmatprep.mubr.f32.mxu1 %v38836_v48  ;;  %v25161_v48 = vld [vmem:[%s39346_s3 + $0x40] sm:$0xff] }
 0xc5a   : > { %30757 = vmatmul.mubr.f32.vlgmr.msra.gmra.mrb[32].mxu1 %v39108_v28  ;;  %v24248_v28 = vsel %vm17832_vm3, %v24227_v2, 0 }
 0xc5b   : > { %30769 = vmatpush3.msra.mxu1 %v39076_v62  ;;  %30759 = vmatprep.mubr.f32.mxu1 %v39113_v15  ;;  %v39217_v15 = vsub.f32 %v24242_v57, %v39203_v5  ;;  %v39219_v9 = vand.u32 4294901760, %v24248_v28 }
 0xc5c   : > { %30782 = vmatprep.subr.mxu1 %v39088_v42 }
 0xc5e   : > { %30760 = vmatmul.mubr.f32.gmra.mrb[34].mxu1 %v23564_v43 }
 0xc5f   : > { %30762 = vmatprep.mubr.f32.mxu1 %v23574_v59  ;;  %v24373_v59 = vsub.f32 %v24248_v28, %v39219_v9 }
 0xc62   : > { %30763 = vmatmul.mubr.f32.gmra.mrb[36].mxu1 %v23584_v54 }
 0xc63   : > { %30765 = vmatprep.mubr.f32.mxu1 %v38854_v12  ;;  %v39163_v12 = vand.u32 4294901760, %v25161_v48 }
 0xc66   : > { %30766 = vmatmul.mubr.f32.gmra.mrb[38].mxu1 %v23604_v16  ;;  %v24374_v16 = vand.u32 4294901760, %v24373_v59 }
 0xc67   : > { %30770 = vmatprep.mubr.f32.mxu1 %v38841_v38  ;;  %v39170_v38 = vsub.f32 %v25161_v48, %v39163_v12 }
 0xc68   : > { %v24375_v23 = vsub.f32 %v24373_v59, %v24374_v16 }
 0xc69   : > { %v39175_v18 = vand.u32 4294901760, %v39170_v38 }
 0xc6a   : > { %30771 = vmatmul.mubr.f32.vlgmr.msra.gmra.mrb[32].mxu1 %v23545_v33 }
 0xc6b   : > { %30783 = vmatpush3.msra.mxu1 %v39088_v42  ;;  %30773 = vmatprep.mubr.f32.mxu1 %v23555_v41  ;;  %v24406_v29 = vsub.f32 %v39170_v38, %v39175_v18  ;;  %v24226_v42 = vld [vmem:[#allocation4 + $0x62] sm:$0xff]  ;;  %v24354_v41 = vand.u32 4294901760, %v39217_v15 }
 0xc6c   : > { %30796 = vmatprep.subr.mxu1 %v39076_v62  ;;  %v24245_v19 = vsel %vm17832_vm3, %v24226_v42, 0 }
 0xc6d   : > { %v24407_v36 = vand.u32 4294901760, %v24406_v29 }
 0xc6e   : > { %30774 = vmatmul.mubr.f32.gmra.mrb[34].mxu1 %v23565_v56 }
 0xc6f   : > { %30776 = vmatprep.mubr.f32.mxu1 %v23575_v22  ;;  %v24355_v22 = vsub.f32 %v39217_v15, %v24354_v41 }
 0xc72   : > { %30777 = vmatmul.mubr.f32.gmra.mrb[36].mxu1 %v23585_v34  ;;  %v24356_v34 = vand.u32 4294901760, %v24355_v22 }
 0xc73   : > { %30779 = vmatprep.mubr.f32.mxu1 %v38859_v27  ;;  %v24222_v27 = vld [vmem:[#allocation4 + $0x22] sm:$0xff] }
 0xc74   : > { %v24233_v55 = vsel %vm17832_vm3, %v24222_v27, 0 }
 0xc75   : > { %v39182_v30 = vand.u32 4294901760, %v24233_v55 }
 0xc76   : > { %30780 = vmatmul.mubr.f32.gmra.mrb[38].mxu1 %v23605_v25  ;;  %v24376_v25 = vand.u32 4294901760, %v24375_v23 }
 0xc77   : > { %30784 = vmatprep.mubr.f32.mxu1 %v38829_v52  ;;  %v39191_v10 = vsub.f32 %v24233_v55, %v39182_v30 }
 0xc79   : > { %v24324_v26 = vand.u32 4294901760, %v39191_v10 }
 0xc7a   : > { %30785 = vmatmul.mubr.f32.vlgmr.msra.gmra.mrb[32].mxu1 %v39098_v51 }
 0xc7b   : > { %30797 = vmatpush3.msra.mxu1 %v39076_v62  ;;  %30787 = vmatprep.mubr.f32.mxu1 %v39100_v14  ;;  %v24239_v62 = vsel %vm17832_vm3, %v24224_v44, 0  ;;  %v24325_v50 = vsub.f32 %v39191_v10, %v24324_v26 }
 0xc7c   : > { %30810 = vmatprep.subr.mxu1 %v39163_v12  ;;  %v39193_v39 = vand.u32 4294901760, %v24239_v62 }
 0xc7d   : > { %v24326_v46 = vand.u32 4294901760, %v24325_v50 }
 0xc7e   : > { %30788 = vmatmul.mubr.f32.gmra.mrb[34].mxu1 %v39110_v7  ;;  %v39207_v32 = vsub.f32 %v24239_v62, %v39193_v39 }
 0xc7f   : > { %30790 = vmatprep.mubr.f32.mxu1 %v39115_v61 }
 0xc80   : > { %v24344_v33 = vand.u32 4294901760, %v39207_v32 }
 0xc82   : > { %30791 = vmatmul.mubr.f32.gmra.mrb[36].mxu1 %v39123_v13  ;;  %v24345_v56 = vsub.f32 %v39207_v32, %v24344_v33 }
 0xc83   : > { %30793 = vmatprep.mubr.f32.mxu1 %v38848_v17 }
 0xc86   : > { %30794 = vmatmul.mubr.f32.gmra.mrb[38].mxu1 %v39128_v31 }
 0xc87   : > { %30798 = vmatprep.mubr.f32.mxu1 %v38829_v52  ;;  %v39201_v52 = vsub.f32 %v24236_v47, %v39188_v3 }
 0xc89   : > { %v24334_v40 = vand.u32 4294901760, %v39201_v52 }
 0xc8a   : > { %30799 = vmatmul.mubr.f32.vlgmr.msra.gmra.mrb[32].mxu1 %v39098_v51  ;;  %v39209_v51 = vand.u32 4294901760, %v24245_v19 }
 0xc8b   : > { %30811 = vmatpush3.msra.mxu1 %v39163_v12  ;;  %30801 = vmatprep.mubr.f32.mxu1 %v39100_v14  ;;  %v24254_v14 = vsel %vm17832_vm3, %v24229_v58, 0 }
 0xc8c   : > { %30824 = vmatprep.subr.mxu1 %v24407_v36  ;;  %v24363_v43 = vsub.f32 %v24245_v19, %v39209_v51 }
 0xc8e   : > { %30802 = vmatmul.mubr.f32.gmra.mrb[34].mxu1 %v39110_v7  ;;  %v39227_v7 = vand.u32 4294901760, %v24254_v14  ;;  %v24364_v54 = vand.u32 4294901760, %v24363_v43 }
 0xc8f   : > { %30804 = vmatprep.mubr.f32.mxu1 %v39115_v61  ;;  %v24335_v61 = vsub.f32 %v39201_v52, %v24334_v40 }
 0xc90   : > { %v24393_v6 = vsub.f32 %v24254_v14, %v39227_v7  ;;  %v24365_v24 = vsub.f32 %v24363_v43, %v24364_v54 }
 0xc92   : > { %30805 = vmatmul.mubr.f32.gmra.mrb[36].mxu1 %v39123_v13  ;;  %v24336_v13 = vand.u32 4294901760, %v24335_v61  ;;  %v24394_v45 = vand.u32 4294901760, %v24393_v6  ;;  %v24366_v63 = vand.u32 4294901760, %v24365_v24 }
 0xc93   : > { %30807 = vmatprep.mubr.f32.mxu1 %v38848_v17  ;;  %v24346_v17 = vand.u32 4294901760, %v24345_v56 }
 0xc96   : > { %30808 = vmatmul.mubr.f32.gmra.mrb[38].mxu1 %v39128_v31  ;;  %v24395_v31 = vsub.f32 %v24393_v6, %v24394_v45 }
 0xc97   : > { %30812 = vmatprep.mubr.f32.mxu1 %v24326_v46 }
 0xc98   : > { %v24396_v4 = vand.u32 4294901760, %v24395_v31 }
 0xc9a   : > { %30813 = vmatmul.mubr.f32.vlgmr.msra.gmra.mrb[32].mxu1 %v24336_v13 }
 0xc9b   : > { %30825 = vmatpush3.msra.mxu1 %v24407_v36  ;;  %30815 = vmatprep.mubr.f32.mxu1 %v24346_v17 }
 0xc9c   : > { %30838 = vmatprep.subr.mxu1 %v39170_v38 }
 0xc9e   : > { %30816 = vmatmul.mubr.f32.gmra.mrb[34].mxu1 %v24356_v34 }
 0xc9f   : > { %30818 = vmatprep.mubr.f32.mxu1 %v24366_v63 }
 0xca2   : > { %30819 = vmatmul.mubr.f32.gmra.mrb[36].mxu1 %v24376_v25 }
 0xca3   : > { %30821 = vmatprep.mubr.f32.mxu1 %v38940_v37 }
 0xca6   : > { %30822 = vmatmul.mubr.f32.gmra.mrb[38].mxu1 %v24396_v4 }
 0xca7   : > { %30826 = vmatprep.mubr.f32.mxu1 %v39182_v30 }
 0xcaa   : > { %30827 = vmatmul.mubr.f32.vlgmr.msra.gmra.mrb[32].mxu1 %v39188_v3 }
 0xcab   : > { %30839 = vmatpush3.msra.mxu1 %v39170_v38  ;;  %30829 = vmatprep.mubr.f32.mxu1 %v39193_v39 }
 0xcac   : > { %30852 = vmatprep.subr.mxu1 %v39163_v12 }
 0xcae   : > { %30830 = vmatmul.mubr.f32.gmra.mrb[34].mxu1 %v39203_v5 }
 0xcaf   : > { %30832 = vmatprep.mubr.f32.mxu1 %v39209_v51 }
 0xcb2   : > { %30833 = vmatmul.mubr.f32.gmra.mrb[36].mxu1 %v39219_v9 }
 0xcb3   : > { %30835 = vmatprep.mubr.f32.mxu1 %v38922_v0 }
 0xcb6   : > { %30836 = vmatmul.mubr.f32.gmra.mrb[38].mxu1 %v39227_v7 }
 0xcb7   : > { %30840 = vmatprep.mubr.f32.mxu1 %v39191_v10 }
 0xcba   : > { %30841 = vmatmul.mubr.f32.vlgmr.msra.gmra.mrb[32].mxu1 %v39201_v52 }
 0xcbb   : > { %30853 = vmatpush3.msra.mxu1 %v39163_v12  ;;  %30843 = vmatprep.mubr.f32.mxu1 %v39207_v32 }
 0xcbc   : > { %30866 = vmatprep.subr.mxu1 %v39175_v18 }
 0xcbe   : > { %30844 = vmatmul.mubr.f32.gmra.mrb[34].mxu1 %v39217_v15 }
 0xcbf   : > { %30846 = vmatprep.mubr.f32.mxu1 %v24363_v43 }
 0xcc2   : > { %30847 = vmatmul.mubr.f32.gmra.mrb[36].mxu1 %v24373_v59 }
 0xcc3   : > { %30849 = vmatprep.mubr.f32.mxu1 %v38927_v60  ;;  %v25162_v60 = vld [vmem:[%s39347_s4] ss:$0 sm:$0xff] }
 0xcc6   : > { %30850 = vmatmul.mubr.f32.gmra.mrb[38].mxu1 %v24393_v6 }
 0xcc7   : > { %30854 = vmatprep.mubr.f32.mxu1 %v24324_v26 }
 0xcca   : > { %30855 = vmatmul.mubr.f32.vlgmr.msra.gmra.mrb[32].mxu1 %v24334_v40 }
 0xccb   : > { %30867 = vmatpush3.msra.mxu1 %v39175_v18  ;;  %30857 = vmatprep.mubr.f32.mxu1 %v24344_v33 }
 0xccc   : > { %30880 = vmatprep.subr.mxu1 %v39163_v12 }
 0xcce   : > { %30858 = vmatmul.mubr.f32.gmra.mrb[34].mxu1 %v24354_v41 }
 0xccf   : > { %30860 = vmatprep.mubr.f32.mxu1 %v24364_v54 }
 0xcd2   : > { %30861 = vmatmul.mubr.f32.gmra.mrb[36].mxu1 %v24374_v16 }
 0xcd3   : > { %30863 = vmatprep.mubr.f32.mxu1 %v38932_v35 }
 0xcd6   : > { %30864 = vmatmul.mubr.f32.gmra.mrb[38].mxu1 %v24394_v45 }
 0xcd7   : > { %30868 = vmatprep.mubr.f32.mxu1 %v39182_v30 }
 0xcda   : > { %30869 = vmatmul.mubr.f32.vlgmr.msra.gmra.mrb[32].mxu1 %v39188_v3 }
 0xcdb   : > { %30881 = vmatpush3.msra.mxu1 %v39163_v12  ;;  %30871 = vmatprep.mubr.f32.mxu1 %v39193_v39 }
 0xcde   : > { %30872 = vmatmul.mubr.f32.gmra.mrb[34].mxu1 %v39203_v5 }
 0xcdf   : > { %30874 = vmatprep.mubr.f32.mxu1 %v39209_v51 }
 0xce2   : > { %30875 = vmatmul.mubr.f32.gmra.mrb[36].mxu1 %v39219_v9 }
 0xce3   : > { %30877 = vmatprep.mubr.f32.mxu1 %v38922_v0 }
 0xce6   : > { %30878 = vmatmul.mubr.f32.gmra.mrb[38].mxu1 %v39227_v7 }
 0xce7   : > { %30882 = vmatprep.mubr.f32.mxu1 %v39182_v30 }
 0xcea   : > { %30883 = vmatmul.mubr.f32.vlgmr.msra.gmra.mrb[32].mxu1 %v39188_v3 }
 0xceb   : > { %30885 = vmatprep.mubr.f32.mxu1 %v39193_v39 }
 0xcee   : > { %30886 = vmatmul.mubr.f32.gmra.mrb[34].mxu1 %v39203_v5 }
 0xcef   : > { %30888 = vmatprep.mubr.f32.mxu1 %v39209_v51 }
 0xcf2   : > { %30889 = vmatmul.mubr.f32.gmra.mrb[36].mxu1 %v39219_v9 }
 0xcf3   : > { %30891 = vmatprep.mubr.f32.mxu1 %v38922_v0 }
 0xcf6   : > { %30892 = vmatmul.mubr.f32.gmra.mrb[38].mxu1 %v39227_v7 }
 0xdbd   : > { %v30884_v35 = vpop.f32.mrb[32].mxu1 }
 0xdbe   : > { %v25019_v37 = vadd.f32 %v30884_v35, %v25162_v60  ;;  %v24957_v20 = vpop.f32.mrb[33].mxu1 }
 0xdbf   : > { %v25018_v11 = vadd.f32 %v25162_v60, %v24957_v20 }
 0xdc1   : > { %v25026_v53 = vmax.f32 %v25018_v11, %v25019_v37  ;;  %v30887_v21 = vpop.f32.mrb[34].mxu1 }
 0xdc2   : > { %v25021_v8 = vadd.f32 %v30887_v21, %v25162_v60  ;;  %v24969_v48 = vpop.f32.mrb[35].mxu1 }
 0xdc3   : > { %25030 = vst.msk [vmem:[#allocation5] sm:$0xff] %vm17832_vm3, %v25026_v53  ;;  %v25020_v12 = vadd.f32 %v25162_v60, %v24969_v48 }
 0xdc5   : > { %v25027_v0 = vmax.f32 %v25020_v12, %v25021_v8  ;;  %v30890_v38 = vpop.f32.mrb[36].mxu1 }
 0xdc6   : > { %v25023_v27 = vadd.f32 %v30890_v38, %v25162_v60  ;;  %v24981_v18 = vpop.f32.mrb[37].mxu1 }
 0xdc7   : > { %25031 = vst.msk [vmem:[#allocation5 + $0x8] sm:$0xff] %vm17832_vm3, %v25027_v0  ;;  %v25022_v55 = vadd.f32 %v25162_v60, %v24981_v18 }
 0xdc9   : > { %v25028_v1 = vmax.f32 %v25022_v55, %v25023_v27  ;;  %v30893_v44 = vpop.f32.mrb[38].mxu1 }
 0xdca   : > { %v25025_v29 = vadd.f32 %v30893_v44, %v25162_v60  ;;  %v24993_v30 = vpop.f32.mrb[39].mxu1  ;;  %v25034_v47 = vld [vmem:[#allocation5] ss:$2 sm:$0xf] }
 0xdcb   : > { %25032 = vst.msk [vmem:[#allocation5 + $0x10] sm:$0xff] %vm17832_vm3, %v25028_v1  ;;  %v25024_v62 = vadd.f32 %v25162_v60, %v24993_v30  ;;  %v25042_v49 = vld [vmem:[#allocation5 + $0x1] ss:$2 sm:$0xf] }
 0xdcc   : > { %v25049_v42 = vmax.f32 %v25034_v47, %v25042_v49 }
 0xdcd   : > { %v25029_v36 = vmax.f32 %v25024_v62, %v25025_v29 }
 0xdce   : > { %v25036_v3 = vld [vmem:[#allocation5 + $0x8] ss:$2 sm:$0xf]  ;;  %v25044_v10 = vld [vmem:[#allocation5 + $0x9] ss:$2 sm:$0xf] }
 0xdcf   : > { %25033 = vst.msk [vmem:[#allocation5 + $0x18] sm:$0xff] %vm17832_vm3, %v25029_v36  ;;  %v25050_v39 = vmax.f32 %v25036_v3, %v25044_v10  ;;  %v25053_v57 = vmax.f32 %v25049_v42, 0.0 }
 0xdd1   : > { %v25054_v19 = vmax.f32 %v25050_v39, 0.0  ;;  %25058 = vst.msk [vmem:[%s217_s26] sm:$0xf] %vm25057_vm5, %v25053_v57 }
 0xdd2   : > { %v25038_v2 = vld [vmem:[#allocation5 + $0x10] ss:$2 sm:$0xf]  ;;  %v25046_v52 = vld [vmem:[#allocation5 + $0x11] ss:$2 sm:$0xf] }
 0xdd3   : > { %v25051_v5 = vmax.f32 %v25038_v2, %v25046_v52  ;;  %25059 = vst.msk [vmem:[%s217_s26 + $0x4] sm:$0xf] %vm25057_vm5, %v25054_v19 }
 0xdd5   : > { %v25055_v58 = vmax.f32 %v25051_v5, 0.0 }
 0xdd6   : > { %v25040_v26 = vld [vmem:[#allocation5 + $0x18] ss:$2 sm:$0xf]  ;;  %v25048_v32 = vld [vmem:[#allocation5 + $0x19] ss:$2 sm:$0xf] }
 0xdd7   : > { %v25052_v51 = vmax.f32 %v25040_v26, %v25048_v32  ;;  %25060 = vst.msk [vmem:[%s217_s26 + $0x8] sm:$0xf] %vm25057_vm5, %v25055_v58 }
 0xdd9   : > { %v25056_v28 = vmax.f32 %v25052_v51, 0.0 }
 0xddb   : > { %25061 = vst.msk [vmem:[%s217_s26 + $0xc] sm:$0xf] %vm25057_vm5, %v25056_v28 }
 0xddc   : > { %33071 = shalt.err (!%p33068_p3)
}
 0xddd   : > { %s33072_s14 = scalar_lea.hbm %s39295_s9, 256  ;;  %s33076_s17 = scalar_lea.hbm %s39348_s5, 512 }
 0xdde   : > { %p33073_p4 = scmp.ne.s32.totalorder %s39295_s9, %s33072_s14  ;;  %p33077_p9 = scmp.lt.u32.totalorder %s39295_s9, %s39348_s5 }
 0xddf   : > { %p33078_p10 = scmp.lt.u32.totalorder %s33076_s17, %s33072_s14  ;;  %p33080_p12 = scmp.lt.u32.totalorder %s33072_s14, %s39295_s9 }
 0xde0   : > { %p33074_p7 = pnand %p33073_p4, %p33194_p5 }
 0xde1   : > { %p33079_p11 = por %p33078_p10, %p33077_p9 }
 0xde2   : > { %p33075_p8 = pneg %p33074_p7 }
 0xde3   : > { %p33081_p13 = por %p33080_p12, %p33079_p11 }
 0xde5   : > { %p33082_p0 = pnand %p33081_p13, %p33075_p8 }
 0xde7   : > { %33085 = shalt.err (!%p33082_p0)
}
 0xde8   : > { %s33124_s26 = smov 64   ;;  %s33125_s30 = smov 4  }
 0xde9   : > { %33016 = dma.vmem_to_hbm [thread:$0]  (%p33194_p5), %s39297_s6, 256, %s39295_s9, %s39302_s22, %s33124_s26, %s33124_s26, %s33125_s30  }
 0xdea PF: > { %p33022_p1 = scmp.ge.s32.totalorder %s33120_s21, 2  ;;  %s25091_s7 = sand.u32 1, %s33108_s18  }
 0xdeb   : > { %s25092_s8 = scalar_lea.sflag [#allocation7], %s25091_s7 }
 0xdec   : > { %p33019_p2 = pnand %p33022_p1, %p33198_p6 }
 0xdee   : > { %33103 = dma.done.wait (!%p33019_p2), %s25092_s8, 256  }
 0xdef   : > { %33105 = vsyncadd (!%p33019_p2), %s25092_s8, 4294967040  ;;  %p15_p3 = scmp.ge.s32.totalorder %s33181_s24, 4   ;;  %s41869_s18 = smov %s33112_s19 }
 0xdf0   : > { %s41870_s19 = smov %s33116_s20  ;;  %s41871_s20 = smov %s33192_s27 }
 0xdf1   : > { %s41872_s21 = smov %s33181_s24  ;;  %17 = sbr.rel (!%p15_p3) target bundleno = 3 (0x3), region = 117 }
 0xdf8   :  { %25097 = vsyncpa [#allocation7], 1 }
 0xdf9   :  { %25099 = vsyncpa [#allocation7 + $0x1], 1 }

</bundles_post_ra>
